<compile_context>
chip_gen: v7x
topology: tpu7x:2x2x1
jax: 0.10.0
libtpu: 0.0.40
codegen_flags: <defaults>
</compile_context>

<pallas_src>
import functools

import jax
import jax.numpy as jnp
from jax import lax
from jax.experimental import pallas as pl
from jax.experimental.pallas import tpu as pltpu


# --------------------------------------------------------------------------
# Fused Pallas kernel: whole SimpleCNN forward for `bsub` batch elements
# --------------------------------------------------------------------------
def fused_cnn_kernel(x_ref, w1_ref, b1_ref, s1_ref, w2_ref, b2_ref, s2_ref,
                     fw1_ref, fb1_ref, fw2_ref, fb2_ref, o_ref,
                     patches1, h1_s, p_pad, patches2, h2_s, flat_s,
                     *, bsub, cin_p, c1out, c2out, wp1, l1, l1p, m1len,
                     p2len, p2p, wp2, l2, l2p, m2len, hw3):
    f32 = jnp.float32
    bf16 = jnp.bfloat16

    # ---- conv1 (+bias+ReLU): fold the 9 taps into one K = 9*cin_p matmul over
    #      all bsub images (each image occupies a 128-aligned l1p lane block). ----
    for b in range(bsub):
        for k in range(9):
            dy, dx = divmod(k, 3)
            off = dy * wp1 + dx
            patches1[k * cin_p:(k + 1) * cin_p, b * l1p:b * l1p + l1] = \
                x_ref[b, :, off:off + l1]
    h1 = jnp.dot(w1_ref[...], patches1[...].astype(bf16),
                 preferred_element_type=f32)                 # (c1out, bsub*l1p)
    h1_s[...] = jnp.maximum(h1 + b1_ref[...], 0.0).astype(bf16)

    # ---- maxpool1 2x2/2 + zero re-pad for conv2: per-image 0/1 bf16 matmul ----
    for b in range(bsub):
        base = b * l1p
        m1 = jnp.maximum(
            jnp.maximum(h1_s[:, base:base + m1len],
                        h1_s[:, base + 1:base + 1 + m1len]),
            jnp.maximum(h1_s[:, base + wp1:base + wp1 + m1len],
                        h1_s[:, base + wp1 + 1:base + wp1 + 1 + m1len]))
        p_pad[:, b * p2p:b * p2p + p2len] = jnp.dot(
            m1, s1_ref[...], preferred_element_type=f32).astype(bf16)

    # ---- conv2 (+bias+ReLU): folded K = 9*c1out, bf16 patches (16-row bands) ----
    for b in range(bsub):
        for k in range(9):
            dy, dx = divmod(k, 3)
            off = dy * wp2 + dx
            patches2[k * c1out:(k + 1) * c1out, b * l2p:b * l2p + l2] = \
                p_pad[:, b * p2p + off:b * p2p + off + l2]
    h2 = jnp.dot(w2_ref[...], patches2[...],
                 preferred_element_type=f32)                 # (c2out, bsub*l2p)
    h2_s[...] = jnp.maximum(h2 + b2_ref[...], 0.0).astype(bf16)

    # ---- maxpool2 2x2/2 + flatten to PyTorch (C,H,W) view order ----
    for b in range(bsub):
        base = b * l2p
        m2 = jnp.maximum(
            jnp.maximum(h2_s[:, base:base + m2len],
                        h2_s[:, base + 1:base + 1 + m2len]),
            jnp.maximum(h2_s[:, base + wp2:base + wp2 + m2len],
                        h2_s[:, base + wp2 + 1:base + wp2 + 1 + m2len]))
        feat = jnp.dot(m2, s2_ref[...], preferred_element_type=f32)  # (c2out, hw3)
        for c in range(0, c2out - 1, 2):          # paired 128-lane stores
            flat_s[b:b + 1, c * hw3:(c + 2) * hw3] = jnp.concatenate(
                [feat[c:c + 1, :], feat[c + 1:c + 2, :]], axis=1)
        if c2out % 2:                              # odd-channel tail (unused here)
            c = c2out - 1
            flat_s[b:b + 1, c * hw3:(c + 1) * hw3] = feat[c:c + 1, :]

    # TODO(synk): dropout(p=0.25) is identity here (inference); no train-mode mask.
    # ---- fc1 + ReLU + fc2 (M = bsub) ----
    z1 = jnp.dot(flat_s[...].astype(bf16), fw1_ref[...],
                 preferred_element_type=f32) + fb1_ref[...]
    z1 = jnp.maximum(z1, 0.0)
    z2 = jnp.dot(z1.astype(bf16), fw2_ref[...],
                 preferred_element_type=f32) + fb2_ref[...]
    o_ref[0] = z2.astype(o_ref.dtype)


# --------------------------------------------------------------------------
# Wrapper: host-side layout/dtype prep (cheap) + single pallas_call
# --------------------------------------------------------------------------
def simple_cnn_forward(x_nchw, params, *, bsub=None):
    f32, bf16 = jnp.float32, jnp.bfloat16
    B, cin, H, W = x_nchw.shape
    c1out = params["conv1_w"].shape[0]           # 16
    c2out = params["conv2_w"].shape[0]           # 32
    hidden = params["fc1_w"].shape[1]
    n_out = params["fc2_w"].shape[1]

    # keep the parallel grid extent >= 2 so both v7x TensorCores stay busy
    if bsub is None:
        bsub = 2 if (B % 2 == 0 and B >= 4) else 1
    B_pad = ((B + bsub - 1) // bsub) * bsub
    nblk = B_pad // bsub

    cin_p = ((cin + 7) // 8) * 8                 # sublane-align conv1 channels
    hp1, wp1 = H + 2, W + 2
    l1 = wp1 * (H - 1) + W                       # valid flat length of conv1 out
    l1p = ((l1 + 127) // 128) * 128              # 128-lane aligned per-image block
    h2d, w2d = H // 2, W // 2
    m1len = 2 * wp1 * (h2d - 1) + 2 * (w2d - 1) + 1
    hp2, wp2 = h2d + 2, w2d + 2
    p2len = hp2 * wp2
    p2p = ((p2len + 127) // 128) * 128
    l2 = wp2 * (h2d - 1) + w2d
    l2p = ((l2 + 127) // 128) * 128
    h3d, w3d = h2d // 2, w2d // 2
    m2len = 2 * wp2 * (h3d - 1) + 2 * (w3d - 1) + 1
    hw3 = h3d * w3d
    n_feat = c2out * hw3
    assert params["fc1_w"].shape[0] == n_feat

    # batch-pad to a multiple of bsub, channel-pad to cin_p, spatial ring of 1
    xp = jnp.pad(x_nchw.astype(f32),
                 ((0, B_pad - B), (0, cin_p - cin), (1, 1), (1, 1)))
    x_flat = xp.reshape(B_pad, cin_p, hp1 * wp1)

    # fold OIHW conv weights -> (Cout, 9*Cin_pad), tap-major / channel-minor, bf16
    def fold_conv_w(w, cp):
        co, ci = w.shape[0], w.shape[1]
        wq = jnp.pad(w.astype(f32), ((0, 0), (0, cp - ci), (0, 0), (0, 0)))
        return jnp.transpose(wq, (0, 2, 3, 1)).reshape(co, 9 * cp).astype(bf16)

    w1f = fold_conv_w(params["conv1_w"], cin_p)
    w2f = fold_conv_w(params["conv2_w"], c1out)
    b1 = params["conv1_b"].astype(f32).reshape(c1out, 1)
    b2 = params["conv2_b"].astype(f32).reshape(c2out, 1)

    # 0/1 selection matrices (bf16-exact): stride-2 pool anchors + zero re-pad
    ii, jj = jnp.meshgrid(jnp.arange(h2d), jnp.arange(w2d), indexing="ij")
    s1e = jnp.zeros((m1len, p2len), f32).at[
        (2 * ii * wp1 + 2 * jj).ravel(),
        ((ii + 1) * wp2 + (jj + 1)).ravel()].set(1.0).astype(bf16)
    aa, bb = jnp.meshgrid(jnp.arange(h3d), jnp.arange(w3d), indexing="ij")
    s2 = jnp.zeros((m2len, hw3), f32).at[
        (2 * aa * wp2 + 2 * bb).ravel(),
        (aa * w3d + bb).ravel()].set(1.0).astype(bf16)

    fw1 = params["fc1_w"].astype(bf16)
    fb1 = params["fc1_b"].astype(f32).reshape(1, hidden)
    fw2 = params["fc2_w"].astype(bf16)
    fb2 = params["fc2_b"].astype(f32).reshape(1, n_out)

    kernel = functools.partial(
        fused_cnn_kernel, bsub=bsub, cin_p=cin_p, c1out=c1out, c2out=c2out,
        wp1=wp1, l1=l1, l1p=l1p, m1len=m1len, p2len=p2len, p2p=p2p,
        wp2=wp2, l2=l2, l2p=l2p, m2len=m2len, hw3=hw3)

    resident = lambda i: (0, 0)                  # same block every step -> VMEM-resident
    out = pl.pallas_call(
        kernel,
        out_shape=jax.ShapeDtypeStruct((nblk, bsub, n_out), f32),
        grid_spec=pltpu.PrefetchScalarGridSpec(
            num_scalar_prefetch=0,
            grid=(nblk,),
            in_specs=[
                pl.BlockSpec((bsub, cin_p, hp1 * wp1), lambda i: (i, 0, 0)),
                pl.BlockSpec((c1out, 9 * cin_p), resident),
                pl.BlockSpec((c1out, 1), resident),
                pl.BlockSpec((m1len, p2len), resident),
                pl.BlockSpec((c2out, 9 * c1out), resident),
                pl.BlockSpec((c2out, 1), resident),
                pl.BlockSpec((m2len, hw3), resident),
                pl.BlockSpec((n_feat, hidden), resident),
                pl.BlockSpec((1, hidden), resident),
                pl.BlockSpec((hidden, n_out), resident),
                pl.BlockSpec((1, n_out), resident),
            ],
            out_specs=pl.BlockSpec((1, bsub, n_out), lambda i: (i, 0, 0)),
            scratch_shapes=[
                pltpu.VMEM((9 * cin_p, bsub * l1p), f32),   # conv1 folded-tap patches
                pltpu.VMEM((c1out, bsub * l1p), bf16),      # conv1 relu output
                pltpu.VMEM((c1out, bsub * p2p), bf16),      # pooled + re-padded conv2 in
                pltpu.VMEM((9 * c1out, bsub * l2p), bf16),  # conv2 folded-tap patches
                pltpu.VMEM((c2out, bsub * l2p), bf16),      # conv2 relu output
                pltpu.VMEM((bsub, n_feat), f32),            # flattened (C,H,W) features
            ],
        ),
        compiler_params=pltpu.CompilerParams(
            dimension_semantics=("parallel",),
            vmem_limit_bytes=32 * 1024 * 1024,
        ),
    )(x_flat, w1f, b1, s1e, w2f, b2, s2, fw1, fb1, fw2, fb2)
    return out.reshape(B_pad, n_out)[:B]


# --------------------------------------------------------------------------
# Plain-XLA reference (same bf16-operand / f32-accumulate precision policy)
# --------------------------------------------------------------------------
def reference_forward(x_nchw, params):
    f32, bf16 = jnp.float32, jnp.bfloat16

    def conv(x, w, b):
        y = lax.conv_general_dilated(
            x.astype(bf16), w.astype(bf16), window_strides=(1, 1),
            padding=((1, 1), (1, 1)),
            dimension_numbers=("NCHW", "OIHW", "NCHW"),
            preferred_element_type=f32)
        return y + b.astype(f32)[None, :, None, None]

    def pool(x):
        b, c, h, w = x.shape
        return jnp.max(x.reshape(b, c, h // 2, 2, w // 2, 2), axis=(3, 5))

    x = x_nchw.astype(f32)
    x = pool(jnp.maximum(conv(x, params["conv1_w"], params["conv1_b"]), 0.0))
    x = pool(jnp.maximum(conv(x, params["conv2_w"], params["conv2_b"]), 0.0))
    x = x.reshape(x.shape[0], -1)
    x = jnp.dot(x.astype(bf16), params["fc1_w"].astype(bf16),
                preferred_element_type=f32) + params["fc1_b"]
    x = jnp.maximum(x, 0.0)
    x = jnp.dot(x.astype(bf16), params["fc2_w"].astype(bf16),
                preferred_element_type=f32) + params["fc2_b"]
    return x


def init_params(key, input_channels, hidden_units, output_shape):
    """Synthetic params. conv weights: PyTorch OIHW; fc weights: (in, out)."""
    ks = jax.random.split(key, 8)
    flat = 32 * 8 * 8  # fc1 in_features, as in the PyTorch module
    return {
        "conv1_w": 0.1 * jax.random.normal(ks[0], (16, input_channels, 3, 3), jnp.float32),
        "conv1_b": 0.1 * jax.random.normal(ks[1], (16,), jnp.float32),
        "conv2_w": 0.1 * jax.random.normal(ks[2], (32, 16, 3, 3), jnp.float32),
        "conv2_b": 0.1 * jax.random.normal(ks[3], (32,), jnp.float32),
        "fc1_w": 0.02 * jax.random.normal(ks[4], (flat, hidden_units), jnp.float32),
        "fc1_b": 0.02 * jax.random.normal(ks[5], (hidden_units,), jnp.float32),
        "fc2_w": 0.1 * jax.random.normal(ks[6], (hidden_units, output_shape), jnp.float32),
        "fc2_b": 0.1 * jax.random.normal(ks[7], (output_shape,), jnp.float32),
    }


if __name__ == "__main__":
    key = jax.random.PRNGKey(0)
    # fc1 expects 32*8*8 features -> spatial input must be 32x32 (two 2x2 pools)
    # B=4 so bsub=2 images/step still leaves a parallel grid extent of 2 (v7x).
    B, C_in, H, W = 4, 3, 32, 32
    hidden_units, output_shape = 32, 10

    k_x, k_p = jax.random.split(key)
    x = jax.random.normal(k_x, (B, C_in, H, W), jnp.float32)
    params = init_params(k_p, C_in, hidden_units, output_shape)

    fwd = jax.jit(simple_cnn_forward)
    y = fwd(x, params)
    jax.block_until_ready(y)

    assert y.shape == (B, output_shape), y.shape
    assert y.dtype == jnp.float32

    y_ref = jax.jit(reference_forward)(x, params)
    err = float(jnp.max(jnp.abs(y - y_ref)))
    assert err < 3e-2, f"kernel/reference mismatch: max abs err = {err}"
    print("KERNEL_OK")
</pallas_src>

<mosaic_0001>
module attributes {stable_mosaic.version = 11 : i64} {
  func.func @fused_cnn_kernel(%arg0: i32, %arg1: memref<2x8x1156xf32, #tpu.memory_space<vmem>>, %arg2: memref<16x72xbf16, #tpu.memory_space<vmem>>, %arg3: memref<16x1xf32, #tpu.memory_space<vmem>>, %arg4: memref<1051x324xbf16, #tpu.memory_space<vmem>>, %arg5: memref<32x144xbf16, #tpu.memory_space<vmem>>, %arg6: memref<32x1xf32, #tpu.memory_space<vmem>>, %arg7: memref<267x64xbf16, #tpu.memory_space<vmem>>, %arg8: memref<2048x32xbf16, #tpu.memory_space<vmem>>, %arg9: memref<1x32xf32, #tpu.memory_space<vmem>>, %arg10: memref<32x10xbf16, #tpu.memory_space<vmem>>, %arg11: memref<1x10xf32, #tpu.memory_space<vmem>>, %arg12: memref<1x2x10xf32, #tpu.memory_space<vmem>>, %arg13: memref<72x2304xf32, #tpu.memory_space<vmem>>, %arg14: memref<16x2304xbf16, #tpu.memory_space<vmem>>, %arg15: memref<16x768xbf16, #tpu.memory_space<vmem>>, %arg16: memref<144x768xbf16, #tpu.memory_space<vmem>>, %arg17: memref<32x768xbf16, #tpu.memory_space<vmem>>, %arg18: memref<2x2048xf32, #tpu.memory_space<vmem>>) attributes {dimension_semantics = [#tpu.dimension_semantics<parallel>], iteration_bounds = array<i64: 2>, scalar_prefetch = 0 : i64, scratch_operands = 6 : i64, tpu.core_type = #tpu.core_type<tc>, window_params = [{transform_indices = @transform_0, window_bounds = array<i64: 2, 8, 1156>}, {pipeline_mode = #tpu.pipeline_mode<synchronous>, transform_indices = @transform_1, window_bounds = array<i64: 16, 72>}, {pipeline_mode = #tpu.pipeline_mode<synchronous>, transform_indices = @transform_2, window_bounds = array<i64: 16, 1>}, {pipeline_mode = #tpu.pipeline_mode<synchronous>, transform_indices = @transform_3, window_bounds = array<i64: 1051, 324>}, {pipeline_mode = #tpu.pipeline_mode<synchronous>, transform_indices = @transform_4, window_bounds = array<i64: 32, 144>}, {pipeline_mode = #tpu.pipeline_mode<synchronous>, transform_indices = @transform_5, window_bounds = array<i64: 32, 1>}, {pipeline_mode = #tpu.pipeline_mode<synchronous>, transform_indices = @transform_6, window_bounds = array<i64: 267, 64>}, {pipeline_mode = #tpu.pipeline_mode<synchronous>, transform_indices = @transform_7, window_bounds = array<i64: 2048, 32>}, {pipeline_mode = #tpu.pipeline_mode<synchronous>, transform_indices = @transform_8, window_bounds = array<i64: 1, 32>}, {pipeline_mode = #tpu.pipeline_mode<synchronous>, transform_indices = @transform_9, window_bounds = array<i64: 32, 10>}, {pipeline_mode = #tpu.pipeline_mode<synchronous>, transform_indices = @transform_10, window_bounds = array<i64: 1, 10>}, {transform_indices = @transform_11, window_bounds = array<i64: 1, 2, 10>}]} {
    %c0 = arith.constant 0 : index
    %c0_0 = arith.constant 0 : index
    %c0_1 = arith.constant 0 : index
    %0 = vector.load %arg1[%c0, %c0_0, %c0_1] : memref<2x8x1156xf32, #tpu.memory_space<vmem>>, vector<1x8x1086xf32>
    %1 = vector.shape_cast %0 : vector<1x8x1086xf32> to vector<8x1086xf32>
    %c0_2 = arith.constant 0 : index
    %c0_3 = arith.constant 0 : index
    %2 = vector.load %arg13[%c0_2, %c0_3] : memref<72x2304xf32, #tpu.memory_space<vmem>>, vector<8x1086xf32>
    tpu.vector_store %arg13[%c0_2, %c0_3], %1 {strides = array<i32>} : memref<72x2304xf32, #tpu.memory_space<vmem>>, vector<8x1086xf32>,
    %c0_4 = arith.constant 0 : index
    %c0_5 = arith.constant 0 : index
    %c1 = arith.constant 1 : index
    %3 = vector.load %arg1[%c0_4, %c0_5, %c1] : memref<2x8x1156xf32, #tpu.memory_space<vmem>>, vector<1x8x1086xf32>
    %4 = vector.shape_cast %3 : vector<1x8x1086xf32> to vector<8x1086xf32>
    %c8 = arith.constant 8 : index
    %c0_6 = arith.constant 0 : index
    %5 = vector.load %arg13[%c8, %c0_6] : memref<72x2304xf32, #tpu.memory_space<vmem>>, vector<8x1086xf32>
    tpu.vector_store %arg13[%c8, %c0_6], %4 {strides = array<i32>} : memref<72x2304xf32, #tpu.memory_space<vmem>>, vector<8x1086xf32>,
    %c0_7 = arith.constant 0 : index
    %c0_8 = arith.constant 0 : index
    %c2 = arith.constant 2 : index
    %6 = vector.load %arg1[%c0_7, %c0_8, %c2] : memref<2x8x1156xf32, #tpu.memory_space<vmem>>, vector<1x8x1086xf32>
    %7 = vector.shape_cast %6 : vector<1x8x1086xf32> to vector<8x1086xf32>
    %c16 = arith.constant 16 : index
    %c0_9 = arith.constant 0 : index
    %8 = vector.load %arg13[%c16, %c0_9] : memref<72x2304xf32, #tpu.memory_space<vmem>>, vector<8x1086xf32>
    tpu.vector_store %arg13[%c16, %c0_9], %7 {strides = array<i32>} : memref<72x2304xf32, #tpu.memory_space<vmem>>, vector<8x1086xf32>,
    %c0_10 = arith.constant 0 : index
    %c0_11 = arith.constant 0 : index
    %c34 = arith.constant 34 : index
    %9 = vector.load %arg1[%c0_10, %c0_11, %c34] : memref<2x8x1156xf32, #tpu.memory_space<vmem>>, vector<1x8x1086xf32>
    %10 = vector.shape_cast %9 : vector<1x8x1086xf32> to vector<8x1086xf32>
    %c24 = arith.constant 24 : index
    %c0_12 = arith.constant 0 : index
    %11 = vector.load %arg13[%c24, %c0_12] : memref<72x2304xf32, #tpu.memory_space<vmem>>, vector<8x1086xf32>
    tpu.vector_store %arg13[%c24, %c0_12], %10 {strides = array<i32>} : memref<72x2304xf32, #tpu.memory_space<vmem>>, vector<8x1086xf32>,
    %c0_13 = arith.constant 0 : index
    %c0_14 = arith.constant 0 : index
    %c35 = arith.constant 35 : index
    %12 = vector.load %arg1[%c0_13, %c0_14, %c35] : memref<2x8x1156xf32, #tpu.memory_space<vmem>>, vector<1x8x1086xf32>
    %13 = vector.shape_cast %12 : vector<1x8x1086xf32> to vector<8x1086xf32>
    %c32 = arith.constant 32 : index
    %c0_15 = arith.constant 0 : index
    %14 = vector.load %arg13[%c32, %c0_15] : memref<72x2304xf32, #tpu.memory_space<vmem>>, vector<8x1086xf32>
    tpu.vector_store %arg13[%c32, %c0_15], %13 {strides = array<i32>} : memref<72x2304xf32, #tpu.memory_space<vmem>>, vector<8x1086xf32>,
    %c0_16 = arith.constant 0 : index
    %c0_17 = arith.constant 0 : index
    %c36 = arith.constant 36 : index
    %15 = vector.load %arg1[%c0_16, %c0_17, %c36] : memref<2x8x1156xf32, #tpu.memory_space<vmem>>, vector<1x8x1086xf32>
    %16 = vector.shape_cast %15 : vector<1x8x1086xf32> to vector<8x1086xf32>
    %c40 = arith.constant 40 : index
    %c0_18 = arith.constant 0 : index
    %17 = vector.load %arg13[%c40, %c0_18] : memref<72x2304xf32, #tpu.memory_space<vmem>>, vector<8x1086xf32>
    tpu.vector_store %arg13[%c40, %c0_18], %16 {strides = array<i32>} : memref<72x2304xf32, #tpu.memory_space<vmem>>, vector<8x1086xf32>,
    %c0_19 = arith.constant 0 : index
    %c0_20 = arith.constant 0 : index
    %c68 = arith.constant 68 : index
    %18 = vector.load %arg1[%c0_19, %c0_20, %c68] : memref<2x8x1156xf32, #tpu.memory_space<vmem>>, vector<1x8x1086xf32>
    %19 = vector.shape_cast %18 : vector<1x8x1086xf32> to vector<8x1086xf32>
    %c48 = arith.constant 48 : index
    %c0_21 = arith.constant 0 : index
    %20 = vector.load %arg13[%c48, %c0_21] : memref<72x2304xf32, #tpu.memory_space<vmem>>, vector<8x1086xf32>
    tpu.vector_store %arg13[%c48, %c0_21], %19 {strides = array<i32>} : memref<72x2304xf32, #tpu.memory_space<vmem>>, vector<8x1086xf32>,
    %c0_22 = arith.constant 0 : index
    %c0_23 = arith.constant 0 : index
    %c69 = arith.constant 69 : index
    %21 = vector.load %arg1[%c0_22, %c0_23, %c69] : memref<2x8x1156xf32, #tpu.memory_space<vmem>>, vector<1x8x1086xf32>
    %22 = vector.shape_cast %21 : vector<1x8x1086xf32> to vector<8x1086xf32>
    %c56 = arith.constant 56 : index
    %c0_24 = arith.constant 0 : index
    %23 = vector.load %arg13[%c56, %c0_24] : memref<72x2304xf32, #tpu.memory_space<vmem>>, vector<8x1086xf32>
    tpu.vector_store %arg13[%c56, %c0_24], %22 {strides = array<i32>} : memref<72x2304xf32, #tpu.memory_space<vmem>>, vector<8x1086xf32>,
    %c0_25 = arith.constant 0 : index
    %c0_26 = arith.constant 0 : index
    %c70 = arith.constant 70 : index
    %24 = vector.load %arg1[%c0_25, %c0_26, %c70] : memref<2x8x1156xf32, #tpu.memory_space<vmem>>, vector<1x8x1086xf32>
    %25 = vector.shape_cast %24 : vector<1x8x1086xf32> to vector<8x1086xf32>
    %c64 = arith.constant 64 : index
    %c0_27 = arith.constant 0 : index
    %26 = vector.load %arg13[%c64, %c0_27] : memref<72x2304xf32, #tpu.memory_space<vmem>>, vector<8x1086xf32>
    tpu.vector_store %arg13[%c64, %c0_27], %25 {strides = array<i32>} : memref<72x2304xf32, #tpu.memory_space<vmem>>, vector<8x1086xf32>,
    %c1_28 = arith.constant 1 : index
    %c0_29 = arith.constant 0 : index
    %c0_30 = arith.constant 0 : index
    %27 = vector.load %arg1[%c1_28, %c0_29, %c0_30] : memref<2x8x1156xf32, #tpu.memory_space<vmem>>, vector<1x8x1086xf32>
    %28 = vector.shape_cast %27 : vector<1x8x1086xf32> to vector<8x1086xf32>
    %c0_31 = arith.constant 0 : index
    %c1152 = arith.constant 1152 : index
    %29 = vector.load %arg13[%c0_31, %c1152] : memref<72x2304xf32, #tpu.memory_space<vmem>>, vector<8x1086xf32>
    tpu.vector_store %arg13[%c0_31, %c1152], %28 {strides = array<i32>} : memref<72x2304xf32, #tpu.memory_space<vmem>>, vector<8x1086xf32>,
    %c1_32 = arith.constant 1 : index
    %c0_33 = arith.constant 0 : index
    %c1_34 = arith.constant 1 : index
    %30 = vector.load %arg1[%c1_32, %c0_33, %c1_34] : memref<2x8x1156xf32, #tpu.memory_space<vmem>>, vector<1x8x1086xf32>
    %31 = vector.shape_cast %30 : vector<1x8x1086xf32> to vector<8x1086xf32>
    %c8_35 = arith.constant 8 : index
    %c1152_36 = arith.constant 1152 : index
    %32 = vector.load %arg13[%c8_35, %c1152_36] : memref<72x2304xf32, #tpu.memory_space<vmem>>, vector<8x1086xf32>
    tpu.vector_store %arg13[%c8_35, %c1152_36], %31 {strides = array<i32>} : memref<72x2304xf32, #tpu.memory_space<vmem>>, vector<8x1086xf32>,
    %c1_37 = arith.constant 1 : index
    %c0_38 = arith.constant 0 : index
    %c2_39 = arith.constant 2 : index
    %33 = vector.load %arg1[%c1_37, %c0_38, %c2_39] : memref<2x8x1156xf32, #tpu.memory_space<vmem>>, vector<1x8x1086xf32>
    %34 = vector.shape_cast %33 : vector<1x8x1086xf32> to vector<8x1086xf32>
    %c16_40 = arith.constant 16 : index
    %c1152_41 = arith.constant 1152 : index
    %35 = vector.load %arg13[%c16_40, %c1152_41] : memref<72x2304xf32, #tpu.memory_space<vmem>>, vector<8x1086xf32>
    tpu.vector_store %arg13[%c16_40, %c1152_41], %34 {strides = array<i32>} : memref<72x2304xf32, #tpu.memory_space<vmem>>, vector<8x1086xf32>,
    %c1_42 = arith.constant 1 : index
    %c0_43 = arith.constant 0 : index
    %c34_44 = arith.constant 34 : index
    %36 = vector.load %arg1[%c1_42, %c0_43, %c34_44] : memref<2x8x1156xf32, #tpu.memory_space<vmem>>, vector<1x8x1086xf32>
    %37 = vector.shape_cast %36 : vector<1x8x1086xf32> to vector<8x1086xf32>
    %c24_45 = arith.constant 24 : index
    %c1152_46 = arith.constant 1152 : index
    %38 = vector.load %arg13[%c24_45, %c1152_46] : memref<72x2304xf32, #tpu.memory_space<vmem>>, vector<8x1086xf32>
    tpu.vector_store %arg13[%c24_45, %c1152_46], %37 {strides = array<i32>} : memref<72x2304xf32, #tpu.memory_space<vmem>>, vector<8x1086xf32>,
    %c1_47 = arith.constant 1 : index
    %c0_48 = arith.constant 0 : index
    %c35_49 = arith.constant 35 : index
    %39 = vector.load %arg1[%c1_47, %c0_48, %c35_49] : memref<2x8x1156xf32, #tpu.memory_space<vmem>>, vector<1x8x1086xf32>
    %40 = vector.shape_cast %39 : vector<1x8x1086xf32> to vector<8x1086xf32>
    %c32_50 = arith.constant 32 : index
    %c1152_51 = arith.constant 1152 : index
    %41 = vector.load %arg13[%c32_50, %c1152_51] : memref<72x2304xf32, #tpu.memory_space<vmem>>, vector<8x1086xf32>
    tpu.vector_store %arg13[%c32_50, %c1152_51], %40 {strides = array<i32>} : memref<72x2304xf32, #tpu.memory_space<vmem>>, vector<8x1086xf32>,
    %c1_52 = arith.constant 1 : index
    %c0_53 = arith.constant 0 : index
    %c36_54 = arith.constant 36 : index
    %42 = vector.load %arg1[%c1_52, %c0_53, %c36_54] : memref<2x8x1156xf32, #tpu.memory_space<vmem>>, vector<1x8x1086xf32>
    %43 = vector.shape_cast %42 : vector<1x8x1086xf32> to vector<8x1086xf32>
    %c40_55 = arith.constant 40 : index
    %c1152_56 = arith.constant 1152 : index
    %44 = vector.load %arg13[%c40_55, %c1152_56] : memref<72x2304xf32, #tpu.memory_space<vmem>>, vector<8x1086xf32>
    tpu.vector_store %arg13[%c40_55, %c1152_56], %43 {strides = array<i32>} : memref<72x2304xf32, #tpu.memory_space<vmem>>, vector<8x1086xf32>,
    %c1_57 = arith.constant 1 : index
    %c0_58 = arith.constant 0 : index
    %c68_59 = arith.constant 68 : index
    %45 = vector.load %arg1[%c1_57, %c0_58, %c68_59] : memref<2x8x1156xf32, #tpu.memory_space<vmem>>, vector<1x8x1086xf32>
    %46 = vector.shape_cast %45 : vector<1x8x1086xf32> to vector<8x1086xf32>
    %c48_60 = arith.constant 48 : index
    %c1152_61 = arith.constant 1152 : index
    %47 = vector.load %arg13[%c48_60, %c1152_61] : memref<72x2304xf32, #tpu.memory_space<vmem>>, vector<8x1086xf32>
    tpu.vector_store %arg13[%c48_60, %c1152_61], %46 {strides = array<i32>} : memref<72x2304xf32, #tpu.memory_space<vmem>>, vector<8x1086xf32>,
    %c1_62 = arith.constant 1 : index
    %c0_63 = arith.constant 0 : index
    %c69_64 = arith.constant 69 : index
    %48 = vector.load %arg1[%c1_62, %c0_63, %c69_64] : memref<2x8x1156xf32, #tpu.memory_space<vmem>>, vector<1x8x1086xf32>
    %49 = vector.shape_cast %48 : vector<1x8x1086xf32> to vector<8x1086xf32>
    %c56_65 = arith.constant 56 : index
    %c1152_66 = arith.constant 1152 : index
    %50 = vector.load %arg13[%c56_65, %c1152_66] : memref<72x2304xf32, #tpu.memory_space<vmem>>, vector<8x1086xf32>
    tpu.vector_store %arg13[%c56_65, %c1152_66], %49 {strides = array<i32>} : memref<72x2304xf32, #tpu.memory_space<vmem>>, vector<8x1086xf32>,
    %c1_67 = arith.constant 1 : index
    %c0_68 = arith.constant 0 : index
    %c70_69 = arith.constant 70 : index
    %51 = vector.load %arg1[%c1_67, %c0_68, %c70_69] : memref<2x8x1156xf32, #tpu.memory_space<vmem>>, vector<1x8x1086xf32>
    %52 = vector.shape_cast %51 : vector<1x8x1086xf32> to vector<8x1086xf32>
    %c64_70 = arith.constant 64 : index
    %c1152_71 = arith.constant 1152 : index
    %53 = vector.load %arg13[%c64_70, %c1152_71] : memref<72x2304xf32, #tpu.memory_space<vmem>>, vector<8x1086xf32>
    tpu.vector_store %arg13[%c64_70, %c1152_71], %52 {strides = array<i32>} : memref<72x2304xf32, #tpu.memory_space<vmem>>, vector<8x1086xf32>,
    %c0_72 = arith.constant 0 : index
    %c0_73 = arith.constant 0 : index
    %54 = vector.load %arg2[%c0_72, %c0_73] : memref<16x72xbf16, #tpu.memory_space<vmem>>, vector<16x72xbf16>
    %c0_74 = arith.constant 0 : index
    %c0_75 = arith.constant 0 : index
    %55 = vector.load %arg13[%c0_74, %c0_75] : memref<72x2304xf32, #tpu.memory_space<vmem>>, vector<72x2304xf32>
    %56 = arith.truncf %55 : vector<72x2304xf32> to vector<72x2304xbf16>
    %cst = arith.constant dense<0.000000e+00> : vector<16x2304xf32>
    %57 = tpu.matmul %54, %56, %cst {dimension_numbers = #tpu.dot_dimension_numbers<[1], [0], [0], [1], [0, 0, 1, 1], [], []>} : vector<16x72xbf16>, vector<72x2304xbf16>, vector<16x2304xf32> -> vector<16x2304xf32>
    %c0_76 = arith.constant 0 : index
    %c0_77 = arith.constant 0 : index
    %58 = vector.load %arg3[%c0_76, %c0_77] : memref<16x1xf32, #tpu.memory_space<vmem>>, vector<16x1xf32>
    %59 = vector.broadcast %58 : vector<16x1xf32> to vector<16x2304xf32>
    %60 = arith.addf %57, %59 : vector<16x2304xf32>
    %cst_78 = arith.constant 0.000000e+00 : f32
    %61 = vector.broadcast %cst_78 : f32 to vector<16x2304xf32>
    %62 = arith.maximumf %60, %61 : vector<16x2304xf32>
    %63 = arith.truncf %62 : vector<16x2304xf32> to vector<16x2304xbf16>
    %c0_79 = arith.constant 0 : index
    %c0_80 = arith.constant 0 : index
    %64 = vector.load %arg14[%c0_79, %c0_80] : memref<16x2304xbf16, #tpu.memory_space<vmem>>, vector<16x2304xbf16>
    tpu.vector_store %arg14[%c0_79, %c0_80], %63 {strides = array<i32>} : memref<16x2304xbf16, #tpu.memory_space<vmem>>, vector<16x2304xbf16>,
    %c0_81 = arith.constant 0 : index
    %c0_82 = arith.constant 0 : index
    %65 = vector.load %arg14[%c0_81, %c0_82] : memref<16x2304xbf16, #tpu.memory_space<vmem>>, vector<16x1051xbf16>
    %c0_83 = arith.constant 0 : index
    %c1_84 = arith.constant 1 : index
    %66 = vector.load %arg14[%c0_83, %c1_84] : memref<16x2304xbf16, #tpu.memory_space<vmem>>, vector<16x1051xbf16>
    %67 = arith.maximumf %65, %66 : vector<16x1051xbf16>
    %c0_85 = arith.constant 0 : index
    %c34_86 = arith.constant 34 : index
    %68 = vector.load %arg14[%c0_85, %c34_86] : memref<16x2304xbf16, #tpu.memory_space<vmem>>, vector<16x1051xbf16>
    %c0_87 = arith.constant 0 : index
    %c35_88 = arith.constant 35 : index
    %69 = vector.load %arg14[%c0_87, %c35_88] : memref<16x2304xbf16, #tpu.memory_space<vmem>>, vector<16x1051xbf16>
    %70 = arith.maximumf %68, %69 : vector<16x1051xbf16>
    %71 = arith.maximumf %67, %70 : vector<16x1051xbf16>
    %c0_89 = arith.constant 0 : index
    %c0_90 = arith.constant 0 : index
    %72 = vector.load %arg4[%c0_89, %c0_90] : memref<1051x324xbf16, #tpu.memory_space<vmem>>, vector<1051x324xbf16>
    %cst_91 = arith.constant dense<0.000000e+00> : vector<16x324xf32>
    %73 = tpu.matmul %71, %72, %cst_91 {dimension_numbers = #tpu.dot_dimension_numbers<[1], [0], [0], [1], [0, 0, 1, 1], [], []>} : vector<16x1051xbf16>, vector<1051x324xbf16>, vector<16x324xf32> -> vector<16x324xf32>
    %74 = arith.truncf %73 : vector<16x324xf32> to vector<16x324xbf16>
    %c0_92 = arith.constant 0 : index
    %c0_93 = arith.constant 0 : index
    %75 = vector.load %arg15[%c0_92, %c0_93] : memref<16x768xbf16, #tpu.memory_space<vmem>>, vector<16x324xbf16>
    tpu.vector_store %arg15[%c0_92, %c0_93], %74 {strides = array<i32>} : memref<16x768xbf16, #tpu.memory_space<vmem>>, vector<16x324xbf16>,
    %c0_94 = arith.constant 0 : index
    %c1152_95 = arith.constant 1152 : index
    %76 = vector.load %arg14[%c0_94, %c1152_95] : memref<16x2304xbf16, #tpu.memory_space<vmem>>, vector<16x1051xbf16>
    %c0_96 = arith.constant 0 : index
    %c1153 = arith.constant 1153 : index
    %77 = vector.load %arg14[%c0_96, %c1153] : memref<16x2304xbf16, #tpu.memory_space<vmem>>, vector<16x1051xbf16>
    %78 = arith.maximumf %76, %77 : vector<16x1051xbf16>
    %c0_97 = arith.constant 0 : index
    %c1186 = arith.constant 1186 : index
    %79 = vector.load %arg14[%c0_97, %c1186] : memref<16x2304xbf16, #tpu.memory_space<vmem>>, vector<16x1051xbf16>
    %c0_98 = arith.constant 0 : index
    %c1187 = arith.constant 1187 : index
    %80 = vector.load %arg14[%c0_98, %c1187] : memref<16x2304xbf16, #tpu.memory_space<vmem>>, vector<16x1051xbf16>
    %81 = arith.maximumf %79, %80 : vector<16x1051xbf16>
    %82 = arith.maximumf %78, %81 : vector<16x1051xbf16>
    %c0_99 = arith.constant 0 : index
    %c0_100 = arith.constant 0 : index
    %83 = vector.load %arg4[%c0_99, %c0_100] : memref<1051x324xbf16, #tpu.memory_space<vmem>>, vector<1051x324xbf16>
    %cst_101 = arith.constant dense<0.000000e+00> : vector<16x324xf32>
    %84 = tpu.matmul %82, %83, %cst_101 {dimension_numbers = #tpu.dot_dimension_numbers<[1], [0], [0], [1], [0, 0, 1, 1], [], []>} : vector<16x1051xbf16>, vector<1051x324xbf16>, vector<16x324xf32> -> vector<16x324xf32>
    %85 = arith.truncf %84 : vector<16x324xf32> to vector<16x324xbf16>
    %c0_102 = arith.constant 0 : index
    %c384 = arith.constant 384 : index
    %86 = vector.load %arg15[%c0_102, %c384] : memref<16x768xbf16, #tpu.memory_space<vmem>>, vector<16x324xbf16>
    tpu.vector_store %arg15[%c0_102, %c384], %85 {strides = array<i32>} : memref<16x768xbf16, #tpu.memory_space<vmem>>, vector<16x324xbf16>,
    %c0_103 = arith.constant 0 : index
    %c0_104 = arith.constant 0 : index
    %87 = vector.load %arg15[%c0_103, %c0_104] : memref<16x768xbf16, #tpu.memory_space<vmem>>, vector<16x286xbf16>
    %c0_105 = arith.constant 0 : index
    %c0_106 = arith.constant 0 : index
    %88 = vector.load %arg16[%c0_105, %c0_106] : memref<144x768xbf16, #tpu.memory_space<vmem>>, vector<16x286xbf16>
    tpu.vector_store %arg16[%c0_105, %c0_106], %87 {strides = array<i32>} : memref<144x768xbf16, #tpu.memory_space<vmem>>, vector<16x286xbf16>,
    %c0_107 = arith.constant 0 : index
    %c1_108 = arith.constant 1 : index
    %89 = vector.load %arg15[%c0_107, %c1_108] : memref<16x768xbf16, #tpu.memory_space<vmem>>, vector<16x286xbf16>
    %c16_109 = arith.constant 16 : index
    %c0_110 = arith.constant 0 : index
    %90 = vector.load %arg16[%c16_109, %c0_110] : memref<144x768xbf16, #tpu.memory_space<vmem>>, vector<16x286xbf16>
    tpu.vector_store %arg16[%c16_109, %c0_110], %89 {strides = array<i32>} : memref<144x768xbf16, #tpu.memory_space<vmem>>, vector<16x286xbf16>,
    %c0_111 = arith.constant 0 : index
    %c2_112 = arith.constant 2 : index
    %91 = vector.load %arg15[%c0_111, %c2_112] : memref<16x768xbf16, #tpu.memory_space<vmem>>, vector<16x286xbf16>
    %c32_113 = arith.constant 32 : index
    %c0_114 = arith.constant 0 : index
    %92 = vector.load %arg16[%c32_113, %c0_114] : memref<144x768xbf16, #tpu.memory_space<vmem>>, vector<16x286xbf16>
    tpu.vector_store %arg16[%c32_113, %c0_114], %91 {strides = array<i32>} : memref<144x768xbf16, #tpu.memory_space<vmem>>, vector<16x286xbf16>,
    %c0_115 = arith.constant 0 : index
    %c18 = arith.constant 18 : index
    %93 = vector.load %arg15[%c0_115, %c18] : memref<16x768xbf16, #tpu.memory_space<vmem>>, vector<16x286xbf16>
    %c48_116 = arith.constant 48 : index
    %c0_117 = arith.constant 0 : index
    %94 = vector.load %arg16[%c48_116, %c0_117] : memref<144x768xbf16, #tpu.memory_space<vmem>>, vector<16x286xbf16>
    tpu.vector_store %arg16[%c48_116, %c0_117], %93 {strides = array<i32>} : memref<144x768xbf16, #tpu.memory_space<vmem>>, vector<16x286xbf16>,
    %c0_118 = arith.constant 0 : index
    %c19 = arith.constant 19 : index
    %95 = vector.load %arg15[%c0_118, %c19] : memref<16x768xbf16, #tpu.memory_space<vmem>>, vector<16x286xbf16>
    %c64_119 = arith.constant 64 : index
    %c0_120 = arith.constant 0 : index
    %96 = vector.load %arg16[%c64_119, %c0_120] : memref<144x768xbf16, #tpu.memory_space<vmem>>, vector<16x286xbf16>
    tpu.vector_store %arg16[%c64_119, %c0_120], %95 {strides = array<i32>} : memref<144x768xbf16, #tpu.memory_space<vmem>>, vector<16x286xbf16>,
    %c0_121 = arith.constant 0 : index
    %c20 = arith.constant 20 : index
    %97 = vector.load %arg15[%c0_121, %c20] : memref<16x768xbf16, #tpu.memory_space<vmem>>, vector<16x286xbf16>
    %c80 = arith.constant 80 : index
    %c0_122 = arith.constant 0 : index
    %98 = vector.load %arg16[%c80, %c0_122] : memref<144x768xbf16, #tpu.memory_space<vmem>>, vector<16x286xbf16>
    tpu.vector_store %arg16[%c80, %c0_122], %97 {strides = array<i32>} : memref<144x768xbf16, #tpu.memory_space<vmem>>, vector<16x286xbf16>,
    %c0_123 = arith.constant 0 : index
    %c36_124 = arith.constant 36 : index
    %99 = vector.load %arg15[%c0_123, %c36_124] : memref<16x768xbf16, #tpu.memory_space<vmem>>, vector<16x286xbf16>
    %c96 = arith.constant 96 : index
    %c0_125 = arith.constant 0 : index
    %100 = vector.load %arg16[%c96, %c0_125] : memref<144x768xbf16, #tpu.memory_space<vmem>>, vector<16x286xbf16>
    tpu.vector_store %arg16[%c96, %c0_125], %99 {strides = array<i32>} : memref<144x768xbf16, #tpu.memory_space<vmem>>, vector<16x286xbf16>,
    %c0_126 = arith.constant 0 : index
    %c37 = arith.constant 37 : index
    %101 = vector.load %arg15[%c0_126, %c37] : memref<16x768xbf16, #tpu.memory_space<vmem>>, vector<16x286xbf16>
    %c112 = arith.constant 112 : index
    %c0_127 = arith.constant 0 : index
    %102 = vector.load %arg16[%c112, %c0_127] : memref<144x768xbf16, #tpu.memory_space<vmem>>, vector<16x286xbf16>
    tpu.vector_store %arg16[%c112, %c0_127], %101 {strides = array<i32>} : memref<144x768xbf16, #tpu.memory_space<vmem>>, vector<16x286xbf16>,
    %c0_128 = arith.constant 0 : index
    %c38 = arith.constant 38 : index
    %103 = vector.load %arg15[%c0_128, %c38] : memref<16x768xbf16, #tpu.memory_space<vmem>>, vector<16x286xbf16>
    %c128 = arith.constant 128 : index
    %c0_129 = arith.constant 0 : index
    %104 = vector.load %arg16[%c128, %c0_129] : memref<144x768xbf16, #tpu.memory_space<vmem>>, vector<16x286xbf16>
    tpu.vector_store %arg16[%c128, %c0_129], %103 {strides = array<i32>} : memref<144x768xbf16, #tpu.memory_space<vmem>>, vector<16x286xbf16>,
    %c0_130 = arith.constant 0 : index
    %c384_131 = arith.constant 384 : index
    %105 = vector.load %arg15[%c0_130, %c384_131] : memref<16x768xbf16, #tpu.memory_space<vmem>>, vector<16x286xbf16>
    %c0_132 = arith.constant 0 : index
    %c384_133 = arith.constant 384 : index
    %106 = vector.load %arg16[%c0_132, %c384_133] : memref<144x768xbf16, #tpu.memory_space<vmem>>, vector<16x286xbf16>
    tpu.vector_store %arg16[%c0_132, %c384_133], %105 {strides = array<i32>} : memref<144x768xbf16, #tpu.memory_space<vmem>>, vector<16x286xbf16>,
    %c0_134 = arith.constant 0 : index
    %c385 = arith.constant 385 : index
    %107 = vector.load %arg15[%c0_134, %c385] : memref<16x768xbf16, #tpu.memory_space<vmem>>, vector<16x286xbf16>
    %c16_135 = arith.constant 16 : index
    %c384_136 = arith.constant 384 : index
    %108 = vector.load %arg16[%c16_135, %c384_136] : memref<144x768xbf16, #tpu.memory_space<vmem>>, vector<16x286xbf16>
    tpu.vector_store %arg16[%c16_135, %c384_136], %107 {strides = array<i32>} : memref<144x768xbf16, #tpu.memory_space<vmem>>, vector<16x286xbf16>,
    %c0_137 = arith.constant 0 : index
    %c386 = arith.constant 386 : index
    %109 = vector.load %arg15[%c0_137, %c386] : memref<16x768xbf16, #tpu.memory_space<vmem>>, vector<16x286xbf16>
    %c32_138 = arith.constant 32 : index
    %c384_139 = arith.constant 384 : index
    %110 = vector.load %arg16[%c32_138, %c384_139] : memref<144x768xbf16, #tpu.memory_space<vmem>>, vector<16x286xbf16>
    tpu.vector_store %arg16[%c32_138, %c384_139], %109 {strides = array<i32>} : memref<144x768xbf16, #tpu.memory_space<vmem>>, vector<16x286xbf16>,
    %c0_140 = arith.constant 0 : index
    %c402 = arith.constant 402 : index
    %111 = vector.load %arg15[%c0_140, %c402] : memref<16x768xbf16, #tpu.memory_space<vmem>>, vector<16x286xbf16>
    %c48_141 = arith.constant 48 : index
    %c384_142 = arith.constant 384 : index
    %112 = vector.load %arg16[%c48_141, %c384_142] : memref<144x768xbf16, #tpu.memory_space<vmem>>, vector<16x286xbf16>
    tpu.vector_store %arg16[%c48_141, %c384_142], %111 {strides = array<i32>} : memref<144x768xbf16, #tpu.memory_space<vmem>>, vector<16x286xbf16>,
    %c0_143 = arith.constant 0 : index
    %c403 = arith.constant 403 : index
    %113 = vector.load %arg15[%c0_143, %c403] : memref<16x768xbf16, #tpu.memory_space<vmem>>, vector<16x286xbf16>
    %c64_144 = arith.constant 64 : index
    %c384_145 = arith.constant 384 : index
    %114 = vector.load %arg16[%c64_144, %c384_145] : memref<144x768xbf16, #tpu.memory_space<vmem>>, vector<16x286xbf16>
    tpu.vector_store %arg16[%c64_144, %c384_145], %113 {strides = array<i32>} : memref<144x768xbf16, #tpu.memory_space<vmem>>, vector<16x286xbf16>,
    %c0_146 = arith.constant 0 : index
    %c404 = arith.constant 404 : index
    %115 = vector.load %arg15[%c0_146, %c404] : memref<16x768xbf16, #tpu.memory_space<vmem>>, vector<16x286xbf16>
    %c80_147 = arith.constant 80 : index
    %c384_148 = arith.constant 384 : index
    %116 = vector.load %arg16[%c80_147, %c384_148] : memref<144x768xbf16, #tpu.memory_space<vmem>>, vector<16x286xbf16>
    tpu.vector_store %arg16[%c80_147, %c384_148], %115 {strides = array<i32>} : memref<144x768xbf16, #tpu.memory_space<vmem>>, vector<16x286xbf16>,
    %c0_149 = arith.constant 0 : index
    %c420 = arith.constant 420 : index
    %117 = vector.load %arg15[%c0_149, %c420] : memref<16x768xbf16, #tpu.memory_space<vmem>>, vector<16x286xbf16>
    %c96_150 = arith.constant 96 : index
    %c384_151 = arith.constant 384 : index
    %118 = vector.load %arg16[%c96_150, %c384_151] : memref<144x768xbf16, #tpu.memory_space<vmem>>, vector<16x286xbf16>
    tpu.vector_store %arg16[%c96_150, %c384_151], %117 {strides = array<i32>} : memref<144x768xbf16, #tpu.memory_space<vmem>>, vector<16x286xbf16>,
    %c0_152 = arith.constant 0 : index
    %c421 = arith.constant 421 : index
    %119 = vector.load %arg15[%c0_152, %c421] : memref<16x768xbf16, #tpu.memory_space<vmem>>, vector<16x286xbf16>
    %c112_153 = arith.constant 112 : index
    %c384_154 = arith.constant 384 : index
    %120 = vector.load %arg16[%c112_153, %c384_154] : memref<144x768xbf16, #tpu.memory_space<vmem>>, vector<16x286xbf16>
    tpu.vector_store %arg16[%c112_153, %c384_154], %119 {strides = array<i32>} : memref<144x768xbf16, #tpu.memory_space<vmem>>, vector<16x286xbf16>,
    %c0_155 = arith.constant 0 : index
    %c422 = arith.constant 422 : index
    %121 = vector.load %arg15[%c0_155, %c422] : memref<16x768xbf16, #tpu.memory_space<vmem>>, vector<16x286xbf16>
    %c128_156 = arith.constant 128 : index
    %c384_157 = arith.constant 384 : index
    %122 = vector.load %arg16[%c128_156, %c384_157] : memref<144x768xbf16, #tpu.memory_space<vmem>>, vector<16x286xbf16>
    tpu.vector_store %arg16[%c128_156, %c384_157], %121 {strides = array<i32>} : memref<144x768xbf16, #tpu.memory_space<vmem>>, vector<16x286xbf16>,
    %c0_158 = arith.constant 0 : index
    %c0_159 = arith.constant 0 : index
    %123 = vector.load %arg5[%c0_158, %c0_159] : memref<32x144xbf16, #tpu.memory_space<vmem>>, vector<32x144xbf16>
    %c0_160 = arith.constant 0 : index
    %c0_161 = arith.constant 0 : index
    %124 = vector.load %arg16[%c0_160, %c0_161] : memref<144x768xbf16, #tpu.memory_space<vmem>>, vector<144x768xbf16>
    %cst_162 = arith.constant dense<0.000000e+00> : vector<32x768xf32>
    %125 = tpu.matmul %123, %124, %cst_162 {dimension_numbers = #tpu.dot_dimension_numbers<[1], [0], [0], [1], [0, 0, 1, 1], [], []>} : vector<32x144xbf16>, vector<144x768xbf16>, vector<32x768xf32> -> vector<32x768xf32>
    %c0_163 = arith.constant 0 : index
    %c0_164 = arith.constant 0 : index
    %126 = vector.load %arg6[%c0_163, %c0_164] : memref<32x1xf32, #tpu.memory_space<vmem>>, vector<32x1xf32>
    %127 = vector.broadcast %126 : vector<32x1xf32> to vector<32x768xf32>
    %128 = arith.addf %125, %127 : vector<32x768xf32>
    %cst_165 = arith.constant 0.000000e+00 : f32
    %129 = vector.broadcast %cst_165 : f32 to vector<32x768xf32>
    %130 = arith.maximumf %128, %129 : vector<32x768xf32>
    %131 = arith.truncf %130 : vector<32x768xf32> to vector<32x768xbf16>
    %c0_166 = arith.constant 0 : index
    %c0_167 = arith.constant 0 : index
    %132 = vector.load %arg17[%c0_166, %c0_167] : memref<32x768xbf16, #tpu.memory_space<vmem>>, vector<32x768xbf16>
    tpu.vector_store %arg17[%c0_166, %c0_167], %131 {strides = array<i32>} : memref<32x768xbf16, #tpu.memory_space<vmem>>, vector<32x768xbf16>,
    %c0_168 = arith.constant 0 : index
    %c0_169 = arith.constant 0 : index
    %133 = vector.load %arg17[%c0_168, %c0_169] : memref<32x768xbf16, #tpu.memory_space<vmem>>, vector<32x267xbf16>
    %c0_170 = arith.constant 0 : index
    %c1_171 = arith.constant 1 : index
    %134 = vector.load %arg17[%c0_170, %c1_171] : memref<32x768xbf16, #tpu.memory_space<vmem>>, vector<32x267xbf16>
    %135 = arith.maximumf %133, %134 : vector<32x267xbf16>
    %c0_172 = arith.constant 0 : index
    %c18_173 = arith.constant 18 : index
    %136 = vector.load %arg17[%c0_172, %c18_173] : memref<32x768xbf16, #tpu.memory_space<vmem>>, vector<32x267xbf16>
    %c0_174 = arith.constant 0 : index
    %c19_175 = arith.constant 19 : index
    %137 = vector.load %arg17[%c0_174, %c19_175] : memref<32x768xbf16, #tpu.memory_space<vmem>>, vector<32x267xbf16>
    %138 = arith.maximumf %136, %137 : vector<32x267xbf16>
    %139 = arith.maximumf %135, %138 : vector<32x267xbf16>
    %c0_176 = arith.constant 0 : index
    %c0_177 = arith.constant 0 : index
    %140 = vector.load %arg7[%c0_176, %c0_177] : memref<267x64xbf16, #tpu.memory_space<vmem>>, vector<267x64xbf16>
    %cst_178 = arith.constant dense<0.000000e+00> : vector<32x64xf32>
    %141 = tpu.matmul %139, %140, %cst_178 {dimension_numbers = #tpu.dot_dimension_numbers<[1], [0], [0], [1], [0, 0, 1, 1], [], []>} : vector<32x267xbf16>, vector<267x64xbf16>, vector<32x64xf32> -> vector<32x64xf32>
    %142 = vector.extract_strided_slice %141 {offsets = [0, 0], sizes = [1, 64], strides = [1, 1]} : vector<32x64xf32> to vector<1x64xf32>
    %143 = vector.extract_strided_slice %141 {offsets = [1, 0], sizes = [1, 64], strides = [1, 1]} : vector<32x64xf32> to vector<1x64xf32>
    %144 = tpu.concatenate %142, %143 in 1 : vector<1x64xf32>, vector<1x64xf32> -> vector<1x128xf32>
    %c0_179 = arith.constant 0 : index
    %c0_180 = arith.constant 0 : index
    %145 = vector.load %arg18[%c0_179, %c0_180] : memref<2x2048xf32, #tpu.memory_space<vmem>>, vector<1x128xf32>
    tpu.vector_store %arg18[%c0_179, %c0_180], %144 {strides = array<i32>} : memref<2x2048xf32, #tpu.memory_space<vmem>>, vector<1x128xf32>,
    %146 = vector.extract_strided_slice %141 {offsets = [2, 0], sizes = [1, 64], strides = [1, 1]} : vector<32x64xf32> to vector<1x64xf32>
    %147 = vector.extract_strided_slice %141 {offsets = [3, 0], sizes = [1, 64], strides = [1, 1]} : vector<32x64xf32> to vector<1x64xf32>
    %148 = tpu.concatenate %146, %147 in 1 : vector<1x64xf32>, vector<1x64xf32> -> vector<1x128xf32>
    %c0_181 = arith.constant 0 : index
    %c128_182 = arith.constant 128 : index
    %149 = vector.load %arg18[%c0_181, %c128_182] : memref<2x2048xf32, #tpu.memory_space<vmem>>, vector<1x128xf32>
    tpu.vector_store %arg18[%c0_181, %c128_182], %148 {strides = array<i32>} : memref<2x2048xf32, #tpu.memory_space<vmem>>, vector<1x128xf32>,
    %150 = vector.extract_strided_slice %141 {offsets = [4, 0], sizes = [1, 64], strides = [1, 1]} : vector<32x64xf32> to vector<1x64xf32>
    %151 = vector.extract_strided_slice %141 {offsets = [5, 0], sizes = [1, 64], strides = [1, 1]} : vector<32x64xf32> to vector<1x64xf32>
    %152 = tpu.concatenate %150, %151 in 1 : vector<1x64xf32>, vector<1x64xf32> -> vector<1x128xf32>
    %c0_183 = arith.constant 0 : index
    %c256 = arith.constant 256 : index
    %153 = vector.load %arg18[%c0_183, %c256] : memref<2x2048xf32, #tpu.memory_space<vmem>>, vector<1x128xf32>
    tpu.vector_store %arg18[%c0_183, %c256], %152 {strides = array<i32>} : memref<2x2048xf32, #tpu.memory_space<vmem>>, vector<1x128xf32>,
    %154 = vector.extract_strided_slice %141 {offsets = [6, 0], sizes = [1, 64], strides = [1, 1]} : vector<32x64xf32> to vector<1x64xf32>
    %155 = vector.extract_strided_slice %141 {offsets = [7, 0], sizes = [1, 64], strides = [1, 1]} : vector<32x64xf32> to vector<1x64xf32>
    %156 = tpu.concatenate %154, %155 in 1 : vector<1x64xf32>, vector<1x64xf32> -> vector<1x128xf32>
    %c0_184 = arith.constant 0 : index
    %c384_185 = arith.constant 384 : index
    %157 = vector.load %arg18[%c0_184, %c384_185] : memref<2x2048xf32, #tpu.memory_space<vmem>>, vector<1x128xf32>
    tpu.vector_store %arg18[%c0_184, %c384_185], %156 {strides = array<i32>} : memref<2x2048xf32, #tpu.memory_space<vmem>>, vector<1x128xf32>,
    %158 = vector.extract_strided_slice %141 {offsets = [8, 0], sizes = [1, 64], strides = [1, 1]} : vector<32x64xf32> to vector<1x64xf32>
    %159 = vector.extract_strided_slice %141 {offsets = [9, 0], sizes = [1, 64], strides = [1, 1]} : vector<32x64xf32> to vector<1x64xf32>
    %160 = tpu.concatenate %158, %159 in 1 : vector<1x64xf32>, vector<1x64xf32> -> vector<1x128xf32>
    %c0_186 = arith.constant 0 : index
    %c512 = arith.constant 512 : index
    %161 = vector.load %arg18[%c0_186, %c512] : memref<2x2048xf32, #tpu.memory_space<vmem>>, vector<1x128xf32>
    tpu.vector_store %arg18[%c0_186, %c512], %160 {strides = array<i32>} : memref<2x2048xf32, #tpu.memory_space<vmem>>, vector<1x128xf32>,
    %162 = vector.extract_strided_slice %141 {offsets = [10, 0], sizes = [1, 64], strides = [1, 1]} : vector<32x64xf32> to vector<1x64xf32>
    %163 = vector.extract_strided_slice %141 {offsets = [11, 0], sizes = [1, 64], strides = [1, 1]} : vector<32x64xf32> to vector<1x64xf32>
    %164 = tpu.concatenate %162, %163 in 1 : vector<1x64xf32>, vector<1x64xf32> -> vector<1x128xf32>
    %c0_187 = arith.constant 0 : index
    %c640 = arith.constant 640 : index
    %165 = vector.load %arg18[%c0_187, %c640] : memref<2x2048xf32, #tpu.memory_space<vmem>>, vector<1x128xf32>
    tpu.vector_store %arg18[%c0_187, %c640], %164 {strides = array<i32>} : memref<2x2048xf32, #tpu.memory_space<vmem>>, vector<1x128xf32>,
    %166 = vector.extract_strided_slice %141 {offsets = [12, 0], sizes = [1, 64], strides = [1, 1]} : vector<32x64xf32> to vector<1x64xf32>
    %167 = vector.extract_strided_slice %141 {offsets = [13, 0], sizes = [1, 64], strides = [1, 1]} : vector<32x64xf32> to vector<1x64xf32>
    %168 = tpu.concatenate %166, %167 in 1 : vector<1x64xf32>, vector<1x64xf32> -> vector<1x128xf32>
    %c0_188 = arith.constant 0 : index
    %c768 = arith.constant 768 : index
    %169 = vector.load %arg18[%c0_188, %c768] : memref<2x2048xf32, #tpu.memory_space<vmem>>, vector<1x128xf32>
    tpu.vector_store %arg18[%c0_188, %c768], %168 {strides = array<i32>} : memref<2x2048xf32, #tpu.memory_space<vmem>>, vector<1x128xf32>,
    %170 = vector.extract_strided_slice %141 {offsets = [14, 0], sizes = [1, 64], strides = [1, 1]} : vector<32x64xf32> to vector<1x64xf32>
    %171 = vector.extract_strided_slice %141 {offsets = [15, 0], sizes = [1, 64], strides = [1, 1]} : vector<32x64xf32> to vector<1x64xf32>
    %172 = tpu.concatenate %170, %171 in 1 : vector<1x64xf32>, vector<1x64xf32> -> vector<1x128xf32>
    %c0_189 = arith.constant 0 : index
    %c896 = arith.constant 896 : index
    %173 = vector.load %arg18[%c0_189, %c896] : memref<2x2048xf32, #tpu.memory_space<vmem>>, vector<1x128xf32>
    tpu.vector_store %arg18[%c0_189, %c896], %172 {strides = array<i32>} : memref<2x2048xf32, #tpu.memory_space<vmem>>, vector<1x128xf32>,
    %174 = vector.extract_strided_slice %141 {offsets = [16, 0], sizes = [1, 64], strides = [1, 1]} : vector<32x64xf32> to vector<1x64xf32>
    %175 = vector.extract_strided_slice %141 {offsets = [17, 0], sizes = [1, 64], strides = [1, 1]} : vector<32x64xf32> to vector<1x64xf32>
    %176 = tpu.concatenate %174, %175 in 1 : vector<1x64xf32>, vector<1x64xf32> -> vector<1x128xf32>
    %c0_190 = arith.constant 0 : index
    %c1024 = arith.constant 1024 : index
    %177 = vector.load %arg18[%c0_190, %c1024] : memref<2x2048xf32, #tpu.memory_space<vmem>>, vector<1x128xf32>
    tpu.vector_store %arg18[%c0_190, %c1024], %176 {strides = array<i32>} : memref<2x2048xf32, #tpu.memory_space<vmem>>, vector<1x128xf32>,
    %178 = vector.extract_strided_slice %141 {offsets = [18, 0], sizes = [1, 64], strides = [1, 1]} : vector<32x64xf32> to vector<1x64xf32>
    %179 = vector.extract_strided_slice %141 {offsets = [19, 0], sizes = [1, 64], strides = [1, 1]} : vector<32x64xf32> to vector<1x64xf32>
    %180 = tpu.concatenate %178, %179 in 1 : vector<1x64xf32>, vector<1x64xf32> -> vector<1x128xf32>
    %c0_191 = arith.constant 0 : index
    %c1152_192 = arith.constant 1152 : index
    %181 = vector.load %arg18[%c0_191, %c1152_192] : memref<2x2048xf32, #tpu.memory_space<vmem>>, vector<1x128xf32>
    tpu.vector_store %arg18[%c0_191, %c1152_192], %180 {strides = array<i32>} : memref<2x2048xf32, #tpu.memory_space<vmem>>, vector<1x128xf32>,
    %182 = vector.extract_strided_slice %141 {offsets = [20, 0], sizes = [1, 64], strides = [1, 1]} : vector<32x64xf32> to vector<1x64xf32>
    %183 = vector.extract_strided_slice %141 {offsets = [21, 0], sizes = [1, 64], strides = [1, 1]} : vector<32x64xf32> to vector<1x64xf32>
    %184 = tpu.concatenate %182, %183 in 1 : vector<1x64xf32>, vector<1x64xf32> -> vector<1x128xf32>
    %c0_193 = arith.constant 0 : index
    %c1280 = arith.constant 1280 : index
    %185 = vector.load %arg18[%c0_193, %c1280] : memref<2x2048xf32, #tpu.memory_space<vmem>>, vector<1x128xf32>
    tpu.vector_store %arg18[%c0_193, %c1280], %184 {strides = array<i32>} : memref<2x2048xf32, #tpu.memory_space<vmem>>, vector<1x128xf32>,
    %186 = vector.extract_strided_slice %141 {offsets = [22, 0], sizes = [1, 64], strides = [1, 1]} : vector<32x64xf32> to vector<1x64xf32>
    %187 = vector.extract_strided_slice %141 {offsets = [23, 0], sizes = [1, 64], strides = [1, 1]} : vector<32x64xf32> to vector<1x64xf32>
    %188 = tpu.concatenate %186, %187 in 1 : vector<1x64xf32>, vector<1x64xf32> -> vector<1x128xf32>
    %c0_194 = arith.constant 0 : index
    %c1408 = arith.constant 1408 : index
    %189 = vector.load %arg18[%c0_194, %c1408] : memref<2x2048xf32, #tpu.memory_space<vmem>>, vector<1x128xf32>
    tpu.vector_store %arg18[%c0_194, %c1408], %188 {strides = array<i32>} : memref<2x2048xf32, #tpu.memory_space<vmem>>, vector<1x128xf32>,
    %190 = vector.extract_strided_slice %141 {offsets = [24, 0], sizes = [1, 64], strides = [1, 1]} : vector<32x64xf32> to vector<1x64xf32>
    %191 = vector.extract_strided_slice %141 {offsets = [25, 0], sizes = [1, 64], strides = [1, 1]} : vector<32x64xf32> to vector<1x64xf32>
    %192 = tpu.concatenate %190, %191 in 1 : vector<1x64xf32>, vector<1x64xf32> -> vector<1x128xf32>
    %c0_195 = arith.constant 0 : index
    %c1536 = arith.constant 1536 : index
    %193 = vector.load %arg18[%c0_195, %c1536] : memref<2x2048xf32, #tpu.memory_space<vmem>>, vector<1x128xf32>
    tpu.vector_store %arg18[%c0_195, %c1536], %192 {strides = array<i32>} : memref<2x2048xf32, #tpu.memory_space<vmem>>, vector<1x128xf32>,
    %194 = vector.extract_strided_slice %141 {offsets = [26, 0], sizes = [1, 64], strides = [1, 1]} : vector<32x64xf32> to vector<1x64xf32>
    %195 = vector.extract_strided_slice %141 {offsets = [27, 0], sizes = [1, 64], strides = [1, 1]} : vector<32x64xf32> to vector<1x64xf32>
    %196 = tpu.concatenate %194, %195 in 1 : vector<1x64xf32>, vector<1x64xf32> -> vector<1x128xf32>
    %c0_196 = arith.constant 0 : index
    %c1664 = arith.constant 1664 : index
    %197 = vector.load %arg18[%c0_196, %c1664] : memref<2x2048xf32, #tpu.memory_space<vmem>>, vector<1x128xf32>
    tpu.vector_store %arg18[%c0_196, %c1664], %196 {strides = array<i32>} : memref<2x2048xf32, #tpu.memory_space<vmem>>, vector<1x128xf32>,
    %198 = vector.extract_strided_slice %141 {offsets = [28, 0], sizes = [1, 64], strides = [1, 1]} : vector<32x64xf32> to vector<1x64xf32>
    %199 = vector.extract_strided_slice %141 {offsets = [29, 0], sizes = [1, 64], strides = [1, 1]} : vector<32x64xf32> to vector<1x64xf32>
    %200 = tpu.concatenate %198, %199 in 1 : vector<1x64xf32>, vector<1x64xf32> -> vector<1x128xf32>
    %c0_197 = arith.constant 0 : index
    %c1792 = arith.constant 1792 : index
    %201 = vector.load %arg18[%c0_197, %c1792] : memref<2x2048xf32, #tpu.memory_space<vmem>>, vector<1x128xf32>
    tpu.vector_store %arg18[%c0_197, %c1792], %200 {strides = array<i32>} : memref<2x2048xf32, #tpu.memory_space<vmem>>, vector<1x128xf32>,
    %202 = vector.extract_strided_slice %141 {offsets = [30, 0], sizes = [1, 64], strides = [1, 1]} : vector<32x64xf32> to vector<1x64xf32>
    %203 = vector.extract_strided_slice %141 {offsets = [31, 0], sizes = [1, 64], strides = [1, 1]} : vector<32x64xf32> to vector<1x64xf32>
    %204 = tpu.concatenate %202, %203 in 1 : vector<1x64xf32>, vector<1x64xf32> -> vector<1x128xf32>
    %c0_198 = arith.constant 0 : index
    %c1920 = arith.constant 1920 : index
    %205 = vector.load %arg18[%c0_198, %c1920] : memref<2x2048xf32, #tpu.memory_space<vmem>>, vector<1x128xf32>
    tpu.vector_store %arg18[%c0_198, %c1920], %204 {strides = array<i32>} : memref<2x2048xf32, #tpu.memory_space<vmem>>, vector<1x128xf32>,
    %c0_199 = arith.constant 0 : index
    %c384_200 = arith.constant 384 : index
    %206 = vector.load %arg17[%c0_199, %c384_200] : memref<32x768xbf16, #tpu.memory_space<vmem>>, vector<32x267xbf16>
    %c0_201 = arith.constant 0 : index
    %c385_202 = arith.constant 385 : index
    %207 = vector.load %arg17[%c0_201, %c385_202] : memref<32x768xbf16, #tpu.memory_space<vmem>>, vector<32x267xbf16>
    %208 = arith.maximumf %206, %207 : vector<32x267xbf16>
    %c0_203 = arith.constant 0 : index
    %c402_204 = arith.constant 402 : index
    %209 = vector.load %arg17[%c0_203, %c402_204] : memref<32x768xbf16, #tpu.memory_space<vmem>>, vector<32x267xbf16>
    %c0_205 = arith.constant 0 : index
    %c403_206 = arith.constant 403 : index
    %210 = vector.load %arg17[%c0_205, %c403_206] : memref<32x768xbf16, #tpu.memory_space<vmem>>, vector<32x267xbf16>
    %211 = arith.maximumf %209, %210 : vector<32x267xbf16>
    %212 = arith.maximumf %208, %211 : vector<32x267xbf16>
    %c0_207 = arith.constant 0 : index
    %c0_208 = arith.constant 0 : index
    %213 = vector.load %arg7[%c0_207, %c0_208] : memref<267x64xbf16, #tpu.memory_space<vmem>>, vector<267x64xbf16>
    %cst_209 = arith.constant dense<0.000000e+00> : vector<32x64xf32>
    %214 = tpu.matmul %212, %213, %cst_209 {dimension_numbers = #tpu.dot_dimension_numbers<[1], [0], [0], [1], [0, 0, 1, 1], [], []>} : vector<32x267xbf16>, vector<267x64xbf16>, vector<32x64xf32> -> vector<32x64xf32>
    %215 = vector.extract_strided_slice %214 {offsets = [0, 0], sizes = [1, 64], strides = [1, 1]} : vector<32x64xf32> to vector<1x64xf32>
    %216 = vector.extract_strided_slice %214 {offsets = [1, 0], sizes = [1, 64], strides = [1, 1]} : vector<32x64xf32> to vector<1x64xf32>
    %217 = tpu.concatenate %215, %216 in 1 : vector<1x64xf32>, vector<1x64xf32> -> vector<1x128xf32>
    %c1_210 = arith.constant 1 : index
    %c0_211 = arith.constant 0 : index
    %218 = vector.load %arg18[%c1_210, %c0_211] : memref<2x2048xf32, #tpu.memory_space<vmem>>, vector<1x128xf32>
    tpu.vector_store %arg18[%c1_210, %c0_211], %217 {strides = array<i32>} : memref<2x2048xf32, #tpu.memory_space<vmem>>, vector<1x128xf32>,
    %219 = vector.extract_strided_slice %214 {offsets = [2, 0], sizes = [1, 64], strides = [1, 1]} : vector<32x64xf32> to vector<1x64xf32>
    %220 = vector.extract_strided_slice %214 {offsets = [3, 0], sizes = [1, 64], strides = [1, 1]} : vector<32x64xf32> to vector<1x64xf32>
    %221 = tpu.concatenate %219, %220 in 1 : vector<1x64xf32>, vector<1x64xf32> -> vector<1x128xf32>
    %c1_212 = arith.constant 1 : index
    %c128_213 = arith.constant 128 : index
    %222 = vector.load %arg18[%c1_212, %c128_213] : memref<2x2048xf32, #tpu.memory_space<vmem>>, vector<1x128xf32>
    tpu.vector_store %arg18[%c1_212, %c128_213], %221 {strides = array<i32>} : memref<2x2048xf32, #tpu.memory_space<vmem>>, vector<1x128xf32>,
    %223 = vector.extract_strided_slice %214 {offsets = [4, 0], sizes = [1, 64], strides = [1, 1]} : vector<32x64xf32> to vector<1x64xf32>
    %224 = vector.extract_strided_slice %214 {offsets = [5, 0], sizes = [1, 64], strides = [1, 1]} : vector<32x64xf32> to vector<1x64xf32>
    %225 = tpu.concatenate %223, %224 in 1 : vector<1x64xf32>, vector<1x64xf32> -> vector<1x128xf32>
    %c1_214 = arith.constant 1 : index
    %c256_215 = arith.constant 256 : index
    %226 = vector.load %arg18[%c1_214, %c256_215] : memref<2x2048xf32, #tpu.memory_space<vmem>>, vector<1x128xf32>
    tpu.vector_store %arg18[%c1_214, %c256_215], %225 {strides = array<i32>} : memref<2x2048xf32, #tpu.memory_space<vmem>>, vector<1x128xf32>,
    %227 = vector.extract_strided_slice %214 {offsets = [6, 0], sizes = [1, 64], strides = [1, 1]} : vector<32x64xf32> to vector<1x64xf32>
    %228 = vector.extract_strided_slice %214 {offsets = [7, 0], sizes = [1, 64], strides = [1, 1]} : vector<32x64xf32> to vector<1x64xf32>
    %229 = tpu.concatenate %227, %228 in 1 : vector<1x64xf32>, vector<1x64xf32> -> vector<1x128xf32>
    %c1_216 = arith.constant 1 : index
    %c384_217 = arith.constant 384 : index
    %230 = vector.load %arg18[%c1_216, %c384_217] : memref<2x2048xf32, #tpu.memory_space<vmem>>, vector<1x128xf32>
    tpu.vector_store %arg18[%c1_216, %c384_217], %229 {strides = array<i32>} : memref<2x2048xf32, #tpu.memory_space<vmem>>, vector<1x128xf32>,
    %231 = vector.extract_strided_slice %214 {offsets = [8, 0], sizes = [1, 64], strides = [1, 1]} : vector<32x64xf32> to vector<1x64xf32>
    %232 = vector.extract_strided_slice %214 {offsets = [9, 0], sizes = [1, 64], strides = [1, 1]} : vector<32x64xf32> to vector<1x64xf32>
    %233 = tpu.concatenate %231, %232 in 1 : vector<1x64xf32>, vector<1x64xf32> -> vector<1x128xf32>
    %c1_218 = arith.constant 1 : index
    %c512_219 = arith.constant 512 : index
    %234 = vector.load %arg18[%c1_218, %c512_219] : memref<2x2048xf32, #tpu.memory_space<vmem>>, vector<1x128xf32>
    tpu.vector_store %arg18[%c1_218, %c512_219], %233 {strides = array<i32>} : memref<2x2048xf32, #tpu.memory_space<vmem>>, vector<1x128xf32>,
    %235 = vector.extract_strided_slice %214 {offsets = [10, 0], sizes = [1, 64], strides = [1, 1]} : vector<32x64xf32> to vector<1x64xf32>
    %236 = vector.extract_strided_slice %214 {offsets = [11, 0], sizes = [1, 64], strides = [1, 1]} : vector<32x64xf32> to vector<1x64xf32>
    %237 = tpu.concatenate %235, %236 in 1 : vector<1x64xf32>, vector<1x64xf32> -> vector<1x128xf32>
    %c1_220 = arith.constant 1 : index
    %c640_221 = arith.constant 640 : index
    %238 = vector.load %arg18[%c1_220, %c640_221] : memref<2x2048xf32, #tpu.memory_space<vmem>>, vector<1x128xf32>
    tpu.vector_store %arg18[%c1_220, %c640_221], %237 {strides = array<i32>} : memref<2x2048xf32, #tpu.memory_space<vmem>>, vector<1x128xf32>,
    %239 = vector.extract_strided_slice %214 {offsets = [12, 0], sizes = [1, 64], strides = [1, 1]} : vector<32x64xf32> to vector<1x64xf32>
    %240 = vector.extract_strided_slice %214 {offsets = [13, 0], sizes = [1, 64], strides = [1, 1]} : vector<32x64xf32> to vector<1x64xf32>
    %241 = tpu.concatenate %239, %240 in 1 : vector<1x64xf32>, vector<1x64xf32> -> vector<1x128xf32>
    %c1_222 = arith.constant 1 : index
    %c768_223 = arith.constant 768 : index
    %242 = vector.load %arg18[%c1_222, %c768_223] : memref<2x2048xf32, #tpu.memory_space<vmem>>, vector<1x128xf32>
    tpu.vector_store %arg18[%c1_222, %c768_223], %241 {strides = array<i32>} : memref<2x2048xf32, #tpu.memory_space<vmem>>, vector<1x128xf32>,
    %243 = vector.extract_strided_slice %214 {offsets = [14, 0], sizes = [1, 64], strides = [1, 1]} : vector<32x64xf32> to vector<1x64xf32>
    %244 = vector.extract_strided_slice %214 {offsets = [15, 0], sizes = [1, 64], strides = [1, 1]} : vector<32x64xf32> to vector<1x64xf32>
    %245 = tpu.concatenate %243, %244 in 1 : vector<1x64xf32>, vector<1x64xf32> -> vector<1x128xf32>
    %c1_224 = arith.constant 1 : index
    %c896_225 = arith.constant 896 : index
    %246 = vector.load %arg18[%c1_224, %c896_225] : memref<2x2048xf32, #tpu.memory_space<vmem>>, vector<1x128xf32>
    tpu.vector_store %arg18[%c1_224, %c896_225], %245 {strides = array<i32>} : memref<2x2048xf32, #tpu.memory_space<vmem>>, vector<1x128xf32>,
    %247 = vector.extract_strided_slice %214 {offsets = [16, 0], sizes = [1, 64], strides = [1, 1]} : vector<32x64xf32> to vector<1x64xf32>
    %248 = vector.extract_strided_slice %214 {offsets = [17, 0], sizes = [1, 64], strides = [1, 1]} : vector<32x64xf32> to vector<1x64xf32>
    %249 = tpu.concatenate %247, %248 in 1 : vector<1x64xf32>, vector<1x64xf32> -> vector<1x128xf32>
    %c1_226 = arith.constant 1 : index
    %c1024_227 = arith.constant 1024 : index
    %250 = vector.load %arg18[%c1_226, %c1024_227] : memref<2x2048xf32, #tpu.memory_space<vmem>>, vector<1x128xf32>
    tpu.vector_store %arg18[%c1_226, %c1024_227], %249 {strides = array<i32>} : memref<2x2048xf32, #tpu.memory_space<vmem>>, vector<1x128xf32>,
    %251 = vector.extract_strided_slice %214 {offsets = [18, 0], sizes = [1, 64], strides = [1, 1]} : vector<32x64xf32> to vector<1x64xf32>
    %252 = vector.extract_strided_slice %214 {offsets = [19, 0], sizes = [1, 64], strides = [1, 1]} : vector<32x64xf32> to vector<1x64xf32>
    %253 = tpu.concatenate %251, %252 in 1 : vector<1x64xf32>, vector<1x64xf32> -> vector<1x128xf32>
    %c1_228 = arith.constant 1 : index
    %c1152_229 = arith.constant 1152 : index
    %254 = vector.load %arg18[%c1_228, %c1152_229] : memref<2x2048xf32, #tpu.memory_space<vmem>>, vector<1x128xf32>
    tpu.vector_store %arg18[%c1_228, %c1152_229], %253 {strides = array<i32>} : memref<2x2048xf32, #tpu.memory_space<vmem>>, vector<1x128xf32>,
    %255 = vector.extract_strided_slice %214 {offsets = [20, 0], sizes = [1, 64], strides = [1, 1]} : vector<32x64xf32> to vector<1x64xf32>
    %256 = vector.extract_strided_slice %214 {offsets = [21, 0], sizes = [1, 64], strides = [1, 1]} : vector<32x64xf32> to vector<1x64xf32>
    %257 = tpu.concatenate %255, %256 in 1 : vector<1x64xf32>, vector<1x64xf32> -> vector<1x128xf32>
    %c1_230 = arith.constant 1 : index
    %c1280_231 = arith.constant 1280 : index
    %258 = vector.load %arg18[%c1_230, %c1280_231] : memref<2x2048xf32, #tpu.memory_space<vmem>>, vector<1x128xf32>
    tpu.vector_store %arg18[%c1_230, %c1280_231], %257 {strides = array<i32>} : memref<2x2048xf32, #tpu.memory_space<vmem>>, vector<1x128xf32>,
    %259 = vector.extract_strided_slice %214 {offsets = [22, 0], sizes = [1, 64], strides = [1, 1]} : vector<32x64xf32> to vector<1x64xf32>
    %260 = vector.extract_strided_slice %214 {offsets = [23, 0], sizes = [1, 64], strides = [1, 1]} : vector<32x64xf32> to vector<1x64xf32>
    %261 = tpu.concatenate %259, %260 in 1 : vector<1x64xf32>, vector<1x64xf32> -> vector<1x128xf32>
    %c1_232 = arith.constant 1 : index
    %c1408_233 = arith.constant 1408 : index
    %262 = vector.load %arg18[%c1_232, %c1408_233] : memref<2x2048xf32, #tpu.memory_space<vmem>>, vector<1x128xf32>
    tpu.vector_store %arg18[%c1_232, %c1408_233], %261 {strides = array<i32>} : memref<2x2048xf32, #tpu.memory_space<vmem>>, vector<1x128xf32>,
    %263 = vector.extract_strided_slice %214 {offsets = [24, 0], sizes = [1, 64], strides = [1, 1]} : vector<32x64xf32> to vector<1x64xf32>
    %264 = vector.extract_strided_slice %214 {offsets = [25, 0], sizes = [1, 64], strides = [1, 1]} : vector<32x64xf32> to vector<1x64xf32>
    %265 = tpu.concatenate %263, %264 in 1 : vector<1x64xf32>, vector<1x64xf32> -> vector<1x128xf32>
    %c1_234 = arith.constant 1 : index
    %c1536_235 = arith.constant 1536 : index
    %266 = vector.load %arg18[%c1_234, %c1536_235] : memref<2x2048xf32, #tpu.memory_space<vmem>>, vector<1x128xf32>
    tpu.vector_store %arg18[%c1_234, %c1536_235], %265 {strides = array<i32>} : memref<2x2048xf32, #tpu.memory_space<vmem>>, vector<1x128xf32>,
    %267 = vector.extract_strided_slice %214 {offsets = [26, 0], sizes = [1, 64], strides = [1, 1]} : vector<32x64xf32> to vector<1x64xf32>
    %268 = vector.extract_strided_slice %214 {offsets = [27, 0], sizes = [1, 64], strides = [1, 1]} : vector<32x64xf32> to vector<1x64xf32>
    %269 = tpu.concatenate %267, %268 in 1 : vector<1x64xf32>, vector<1x64xf32> -> vector<1x128xf32>
    %c1_236 = arith.constant 1 : index
    %c1664_237 = arith.constant 1664 : index
    %270 = vector.load %arg18[%c1_236, %c1664_237] : memref<2x2048xf32, #tpu.memory_space<vmem>>, vector<1x128xf32>
    tpu.vector_store %arg18[%c1_236, %c1664_237], %269 {strides = array<i32>} : memref<2x2048xf32, #tpu.memory_space<vmem>>, vector<1x128xf32>,
    %271 = vector.extract_strided_slice %214 {offsets = [28, 0], sizes = [1, 64], strides = [1, 1]} : vector<32x64xf32> to vector<1x64xf32>
    %272 = vector.extract_strided_slice %214 {offsets = [29, 0], sizes = [1, 64], strides = [1, 1]} : vector<32x64xf32> to vector<1x64xf32>
    %273 = tpu.concatenate %271, %272 in 1 : vector<1x64xf32>, vector<1x64xf32> -> vector<1x128xf32>
    %c1_238 = arith.constant 1 : index
    %c1792_239 = arith.constant 1792 : index
    %274 = vector.load %arg18[%c1_238, %c1792_239] : memref<2x2048xf32, #tpu.memory_space<vmem>>, vector<1x128xf32>
    tpu.vector_store %arg18[%c1_238, %c1792_239], %273 {strides = array<i32>} : memref<2x2048xf32, #tpu.memory_space<vmem>>, vector<1x128xf32>,
    %275 = vector.extract_strided_slice %214 {offsets = [30, 0], sizes = [1, 64], strides = [1, 1]} : vector<32x64xf32> to vector<1x64xf32>
    %276 = vector.extract_strided_slice %214 {offsets = [31, 0], sizes = [1, 64], strides = [1, 1]} : vector<32x64xf32> to vector<1x64xf32>
    %277 = tpu.concatenate %275, %276 in 1 : vector<1x64xf32>, vector<1x64xf32> -> vector<1x128xf32>
    %c1_240 = arith.constant 1 : index
    %c1920_241 = arith.constant 1920 : index
    %278 = vector.load %arg18[%c1_240, %c1920_241] : memref<2x2048xf32, #tpu.memory_space<vmem>>, vector<1x128xf32>
    tpu.vector_store %arg18[%c1_240, %c1920_241], %277 {strides = array<i32>} : memref<2x2048xf32, #tpu.memory_space<vmem>>, vector<1x128xf32>,
    %c0_242 = arith.constant 0 : index
    %c0_243 = arith.constant 0 : index
    %279 = vector.load %arg18[%c0_242, %c0_243] : memref<2x2048xf32, #tpu.memory_space<vmem>>, vector<2x2048xf32>
    %280 = arith.truncf %279 : vector<2x2048xf32> to vector<2x2048xbf16>
    %c0_244 = arith.constant 0 : index
    %c0_245 = arith.constant 0 : index
    %281 = vector.load %arg8[%c0_244, %c0_245] : memref<2048x32xbf16, #tpu.memory_space<vmem>>, vector<2048x32xbf16>
    %cst_246 = arith.constant dense<0.000000e+00> : vector<2x32xf32>
    %282 = tpu.matmul %280, %281, %cst_246 {dimension_numbers = #tpu.dot_dimension_numbers<[1], [0], [0], [1], [0, 0, 1, 1], [], []>} : vector<2x2048xbf16>, vector<2048x32xbf16>, vector<2x32xf32> -> vector<2x32xf32>
    %c0_247 = arith.constant 0 : index
    %c0_248 = arith.constant 0 : index
    %283 = vector.load %arg9[%c0_247, %c0_248] : memref<1x32xf32, #tpu.memory_space<vmem>>, vector<1x32xf32>
    %284 = vector.broadcast %283 : vector<1x32xf32> to vector<2x32xf32>
    %285 = arith.addf %282, %284 : vector<2x32xf32>
    %cst_249 = arith.constant 0.000000e+00 : f32
    %286 = vector.broadcast %cst_249 : f32 to vector<2x32xf32>
    %287 = arith.maximumf %285, %286 : vector<2x32xf32>
    %288 = arith.truncf %287 : vector<2x32xf32> to vector<2x32xbf16>
    %c0_250 = arith.constant 0 : index
    %c0_251 = arith.constant 0 : index
    %289 = vector.load %arg10[%c0_250, %c0_251] : memref<32x10xbf16, #tpu.memory_space<vmem>>, vector<32x10xbf16>
    %cst_252 = arith.constant dense<0.000000e+00> : vector<2x10xf32>
    %290 = tpu.matmul %288, %289, %cst_252 {dimension_numbers = #tpu.dot_dimension_numbers<[1], [0], [0], [1], [0, 0, 1, 1], [], []>} : vector<2x32xbf16>, vector<32x10xbf16>, vector<2x10xf32> -> vector<2x10xf32>
    %c0_253 = arith.constant 0 : index
    %c0_254 = arith.constant 0 : index
    %291 = vector.load %arg11[%c0_253, %c0_254] : memref<1x10xf32, #tpu.memory_space<vmem>>, vector<1x10xf32>
    %292 = vector.broadcast %291 : vector<1x10xf32> to vector<2x10xf32>
    %293 = arith.addf %290, %292 : vector<2x10xf32>
    %c0_255 = arith.constant 0 : index
    %c0_256 = arith.constant 0 : index
    %c0_257 = arith.constant 0 : index
    %294 = vector.load %arg12[%c0_255, %c0_256, %c0_257] : memref<1x2x10xf32, #tpu.memory_space<vmem>>, vector<1x2x10xf32>
    %295 = vector.shape_cast %294 : vector<1x2x10xf32> to vector<2x10xf32>
    %296 = vector.shape_cast %293 : vector<2x10xf32> to vector<1x2x10xf32>
    tpu.vector_store %arg12[%c0_255, %c0_256, %c0_257], %296 {strides = array<i32>} : memref<1x2x10xf32, #tpu.memory_space<vmem>>, vector<1x2x10xf32>,
    return
  }
  func.func @transform_0(%arg0: i32) -> (i32, i32, i32) {
    %c0_i32 = arith.constant 0 : i32
    %c0_i32_0 = arith.constant 0 : i32
    %c0_i32_1 = arith.constant 0 : i32
    return %arg0, %c0_i32, %c0_i32_0 : i32, i32, i32
  }
  func.func @transform_1(%arg0: i32) -> (i32, i32) {
    %c0_i32 = arith.constant 0 : i32
    %c0_i32_0 = arith.constant 0 : i32
    %c0_i32_1 = arith.constant 0 : i32
    return %c0_i32, %c0_i32_0 : i32, i32
  }
  func.func @transform_2(%arg0: i32) -> (i32, i32) {
    %c0_i32 = arith.constant 0 : i32
    %c0_i32_0 = arith.constant 0 : i32
    %c0_i32_1 = arith.constant 0 : i32
    return %c0_i32, %c0_i32_0 : i32, i32
  }
  func.func @transform_3(%arg0: i32) -> (i32, i32) {
    %c0_i32 = arith.constant 0 : i32
    %c0_i32_0 = arith.constant 0 : i32
    %c0_i32_1 = arith.constant 0 : i32
    return %c0_i32, %c0_i32_0 : i32, i32
  }
  func.func @transform_4(%arg0: i32) -> (i32, i32) {
    %c0_i32 = arith.constant 0 : i32
    %c0_i32_0 = arith.constant 0 : i32
    %c0_i32_1 = arith.constant 0 : i32
    return %c0_i32, %c0_i32_0 : i32, i32
  }
  func.func @transform_5(%arg0: i32) -> (i32, i32) {
    %c0_i32 = arith.constant 0 : i32
    %c0_i32_0 = arith.constant 0 : i32
    %c0_i32_1 = arith.constant 0 : i32
    return %c0_i32, %c0_i32_0 : i32, i32
  }
  func.func @transform_6(%arg0: i32) -> (i32, i32) {
    %c0_i32 = arith.constant 0 : i32
    %c0_i32_0 = arith.constant 0 : i32
    %c0_i32_1 = arith.constant 0 : i32
    return %c0_i32, %c0_i32_0 : i32, i32
  }
  func.func @transform_7(%arg0: i32) -> (i32, i32) {
    %c0_i32 = arith.constant 0 : i32
    %c0_i32_0 = arith.constant 0 : i32
    %c0_i32_1 = arith.constant 0 : i32
    return %c0_i32, %c0_i32_0 : i32, i32
  }
  func.func @transform_8(%arg0: i32) -> (i32, i32) {
    %c0_i32 = arith.constant 0 : i32
    %c0_i32_0 = arith.constant 0 : i32
    %c0_i32_1 = arith.constant 0 : i32
    return %c0_i32, %c0_i32_0 : i32, i32
  }
  func.func @transform_9(%arg0: i32) -> (i32, i32) {
    %c0_i32 = arith.constant 0 : i32
    %c0_i32_0 = arith.constant 0 : i32
    %c0_i32_1 = arith.constant 0 : i32
    return %c0_i32, %c0_i32_0 : i32, i32
  }
  func.func @transform_10(%arg0: i32) -> (i32, i32) {
    %c0_i32 = arith.constant 0 : i32
    %c0_i32_0 = arith.constant 0 : i32
    %c0_i32_1 = arith.constant 0 : i32
    return %c0_i32, %c0_i32_0 : i32, i32
  }
  func.func @transform_11(%arg0: i32) -> (i32, i32, i32) {
    %c0_i32 = arith.constant 0 : i32
    %c0_i32_0 = arith.constant 0 : i32
    %c0_i32_1 = arith.constant 0 : i32
    return %arg0, %c0_i32, %c0_i32_0 : i32, i32, i32
  }
}

</mosaic_0001>

<bundles_post_ra>
// kernel: simple_cnn_forward.1
= control target key start
LH: loop header
LB: loop body
LE: loop exit
PB: predicated region body
PF: predicated region fallthrough
CT: control target
= control target key end

     0   :  { %s14580_s0 = inlined_call_operand.vmem [shape: f32[4,8,1156], index: 0, kind: input, shape index: {}]   ;;  %s14581_s1 = inlined_call_operand.vmem [shape: bf16[16,72], index: 1, kind: input, shape index: {}]   ;;  %s14582_s2 = inlined_call_operand.vmem [shape: f32[16,1], index: 2, kind: input, shape index: {}]   ;;  %s14583_s3 = inlined_call_operand.vmem [shape: bf16[1051,324], index: 3, kind: input, shape index: {}]   ;;  %s14584_s4 = inlined_call_operand.vmem [shape: bf16[32,144], index: 4, kind: input, shape index: {}]   ;;  %s14585_s5 = inlined_call_operand.vmem [shape: f32[32,1], index: 5, kind: input, shape index: {}]   ;;  %s14586_s6 = inlined_call_operand.vmem [shape: bf16[267,64], index: 6, kind: input, shape index: {}]   ;;  %s14587_s7 = inlined_call_operand.vmem [shape: bf16[2048,32], index: 7, kind: input, shape index: {}]   ;;  %s14588_s8 = inlined_call_operand.vmem [shape: f32[1,32], index: 8, kind: input, shape index: {}]   ;;  %s14589_s9 = inlined_call_operand.vmem [shape: bf16[32,10], index: 9, kind: input, shape index: {}]   ;;  %s14590_s10 = inlined_call_operand.vmem [shape: f32[1,10], index: 10, kind: input, shape index: {}]   ;;  %s14591_s11 = inlined_call_operand.hbm [shape: f32[2,2,10], index: 11, kind: output, shape index: {}]  }
   0x1   :  { %14612 = sst [smem:[#allocation13_spill]] %s14580_s0 }
   0x2   :  { %14613 = sst [smem:[#allocation14_spill]] %s14581_s1 }
   0x3   :  { %14614 = sst [smem:[#allocation15_spill]] %s14582_s2 }
   0x4   :  { %16 = vsyncpa [#allocation9], 0 }
   0x5   :  { %18 = vsyncpa [#allocation9 + $0x1], 0  ;;  %s11252_s17 = smov 0   ;;  %s11254_s18 = smov 0  }
   0x6   :  { %s11256_s19 = smov 0   ;;  %s11258_s20 = smov 0  }
   0x7 LB: > { %14615 = sst [smem:[#allocation11_spill]] %s11166_s19  ;;  %s11273_s21 = sadd.s32 4294967295, %s11170_s20   ;;  %s11170_s20 = sphi %s11258_s20, %s14636_s20   ;;  %s11166_s19 = sphi %s11256_s19, %s14633_s19   ;;  %s11162_s18 = sphi %s11254_s18, %s14635_s18   ;;  %s11158_s17 = sphi %s11252_s17, %s14634_s17  }
   0x8   : > { %s9135_s22 = sadd.s32 4294967294, %s11170_s20   ;;  %s11277_s23 = sadd.s32 1, %s11170_s20  }
   0x9   : > { %s267_s24 = sadd.s32 1, %s11166_s19  ;;  %s264_s25 = ssub.s32 %s11170_s20, %s11277_s23 }
   0xa   : > { %p277_p0 = scmp.ne.s32.totalorder %s11166_s19, %s11162_s18  ;;  %p265_p1 = scmp.eq.s32.totalorder %s264_s25, 0 }
   0xb   : > { %p278_p2 = scmp.eq.s32.totalorder %s11273_s21, 1  ;;  %p283_p3 = scmp.ne.s32.totalorder %s11162_s18, %s11158_s17 }
   0xc   : > { %p284_p4 = scmp.eq.s32.totalorder %s9135_s22, 1  ;;  %p9138_p7 = scmp.ge.s32.totalorder %s11170_s20, 1 }
   0xd   : > { %s11288_s26 = scalar_select %p265_p1, %s11166_s19, %s267_s24  }
   0xe   : > { %p11290_p5 = por %p278_p2, %p277_p0  ;;  %p11294_p6 = por %p284_p4, %p283_p3 }
   0xf   : > { %14616 = sst [smem:[#allocation12_spill]] %s11288_s26  ;;  %p342_p8 = scmp.lt.s32.totalorder %s11170_s20, 3 }
  0x11   : > { %p343_p9 = pnand %p9138_p7, %p342_p8 }
  0x12   : > { %s9140_s29 = sshll.u32 (!%p343_p9), %s11273_s21, 1  ;;  %s14619_s0 = sld [smem:[#allocation13_spill]] (!%p343_p9)  ;;  %v11179_v10 = vmov (!%p343_p9), 0   ;;  %vm446_vm0 = vcmask (!%p343_p9), 1039360   ;;  %vm509_vm1 = vcmask (!%p343_p9), 1031168   ;;  %vm408_vm2 = vcmask (!%p343_p9), 506880  }
  0x13   : > { %346 = sbr.rel (%p343_p9) target bundleno = 3169 (0xc61), region = 64  ;;  %p384_p10 = scmp.lt.s32.totalorder (!%p343_p9), %s9140_s29, 3  ;;  %1821 = vmatprep.mubr.bf16.mxu0 (!%p343_p9), %v11179_v10  ;;  %1864 = vmatprep.mubr.bf16.mxu1 (!%p343_p9), %v11179_v10  ;;  %vm572_vm3 = vcmask (!%p343_p9), 769024   ;;  %vm635_vm4 = vcmask (!%p343_p9), 760832   ;;  %vm698_vm5 = vcmask (!%p343_p9), 752640   ;;  %vm765_vm6 = vcmask (!%p343_p9), 490496  }
  0x14   : > { %s14601_s15 = smov (!%p343_p9), 127   ;;  %s14597_s16 = smov (!%p343_p9), 126   ;;  %10388 = vset.pattern.permute.xlu1 (!%p343_p9), %v11179_v10  ;;  %10389 = vset.pattern.permute.xlu0 (!%p343_p9), %v11179_v10  ;;  %vm833_vm7 = vcmask (!%p343_p9), 482304   ;;  %vm901_vm8 = vcmask (!%p343_p9), 474112   ;;  %vm1734_vm9 = vcmask (!%p343_p9), 1043456   ;;  %vm1730_vm10 = vcmask (!%p343_p9), 588800  }
  0x15   : > { %s14599_s22 = smov (!%p343_p9), 94   ;;  %s14594_s24 = smov (!%p343_p9), 93   ;;  %vm3686_vm11 = vcmask (!%p343_p9), 1044480   ;;  %vm3687_vm12 = vcmask (!%p343_p9), 1045504   ;;  %vm3682_vm13 = vcmask (!%p343_p9), 220160   ;;  %vm11183_vm14 = vmmov (!%p343_p9), 0  }
  0x16   : > { %s14595_s25 = smov (!%p343_p9), 92   ;;  %s14592_s12 = smov (!%p343_p9), 58   ;;  %vm4124_vm15 = vcmask (!%p343_p9), 556032  }
  0x17   : > { %s14620_s1 = sld [smem:[#allocation14_spill]] (!%p343_p9)  ;;  %s14622_s2 = sld [smem:[#allocation15_spill]] (!%p343_p9) }
  0x18   : > { %s14624_s13 = smov (!%p343_p9), 92   ;;  %s14630_s19 = smov (!%p343_p9), 109  }
  0x19   : > { %s380_s26 = sand.u32 (!%p343_p9), 1, %s11162_s18  }
  0x1a   : > { %s14638_s29 = smov (!%p384_p10, %s9140_s29), 3 }
  0x1b   : > { %s10329_s30 = smul.u32 80, %s14638_s29  ;;  %s11177_s29 = smov 60  }
  0x1d   : > { %s11304_s14 = scalar_lea.vmem %s14619_s0, %s10329_s30  ;;  %s11178_s30 = smov 59  }
  0x1e   : > { %v11307_v0 = vld [vmem:[%s11304_s14 + $0x18] sm:$0xff]  ;;  %v11310_v1 = vld [vmem:[%s11304_s14 + $0x8] sm:$0xff]  ;;  %v11313_v2 = vld [vmem:[%s11304_s14 + $0x20] sm:$0xff]  ;;  %s14605_s0 = smov 108  }
  0x1f   : > { %434 = vrot.lane.b32.xlu1 %v11307_v0, %s14601_s15  ;;  %430 = vrot.lane.b32.xlu0 %v11310_v1, %s14601_s15  ;;  %v11320_v3 = vld [vmem:[%s11304_s14 + $0x10] sm:$0xff]  ;;  %v11323_v4 = vld [vmem:[%s11304_s14] sm:$0xff]  ;;  %404 = vst [vmem:[#allocation2 + $0x20] sm:$0xff] %v11313_v2 }
  0x20   : > { %v11327_v5 = vld [vmem:[%s11304_s14 + $0x30] sm:$0xff]  ;;  %v11330_v6 = vld [vmem:[%s11304_s14 + $0x28] sm:$0xff]  ;;  %v11333_v7 = vld [vmem:[%s11304_s14 + $0x38] sm:$0xff] }
  0x21   : > { %405 = vst [vmem:[#allocation2 + $0x28] sm:$0xff] %v11330_v6  ;;  %406 = vst [vmem:[#allocation2 + $0x30] sm:$0xff] %v11327_v5  ;;  %v11351_v8 = vld [vmem:[%s11304_s14 + $0x50] sm:$0xff]  ;;  %v9153_v9 = vld [vmem:[%s11304_s14 + $0x60] sm:$0xff] }
  0x22   : > { %407 = vst [vmem:[#allocation2 + $0x38] sm:$0xff] %v11333_v7  ;;  %939 = vst [vmem:[#allocation2 + $0x48] sm:$0xff] %v11351_v8  ;;  %v11452_v11 = vld [vmem:[%s11304_s14 + $0x40] sm:$0xff]  ;;  %v9158_v20 = vld [vmem:[%s11304_s14 + $0x88] sm:$0xff] }
  0x23   : > { %436 = vrot.lane.b32.xlu1 %v11313_v2, %s14601_s15  ;;  %432 = vrot.lane.b32.xlu0 %v11320_v3, %s14601_s15  ;;  %941 = vst [vmem:[#allocation2 + $0x58] sm:$0xff] %v9153_v9  ;;  %v9157_v14 = vld [vmem:[%s11304_s14 + $0x80] sm:$0xff]  ;;  %946 = vst [vmem:[#allocation2 + $0x80] sm:$0xff] %v9158_v20  ;;  %v11515_v45 = vld [vmem:[%s11304_s14 + $0x58] sm:$0xff] }
  0x24   : > { %945 = vst [vmem:[#allocation2 + $0x78] sm:$0xff] %v9157_v14  ;;  %v399_v34 = vld [vmem:[%s11304_s14 + $0x40] sm:$0xff] }
  0x25   : > { %409 = vst.msk [vmem:[#allocation2 + $0x40] sm:$0xff] %vm408_vm2, %v399_v34  ;;  %v11587_v34 = vld [vmem:[%s11304_s14 + $0x68] sm:$0xff] }
  0x27   : > { %493 = vrot.lane.b32.xlu1 %v11310_v1, %s14597_s16  ;;  %428 = vrot.lane.b32.xlu0 %v11323_v4, %s14601_s15 }
  0x29   : > { %v11092_v59 = vld [vmem:[#allocation2 + $0x48] sm:$0xff] }
  0x2b   : > { %497 = vrot.lane.b32.xlu1 %v11307_v0, %s14597_s16  ;;  %495 = vrot.lane.b32.xlu0 %v11320_v3, %s14597_s16 }
  0x2f   : > { %556 = vrot.lane.b32.xlu1 %v11310_v1, %s14599_s22  ;;  %499 = vrot.lane.b32.xlu0 %v11313_v2, %s14597_s16 }
  0x33   : > { %560 = vrot.lane.b32.xlu1 %v11307_v0, %s14599_s22  ;;  %558 = vrot.lane.b32.xlu0 %v11320_v3, %s14599_s22 }
  0x37   : > { %491 = vrot.lane.b32.xlu1 %v11323_v4, %s14597_s16  ;;  %562 = vrot.lane.b32.xlu0 %v11313_v2, %s14599_s22 }
  0x3b   : > { %619 = vrot.lane.b32.xlu1 %v11310_v1, %s14594_s24  ;;  %554 = vrot.lane.b32.xlu0 %v11323_v4, %s14599_s22 }
  0x3f   : > { %623 = vrot.lane.b32.xlu1 %v11307_v0, %s14594_s24  ;;  %621 = vrot.lane.b32.xlu0 %v11320_v3, %s14594_s24 }
  0x43   : > { %682 = vrot.lane.b32.xlu1 %v11310_v1, %s14595_s25  ;;  %625 = vrot.lane.b32.xlu0 %v11313_v2, %s14594_s24 }
  0x47   : > { %686 = vrot.lane.b32.xlu1 %v11307_v0, %s14595_s25  ;;  %684 = vrot.lane.b32.xlu0 %v11320_v3, %s14595_s25 }
  0x4b   : > { %617 = vrot.lane.b32.xlu1 %v11323_v4, %s14594_s24  ;;  %688 = vrot.lane.b32.xlu0 %v11313_v2, %s14595_s25 }
  0x4f   : > { %747 = vrot.lane.b32.xlu1 %v11310_v1, %s11177_s29  ;;  %680 = vrot.lane.b32.xlu0 %v11323_v4, %s14595_s25 }
  0x53   : > { %751 = vrot.lane.b32.xlu1 %v11307_v0, %s11177_s29  ;;  %749 = vrot.lane.b32.xlu0 %v11320_v3, %s11177_s29 }
  0x57   : > { %815 = vrot.lane.b32.xlu1 %v11310_v1, %s11178_s30  ;;  %753 = vrot.lane.b32.xlu0 %v11313_v2, %s11177_s29 }
  0x5b   : > { %819 = vrot.lane.b32.xlu1 %v11307_v0, %s11178_s30  ;;  %817 = vrot.lane.b32.xlu0 %v11320_v3, %s11178_s30 }
  0x5f   : > { %745 = vrot.lane.b32.xlu1 %v11323_v4, %s11177_s29  ;;  %821 = vrot.lane.b32.xlu0 %v11313_v2, %s11178_s30 }
  0x63   : > { %881 = vrot.lane.b32.xlu1 %v11323_v4, %s14592_s12  ;;  %813 = vrot.lane.b32.xlu0 %v11323_v4, %s11178_s30 }
  0x67   : > { %885 = vrot.lane.b32.xlu1 %v11320_v3, %s14592_s12  ;;  %883 = vrot.lane.b32.xlu0 %v11310_v1, %s14592_s12 }
  0x6b   : > { %889 = vrot.lane.b32.xlu1 %v11313_v2, %s14592_s12  ;;  %887 = vrot.lane.b32.xlu0 %v11307_v0, %s14592_s12 }
  0x6f   : > { %440 = vrot.lane.b32.xlu1 %v11327_v5, %s14601_s15  ;;  %438 = vrot.lane.b32.xlu0 %v11330_v6, %s14601_s15 }
  0x73   : > { %503 = vrot.lane.b32.xlu1 %v11327_v5, %s14597_s16  ;;  %501 = vrot.lane.b32.xlu0 %v11330_v6, %s14597_s16 }
  0x77   : > { %566 = vrot.lane.b32.xlu1 %v11327_v5, %s14599_s22  ;;  %564 = vrot.lane.b32.xlu0 %v11330_v6, %s14599_s22 }
  0x7b   : > { %629 = vrot.lane.b32.xlu1 %v11327_v5, %s14594_s24  ;;  %627 = vrot.lane.b32.xlu0 %v11330_v6, %s14594_s24 }
  0x7f   : > { %692 = vrot.lane.b32.xlu1 %v11327_v5, %s14595_s25  ;;  %690 = vrot.lane.b32.xlu0 %v11330_v6, %s14595_s25 }
  0x83   : > { %757 = vrot.lane.b32.xlu1 %v11327_v5, %s11177_s29  ;;  %755 = vrot.lane.b32.xlu0 %v11330_v6, %s11177_s29 }
  0x87   : > { %825 = vrot.lane.b32.xlu1 %v11327_v5, %s11178_s30  ;;  %823 = vrot.lane.b32.xlu0 %v11330_v6, %s11178_s30 }
  0x8b   : > { %893 = vrot.lane.b32.xlu1 %v11327_v5, %s14592_s12  ;;  %891 = vrot.lane.b32.xlu0 %v11330_v6, %s14592_s12 }
  0x8f   : > { %444 = vrot.lane.b32.xlu1 %v11452_v11, %s14601_s15  ;;  %442 = vrot.lane.b32.xlu0 %v11333_v7, %s14601_s15 }
  0x91   : > { %v435_v12 = vpop.permute.xlu1 %434  ;;  %v431_v13 = vpop.permute.xlu0 %430 }
  0x93   : > { %507 = vrot.lane.b32.xlu1 %v11452_v11, %s14597_s16  ;;  %505 = vrot.lane.b32.xlu0 %v11333_v7, %s14597_s16 }
  0x95   : > { %v11467_v15 = vpop.permute.xlu1 %436  ;;  %v433_v16 = vpop.permute.xlu0 %432 }
  0x96   : > { %v450_v17 = vsel %vm446_vm0, %v435_v12, %v11467_v15  ;;  %v448_v18 = vsel %vm446_vm0, %v431_v13, %v433_v16  ;;  %v449_v19 = vsel %vm446_vm0, %v433_v16, %v435_v12  ;;  %v11557_v12 = vld [vmem:[%s11304_s14 + $0x90] sm:$0xff] }
  0x97   : > { %570 = vrot.lane.b32.xlu1 %v11452_v11, %s14599_s22  ;;  %568 = vrot.lane.b32.xlu0 %v11333_v7, %s14599_s22  ;;  %v1624_v21 = vpack.c.bf16 %v448_v18, %v11310_v1  ;;  %v1626_v22 = vpack.c.bf16 %v450_v17, %v11307_v0  ;;  %v1625_v23 = vpack.c.bf16 %v449_v19, %v11320_v3  ;;  %v802_v18 = vld [vmem:[%s11304_s14 + $0x48] sm:$0xff]  ;;  %v9143_v19 = vld [vmem:[%s11304_s14 + $0x58] sm:$0xff] }
  0x98   : > { %947 = vst.msk [vmem:[#allocation2 + $0x88] sm:$0xff] %vm408_vm2, %v11557_v12  ;;  %940 = vst [vmem:[#allocation2 + $0x50] sm:$0xff] %v9143_v19 }
  0x99   : > { %v494_v24 = vpop.permute.xlu1 %493  ;;  %v429_v25 = vpop.permute.xlu0 %428  ;;  %1789 = vmatprep.subr.bf16.mxu0 %v1624_v21  ;;  %1832 = vmatprep.subr.bf16.mxu1 %v1626_v22 }
  0x9a   : > { %v447_v26 = vsel %vm446_vm0, %v429_v25, %v431_v13  ;;  %1833 = vmatpush1.bf16.msra.mxu1 %v1625_v23 }
  0x9b   : > { %633 = vrot.lane.b32.xlu1 %v11452_v11, %s14594_s24  ;;  %631 = vrot.lane.b32.xlu0 %v11333_v7, %s14594_s24  ;;  %v1623_v27 = vpack.c.bf16 %v447_v26, %v11323_v4 }
  0x9d   : > { %v498_v28 = vpop.permute.xlu1 %497  ;;  %v496_v29 = vpop.permute.xlu0 %495  ;;  %1790 = vmatpush1.bf16.msra.mxu0 %v1623_v27 }
  0x9e   : > { %v511_v30 = vsel %vm509_vm1, %v494_v24, %v496_v29  ;;  %v512_v31 = vsel %vm509_vm1, %v496_v29, %v498_v28 }
  0x9f   : > { %696 = vrot.lane.b32.xlu1 %v11452_v11, %s14595_s25  ;;  %694 = vrot.lane.b32.xlu0 %v11333_v7, %s14595_s25 }
  0xa1   : > { %v557_v32 = vpop.permute.xlu1 %556  ;;  %v11493_v33 = vpop.permute.xlu0 %499 }
  0xa2   : > { %v513_v35 = vsel %vm509_vm1, %v498_v28, %v11493_v33 }
  0xa3   : > { %761 = vrot.lane.b32.xlu1 %v11452_v11, %s11177_s29  ;;  %759 = vrot.lane.b32.xlu0 %v11333_v7, %s11177_s29 }
  0xa5   : > { %v561_v36 = vpop.permute.xlu1 %560  ;;  %v559_v37 = vpop.permute.xlu0 %558 }
  0xa6   : > { %v574_v38 = vsel %vm572_vm3, %v557_v32, %v559_v37  ;;  %v575_v39 = vsel %vm572_vm3, %v559_v37, %v561_v36 }
  0xa7   : > { %829 = vrot.lane.b32.xlu1 %v11452_v11, %s11178_s30  ;;  %827 = vrot.lane.b32.xlu0 %v11333_v7, %s11178_s30  ;;  %v1642_v40 = vpack.c.bf16 %v574_v38, %v511_v30  ;;  %v1643_v47 = vpack.c.bf16 %v575_v39, %v512_v31 }
  0xa9   : > { %v492_v41 = vpop.permute.xlu1 %491  ;;  %v11509_v42 = vpop.permute.xlu0 %562  ;;  %1791 = vmatprep.subr.bf16.mxu0 %v1642_v40 }
  0xaa   : > { %v510_v43 = vsel %vm509_vm1, %v492_v41, %v494_v24  ;;  %v576_v44 = vsel %vm572_vm3, %v561_v36, %v11509_v42  ;;  %v11597_v41 = vld [vmem:[%s11304_s14 + $0x78] sm:$0xff] }
  0xab   : > { %897 = vrot.lane.b32.xlu1 %v11452_v11, %s14592_s12  ;;  %895 = vrot.lane.b32.xlu0 %v11333_v7, %s14592_s12  ;;  %v1644_v46 = vpack.c.bf16 %v576_v44, %v513_v35  ;;  %v11589_v35 = vld [vmem:[#allocation2 + $0x58] sm:$0xff] }
  0xad   : > { %v620_v48 = vpop.permute.xlu1 %619  ;;  %v555_v49 = vpop.permute.xlu0 %554  ;;  %1834 = vmatprep.subr.bf16.mxu1 %v1644_v46 }
  0xae   : > { %v573_v50 = vsel %vm572_vm3, %v555_v49, %v557_v32  ;;  %1835 = vmatpush1.bf16.msra.mxu1 %v1643_v47  ;;  %v11584_v32 = vld [vmem:[%s11304_s14 + $0x70] sm:$0xff] }
  0xaf   : > { %968 = vrot.lane.b32.xlu1 %v11515_v45, %s14601_s15  ;;  %966 = vrot.lane.b32.xlu0 %v11351_v8, %s14601_s15  ;;  %v1641_v51 = vpack.c.bf16 %v573_v50, %v510_v43  ;;  %v11612_v50 = vld [vmem:[%s14620_s1] sm:$0xff]  }
  0xb1   : > { %v624_v52 = vpop.permute.xlu1 %623  ;;  %v622_v53 = vpop.permute.xlu0 %621  ;;  %1792 = vmatpush1.bf16.msra.mxu0 %v1641_v51 }
  0xb2   : > { %v637_v54 = vsel %vm635_vm4, %v620_v48, %v622_v53  ;;  %v638_v55 = vsel %vm635_vm4, %v622_v53, %v624_v52 }
  0xb3   : > { %1030 = vrot.lane.b32.xlu1 %v11515_v45, %s14597_s16  ;;  %1028 = vrot.lane.b32.xlu0 %v11351_v8, %s14597_s16 }
  0xb5   : > { %v683_v56 = vpop.permute.xlu1 %682  ;;  %v11532_v57 = vpop.permute.xlu0 %625 }
  0xb6   : > { %v639_v58 = vsel %vm635_vm4, %v624_v52, %v11532_v57 }
  0xb7   : > { %1092 = vrot.lane.b32.xlu1 %v11515_v45, %s14599_s22  ;;  %1090 = vrot.lane.b32.xlu0 %v11092_v59, %s14599_s22 }
  0xb9   : > { %v687_v60 = vpop.permute.xlu1 %686  ;;  %v685_v61 = vpop.permute.xlu0 %684 }
  0xba   : > { %v700_v62 = vsel %vm698_vm5, %v683_v56, %v685_v61  ;;  %v701_v63 = vsel %vm698_vm5, %v685_v61, %v687_v60 }
  0xbb   : > { %1154 = vrot.lane.b32.xlu1 %v11515_v45, %s14594_s24  ;;  %1152 = vrot.lane.b32.xlu0 %v11092_v59, %s14594_s24  ;;  %v1660_v0 = vpack.c.bf16 %v700_v62, %v637_v54  ;;  %v1661_v6 = vpack.c.bf16 %v701_v63, %v638_v55 }
  0xbd   : > { %v618_v1 = vpop.permute.xlu1 %617  ;;  %v11544_v2 = vpop.permute.xlu0 %688  ;;  %1793 = vmatprep.subr.bf16.mxu0 %v1660_v0  ;;  %v11094_v0 = vld [vmem:[#allocation2 + $0x28] sm:$0xff] }
  0xbe   : > { %v636_v3 = vsel %vm635_vm4, %v618_v1, %v620_v48  ;;  %v702_v4 = vsel %vm698_vm5, %v687_v60, %v11544_v2 }
  0xbf   : > { %1216 = vrot.lane.b32.xlu1 %v11515_v45, %s14595_s25  ;;  %1214 = vrot.lane.b32.xlu0 %v11092_v59, %s14595_s25  ;;  %v1662_v5 = vpack.c.bf16 %v702_v4, %v639_v58 }
  0xc1   : > { %v748_v7 = vpop.permute.xlu1 %747  ;;  %v681_v8 = vpop.permute.xlu0 %680  ;;  %1836 = vmatprep.subr.bf16.mxu1 %v1662_v5 }
  0xc2   : > { %v699_v9 = vsel %vm698_vm5, %v681_v8, %v683_v56  ;;  %1837 = vmatpush1.bf16.msra.mxu1 %v1661_v6  ;;  %v9146_v6 = vld [vmem:[%s11304_s14 + $0x70] sm:$0xff] }
  0xc3   : > { %1280 = vrot.lane.b32.xlu1 %v11515_v45, %s11177_s29  ;;  %1278 = vrot.lane.b32.xlu0 %v11092_v59, %s11177_s29  ;;  %v1659_v11 = vpack.c.bf16 %v699_v9, %v636_v3  ;;  %v11095_v3 = vld [vmem:[#allocation2 + $0x20] sm:$0xff]  ;;  %943 = vst [vmem:[#allocation2 + $0x68] sm:$0xff] %v9146_v6  ;;  %v9145_v9 = vld [vmem:[%s11304_s14 + $0x68] sm:$0xff] }
  0xc4   : > { %942 = vst [vmem:[#allocation2 + $0x60] sm:$0xff] %v9145_v9 }
  0xc5   : > { %v752_v13 = vpop.permute.xlu1 %751  ;;  %v750_v14 = vpop.permute.xlu0 %749  ;;  %1794 = vmatpush1.bf16.msra.mxu0 %v1659_v11 }
  0xc6   : > { %v767_v16 = vsel %vm765_vm6, %v748_v7, %v750_v14  ;;  %v768_v17 = vsel %vm765_vm6, %v750_v14, %v752_v13 }
  0xc7   : > { %1347 = vrot.lane.b32.xlu1 %v11515_v45, %s11178_s30  ;;  %1345 = vrot.lane.b32.xlu0 %v11092_v59, %s11178_s30 }
  0xc9   : > { %v816_v20 = vpop.permute.xlu1 %815  ;;  %v11568_v21 = vpop.permute.xlu0 %753 }
  0xca   : > { %v769_v22 = vsel %vm765_vm6, %v752_v13, %v11568_v21 }
  0xcb   : > { %831 = vrot.lane.b32.xlu1 %v802_v18, %s11178_s30  ;;  %763 = vrot.lane.b32.xlu0 %v802_v18, %s11177_s29 }
  0xcd   : > { %v820_v23 = vpop.permute.xlu1 %819  ;;  %v818_v24 = vpop.permute.xlu0 %817 }
  0xce   : > { %v835_v25 = vsel %vm833_vm7, %v816_v20, %v818_v24  ;;  %v836_v26 = vsel %vm833_vm7, %v818_v24, %v820_v23 }
  0xcf   : > { %1412 = vrot.lane.b32.xlu1 %v11092_v59, %s14592_s12  ;;  %899 = vrot.lane.b32.xlu0 %v802_v18, %s14592_s12  ;;  %v1678_v27 = vpack.c.bf16 %v835_v25, %v767_v16  ;;  %v1679_v37 = vpack.c.bf16 %v836_v26, %v768_v17 }
  0xd1   : > { %v746_v28 = vpop.permute.xlu1 %745  ;;  %v11578_v29 = vpop.permute.xlu0 %821  ;;  %1795 = vmatprep.subr.bf16.mxu0 %v1678_v27 }
  0xd2   : > { %v766_v30 = vsel %vm765_vm6, %v746_v28, %v748_v7  ;;  %v837_v31 = vsel %vm833_vm7, %v820_v23, %v11578_v29 }
  0xd3   : > { %970 = vrot.lane.b32.xlu1 %v11589_v35, %s14601_s15  ;;  %1414 = vrot.lane.b32.xlu0 %v11515_v45, %s14592_s12  ;;  %v1680_v36 = vpack.c.bf16 %v837_v31, %v769_v22  ;;  %s14621_s12 = smov 58  }
  0xd5   : > { %v882_v38 = vpop.permute.xlu1 %881  ;;  %v814_v39 = vpop.permute.xlu0 %813  ;;  %1838 = vmatprep.subr.bf16.mxu1 %v1680_v36 }
  0xd6   : > { %v834_v40 = vsel %vm833_vm7, %v814_v39, %v816_v20  ;;  %1839 = vmatpush1.bf16.msra.mxu1 %v1679_v37 }
  0xd7   : > { %974 = vrot.lane.b32.xlu1 %v11584_v32, %s14601_s15  ;;  %972 = vrot.lane.b32.xlu0 %v11587_v34, %s14601_s15  ;;  %v1677_v43 = vpack.c.bf16 %v834_v40, %v766_v30 }
  0xd9   : > { %v886_v44 = vpop.permute.xlu1 %885  ;;  %v884_v45 = vpop.permute.xlu0 %883  ;;  %1796 = vmatpush1.bf16.msra.mxu0 %v1677_v43 }
  0xda   : > { %v902_v46 = vsel %vm901_vm8, %v882_v38, %v884_v45  ;;  %v903_v47 = vsel %vm901_vm8, %v884_v45, %v886_v44 }
  0xdb   : > { %1032 = vrot.lane.b32.xlu1 %v11589_v35, %s14597_s16  ;;  %976 = vrot.lane.b32.xlu0 %v11597_v41, %s14601_s15  ;;  %v1696_v48 = vpack.c.bf16 %v903_v47, %v903_v47  ;;  %v1695_v49 = vpack.c.bf16 %v902_v46, %v902_v46 }
  0xdd   : > { %v11614_v51 = vpop.permute.xlu1 %889  ;;  %v888_v52 = vpop.permute.xlu0 %887  ;;  %9227 = vmatprep.subr.msk.bf16.mxu0 %vm1734_vm9, %v1696_v48  ;;  %v1736_v53 = vsel %vm1734_vm9, %v1695_v49, 0 }
  0xde   : > { %v904_v54 = vsel %vm901_vm8, %v886_v44, %v888_v52  ;;  %v905_v55 = vsel %vm901_vm8, %v888_v52, %v11614_v51  ;;  %1798 = vmatpush1.bf16.msra.mxu0 %v1736_v53  ;;  %v11096_v53 = vld [vmem:[#allocation2 + $0x38] sm:$0xff] }
  0xdf   : > { %1094 = vrot.lane.b32.xlu1 %v11589_v35, %s14599_s22  ;;  %1034 = vrot.lane.b32.xlu0 %v11587_v34, %s14597_s16  ;;  %v1698_v56 = vpack.c.bf16 %v905_v55, %v905_v55  ;;  %v1697_v58 = vpack.c.bf16 %v904_v54, %v904_v54  ;;  %v11097_v55 = vld [vmem:[#allocation2 + $0x30] sm:$0xff] }
  0xe1   : > { %v11625_v59 = vpop.permute.xlu1 %440  ;;  %v439_v60 = vpop.permute.xlu0 %438  ;;  %9228 = vmatmul.mubr.msk.bf16.vlgmr.msra.gmra.mrb[0].mxu0 %vm1730_vm10, %v11612_v50  ;;  %9229 = vmatprep.subr.msk.bf16.mxu1 %vm1734_vm9, %v1698_v56  ;;  %v1742_v61 = vsel %vm1734_vm9, %v1697_v58, 0 }
  0xe2   : > { %v451_v62 = vsel %vm446_vm0, %v11467_v15, %v439_v60  ;;  %v452_v63 = vsel %vm446_vm0, %v439_v60, %v11625_v59  ;;  %1841 = vmatpush1.bf16.msra.mxu1 %v1742_v61  ;;  %1907 = vmatprep.mubr.bf16.mxu0 %v11179_v10 }
  0xe3   : > { %1036 = vrot.lane.b32.xlu1 %v11584_v32, %s14597_s16  ;;  %1096 = vrot.lane.b32.xlu0 %v11587_v34, %s14599_s22  ;;  %v1628_v1 = vpack.c.bf16 %v452_v63, %v11094_v0  ;;  %v1627_v4 = vpack.c.bf16 %v451_v62, %v11095_v3  ;;  %v9147_v62 = vld [vmem:[%s11304_s14 + $0x78] sm:$0xff] }
  0xe4   : > { %944 = vst [vmem:[#allocation2 + $0x70] sm:$0xff] %v9147_v62 }
  0xe5   : > { %v11640_v5 = vpop.permute.xlu1 %503  ;;  %v502_v15 = vpop.permute.xlu0 %501  ;;  %9230 = vmatmul.mubr.msk.bf16.vlgmr.msra.gmra.mrb[0].mxu1 %vm1730_vm10, %v11612_v50  ;;  %1875 = vmatprep.subr.bf16.mxu0 %v1628_v1 }
  0xe6   : > { %v514_v7 = vsel %vm509_vm1, %v11493_v33, %v502_v15  ;;  %v515_v8 = vsel %vm509_vm1, %v502_v15, %v11640_v5  ;;  %1876 = vmatpush1.bf16.msra.mxu0 %v1627_v4  ;;  %1950 = vmatprep.mubr.bf16.mxu1 %v11179_v10 }
  0xe7   : > { %1098 = vrot.lane.b32.xlu1 %v11584_v32, %s14599_s22  ;;  %1038 = vrot.lane.b32.xlu0 %v11597_v41, %s14597_s16 }
  0xe9   : > { %v11655_v11 = vpop.permute.xlu1 %566  ;;  %v565_v13 = vpop.permute.xlu0 %564 }
  0xea   : > { %v577_v33 = vsel %vm572_vm3, %v11509_v42, %v565_v13  ;;  %v578_v14 = vsel %vm572_vm3, %v565_v13, %v11655_v11 }
  0xeb   : > { %1156 = vrot.lane.b32.xlu1 %v11589_v35, %s14594_s24  ;;  %1100 = vrot.lane.b32.xlu0 %v11597_v41, %s14599_s22  ;;  %v1646_v16 = vpack.c.bf16 %v578_v14, %v515_v8  ;;  %v1645_v17 = vpack.c.bf16 %v577_v33, %v514_v7  ;;  %v11757_v33 = vld [vmem:[#allocation2 + $0x78] sm:$0xff] }
  0xed   : > { %v11665_v18 = vpop.permute.xlu1 %629  ;;  %v628_v19 = vpop.permute.xlu0 %627  ;;  %1877 = vmatprep.subr.bf16.mxu0 %v1646_v16 }
  0xee   : > { %v640_v20 = vsel %vm635_vm4, %v11532_v57, %v628_v19  ;;  %v641_v42 = vsel %vm635_vm4, %v628_v19, %v11665_v18  ;;  %1878 = vmatpush1.bf16.msra.mxu0 %v1645_v17  ;;  %v11771_v19 = vld [vmem:[#allocation2 + $0x80] sm:$0xff] }
  0xef   : > { %1218 = vrot.lane.b32.xlu1 %v11589_v35, %s14595_s25  ;;  %1158 = vrot.lane.b32.xlu0 %v11587_v34, %s14594_s24 }
  0xf1   : > { %v11675_v22 = vpop.permute.xlu1 %692  ;;  %v691_v23 = vpop.permute.xlu0 %690 }
  0xf2   : > { %v703_v24 = vsel %vm698_vm5, %v11544_v2, %v691_v23  ;;  %v704_v25 = vsel %vm698_vm5, %v691_v23, %v11675_v22 }
  0xf3   : > { %1160 = vrot.lane.b32.xlu1 %v11584_v32, %s14594_s24  ;;  %1220 = vrot.lane.b32.xlu0 %v11587_v34, %s14595_s25  ;;  %v1664_v57 = vpack.c.bf16 %v704_v25, %v641_v42  ;;  %v1663_v26 = vpack.c.bf16 %v703_v24, %v640_v20 }
  0xf5   : > { %v11685_v27 = vpop.permute.xlu1 %757  ;;  %v756_v28 = vpop.permute.xlu0 %755  ;;  %1879 = vmatprep.subr.bf16.mxu0 %v1664_v57 }
  0xf6   : > { %v770_v30 = vsel %vm765_vm6, %v11568_v21, %v756_v28  ;;  %v771_v2 = vsel %vm765_vm6, %v756_v28, %v11685_v27  ;;  %1880 = vmatpush1.bf16.msra.mxu0 %v1663_v26  ;;  %v1469_v26 = vld [vmem:[#allocation2 + $0x40] sm:$0xff] }
  0xf7   : > { %1222 = vrot.lane.b32.xlu1 %v11584_v32, %s14595_s25  ;;  %1162 = vrot.lane.b32.xlu0 %v11597_v41, %s14594_s24 }
  0xf9   : > { %v11695_v31 = vpop.permute.xlu1 %825  ;;  %v824_v36 = vpop.permute.xlu0 %823 }
  0xfa   : > { %v838_v37 = vsel %vm833_vm7, %v11578_v29, %v824_v36  ;;  %v839_v38 = vsel %vm833_vm7, %v824_v36, %v11695_v31 }
  0xfb   : > { %1282 = vrot.lane.b32.xlu1 %v11589_v35, %s11177_s29  ;;  %1224 = vrot.lane.b32.xlu0 %v11597_v41, %s14595_s25  ;;  %v1682_v21 = vpack.c.bf16 %v839_v38, %v771_v2  ;;  %v1681_v39 = vpack.c.bf16 %v838_v37, %v770_v30 }
  0xfd   : > { %v11705_v40 = vpop.permute.xlu1 %893  ;;  %v892_v43 = vpop.permute.xlu0 %891  ;;  %1881 = vmatprep.subr.bf16.mxu0 %v1682_v21 }
  0xfe   : > { %v906_v44 = vsel %vm901_vm8, %v11614_v51, %v892_v43  ;;  %v907_v29 = vsel %vm901_vm8, %v892_v43, %v11705_v40  ;;  %1882 = vmatpush1.bf16.msra.mxu0 %v1681_v39 }
  0xff   : > { %1349 = vrot.lane.b32.xlu1 %v11589_v35, %s11178_s30  ;;  %1284 = vrot.lane.b32.xlu0 %v11587_v34, %s11177_s29  ;;  %v1700_v45 = vpack.c.bf16 %v907_v29, %v907_v29  ;;  %v1699_v46 = vpack.c.bf16 %v906_v44, %v906_v44 }
 0x101   : > { %v445_v47 = vpop.permute.xlu1 %444  ;;  %v443_v48 = vpop.permute.xlu0 %442  ;;  %9231 = vmatprep.subr.msk.bf16.mxu0 %vm1734_vm9, %v1700_v45  ;;  %v1748_v49 = vsel %vm1734_vm9, %v1699_v46, 0 }
 0x102   : > { %472 = vst.msk [vmem:[#allocation2 + $0xd0] sm:$0xff] %vm408_vm2, %v445_v47  ;;  %v453_v51 = vsel %vm446_vm0, %v11625_v59, %v443_v48  ;;  %v454_v52 = vsel %vm446_vm0, %v443_v48, %v445_v47  ;;  %1884 = vmatpush1.bf16.msra.mxu0 %v1748_v49 }
 0x103   : > { %1286 = vrot.lane.b32.xlu1 %v11584_v32, %s11177_s29  ;;  %1351 = vrot.lane.b32.xlu0 %v11587_v34, %s11178_s30  ;;  %v1630_v54 = vpack.c.bf16 %v454_v52, %v11096_v53  ;;  %v1629_v56 = vpack.c.bf16 %v453_v51, %v11097_v55  ;;  %v1713_v51 = vld [vmem:[%s14622_s2] sm:$0xff] }
 0x105   : > { %v508_v58 = vpop.permute.xlu1 %507  ;;  %v506_v60 = vpop.permute.xlu0 %505  ;;  %9232 = vmatmul.mubr.msk.bf16.vlgmr.msra.gmra.mrb[4].mxu0 %vm1730_vm10, %v11612_v50  ;;  %1918 = vmatprep.subr.bf16.mxu1 %v1630_v54 }
 0x106   : > { %535 = vst.msk [vmem:[#allocation2 + $0x160] sm:$0xff] %vm408_vm2, %v508_v58  ;;  %v516_v59 = vsel %vm509_vm1, %v11640_v5, %v506_v60  ;;  %v517_v61 = vsel %vm509_vm1, %v506_v60, %v508_v58  ;;  %1919 = vmatpush1.bf16.msra.mxu1 %v1629_v56  ;;  %1993 = vmatprep.mubr.bf16.mxu0 %v11179_v10 }
 0x107   : > { %1353 = vrot.lane.b32.xlu1 %v11584_v32, %s11178_s30  ;;  %1288 = vrot.lane.b32.xlu0 %v11597_v41, %s11177_s29 }
 0x109   : > { %v571_v63 = vpop.permute.xlu1 %570  ;;  %v569_v0 = vpop.permute.xlu0 %568 }
 0x10a   : > { %598 = vst.msk [vmem:[#allocation2 + $0x1f0] sm:$0xff] %vm408_vm2, %v571_v63  ;;  %v579_v1 = vsel %vm572_vm3, %v11655_v11, %v569_v0  ;;  %v580_v3 = vsel %vm572_vm3, %v569_v0, %v571_v63 }
 0x10b   : > { %1416 = vrot.lane.b32.xlu1 %v11589_v35, %s14621_s12  ;;  %1355 = vrot.lane.b32.xlu0 %v11597_v41, %s11178_s30  ;;  %v1648_v4 = vpack.c.bf16 %v580_v3, %v517_v61  ;;  %v1647_v5 = vpack.c.bf16 %v579_v1, %v516_v59  ;;  %v1714_v59 = vld [vmem:[%s14622_s2 + $0x8] sm:$0xff]  ;;  %s9139_s2 = sshll.u32 %s380_s26, 1 }
 0x10d   : > { %v634_v15 = vpop.permute.xlu1 %633  ;;  %v632_v6 = vpop.permute.xlu0 %631  ;;  %1920 = vmatprep.subr.bf16.mxu1 %v1648_v4  ;;  %v1505_v45 = vld [vmem:[#allocation2 + $0x160] sm:$0xff] }
 0x10e   : > { %661 = vst.msk [vmem:[#allocation2 + $0x280] sm:$0xff] %vm408_vm2, %v634_v15  ;;  %v642_v7 = vsel %vm635_vm4, %v11665_v18, %v632_v6  ;;  %v643_v8 = vsel %vm635_vm4, %v632_v6, %v634_v15  ;;  %1921 = vmatpush1.bf16.msra.mxu1 %v1647_v5 }
 0x10f   : > { %1420 = vrot.lane.b32.xlu1 %v11584_v32, %s14621_s12  ;;  %1418 = vrot.lane.b32.xlu0 %v11587_v34, %s14621_s12 }
 0x111   : > { %v697_v35 = vpop.permute.xlu1 %696  ;;  %v695_v9 = vpop.permute.xlu0 %694  ;;  %v1523_v47 = vld [vmem:[#allocation2 + $0x1f0] sm:$0xff] }
 0x112   : > { %724 = vst.msk [vmem:[#allocation2 + $0x310] sm:$0xff] %vm408_vm2, %v697_v35  ;;  %v705_v11 = vsel %vm698_vm5, %v11675_v22, %v695_v9  ;;  %v706_v13 = vsel %vm698_vm5, %v695_v9, %v697_v35  ;;  %v1649_v52 = vpack.c.bf16 %v1523_v47, %v1505_v45 }
 0x113   : > { %978 = vrot.lane.b32.xlu1 %v11757_v33, %s14601_s15  ;;  %1422 = vrot.lane.b32.xlu0 %v11597_v41, %s14621_s12  ;;  %v1666_v32 = vpack.c.bf16 %v706_v13, %v643_v8  ;;  %v1665_v14 = vpack.c.bf16 %v705_v11, %v642_v7 }
 0x115   : > { %v11763_v34 = vpop.permute.xlu1 %761  ;;  %v760_v16 = vpop.permute.xlu0 %759  ;;  %1922 = vmatprep.subr.bf16.mxu1 %v1666_v32  ;;  %v1541_v56 = vld [vmem:[#allocation2 + $0x280] sm:$0xff]  ;;  %v9205_v32 = vld [vmem:[%s11304_s14 + $0x98] sm:$0xff]  ;;  %s14609_s14 = smov 109  }
 0x116   : > { %v772_v17 = vsel %vm765_vm6, %v11685_v27, %v760_v16  ;;  %v773_v18 = vsel %vm765_vm6, %v760_v16, %v11763_v34  ;;  %1923 = vmatpush1.bf16.msra.mxu1 %v1665_v14 }
 0x117   : > { %1040 = vrot.lane.b32.xlu1 %v11757_v33, %s14597_s16  ;;  %980 = vrot.lane.b32.xlu0 %v11771_v19, %s14601_s15 }
 0x119   : > { %v11775_v41 = vpop.permute.xlu1 %829  ;;  %v828_v20 = vpop.permute.xlu0 %827  ;;  %v1559_v58 = vld [vmem:[#allocation2 + $0x310] sm:$0xff] }
 0x11a   : > { %v840_v42 = vsel %vm833_vm7, %v11695_v31, %v828_v20  ;;  %v841_v22 = vsel %vm833_vm7, %v828_v20, %v11775_v41  ;;  %v1487_v31 = vld [vmem:[#allocation2 + $0xd0] sm:$0xff]  ;;  %v1667_v0 = vpack.c.bf16 %v1559_v58, %v1541_v56 }
 0x11b   : > { %1102 = vrot.lane.b32.xlu1 %v11757_v33, %s14599_s22  ;;  %1042 = vrot.lane.b32.xlu0 %v11771_v19, %s14597_s16  ;;  %v1684_v23 = vpack.c.bf16 %v841_v22, %v773_v18  ;;  %v1683_v24 = vpack.c.bf16 %v840_v42, %v772_v17  ;;  %v1631_v39 = vpack.c.bf16 %v1487_v31, %v1469_v26  ;;  %v11102_v31 = vld [vmem:[#allocation2 + $0x50] sm:$0xff] }
 0x11d   : > { %v11785_v25 = vpop.permute.xlu1 %897  ;;  %v896_v57 = vpop.permute.xlu0 %895  ;;  %1924 = vmatprep.subr.bf16.mxu1 %v1684_v23 }
 0x11e   : > { %v908_v27 = vsel %vm901_vm8, %v11705_v40, %v896_v57  ;;  %v909_v28 = vsel %vm901_vm8, %v896_v57, %v11785_v25  ;;  %1925 = vmatpush1.bf16.msra.mxu1 %v1683_v24  ;;  %v11100_v40 = vld [vmem:[#allocation2 + $0x48] sm:$0xff] }
 0x11f   : > { %1164 = vrot.lane.b32.xlu1 %v11757_v33, %s14594_s24  ;;  %1104 = vrot.lane.b32.xlu0 %v11771_v19, %s14599_s22  ;;  %v1702_v30 = vpack.c.bf16 %v909_v28, %v909_v28  ;;  %v1701_v2 = vpack.c.bf16 %v908_v27, %v908_v27 }
 0x121   : > { %v11795_v36 = vpop.permute.xlu1 %968  ;;  %v967_v37 = vpop.permute.xlu0 %966  ;;  %9233 = vmatprep.subr.msk.bf16.mxu1 %vm1734_vm9, %v1702_v30  ;;  %v1754_v38 = vsel %vm1734_vm9, %v1701_v2, 0  ;;  %v11101_v30 = vld [vmem:[#allocation2 + $0x58] sm:$0xff] }
 0x122   : > { %v984_v21 = vsel %vm446_vm0, %v967_v37, %v11795_v36  ;;  %1927 = vmatpush1.bf16.msra.mxu1 %v1754_v38 }
 0x123   : > { %1226 = vrot.lane.b32.xlu1 %v11757_v33, %s14595_s25  ;;  %1166 = vrot.lane.b32.xlu0 %v11771_v19, %s14594_s24  ;;  %v1632_v43 = vpack.c.bf16 %v984_v21, %v11100_v40 }
 0x125   : > { %v11805_v44 = vpop.permute.xlu1 %1030  ;;  %v1029_v29 = vpop.permute.xlu0 %1028  ;;  %9234 = vmatmul.mubr.msk.bf16.vlgmr.msra.gmra.mrb[4].mxu1 %vm1730_vm10, %v11612_v50  ;;  %1961 = vmatprep.subr.bf16.mxu0 %v1632_v43  ;;  %v11103_v43 = vld [vmem:[#allocation2 + $0x60] sm:$0xff] }
 0x126   : > { %v1046_v46 = vsel %vm509_vm1, %v1029_v29, %v11805_v44  ;;  %1962 = vmatpush1.bf16.msra.mxu0 %v1631_v39  ;;  %2036 = vmatprep.mubr.bf16.mxu1 %v11179_v10  ;;  %v11104_v29 = vld [vmem:[#allocation2 + $0x68] sm:$0xff] }
 0x127   : > { %1290 = vrot.lane.b32.xlu1 %v11757_v33, %s11177_s29  ;;  %1228 = vrot.lane.b32.xlu0 %v11771_v19, %s14595_s25  ;;  %s14623_s25 = smov 93  }
 0x129   : > { %v11816_v48 = vpop.permute.xlu1 %1092  ;;  %v1091_v49 = vpop.permute.xlu0 %1090 }
 0x12a   : > { %v1108_v50 = vsel %vm572_vm3, %v1091_v49, %v11816_v48  ;;  %v11900_v49 = vld [vmem:[%s14620_s1] sm:$0xff]   ;;  %s14628_s1 = smov 110  }
 0x12b   : > { %1357 = vrot.lane.b32.xlu1 %v11757_v33, %s11178_s30  ;;  %1292 = vrot.lane.b32.xlu0 %v11771_v19, %s11177_s29  ;;  %v1650_v53 = vpack.c.bf16 %v1108_v50, %v1046_v46 }
 0x12d   : > { %v11827_v54 = vpop.permute.xlu1 %1154  ;;  %v1153_v55 = vpop.permute.xlu0 %1152  ;;  %1963 = vmatprep.subr.bf16.mxu0 %v1650_v53 }
 0x12e   : > { %v1170_v60 = vsel %vm635_vm4, %v1153_v55, %v11827_v54  ;;  %1964 = vmatpush1.bf16.msra.mxu0 %v1649_v52 }
 0x12f   : > { %1717 = vperm.xlu1 %10388, %v1713_v51   ;;  %1359 = vrot.lane.b32.xlu0 %v11771_v19, %s11178_s30 }
 0x131   : > { %v11836_v61 = vpop.permute.xlu1 %1216  ;;  %v1215_v62 = vpop.permute.xlu0 %1214 }
 0x132   : > { %v1232_v63 = vsel %vm698_vm5, %v1215_v62, %v11836_v61 }
 0x133   : > { %1722 = vperm.xlu0 %10389, %v1714_v59   ;;  %v1668_v1 = vpack.c.bf16 %v1232_v63, %v1170_v60  ;;  %1424 = vrot.lane.b32.xlu1 %v11757_v33, %s14621_s12 }
 0x135   : > { %v11842_v3 = vpop.permute.xlu1 %1280  ;;  %v1279_v4 = vpop.permute.xlu0 %1278  ;;  %1965 = vmatprep.subr.bf16.mxu0 %v1668_v1 }
 0x136   : > { %v1298_v5 = vsel %vm765_vm6, %v1279_v4, %v11842_v3  ;;  %1966 = vmatpush1.bf16.msra.mxu0 %v1667_v0 }
 0x137   : > { %1426 = vrot.lane.b32.xlu1 %v11771_v19, %s14621_s12  ;;  %982 = vrot.lane.b32.xlu0 %v11557_v12, %s14601_s15 }
 0x139   : > { %v11850_v15 = vpop.permute.xlu1 %1347  ;;  %v1346_v6 = vpop.permute.xlu0 %1345 }
 0x13a   : > { %v1365_v7 = vsel %vm833_vm7, %v1346_v6, %v11850_v15 }
 0x13b   : > { %1044 = vrot.lane.b32.xlu1 %v11557_v12, %s14597_s16  ;;  %1106 = vrot.lane.b32.xlu0 %v11557_v12, %s14599_s22  ;;  %v1686_v8 = vpack.c.bf16 %v1365_v7, %v1298_v5  ;;  %s14627_s16 = smov 126   ;;  %s14603_s22 = smov 110  }
 0x13d   : > { %v832_v35 = vpop.permute.xlu1 %831  ;;  %v764_v9 = vpop.permute.xlu0 %763  ;;  %1967 = vmatprep.subr.bf16.mxu0 %v1686_v8 }
 0x13e   : > { %v842_v11 = vsel %vm833_vm7, %v11775_v41, %v832_v35  ;;  %v774_v13 = vsel %vm765_vm6, %v11763_v34, %v764_v9 }
 0x13f   : > { %860 = vst.msk [vmem:[#allocation2 + $0x430] sm:$0xff] %vm408_vm2, %v842_v11  ;;  %792 = vst.msk [vmem:[#allocation2 + $0x3a0] sm:$0xff] %vm408_vm2, %v774_v13  ;;  %1168 = vrot.lane.b32.xlu1 %v11557_v12, %s14623_s25  ;;  %1230 = vrot.lane.b32.xlu0 %v11557_v12, %s14624_s13  ;;  %s14629_s25 = smov 108  }
 0x141   : > { %v1413_v14 = vpop.permute.xlu1 %1412  ;;  %v900_v16 = vpop.permute.xlu0 %899 }
 0x142   : > { %v910_v17 = vsel %vm901_vm8, %v11785_v25, %v900_v16 }
 0x143   : > { %928 = vst.msk [vmem:[#allocation2 + $0x4c0] sm:$0xff] %vm408_vm2, %v910_v17  ;;  %1294 = vrot.lane.b32.xlu1 %v11557_v12, %s11177_s29  ;;  %1296 = vrot.lane.b32.xlu0 %v9205_v32, %s11177_s29  ;;  %s14631_s29 = smov 91  }
 0x145   : > { %v971_v34 = vpop.permute.xlu1 %970  ;;  %v11875_v18 = vpop.permute.xlu0 %1414 }
 0x146   : > { %v985_v19 = vsel %vm446_vm0, %v11795_v36, %v971_v34  ;;  %v1432_v41 = vsel %vm901_vm8, %v1413_v14, %v11875_v18  ;;  %v1577_v20 = vld [vmem:[#allocation2 + $0x3a0] sm:$0xff]  ;;  %v1595_v42 = vld [vmem:[#allocation2 + $0x430] sm:$0xff] }
 0x147   : > { %v1685_v22 = vpack.c.bf16 %v1595_v42, %v1577_v20  ;;  %v1704_v23 = vpack.c.bf16 %v1432_v41, %v1432_v41  ;;  %1361 = vrot.lane.b32.xlu1 %v11557_v12, %s11178_s30  ;;  %1363 = vrot.lane.b32.xlu0 %v9205_v32, %s11178_s30  ;;  %v1633_v36 = vpack.c.bf16 %v985_v19, %v11102_v31  ;;  %s14625_s30 = smov 94  }
 0x149   : > { %v975_v24 = vpop.permute.xlu1 %974  ;;  %v973_v25 = vpop.permute.xlu0 %972  ;;  %1968 = vmatpush1.bf16.msra.mxu0 %v1685_v22 }
 0x14a   : > { %v986_v57 = vsel %vm446_vm0, %v971_v34, %v973_v25  ;;  %v987_v26 = vsel %vm446_vm0, %v973_v25, %v975_v24  ;;  %9235 = vmatprep.subr.msk.bf16.mxu0 %vm1734_vm9, %v1704_v23  ;;  %v1613_v27 = vld [vmem:[#allocation2 + $0x4c0] sm:$0xff] }
 0x14b   : > { %v1703_v28 = vpack.c.bf16 %v1613_v27, %v1613_v27  ;;  %v1634_v2 = vpack.c.bf16 %v986_v57, %v11101_v30  ;;  %1428 = vrot.lane.b32.xlu1 %v11557_v12, %s14621_s12  ;;  %1430 = vrot.lane.b32.xlu0 %v9205_v32, %s14621_s12  ;;  %v1635_v12 = vpack.c.bf16 %v987_v26, %v11103_v43  ;;  %s14626_s12 = smov 127  }
 0x14d   : > { %v1033_v37 = vpop.permute.xlu1 %1032  ;;  %v11890_v38 = vpop.permute.xlu0 %976  ;;  %v1760_v21 = vsel %vm1734_vm9, %v1703_v28, 0  ;;  %2004 = vmatprep.subr.bf16.mxu1 %v1634_v2 }
 0x14e   : > { %v1047_v39 = vsel %vm509_vm1, %v11805_v44, %v1033_v37  ;;  %v988_v40 = vsel %vm446_vm0, %v975_v24, %v11890_v38  ;;  %1970 = vmatpush1.bf16.msra.mxu0 %v1760_v21  ;;  %2005 = vmatpush1.bf16.msra.mxu1 %v1633_v36 }
 0x14f   : > { %v1636_v45 = vpack.c.bf16 %v988_v40, %v11104_v29 }
 0x151   : > { %v1095_v46 = vpop.permute.xlu1 %1094  ;;  %v1035_v47 = vpop.permute.xlu0 %1034  ;;  %9236 = vmatmul.mubr.msk.bf16.vlgmr.msra.gmra.mrb[8].mxu0 %vm1730_vm10, %v11900_v49  ;;  %2047 = vmatprep.subr.bf16.mxu0 %v1636_v45 }
 0x152   : > { %v1109_v44 = vsel %vm572_vm3, %v11816_v48, %v1095_v46  ;;  %v1048_v50 = vsel %vm509_vm1, %v1033_v37, %v1035_v47  ;;  %2048 = vmatpush1.bf16.msra.mxu0 %v1635_v12  ;;  %2079 = vmatprep.mubr.bf16.mxu0 %v11179_v10 }
 0x153   : > { %v1651_v58 = vpack.c.bf16 %v1109_v44, %v1047_v39 }
 0x155   : > { %v1037_v51 = vpop.permute.xlu1 %1036  ;;  %v1097_v52 = vpop.permute.xlu0 %1096 }
 0x156   : > { %v1049_v53 = vsel %vm509_vm1, %v1035_v47, %v1037_v51  ;;  %v1110_v55 = vsel %vm572_vm3, %v1095_v46, %v1097_v52 }
 0x157   : > { %v1652_v56 = vpack.c.bf16 %v1110_v55, %v1048_v50 }
 0x159   : > { %v1099_v60 = vpop.permute.xlu1 %1098  ;;  %v11910_v59 = vpop.permute.xlu0 %1038  ;;  %2006 = vmatprep.subr.bf16.mxu1 %v1652_v56 }
 0x15a   : > { %v1111_v62 = vsel %vm572_vm3, %v1097_v52, %v1099_v60  ;;  %v1050_v48 = vsel %vm509_vm1, %v1037_v51, %v11910_v59  ;;  %2007 = vmatpush1.bf16.msra.mxu1 %v1651_v58 }
 0x15b   : > { %v1653_v5 = vpack.c.bf16 %v1111_v62, %v1049_v53 }
 0x15d   : > { %v1157_v63 = vpop.permute.xlu1 %1156  ;;  %v11915_v0 = vpop.permute.xlu0 %1100 }
 0x15e   : > { %v1171_v1 = vsel %vm635_vm4, %v11827_v54, %v1157_v63  ;;  %v1112_v4 = vsel %vm572_vm3, %v1099_v60, %v11915_v0 }
 0x15f   : > { %v1654_v6 = vpack.c.bf16 %v1112_v4, %v1050_v48 }
 0x161   : > { %v1219_v7 = vpop.permute.xlu1 %1218  ;;  %v1159_v8 = vpop.permute.xlu0 %1158  ;;  %2049 = vmatprep.subr.bf16.mxu0 %v1654_v6 }
 0x162   : > { %v1233_v35 = vsel %vm698_vm5, %v11836_v61, %v1219_v7  ;;  %v1172_v9 = vsel %vm635_vm4, %v1157_v63, %v1159_v8  ;;  %2050 = vmatpush1.bf16.msra.mxu0 %v1653_v5 }
 0x163   : > { %v1669_v16 = vpack.c.bf16 %v1233_v35, %v1171_v1 }
 0x165   : > { %v1161_v11 = vpop.permute.xlu1 %1160  ;;  %v1221_v13 = vpop.permute.xlu0 %1220 }
 0x166   : > { %v1173_v32 = vsel %vm635_vm4, %v1159_v8, %v1161_v11  ;;  %v1234_v54 = vsel %vm698_vm5, %v1219_v7, %v1221_v13  ;;  %v11106_v7 = vld [vmem:[#allocation2 + $0x70] sm:$0xff] }
 0x167   : > { %v1670_v14 = vpack.c.bf16 %v1234_v54, %v1172_v9 }
 0x169   : > { %v1223_v17 = vpop.permute.xlu1 %1222  ;;  %v11926_v34 = vpop.permute.xlu0 %1162  ;;  %2008 = vmatprep.subr.bf16.mxu1 %v1670_v14 }
 0x16a   : > { %v1235_v19 = vsel %vm698_vm5, %v1221_v13, %v1223_v17  ;;  %v1174_v61 = vsel %vm635_vm4, %v1161_v11, %v11926_v34  ;;  %2009 = vmatpush1.bf16.msra.mxu1 %v1669_v16 }
 0x16b   : > { %v1671_v23 = vpack.c.bf16 %v1235_v19, %v1173_v32 }
 0x16d   : > { %v1283_v41 = vpop.permute.xlu1 %1282  ;;  %v11931_v20 = vpop.permute.xlu0 %1224 }
 0x16e   : > { %v1299_v42 = vsel %vm765_vm6, %v11842_v3, %v1283_v41  ;;  %v1236_v22 = vsel %vm698_vm5, %v1223_v17, %v11931_v20 }
 0x16f   : > { %v1672_v24 = vpack.c.bf16 %v1236_v22, %v1174_v61 }
 0x171   : > { %v1350_v25 = vpop.permute.xlu1 %1349  ;;  %v1285_v57 = vpop.permute.xlu0 %1284  ;;  %2051 = vmatprep.subr.bf16.mxu0 %v1672_v24 }
 0x172   : > { %v1366_v26 = vsel %vm833_vm7, %v11850_v15, %v1350_v25  ;;  %v1300_v27 = vsel %vm765_vm6, %v1283_v41, %v1285_v57  ;;  %2052 = vmatpush1.bf16.msra.mxu0 %v1671_v23 }
 0x173   : > { %v1687_v36 = vpack.c.bf16 %v1366_v26, %v1299_v42 }
 0x175   : > { %v1287_v28 = vpop.permute.xlu1 %1286  ;;  %v1352_v30 = vpop.permute.xlu0 %1351 }
 0x176   : > { %v1301_v2 = vsel %vm765_vm6, %v1285_v57, %v1287_v28  ;;  %v1367_v3 = vsel %vm833_vm7, %v1350_v25, %v1352_v30 }
 0x177   : > { %v1688_v31 = vpack.c.bf16 %v1367_v3, %v1300_v27 }
 0x179   : > { %v1354_v37 = vpop.permute.xlu1 %1353  ;;  %v11942_v21 = vpop.permute.xlu0 %1288  ;;  %2010 = vmatprep.subr.bf16.mxu1 %v1688_v31 }
 0x17a   : > { %v1368_v39 = vsel %vm833_vm7, %v1352_v30, %v1354_v37  ;;  %v1302_v15 = vsel %vm765_vm6, %v1287_v28, %v11942_v21  ;;  %2011 = vmatpush1.bf16.msra.mxu1 %v1687_v36 }
 0x17b   : > { %v1689_v45 = vpack.c.bf16 %v1368_v39, %v1301_v2 }
 0x17d   : > { %v1417_v40 = vpop.permute.xlu1 %1416  ;;  %v11947_v43 = vpop.permute.xlu0 %1355 }
 0x17e   : > { %v1433_v12 = vsel %vm901_vm8, %v11875_v18, %v1417_v40  ;;  %v1369_v29 = vsel %vm833_vm7, %v1354_v37, %v11947_v43 }
 0x17f   : > { %v1690_v46 = vpack.c.bf16 %v1369_v29, %v1302_v15  ;;  %v1705_v50 = vpack.c.bf16 %v1433_v12, %v1433_v12 }
 0x181   : > { %v1421_v47 = vpop.permute.xlu1 %1420  ;;  %v1419_v44 = vpop.permute.xlu0 %1418  ;;  %2053 = vmatprep.subr.bf16.mxu0 %v1690_v46  ;;  %v1766_v18 = vsel %vm1734_vm9, %v1705_v50, 0 }
 0x182   : > { %v1434_v51 = vsel %vm901_vm8, %v1417_v40, %v1419_v44  ;;  %v1435_v52 = vsel %vm901_vm8, %v1419_v44, %v1421_v47  ;;  %2054 = vmatpush1.bf16.msra.mxu0 %v1689_v45 }
 0x183   : > { %v1706_v53 = vpack.c.bf16 %v1434_v51, %v1434_v51  ;;  %v1707_v55 = vpack.c.bf16 %v1435_v52, %v1435_v52 }
 0x185   : > { %v979_v56 = vpop.permute.xlu1 %978  ;;  %v1423_v58 = vpop.permute.xlu0 %1422  ;;  %9237 = vmatprep.subr.msk.bf16.mxu1 %vm1734_vm9, %v1706_v53  ;;  %v1772_v63 = vsel %vm1734_vm9, %v1707_v55, 0 }
 0x186   : > { %v989_v60 = vsel %vm446_vm0, %v11890_v38, %v979_v56  ;;  %v1436_v62 = vsel %vm901_vm8, %v1421_v47, %v1423_v58  ;;  %2013 = vmatpush1.bf16.msra.mxu1 %v1766_v18 }
 0x187   : > { %v1708_v48 = vpack.c.bf16 %v1436_v62, %v1436_v62  ;;  %v1637_v8 = vpack.c.bf16 %v989_v60, %v11106_v7 }
 0x189   : > { %v1041_v1 = vpop.permute.xlu1 %1040  ;;  %v981_v4 = vpop.permute.xlu0 %980  ;;  %9238 = vmatmul.mubr.msk.bf16.vlgmr.msra.gmra.mrb[8].mxu1 %vm1730_vm10, %v11900_v49  ;;  %9239 = vmatprep.subr.msk.bf16.mxu0 %vm1734_vm9, %v1708_v48 }
 0x18a   : > { %v1051_v5 = vsel %vm509_vm1, %v11910_v59, %v1041_v1  ;;  %v990_v6 = vsel %vm446_vm0, %v979_v56, %v981_v4  ;;  %2056 = vmatpush1.bf16.msra.mxu0 %v1772_v63  ;;  %2122 = vmatprep.mubr.bf16.mxu1 %v11179_v10 }
 0x18b   : > { %v1638_v38 = vpack.c.bf16 %v990_v6, %v11757_v33 }
 0x18d   : > { %v1103_v35 = vpop.permute.xlu1 %1102  ;;  %v11969_v9 = vpop.permute.xlu0 %1042  ;;  %9240 = vmatmul.mubr.msk.bf16.vlgmr.msra.gmra.mrb[12].mxu0 %vm1730_vm10, %v11900_v49  ;;  %2090 = vmatprep.subr.bf16.mxu1 %v1638_v38 }
 0x18e   : > { %v1113_v11 = vsel %vm572_vm3, %v11915_v0, %v1103_v35  ;;  %v1052_v59 = vsel %vm509_vm1, %v1041_v1, %v11969_v9  ;;  %2091 = vmatpush1.bf16.msra.mxu1 %v1637_v8  ;;  %2165 = vmatprep.mubr.bf16.mxu0 %v11179_v10 }
 0x18f   : > { %v1655_v16 = vpack.c.bf16 %v1113_v11, %v1051_v5 }
 0x191   : > { %v1165_v13 = vpop.permute.xlu1 %1164  ;;  %v1105_v33 = vpop.permute.xlu0 %1104 }
 0x192   : > { %v1175_v32 = vsel %vm635_vm4, %v11926_v34, %v1165_v13  ;;  %v1114_v54 = vsel %vm572_vm3, %v1103_v35, %v1105_v33  ;;  %v1478_v35 = vld [vmem:[#allocation2 + $0x88] sm:$0xff] }
 0x193   : > { %v1656_v14 = vpack.c.bf16 %v1114_v54, %v1052_v59 }
 0x195   : > { %v1227_v17 = vpop.permute.xlu1 %1226  ;;  %v11981_v19 = vpop.permute.xlu0 %1166  ;;  %2092 = vmatprep.subr.bf16.mxu1 %v1656_v14 }
 0x196   : > { %v1237_v0 = vsel %vm698_vm5, %v11931_v20, %v1227_v17  ;;  %v1176_v61 = vsel %vm635_vm4, %v1165_v13, %v11981_v19  ;;  %2093 = vmatpush1.bf16.msra.mxu1 %v1655_v16 }
 0x197   : > { %v1673_v24 = vpack.c.bf16 %v1237_v0, %v1175_v32 }
 0x199   : > { %v1291_v41 = vpop.permute.xlu1 %1290  ;;  %v11987_v42 = vpop.permute.xlu0 %1228 }
 0x19a   : > { %v1303_v34 = vsel %vm765_vm6, %v11942_v21, %v1291_v41  ;;  %v1238_v22 = vsel %vm698_vm5, %v1227_v17, %v11987_v42 }
 0x19b   : > { %v1674_v23 = vpack.c.bf16 %v1238_v22, %v1176_v61  ;;  %v11107_v22 = vld [vmem:[#allocation2 + $0x80] sm:$0xff] }
 0x19d   : > { %v1358_v25 = vpop.permute.xlu1 %1357  ;;  %v11993_v57 = vpop.permute.xlu0 %1292  ;;  %2094 = vmatprep.subr.bf16.mxu1 %v1674_v23 }
 0x19e   : > { %v1370_v20 = vsel %vm833_vm7, %v11947_v43, %v1358_v25  ;;  %v1304_v26 = vsel %vm765_vm6, %v1291_v41, %v11993_v57  ;;  %2095 = vmatpush1.bf16.msra.mxu1 %v1673_v24 }
 0x19f   : > { %v1691_v2 = vpack.c.bf16 %v1370_v20, %v1303_v34 }
 0x1a1   : > { %v11999_v27 = vpop.permute.xlu0 %1359 }
 0x1a2   : > { %v1371_v28 = vsel %vm833_vm7, %v1358_v25, %v11999_v27 }
 0x1a3   : > { %v1692_v30 = vpack.c.bf16 %v1371_v28, %v1304_v26 }
 0x1a5   : > { %2096 = vmatprep.subr.bf16.mxu1 %v1692_v30 }
 0x1a6   : > { %2097 = vmatpush1.bf16.msra.mxu1 %v1691_v2 }
 0x1ae   : > { %v12003_v3 = vpop.permute.xlu1 %1717 }
 0x1b2   : > { %v1425_v31 = vpop.permute.xlu1 %1424  ;;  %v12005_v36 = vpop.permute.xlu0 %1722 }
 0x1b3   : > { %v1437_v37 = vsel %vm901_vm8, %v1423_v58, %v1425_v31 }
 0x1b4   : > { %v1823_v21 = vpop.f32.mrb[0].mxu0  ;;  %v1709_v29 = vpack.c.bf16 %v1437_v37, %v1437_v37 }
 0x1b5   : > { %v1824_v39 = vadd.f32 %v1823_v21, %v12003_v3  ;;  %v1825_v15 = vpop.f32.mrb[1].mxu0 }
 0x1b6   : > { %v12009_v40 = vpop.permute.xlu1 %1426  ;;  %v983_v43 = vpop.permute.xlu0 %982  ;;  %v1826_v12 = vadd.f32 %v1825_v15, %v12003_v3  ;;  %v1778_v1 = vsel %vm1734_vm9, %v1709_v29, 0 }
 0x1b7   : > { %v1438_v45 = vsel %vm901_vm8, %v1425_v31, %v12009_v40  ;;  %v991_v46 = vsel %vm446_vm0, %v981_v4, %v983_v43  ;;  %1009 = vst.msk [vmem:[#allocation2 + $0x118] sm:$0xff] %vm408_vm2, %v983_v43  ;;  %v1827_v47 = vpop.f32.mrb[2].mxu0  ;;  %v2176_v44 = vmax.f32 %v1824_v39, 0.0 }
 0x1b8   : > { %v1828_v50 = vadd.f32 %v1827_v47, %v12005_v36  ;;  %v1829_v51 = vpop.f32.mrb[3].mxu0  ;;  %v1866_v52 = vpop.f32.mrb[0].mxu1  ;;  %v1710_v53 = vpack.c.bf16 %v1438_v45, %v1438_v45  ;;  %v2177_v55 = vmax.f32 %v1826_v12, 0.0  ;;  %v1639_v23 = vpack.c.bf16 %v991_v46, %v11107_v22 }
 0x1b9   : > { %v1830_v56 = vadd.f32 %v1829_v51, %v12005_v36  ;;  %v1867_v58 = vadd.f32 %v1866_v52, %v12003_v3  ;;  %v1868_v18 = vpop.f32.mrb[1].mxu1 }
 0x1ba   : > { %v1045_v60 = vpop.permute.xlu1 %1044  ;;  %v1107_v62 = vpop.permute.xlu0 %1106  ;;  %v2194_v48 = vmax.f32 %v1828_v50, 0.0  ;;  %v1869_v63 = vadd.f32 %v1868_v18, %v12003_v3  ;;  %9241 = vmatprep.subr.msk.bf16.mxu1 %vm1734_vm9, %v1710_v53 }
 0x1bb   : > { %v1053_v4 = vsel %vm509_vm1, %v11969_v9, %v1045_v60  ;;  %1071 = vst.msk [vmem:[#allocation2 + $0x1a8] sm:$0xff] %vm408_vm2, %v1045_v60  ;;  %v1115_v5 = vsel %vm572_vm3, %v1105_v33, %v1107_v62  ;;  %1133 = vst.msk [vmem:[#allocation2 + $0x238] sm:$0xff] %vm408_vm2, %v1107_v62  ;;  %v2195_v6 = vmax.f32 %v1830_v56, 0.0  ;;  %v1870_v38 = vpop.f32.mrb[2].mxu1  ;;  %2099 = vmatpush1.bf16.msra.mxu1 %v1778_v1  ;;  %v2178_v8 = vmax.f32 %v1867_v58, 0.0 }
 0x1bc   : > { %v12027_v7 = vpack.c.bf16 %v2194_v48, %v2176_v44  ;;  %v1871_v11 = vadd.f32 %v1870_v38, %v12005_v36  ;;  %v1872_v59 = vpop.f32.mrb[3].mxu1  ;;  %v2179_v32 = vmax.f32 %v1869_v63, 0.0  ;;  %v1657_v2 = vpack.c.bf16 %v1115_v5, %v1053_v4 }
 0x1bd   : > { %v12030_v13 = vpack.c.bf16 %v2195_v6, %v2177_v55  ;;  %v1873_v9 = vadd.f32 %v1872_v59, %v12005_v36  ;;  %v10396_v59 = vld [vmem:[%s14583_s3 + $0x1c] ss:$12 sps:$4 sm:$0xff]  }
 0x1be   : > { %v1169_v54 = vpop.permute.xlu1 %1168  ;;  %v1231_v14 = vpop.permute.xlu0 %1230  ;;  %v1496_v33 = vld [vmem:[#allocation2 + $0x118] sm:$0xff]  ;;  %v2196_v16 = vmax.f32 %v1871_v11, 0.0  ;;  %9242 = vmatmul.mubr.msk.bf16.vlgmr.msra.gmra.mrb[12].mxu1 %vm1730_vm10, %v11900_v49  ;;  %v10393_v11 = vld [vmem:[%s14583_s3 + $0x4] ss:$12 sps:$4 sm:$0xff]  }
 0x1bf   : > { %v1177_v17 = vsel %vm635_vm4, %v11981_v19, %v1169_v54  ;;  %1195 = vst.msk [vmem:[#allocation2 + $0x2c8] sm:$0xff] %vm408_vm2, %v1169_v54  ;;  %v1239_v0 = vsel %vm698_vm5, %v11987_v42, %v1231_v14  ;;  %1257 = vst.msk [vmem:[#allocation2 + $0x358] sm:$0xff] %vm408_vm2, %v1231_v14  ;;  %v1640_v61 = vpack.c.bf16 %v1496_v33, %v1478_v35  ;;  %v2197_v41 = vmax.f32 %v1873_v9, 0.0  ;;  %v10399_v9 = vld [vmem:[%s14583_s3 + $0x34] ss:$12 sps:$4 sm:$0xff]  }
 0x1c0   : > { %2268 = vrot.lane.b32.xlu1 %v12030_v13, %s14601_s15  ;;  %v12043_v34 = vpack.c.bf16 %v2196_v16, %v2178_v8  ;;  %v1675_v12 = vpack.c.bf16 %v1239_v0, %v1177_v17  ;;  %3699 = vmatprep.subr.bf16.mxu1 %v10393_v11  ;;  %v10418_v54 = vld [vmem:[%s14583_s3 + $0xc8] ss:$12 sps:$4 sm:$0xff]   ;;  %v10397_v14 = vld [vmem:[%s14583_s3 + $0x30] ss:$12 sps:$4 sm:$0xff]   ;;  %v10402_v33 = vld [vmem:[%s14583_s3 + $0x4c] ss:$12 sps:$4 sm:$0xff]  }
 0x1c1   : > { %2133 = vmatprep.subr.bf16.mxu0 %v1640_v61  ;;  %v12045_v24 = vpack.c.bf16 %v2197_v41, %v2179_v32  ;;  %v10394_v32 = vld [vmem:[%s14583_s3 + $0x18] ss:$12 sps:$4 sm:$0xff]   ;;  %v10400_v16 = vld [vmem:[%s14583_s3 + $0x48] ss:$12 sps:$4 sm:$0xff]   ;;  %v10403_v0 = vld [vmem:[%s14583_s3 + $0x60] ss:$12 sps:$4 sm:$0xff]  }
 0x1c2   : > { %v1295_v19 = vpop.permute.xlu1 %1294  ;;  %v1297_v25 = vpop.permute.xlu0 %1296  ;;  %2134 = vmatpush1.bf16.msra.mxu0 %v1639_v23  ;;  %v1514_v20 = vld [vmem:[#allocation2 + $0x1a8] sm:$0xff]  ;;  %v1532_v26 = vld [vmem:[#allocation2 + $0x238] sm:$0xff]  ;;  %2270 = vrot.lane.b32.xlu0 %v12043_v34, %s14601_s15  ;;  %v10405_v17 = vld [vmem:[%s14583_s3 + $0x64] ss:$12 sps:$4 sm:$0xff]   ;;  %vm6056_vm4 = vcmask 900096  }
 0x1c3   : > { %v1305_v42 = vsel %vm765_vm6, %v11993_v57, %v1295_v19  ;;  %v1306_v28 = vsel %vm765_vm6, %v1295_v19, %v1297_v25  ;;  %v1658_v30 = vpack.c.bf16 %v1532_v26, %v1514_v20  ;;  %v10408_v41 = vld [vmem:[%s14583_s3 + $0x7c] ss:$12 sps:$4 sm:$0xff]   ;;  %vm6098_vm6 = vcmask 883712  }
 0x1c4   : > { %2272 = vrot.lane.b32.xlu1 %v12045_v24, %s14601_s15  ;;  %1324 = vst.msk [vmem:[#allocation2 + $0x3e8] sm:$0xff] %vm408_vm2, %v1306_v28 }
 0x1c5   : > { %2135 = vmatprep.subr.bf16.mxu0 %v1658_v30  ;;  %v10411_v30 = vld [vmem:[%s14583_s3 + $0x94] ss:$12 sps:$4 sm:$0xff]  }
 0x1c6   : > { %v1362_v31 = vpop.permute.xlu1 %1361  ;;  %v1364_v37 = vpop.permute.xlu0 %1363  ;;  %2136 = vmatpush1.bf16.msra.mxu0 %v1657_v2  ;;  %v1550_v21 = vld [vmem:[#allocation2 + $0x2c8] sm:$0xff]  ;;  %v1568_v39 = vld [vmem:[#allocation2 + $0x358] sm:$0xff]  ;;  %2266 = vrot.lane.b32.xlu0 %v12027_v7, %s14601_s15 }
 0x1c7   : > { %v1372_v57 = vsel %vm833_vm7, %v11999_v27, %v1362_v31  ;;  %v1373_v15 = vsel %vm833_vm7, %v1362_v31, %v1364_v37  ;;  %v1676_v43 = vpack.c.bf16 %v1568_v39, %v1550_v21  ;;  %vm6140_vm7 = vcmask 744448  }
 0x1c8   : > { %1391 = vst.msk [vmem:[#allocation2 + $0x478] sm:$0xff] %vm408_vm2, %v1373_v15  ;;  %v1693_v52 = vpack.c.bf16 %v1372_v57, %v1305_v42  ;;  %v10406_v42 = vld [vmem:[%s14583_s3 + $0x78] ss:$12 sps:$4 sm:$0xff]   ;;  %v10409_v57 = vld [vmem:[%s14583_s3 + $0x90] ss:$12 sps:$4 sm:$0xff]  }
 0x1c9   : > { %2137 = vmatprep.subr.bf16.mxu0 %v1676_v43  ;;  %v10414_v43 = vld [vmem:[%s14583_s3 + $0xac] ss:$12 sps:$4 sm:$0xff]  }
 0x1ca   : > { %v1429_v29 = vpop.permute.xlu1 %1428  ;;  %v1431_v45 = vpop.permute.xlu0 %1430  ;;  %2138 = vmatpush1.bf16.msra.mxu0 %v1675_v12  ;;  %v10412_v12 = vld [vmem:[%s14583_s3 + $0xa8] ss:$12 sps:$4 sm:$0xff]  }
 0x1cb   : > { %v1439_v46 = vsel %vm901_vm8, %v12009_v40, %v1429_v29  ;;  %v1440_v47 = vsel %vm901_vm8, %v1429_v29, %v1431_v45  ;;  %v1586_v44 = vld [vmem:[#allocation2 + $0x3e8] sm:$0xff]  ;;  %v10417_v29 = vld [vmem:[%s14583_s3 + $0xc4] ss:$12 sps:$4 sm:$0xff]   ;;  %vm6436_vm8 = vcmask 130048  }
 0x1cc   : > { %1458 = vst.msk [vmem:[#allocation2 + $0x508] sm:$0xff] %vm408_vm2, %v1440_v47  ;;  %v1711_v51 = vpack.c.bf16 %v1439_v46, %v1439_v46  ;;  %v10415_v45 = vld [vmem:[%s14583_s3 + $0xc0] ss:$12 sps:$4 sm:$0xff]   ;;  %v10419_v46 = vld [vmem:[%s14583_s3 + $0x8] ss:$12 sps:$4 sm:$0xff]   ;;  %vm6001_vm2 = vcmask 244736  }
 0x1cd   : > { %v10422_v47 = vld [vmem:[%s14583_s3 + $0xdc] ss:$12 sps:$4 sm:$0xff]  }
 0x1ce   : > { %v1784_v56 = vsel %vm1734_vm9, %v1711_v51, 0  ;;  %v10427_v51 = vld [vmem:[%s14583_s3 + $0xf4] ss:$12 sps:$4 sm:$0xff]  }
 0x1cf   : > { %v1604_v50 = vld [vmem:[#allocation2 + $0x478] sm:$0xff] }
 0x1d0   : > { %v1694_v27 = vpack.c.bf16 %v1604_v50, %v1586_v44  ;;  %v10423_v44 = vld [vmem:[%s14583_s3 + $0xe0] ss:$12 sps:$4 sm:$0xff]   ;;  %v10420_v50 = vld [vmem:[%s14583_s3 + $0xd8] ss:$12 sps:$4 sm:$0xff]  }
 0x1d2   : > { %2139 = vmatprep.subr.bf16.mxu0 %v1694_v27  ;;  %v10424_v27 = vld [vmem:[%s14583_s3 + $0x20] ss:$12 sps:$4 sm:$0xff]  }
 0x1d3   : > { %2140 = vmatpush1.bf16.msra.mxu0 %v1693_v52  ;;  %v1622_v53 = vld [vmem:[#allocation2 + $0x508] sm:$0xff]  ;;  %v10428_v52 = vld [vmem:[%s14583_s3 + $0xf8] ss:$12 sps:$4 sm:$0xff]  }
 0x1d4   : > { %v1712_v55 = vpack.c.bf16 %v1622_v53, %v1622_v53  ;;  %v10425_v53 = vld [vmem:[%s14583_s3 + $0xf0] ss:$12 sps:$4 sm:$0xff]  }
 0x1d6   : > { %9243 = vmatprep.subr.msk.bf16.mxu0 %vm1734_vm9, %v1712_v55  ;;  %v10429_v55 = vld [vmem:[%s14583_s3 + $0x38] ss:$12 sps:$4 sm:$0xff]   ;;  %vm6161_vm9 = vcmask 736256  }
 0x1d7   : > { %2142 = vmatpush1.bf16.msra.mxu0 %v1784_v56  ;;  %v10432_v56 = vld [vmem:[%s14583_s3 + $0x10c] ss:$12 sps:$4 sm:$0xff]  }
 0x1d8   : > { %v1909_v58 = vpop.f32.mrb[4].mxu0  ;;  %9838 = vmatprep.subr.bf16.mxu0 %v10418_v54 }
 0x1d9   : > { %v1910_v40 = vadd.f32 %v1909_v58, %v12003_v3  ;;  %v1911_v18 = vpop.f32.mrb[5].mxu0  ;;  %v10433_v58 = vld [vmem:[%s14583_s3 + $0x110] ss:$12 sps:$4 sm:$0xff]  }
 0x1da   : > { %9244 = vmatmul.mubr.msk.bf16.vlgmr.msra.gmra.mrb[16].mxu0 %vm1730_vm10, %v11900_v49  ;;  %v1912_v60 = vadd.f32 %v1911_v18, %v12003_v3  ;;  %v1913_v62 = vpop.f32.mrb[6].mxu0  ;;  %v10391_v49 = vld [vmem:[%s14583_s3] ss:$12 sps:$4 sm:$0xff]   ;;  %v10434_v18 = vld [vmem:[%s14583_s3 + $0x50] ss:$12 sps:$4 sm:$0xff]   ;;  %vm9060_vm10 = vcmask 74752  }
 0x1db   : > { %v1914_v48 = vadd.f32 %v1913_v62, %v12005_v36  ;;  %v1915_v63 = vpop.f32.mrb[7].mxu0  ;;  %v2180_v4 = vmax.f32 %v1910_v40, 0.0  ;;  %3700 = vmatpush1.bf16.msra.mxu1 %v10391_v49  ;;  %9839 = vmatpush3.bf16.msra.mxu0 %v10419_v46  ;;  %v10430_v40 = vld [vmem:[%s14583_s3 + $0x108] ss:$12 sps:$4 sm:$0xff]  }
 0x1dc   : > { %v1916_v1 = vadd.f32 %v1915_v63, %v12005_v36  ;;  %v2181_v6 = vmax.f32 %v1912_v60, 0.0  ;;  %3701 = vmatprep.subr.bf16.mxu1 %v10396_v59  ;;  %9840 = vmatprep.subr.bf16.mxu0 %v10423_v44  ;;  %v10437_v60 = vld [vmem:[%s14583_s3 + $0x124] ss:$12 sps:$4 sm:$0xff]   ;;  %v10438_v62 = vld [vmem:[%s14583_s3 + $0x128] ss:$12 sps:$4 sm:$0xff]  }
 0x1dd   : > { %v2198_v5 = vmax.f32 %v1914_v48, 0.0  ;;  %v10435_v48 = vld [vmem:[%s14583_s3 + $0x120] ss:$12 sps:$4 sm:$0xff]   ;;  %v10439_v63 = vld [vmem:[%s14583_s3 + $0x68] ss:$12 sps:$4 sm:$0xff]  }
 0x1de   : > { %v2199_v38 = vmax.f32 %v1916_v1, 0.0  ;;  %v10442_v1 = vld [vmem:[%s14583_s3 + $0x13c] ss:$12 sps:$4 sm:$0xff]  }
 0x1df   : > { %v12073_v8 = vpack.c.bf16 %v2198_v5, %v2180_v4  ;;  %3702 = vmatpush1.bf16.msra.mxu1 %v10394_v32  ;;  %9841 = vmatpush3.bf16.msra.mxu0 %v10424_v27  ;;  %v10443_v4 = vld [vmem:[%s14583_s3 + $0x140] ss:$12 sps:$4 sm:$0xff]   ;;  %v10440_v5 = vld [vmem:[%s14583_s3 + $0x138] ss:$12 sps:$4 sm:$0xff]  }
 0x1e0   : > { %v12075_v35 = vpack.c.bf16 %v2199_v38, %v2181_v6  ;;  %3703 = vmatprep.subr.bf16.mxu1 %v10399_v9  ;;  %9842 = vmatprep.subr.bf16.mxu0 %v10428_v52  ;;  %v10444_v38 = vld [vmem:[%s14583_s3 + $0x80] ss:$12 sps:$4 sm:$0xff]  }
 0x1e1   : > { %2274 = vrot.lane.b32.xlu1 %v12073_v8, %s14601_s15 }
 0x1e2   : > { %2276 = vrot.lane.b32.xlu0 %v12075_v35, %s14601_s15  ;;  %s14607_s15 = smov 91  }
 0x1e3   : > { %3704 = vmatpush1.bf16.msra.mxu1 %v10397_v14  ;;  %9843 = vmatpush3.bf16.msra.mxu0 %v10429_v55  ;;  %v10447_v14 = vld [vmem:[%s14583_s3 + $0x154] ss:$12 sps:$4 sm:$0xff]  }
 0x1e4   : > { %3705 = vmatprep.subr.bf16.mxu1 %v10402_v33  ;;  %9844 = vmatprep.subr.bf16.mxu0 %v10433_v58  ;;  %v10448_v33 = vld [vmem:[%s14583_s3 + $0x158] ss:$12 sps:$4 sm:$0xff]  }
 0x1e7   : > { %3706 = vmatpush1.bf16.msra.mxu1 %v10400_v16  ;;  %9845 = vmatpush3.bf16.msra.mxu0 %v10434_v18 }
 0x1e8   : > { %3707 = vmatprep.subr.bf16.mxu1 %v10405_v17  ;;  %9846 = vmatprep.subr.bf16.mxu0 %v10438_v62  ;;  %v10445_v17 = vld [vmem:[%s14583_s3 + $0x150] ss:$12 sps:$4 sm:$0xff]  }
 0x1eb   : > { %3708 = vmatpush1.bf16.msra.mxu1 %v10403_v0  ;;  %9847 = vmatpush3.bf16.msra.mxu0 %v10439_v63  ;;  %v10449_v0 = vld [vmem:[%s14583_s3 + $0x98] ss:$12 sps:$4 sm:$0xff]  }
 0x1ec   : > { %3709 = vmatprep.subr.bf16.mxu1 %v10408_v41  ;;  %9848 = vmatprep.subr.bf16.mxu0 %v10443_v4 }
 0x1ef   : > { %3710 = vmatpush1.bf16.msra.mxu1 %v10406_v42  ;;  %9849 = vmatpush3.bf16.msra.mxu0 %v10444_v38  ;;  %v10450_v42 = vld [vmem:[%s14583_s3 + $0x168] ss:$12 sps:$4 sm:$0xff]  }
 0x1f0   : > { %3711 = vmatprep.subr.bf16.mxu1 %v10411_v30  ;;  %9850 = vmatprep.subr.bf16.mxu0 %v10448_v33  ;;  %v10457_v30 = vld [vmem:[%s14583_s3 + $0x184] ss:$12 sps:$4 sm:$0xff]  }
 0x1f3   : > { %3712 = vmatpush1.bf16.msra.mxu1 %v10409_v57  ;;  %9851 = vmatpush3.bf16.msra.mxu0 %v10449_v0 }
 0x1f4   : > { %3713 = vmatprep.subr.bf16.mxu1 %v10414_v43 }
 0x1f7   : > { %3714 = vmatpush1.bf16.msra.mxu1 %v10412_v12 }
 0x1f8   : > { %v1952_v61 = vpop.f32.mrb[4].mxu1  ;;  %3715 = vmatprep.subr.bf16.mxu1 %v10417_v29 }
 0x1f9   : > { %v1953_v22 = vadd.f32 %v1952_v61, %v12003_v3  ;;  %v1954_v23 = vpop.f32.mrb[5].mxu1 }
 0x1fa   : > { %v1955_v19 = vadd.f32 %v1954_v23, %v12003_v3  ;;  %v1956_v25 = vpop.f32.mrb[6].mxu1 }
 0x1fb   : > { %v1957_v20 = vadd.f32 %v1956_v25, %v12005_v36  ;;  %v1958_v26 = vpop.f32.mrb[7].mxu1  ;;  %v2182_v2 = vmax.f32 %v1953_v22, 0.0  ;;  %3716 = vmatpush1.bf16.msra.mxu1 %v10415_v45  ;;  %v10452_v25 = vld [vmem:[%s14583_s3 + $0x16c] ss:$12 sps:$4 sm:$0xff]  }
 0x1fc   : > { %v1959_v28 = vadd.f32 %v1958_v26, %v12005_v36  ;;  %v2183_v37 = vmax.f32 %v1955_v19, 0.0  ;;  %3717 = vmatprep.subr.bf16.mxu1 %v10422_v47 }
 0x1fd   : > { %v2200_v31 = vmax.f32 %v1957_v20, 0.0  ;;  %v10453_v20 = vld [vmem:[%s14583_s3 + $0x170] ss:$12 sps:$4 sm:$0xff]  }
 0x1fe   : > { %v2201_v21 = vmax.f32 %v1959_v28, 0.0  ;;  %v10454_v28 = vld [vmem:[%s14583_s3 + $0xb0] ss:$12 sps:$4 sm:$0xff]   ;;  %9852 = vmatprep.subr.bf16.mxu0 %v10453_v20 }
 0x1ff   : > { %v12127_v39 = vpack.c.bf16 %v2200_v31, %v2182_v2  ;;  %3718 = vmatpush1.bf16.msra.mxu1 %v10420_v50  ;;  %9853 = vmatpush3.bf16.msra.mxu0 %v10454_v28  ;;  %v10458_v2 = vld [vmem:[%s14583_s3 + $0x248] ss:$12 sps:$4 sm:$0xff]  }
 0x200   : > { %v12132_v15 = vpack.c.bf16 %v2201_v21, %v2183_v37  ;;  %3719 = vmatprep.subr.bf16.mxu1 %v10427_v51  ;;  %9860 = vmatprep.subr.bf16.mxu0 %v10458_v2 }
 0x203   : > { %3720 = vmatpush1.bf16.msra.mxu1 %v10425_v53 }
 0x204   : > { %3721 = vmatprep.subr.bf16.mxu1 %v10432_v56 }
 0x207   : > { %3722 = vmatpush1.bf16.msra.mxu1 %v10430_v40 }
 0x208   : > { %3723 = vmatprep.subr.bf16.mxu1 %v10437_v60 }
 0x20b   : > { %3724 = vmatpush1.bf16.msra.mxu1 %v10435_v48 }
 0x20c   : > { %3725 = vmatprep.subr.bf16.mxu1 %v10442_v1 }
 0x20f   : > { %3726 = vmatpush1.bf16.msra.mxu1 %v10440_v5 }
 0x210   : > { %3727 = vmatprep.subr.bf16.mxu1 %v10447_v14 }
 0x213   : > { %3728 = vmatpush1.bf16.msra.mxu1 %v10445_v17 }
 0x214   : > { %3729 = vmatprep.subr.bf16.mxu1 %v10452_v25 }
 0x217   : > { %3730 = vmatpush1.bf16.msra.mxu1 %v10450_v42 }
 0x218   : > { %3742 = vmatprep.subr.bf16.mxu1 %v10457_v30 }
 0x224   : > { %v1995_v6 = vpop.f32.mrb[8].mxu0 }
 0x225   : > { %v1996_v49 = vadd.f32 %v1995_v6, %v12003_v3  ;;  %v1997_v11 = vpop.f32.mrb[9].mxu0 }
 0x226   : > { %v1998_v59 = vadd.f32 %v1997_v11, %v12003_v3  ;;  %v1999_v32 = vpop.f32.mrb[10].mxu0 }
 0x227   : > { %v2000_v9 = vadd.f32 %v1999_v32, %v12005_v36  ;;  %v2001_v54 = vpop.f32.mrb[11].mxu0  ;;  %v2184_v61 = vmax.f32 %v1996_v49, 0.0 }
 0x228   : > { %v2002_v16 = vadd.f32 %v2001_v54, %v12005_v36  ;;  %v2185_v22 = vmax.f32 %v1998_v59, 0.0 }
 0x229   : > { %v2202_v41 = vmax.f32 %v2000_v9, 0.0 }
 0x22a   : > { %v2203_v23 = vmax.f32 %v2002_v16, 0.0 }
 0x22b   : > { %v12225_v19 = vpack.c.bf16 %v2202_v41, %v2184_v61 }
 0x22c   : > { %v12233_v26 = vpack.c.bf16 %v2203_v23, %v2185_v22 }
 0x232   : > { %v2269_v31 = vpop.permute.xlu1 %2268 }
 0x234   : > { %v2271_v37 = vpop.permute.xlu0 %2270 }
 0x235   : > { %v2286_v21 = vsel %vm446_vm0, %v2269_v31, %v2271_v37 }
 0x236   : > { %v2273_v57 = vpop.permute.xlu1 %2272  ;;  %v12249_v43 = vmax.bf16 %v2286_v21, %v12030_v13 }
 0x237   : > { %v2287_v12 = vsel %vm446_vm0, %v2271_v37, %v2273_v57 }
 0x238   : > { %v12253_v29 = vmax.bf16 %v2287_v12, %v12043_v34  ;;  %2322 = vrot.lane.b32.xlu1 %v12249_v43, %s14625_s30  ;;  %v2267_v45 = vpop.permute.xlu0 %2266 }
 0x239   : > { %v2285_v46 = vsel %vm446_vm0, %v2267_v45, %v2269_v31 }
 0x23a   : > { %2324 = vrot.lane.b32.xlu0 %v12253_v29, %s14625_s30  ;;  %v12261_v47 = vmax.bf16 %v2285_v46, %v12027_v7 }
 0x23c   : > { %2320 = vrot.lane.b32.xlu1 %v12261_v47, %s14625_s30 }
 0x23e   : > { %2278 = vrot.lane.b32.xlu0 %v12127_v39, %s14626_s12 }
 0x240   : > { %2280 = vrot.lane.b32.xlu1 %v12132_v15, %s14626_s12 }
 0x253   : > { %v2275_v13 = vpop.permute.xlu1 %2274 }
 0x254   : > { %v2288_v34 = vsel %vm446_vm0, %v2273_v57, %v2275_v13  ;;  %v12270_v44 = vpop.permute.xlu0 %2276 }
 0x255   : > { %v12273_v50 = vmax.bf16 %v2288_v34, %v12045_v24  ;;  %v2289_v7 = vsel %vm446_vm0, %v2275_v13, %v12270_v44 }
 0x256   : > { %v12278_v27 = vmax.bf16 %v2289_v7, %v12073_v8 }
 0x257   : > { %2326 = vrot.lane.b32.xlu0 %v12273_v50, %s14625_s30 }
 0x258   : > { %2328 = vrot.lane.b32.xlu1 %v12278_v27, %s14625_s30 }
 0x25b   : > { %2282 = vrot.lane.b32.xlu0 %v12225_v19, %s14626_s12 }
 0x25c   : > { %v2038_v51 = vpop.f32.mrb[8].mxu1 }
 0x25d   : > { %v2039_v52 = vadd.f32 %v2038_v51, %v12003_v3  ;;  %v2040_v24 = vpop.f32.mrb[9].mxu1 }
 0x25e   : > { %v2041_v53 = vadd.f32 %v2040_v24, %v12003_v3  ;;  %v2042_v55 = vpop.f32.mrb[10].mxu1 }
 0x25f   : > { %v2043_v56 = vadd.f32 %v2042_v55, %v12005_v36  ;;  %v2044_v8 = vpop.f32.mrb[11].mxu1  ;;  %v2186_v18 = vmax.f32 %v2039_v52, 0.0  ;;  %v10455_v55 = vld [vmem:[%s14583_s3 + $0x180] ss:$12 sps:$4 sm:$0xff]  }
 0x260   : > { %v2045_v58 = vadd.f32 %v2044_v8, %v12005_v36  ;;  %v2081_v40 = vpop.f32.mrb[12].mxu0  ;;  %v2187_v63 = vmax.f32 %v2041_v53, 0.0 }
 0x261   : > { %v2204_v60 = vmax.f32 %v2043_v56, 0.0  ;;  %v2082_v62 = vadd.f32 %v2081_v40, %v12003_v3  ;;  %v2083_v48 = vpop.f32.mrb[13].mxu0  ;;  %v10462_v40 = vld [vmem:[%s14583_s3 + $0x19c] ss:$12 sps:$4 sm:$0xff]  }
 0x262   : > { %v2205_v1 = vmax.f32 %v2045_v58, 0.0  ;;  %v2084_v4 = vadd.f32 %v2083_v48, %v12003_v3  ;;  %v2085_v5 = vpop.f32.mrb[14].mxu0 }
 0x263   : > { %v12292_v6 = vpack.c.bf16 %v2204_v60, %v2186_v18  ;;  %v2086_v38 = vadd.f32 %v2085_v5, %v12005_v36  ;;  %v2087_v49 = vpop.f32.mrb[15].mxu0  ;;  %v2188_v32 = vmax.f32 %v2082_v62, 0.0  ;;  %v10463_v62 = vld [vmem:[%s14583_s3 + $0x260] ss:$12 sps:$4 sm:$0xff]  }
 0x264   : > { %v12295_v11 = vpack.c.bf16 %v2205_v1, %v2187_v63  ;;  %v2088_v59 = vadd.f32 %v2087_v49, %v12005_v36  ;;  %v2189_v54 = vmax.f32 %v2084_v4, 0.0  ;;  %v10467_v49 = vld [vmem:[%s14583_s3 + $0x1b4] ss:$12 sps:$4 sm:$0xff]  }
 0x265   : > { %v2206_v9 = vmax.f32 %v2086_v38, 0.0 }
 0x266   : > { %v2207_v14 = vmax.f32 %v2088_v59, 0.0 }
 0x267   : > { %v12298_v33 = vpack.c.bf16 %v2206_v9, %v2188_v32  ;;  %v10468_v32 = vld [vmem:[%s14583_s3 + $0x278] ss:$12 sps:$4 sm:$0xff]  }
 0x268   : > { %v12300_v16 = vpack.c.bf16 %v2207_v14, %v2189_v54  ;;  %v10469_v9 = vld [vmem:[%s14583_s3 + $0x1b8] ss:$12 sps:$4 sm:$0xff]   ;;  %v10473_v14 = vld [vmem:[%s14583_s3 + $0x290] ss:$12 sps:$4 sm:$0xff]  }
 0x269   : > { %v10472_v54 = vld [vmem:[%s14583_s3 + $0x1cc] ss:$12 sps:$4 sm:$0xff]  }
 0x291   : > { %v2124_v17 = vpop.f32.mrb[12].mxu1 }
 0x292   : > { %v2125_v0 = vadd.f32 %v2124_v17, %v12003_v3  ;;  %v2126_v61 = vpop.f32.mrb[13].mxu1  ;;  %v10470_v17 = vld [vmem:[%s14583_s3 + $0x1c8] ss:$12 sps:$4 sm:$0xff]  }
 0x293   : > { %v2127_v41 = vadd.f32 %v2126_v61, %v12003_v3  ;;  %v2128_v22 = vpop.f32.mrb[14].mxu1  ;;  %v10477_v61 = vld [vmem:[%s14583_s3 + $0x1e4] ss:$12 sps:$4 sm:$0xff]  }
 0x294   : > { %v2129_v23 = vadd.f32 %v2128_v22, %v12005_v36  ;;  %v2130_v25 = vpop.f32.mrb[15].mxu1  ;;  %v2190_v42 = vmax.f32 %v2125_v0, 0.0  ;;  %v10474_v0 = vld [vmem:[%s14583_s3 + $0x1d0] ss:$12 sps:$4 sm:$0xff]   ;;  %v10475_v22 = vld [vmem:[%s14583_s3 + $0x1e0] ss:$12 sps:$4 sm:$0xff]  }
 0x295   : > { %v2131_v20 = vadd.f32 %v2130_v25, %v12005_v36  ;;  %v2191_v30 = vmax.f32 %v2127_v41, 0.0  ;;  %v10478_v41 = vld [vmem:[%s14583_s3 + $0x2a8] ss:$12 sps:$4 sm:$0xff]  }
 0x296   : > { %v2208_v28 = vmax.f32 %v2129_v23, 0.0  ;;  %v10479_v23 = vld [vmem:[%s14583_s3 + $0x1e8] ss:$12 sps:$4 sm:$0xff]  }
 0x297   : > { %v2209_v2 = vmax.f32 %v2131_v20, 0.0  ;;  %v10482_v25 = vld [vmem:[%s14583_s3 + $0x1fc] ss:$12 sps:$4 sm:$0xff]   ;;  %v10483_v20 = vld [vmem:[%s14583_s3 + $0x2c0] ss:$12 sps:$4 sm:$0xff]  }
 0x298   : > { %v12306_v31 = vpack.c.bf16 %v2208_v28, %v2190_v42  ;;  %v10480_v42 = vld [vmem:[%s14583_s3 + $0x1f8] ss:$12 sps:$4 sm:$0xff]   ;;  %v10484_v28 = vld [vmem:[%s14583_s3 + $0x200] ss:$12 sps:$4 sm:$0xff]  }
 0x299   : > { %v12308_v37 = vpack.c.bf16 %v2209_v2, %v2191_v30  ;;  %v10487_v30 = vld [vmem:[%s14583_s3 + $0x214] ss:$12 sps:$4 sm:$0xff]   ;;  %v10488_v2 = vld [vmem:[%s14583_s3 + $0x2d8] ss:$12 sps:$4 sm:$0xff]  }
 0x2aa   : > { %v2323_v21 = vpop.permute.xlu1 %2322 }
 0x2ac   : > { %v12310_v57 = vpop.permute.xlu0 %2324 }
 0x2ad   : > { %v2340_v12 = vsel %vm572_vm3, %v2323_v21, %v12310_v57  ;;  %v2167_v45 = vpop.f32.mrb[16].mxu0 }
 0x2ae   : > { %v2357_v46 = vmax.bf16 %v2340_v12, %v12249_v43  ;;  %v2168_v13 = vadd.f32 %v2167_v45, %v12003_v3  ;;  %v2169_v34 = vpop.f32.mrb[17].mxu0  ;;  %v2321_v7 = vpop.permute.xlu1 %2320  ;;  %v10459_v43 = vld [vmem:[%s14583_s3 + $0x188] ss:$12 sps:$4 sm:$0xff]   ;;  %v10489_v12 = vld [vmem:[%s14583_s3 + $0x218] ss:$12 sps:$4 sm:$0xff]  }
 0x2af   : > { %v2170_v51 = vadd.f32 %v2169_v34, %v12003_v3  ;;  %v2171_v52 = vpop.f32.mrb[18].mxu0  ;;  %v2339_v24 = vsel %vm572_vm3, %v2321_v7, %v2323_v21  ;;  %v10485_v21 = vld [vmem:[%s14583_s3 + $0x210] ss:$12 sps:$4 sm:$0xff]   ;;  %v10492_v45 = vld [vmem:[%s14583_s3 + $0x22c] ss:$12 sps:$4 sm:$0xff]  }
 0x2b0   : > { %3731 = vmatprep.mubr.bf16.mxu1 %v2357_v46  ;;  %3946 = vmatprep.mubr.bf16.mxu0 %v2357_v46  ;;  %v2279_v53 = vpop.permute.xlu0 %2278  ;;  %v2172_v56 = vadd.f32 %v2171_v52, %v12005_v36  ;;  %v2173_v8 = vpop.f32.mrb[19].mxu0  ;;  %v2356_v58 = vmax.bf16 %v2339_v24, %v12261_v47  ;;  %v2192_v48 = vmax.f32 %v2168_v13, 0.0  ;;  %v10493_v46 = vld [vmem:[%s14583_s3 + $0x2f0] ss:$12 sps:$4 sm:$0xff]  }
 0x2b1   : > { %v2290_v3 = vsel %vm446_vm0, %v12270_v44, %v2279_v53  ;;  %v2174_v18 = vadd.f32 %v2173_v8, %v12005_v36  ;;  %v2193_v47 = vmax.f32 %v2170_v51, 0.0  ;;  %v10460_v36 = vld [vmem:[%s14583_s3 + $0x198] ss:$12 sps:$4 sm:$0xff]   ;;  %v10490_v51 = vld [vmem:[%s14583_s3 + $0x228] ss:$12 sps:$4 sm:$0xff]  }
 0x2b2   : > { %v12333_v60 = vmax.bf16 %v2290_v3, %v12075_v35  ;;  %v2210_v63 = vmax.f32 %v2172_v56, 0.0  ;;  %v12338_v1 = vpop.permute.xlu1 %2280  ;;  %3732 = vmatmul.mubr.bf16.vlgmr.msra.gmra.mrb[16].mxu1 %v2356_v58  ;;  %3947 = vmatmul.mubr.bf16.vlgmr.msra.gmra.mrb[20].mxu0 %v2356_v58  ;;  %v10464_v35 = vld [vmem:[%s14583_s3 + $0x1a0] ss:$12 sps:$4 sm:$0xff]   ;;  %v10494_v52 = vld [vmem:[%s14583_s3 + $0x230] ss:$12 sps:$4 sm:$0xff]  }
 0x2b3   : > { %v2211_v44 = vmax.f32 %v2174_v18, 0.0  ;;  %v2291_v4 = vsel %vm446_vm0, %v2279_v53, %v12338_v1  ;;  %3743 = vmatpush1.bf16.msra.mxu1 %v10455_v55  ;;  %9861 = vmatpush3.bf16.msra.mxu0 %v10459_v43  ;;  %v10497_v53 = vld [vmem:[%s14583_s3 + $0x244] ss:$12 sps:$4 sm:$0xff]   ;;  %v10540_v56 = vld [vmem:[%s14583_s3 + $0x3c8] ss:$12 sps:$4 sm:$0xff]  }
 0x2b4   : > { %v12348_v5 = vpack.c.bf16 %v2210_v63, %v2192_v48  ;;  %v12351_v38 = vmax.bf16 %v2291_v4, %v12127_v39  ;;  %2330 = vrot.lane.b32.xlu1 %v12333_v60, %s14625_s30  ;;  %3744 = vmatprep.subr.bf16.mxu1 %v10462_v40  ;;  %v10465_v39 = vld [vmem:[%s14583_s3 + $0x1b0] ss:$12 sps:$4 sm:$0xff]   ;;  %v10544_v3 = vld [vmem:[%s14583_s3 + $0x308] ss:$12 sps:$4 sm:$0xff]   ;;  %v10549_v18 = vld [vmem:[%s14583_s3 + $0x320] ss:$12 sps:$4 sm:$0xff]  }
 0x2b5   : > { %v12358_v59 = vpack.c.bf16 %v2211_v44, %v2193_v47  ;;  %9862 = vmatprep.subr.bf16.mxu0 %v10463_v62  ;;  %v10503_v62 = vld [vmem:[%s14583_s3 + $0x274] ss:$12 sps:$4 sm:$0xff]   ;;  %v10550_v48 = vld [vmem:[%s14583_s3 + $0x3f8] ss:$12 sps:$4 sm:$0xff]   ;;  %v10501_v63 = vld [vmem:[%s14583_s3 + $0x270] ss:$12 sps:$4 sm:$0xff]  }
 0x2b6   : > { %2332 = vrot.lane.b32.xlu0 %v12351_v38, %s14625_s30  ;;  %v10506_v47 = vld [vmem:[%s14583_s3 + $0x28c] ss:$12 sps:$4 sm:$0xff]   ;;  %v10555_v44 = vld [vmem:[%s14583_s3 + $0x410] ss:$12 sps:$4 sm:$0xff]   ;;  %v10504_v4 = vld [vmem:[%s14583_s3 + $0x288] ss:$12 sps:$4 sm:$0xff]  }
 0x2b7   : > { %3745 = vmatpush1.bf16.msra.mxu1 %v10460_v36  ;;  %9863 = vmatpush3.bf16.msra.mxu0 %v10464_v35  ;;  %v10559_v36 = vld [vmem:[%s14583_s3 + $0x350] ss:$12 sps:$4 sm:$0xff]  }
 0x2b8   : > { %4146 = vrot.lane.b32.xlu1 %v12292_v6, %s14626_s12  ;;  %3746 = vmatprep.subr.bf16.mxu1 %v10467_v49  ;;  %v10509_v35 = vld [vmem:[%s14583_s3 + $0x2a4] ss:$12 sps:$4 sm:$0xff]   ;;  %v10560_v49 = vld [vmem:[%s14583_s3 + $0x428] ss:$12 sps:$4 sm:$0xff]  }
 0x2b9   : > { %9864 = vmatprep.subr.bf16.mxu0 %v10468_v32  ;;  %v10507_v32 = vld [vmem:[%s14583_s3 + $0x2a0] ss:$12 sps:$4 sm:$0xff]  }
 0x2ba   : > { %4148 = vrot.lane.b32.xlu0 %v12295_v11, %s14626_s12 }
 0x2bb   : > { %3747 = vmatpush1.bf16.msra.mxu1 %v10465_v39  ;;  %9865 = vmatpush3.bf16.msra.mxu0 %v10469_v9  ;;  %v10564_v39 = vld [vmem:[%s14583_s3 + $0x368] ss:$12 sps:$4 sm:$0xff]  }
 0x2bc   : > { %3748 = vmatprep.subr.bf16.mxu1 %v10472_v54  ;;  %9866 = vmatprep.subr.bf16.mxu0 %v10473_v14  ;;  %v10512_v9 = vld [vmem:[%s14583_s3 + $0x2bc] ss:$12 sps:$4 sm:$0xff]   ;;  %v10565_v54 = vld [vmem:[%s14583_s3 + $0x440] ss:$12 sps:$4 sm:$0xff]   ;;  %v10510_v14 = vld [vmem:[%s14583_s3 + $0x2b8] ss:$12 sps:$4 sm:$0xff]  }
 0x2bf   : > { %3749 = vmatpush1.bf16.msra.mxu1 %v10470_v17  ;;  %9867 = vmatpush3.bf16.msra.mxu0 %v10474_v0  ;;  %v10569_v17 = vld [vmem:[%s14583_s3 + $0x380] ss:$12 sps:$4 sm:$0xff]  }
 0x2c0   : > { %3750 = vmatprep.subr.bf16.mxu1 %v10477_v61  ;;  %9868 = vmatprep.subr.bf16.mxu0 %v10478_v41  ;;  %v10515_v0 = vld [vmem:[%s14583_s3 + $0x2d4] ss:$12 sps:$4 sm:$0xff]   ;;  %v10570_v61 = vld [vmem:[%s14583_s3 + $0x458] ss:$12 sps:$4 sm:$0xff]   ;;  %v10513_v41 = vld [vmem:[%s14583_s3 + $0x2d0] ss:$12 sps:$4 sm:$0xff]  }
 0x2c3   : > { %3751 = vmatpush1.bf16.msra.mxu1 %v10475_v22  ;;  %9869 = vmatpush3.bf16.msra.mxu0 %v10479_v23  ;;  %v10574_v22 = vld [vmem:[%s14583_s3 + $0x398] ss:$12 sps:$4 sm:$0xff]  }
 0x2c4   : > { %3752 = vmatprep.subr.bf16.mxu1 %v10482_v25  ;;  %9870 = vmatprep.subr.bf16.mxu0 %v10483_v20  ;;  %v10518_v23 = vld [vmem:[%s14583_s3 + $0x2ec] ss:$12 sps:$4 sm:$0xff]   ;;  %v10575_v25 = vld [vmem:[%s14583_s3 + $0x470] ss:$12 sps:$4 sm:$0xff]   ;;  %v10516_v20 = vld [vmem:[%s14583_s3 + $0x2e8] ss:$12 sps:$4 sm:$0xff]  }
 0x2c7   : > { %3753 = vmatpush1.bf16.msra.mxu1 %v10480_v42  ;;  %9871 = vmatpush3.bf16.msra.mxu0 %v10484_v28  ;;  %v10579_v42 = vld [vmem:[%s14583_s3 + $0x3b0] ss:$12 sps:$4 sm:$0xff]  }
 0x2c8   : > { %3754 = vmatprep.subr.bf16.mxu1 %v10487_v30  ;;  %9872 = vmatprep.subr.bf16.mxu0 %v10488_v2  ;;  %v10521_v28 = vld [vmem:[%s14583_s3 + $0x304] ss:$12 sps:$4 sm:$0xff]   ;;  %v10580_v30 = vld [vmem:[%s14583_s3 + $0x548] ss:$12 sps:$4 sm:$0xff]   ;;  %v10519_v2 = vld [vmem:[%s14583_s3 + $0x300] ss:$12 sps:$4 sm:$0xff]  }
 0x2c9   : > { %v2327_v13 = vpop.permute.xlu0 %2326 }
 0x2ca   : > { %v12429_v34 = vpop.permute.xlu1 %2328  ;;  %v2341_v55 = vsel %vm572_vm3, %v12310_v57, %v2327_v13  ;;  %v10495_v57 = vld [vmem:[%s14583_s3 + $0x240] ss:$12 sps:$4 sm:$0xff]  }
 0x2cb   : > { %3755 = vmatpush1.bf16.msra.mxu1 %v10485_v21  ;;  %9873 = vmatpush3.bf16.msra.mxu0 %v10489_v12  ;;  %v2342_v7 = vsel %vm572_vm3, %v2327_v13, %v12429_v34  ;;  %v12463_v40 = vmax.bf16 %v2341_v55, %v12253_v29  ;;  %v10498_v29 = vld [vmem:[%s14583_s3 + $0x258] ss:$12 sps:$4 sm:$0xff]   ;;  %v10524_v21 = vld [vmem:[%s14583_s3 + $0x31c] ss:$12 sps:$4 sm:$0xff]   ;;  %v10539_v55 = vld [vmem:[%s14583_s3 + $0x394] ss:$12 sps:$4 sm:$0xff]  }
 0x2cc   : > { %3756 = vmatprep.subr.bf16.mxu1 %v10492_v45  ;;  %9874 = vmatprep.subr.bf16.mxu0 %v10493_v46  ;;  %v2359_v24 = vmax.bf16 %v2342_v7, %v12273_v50  ;;  %v10522_v12 = vld [vmem:[%s14583_s3 + $0x318] ss:$12 sps:$4 sm:$0xff]   ;;  %v10527_v45 = vld [vmem:[%s14583_s3 + $0x334] ss:$12 sps:$4 sm:$0xff]   ;;  %v10525_v46 = vld [vmem:[%s14583_s3 + $0x330] ss:$12 sps:$4 sm:$0xff]  }
 0x2cd   : > { %v2283_v43 = vpop.permute.xlu0 %2282  ;;  %v10530_v13 = vld [vmem:[%s14583_s3 + $0x34c] ss:$12 sps:$4 sm:$0xff]   ;;  %v10528_v7 = vld [vmem:[%s14583_s3 + $0x348] ss:$12 sps:$4 sm:$0xff]  }
 0x2ce   : > { %v2292_v8 = vsel %vm446_vm0, %v12338_v1, %v2283_v43  ;;  %v12451_v58 = vmax.bf16 %v2283_v43, %v12225_v19  ;;  %3774 = vmatprep.mubr.bf16.mxu1 %v2359_v24  ;;  %3987 = vmatprep.mubr.bf16.mxu0 %v2359_v24  ;;  %v10545_v19 = vld [vmem:[%s14583_s3 + $0x3e0] ss:$12 sps:$4 sm:$0xff]   ;;  %v10554_v1 = vld [vmem:[%s14583_s3 + $0x338] ss:$12 sps:$4 sm:$0xff]   ;;  %v10536_v24 = vld [vmem:[%s14583_s3 + $0x37c] ss:$12 sps:$4 sm:$0xff]  }
 0x2cf   : > { %3757 = vmatpush1.bf16.msra.mxu1 %v10490_v51  ;;  %9875 = vmatpush3.bf16.msra.mxu0 %v10494_v52  ;;  %v12454_v50 = vmax.bf16 %v2292_v8, %v12132_v15  ;;  %v10500_v15 = vld [vmem:[%s14583_s3 + $0x25c] ss:$12 sps:$4 sm:$0xff]   ;;  %v10533_v51 = vld [vmem:[%s14583_s3 + $0x364] ss:$12 sps:$4 sm:$0xff]   ;;  %v10531_v52 = vld [vmem:[%s14583_s3 + $0x360] ss:$12 sps:$4 sm:$0xff]  }
 0x2d0   : > { %3758 = vmatprep.subr.bf16.mxu1 %v10497_v53  ;;  %2336 = vrot.lane.b32.xlu0 %v12451_v58, %s14625_s30  ;;  %v10534_v53 = vld [vmem:[%s14583_s3 + $0x378] ss:$12 sps:$4 sm:$0xff]   ;;  %v10537_v43 = vld [vmem:[%s14583_s3 + $0x390] ss:$12 sps:$4 sm:$0xff]   ;;  %v10541_v8 = vld [vmem:[%s14583_s3 + $0x3a8] ss:$12 sps:$4 sm:$0xff]  }
 0x2d1   : > { %2334 = vrot.lane.b32.xlu1 %v12454_v50, %s14625_s30  ;;  %9882 = vmatprep.subr.bf16.mxu0 %v10540_v56  ;;  %v10543_v56 = vld [vmem:[%s14583_s3 + $0x3ac] ss:$12 sps:$4 sm:$0xff]  }
 0x2d2   : > { %3988 = vmatmul.mubr.bf16.vlgmr.msra.gmra.mrb[24].mxu0 %v12463_v40 }
 0x2d3   : > { %3759 = vmatpush1.bf16.msra.mxu1 %v10495_v57  ;;  %9883 = vmatpush3.bf16.msra.mxu0 %v10544_v3  ;;  %v10548_v57 = vld [vmem:[%s14583_s3 + $0x3c4] ss:$12 sps:$4 sm:$0xff]   ;;  %v10546_v3 = vld [vmem:[%s14583_s3 + $0x3c0] ss:$12 sps:$4 sm:$0xff]  }
 0x2d4   : > { %3760 = vmatprep.subr.bf16.mxu1 %v10500_v15  ;;  %4144 = vrot.lane.b32.xlu0 %v12233_v26, %s14626_s12  ;;  %v10551_v15 = vld [vmem:[%s14583_s3 + $0x3d8] ss:$12 sps:$4 sm:$0xff]  }
 0x2d5   : > { %4150 = vrot.lane.b32.xlu1 %v12298_v33, %s14626_s12  ;;  %9884 = vmatprep.subr.bf16.mxu0 %v10545_v19  ;;  %v10558_v19 = vld [vmem:[%s14583_s3 + $0x3f4] ss:$12 sps:$4 sm:$0xff]  }
 0x2d7   : > { %3761 = vmatpush1.bf16.msra.mxu1 %v10498_v29  ;;  %9885 = vmatpush3.bf16.msra.mxu0 %v10549_v18  ;;  %v10556_v29 = vld [vmem:[%s14583_s3 + $0x3f0] ss:$12 sps:$4 sm:$0xff]   ;;  %v10563_v18 = vld [vmem:[%s14583_s3 + $0x40c] ss:$12 sps:$4 sm:$0xff]  }
 0x2d8   : > { %3762 = vmatprep.subr.bf16.mxu1 %v10503_v62  ;;  %9886 = vmatprep.subr.bf16.mxu0 %v10550_v48  ;;  %v10561_v62 = vld [vmem:[%s14583_s3 + $0x408] ss:$12 sps:$4 sm:$0xff]   ;;  %v10568_v48 = vld [vmem:[%s14583_s3 + $0x424] ss:$12 sps:$4 sm:$0xff]  }
 0x2db   : > { %3763 = vmatpush1.bf16.msra.mxu1 %v10501_v63  ;;  %9887 = vmatpush3.bf16.msra.mxu0 %v10554_v1  ;;  %v10566_v63 = vld [vmem:[%s14583_s3 + $0x420] ss:$12 sps:$4 sm:$0xff]   ;;  %v10573_v1 = vld [vmem:[%s14583_s3 + $0x43c] ss:$12 sps:$4 sm:$0xff]  }
 0x2dc   : > { %3764 = vmatprep.subr.bf16.mxu1 %v10506_v47  ;;  %9888 = vmatprep.subr.bf16.mxu0 %v10555_v44  ;;  %v10571_v47 = vld [vmem:[%s14583_s3 + $0x438] ss:$12 sps:$4 sm:$0xff]   ;;  %v10578_v44 = vld [vmem:[%s14583_s3 + $0x454] ss:$12 sps:$4 sm:$0xff]  }
 0x2df   : > { %3765 = vmatpush1.bf16.msra.mxu1 %v10504_v4  ;;  %9889 = vmatpush3.bf16.msra.mxu0 %v10559_v36  ;;  %v10576_v36 = vld [vmem:[%s14583_s3 + $0x450] ss:$12 sps:$4 sm:$0xff]  }
 0x2e0   : > { %3766 = vmatprep.subr.bf16.mxu1 %v10509_v35  ;;  %9890 = vmatprep.subr.bf16.mxu0 %v10560_v49 }
 0x2e3   : > { %3767 = vmatpush1.bf16.msra.mxu1 %v10507_v32  ;;  %9891 = vmatpush3.bf16.msra.mxu0 %v10564_v39  ;;  %v10583_v39 = vld [vmem:[%s14583_s3 + $0x46c] ss:$12 sps:$4 sm:$0xff]  }
 0x2e4   : > { %3768 = vmatprep.subr.bf16.mxu1 %v10512_v9  ;;  %9892 = vmatprep.subr.bf16.mxu0 %v10565_v54  ;;  %v10584_v54 = vld [vmem:[%s14583_s3 + $0x488] ss:$12 sps:$4 sm:$0xff]  }
 0x2e7   : > { %3769 = vmatpush1.bf16.msra.mxu1 %v10510_v14  ;;  %9893 = vmatpush3.bf16.msra.mxu0 %v10569_v17  ;;  %v10585_v17 = vld [vmem:[%s14583_s3 + $0x560] ss:$12 sps:$4 sm:$0xff]  }
 0x2e8   : > { %3770 = vmatprep.subr.bf16.mxu1 %v10515_v0  ;;  %9894 = vmatprep.subr.bf16.mxu0 %v10570_v61  ;;  %v10588_v61 = vld [vmem:[%s14583_s3 + $0x484] ss:$12 sps:$4 sm:$0xff]  }
 0x2eb   : > { %3771 = vmatpush1.bf16.msra.mxu1 %v10513_v41  ;;  %9895 = vmatpush3.bf16.msra.mxu0 %v10574_v22  ;;  %v10589_v22 = vld [vmem:[%s14583_s3 + $0x4a0] ss:$12 sps:$4 sm:$0xff]  }
 0x2ec   : > { %3772 = vmatprep.subr.bf16.mxu1 %v10518_v23  ;;  %9896 = vmatprep.subr.bf16.mxu0 %v10575_v25  ;;  %v10586_v23 = vld [vmem:[%s14583_s3 + $0x480] ss:$12 sps:$4 sm:$0xff]   ;;  %v10590_v25 = vld [vmem:[%s14583_s3 + $0x578] ss:$12 sps:$4 sm:$0xff]  }
 0x2ef   : > { %3773 = vmatpush1.bf16.msra.mxu1 %v10516_v20  ;;  %9897 = vmatpush3.bf16.msra.mxu0 %v10579_v42  ;;  %v10594_v20 = vld [vmem:[%s14583_s3 + $0x4b8] ss:$12 sps:$4 sm:$0xff]  }
 0x2f0   : > { %3785 = vmatprep.subr.bf16.mxu1 %v10521_v28  ;;  %9904 = vmatprep.subr.bf16.mxu0 %v10580_v30  ;;  %v10591_v42 = vld [vmem:[%s14583_s3 + $0x498] ss:$12 sps:$4 sm:$0xff]   ;;  %v10595_v28 = vld [vmem:[%s14583_s3 + $0x590] ss:$12 sps:$4 sm:$0xff]   ;;  %v10598_v30 = vld [vmem:[%s14583_s3 + $0x4b4] ss:$12 sps:$4 sm:$0xff]  }
 0x2f2   : > { %3775 = vmatmul.mubr.bf16.vlgmr.msra.gmra.mrb[16].mxu1 %v12463_v40  ;;  %v10553_v40 = vld [vmem:[%s14583_s3 + $0x3dc] ss:$12 sps:$4 sm:$0xff]  }
 0x2f3   : > { %3786 = vmatpush1.bf16.msra.mxu1 %v10519_v2  ;;  %v10599_v2 = vld [vmem:[%s14583_s3 + $0x4d0] ss:$12 sps:$4 sm:$0xff]  }
 0x2f4   : > { %3787 = vmatprep.subr.bf16.mxu1 %v10524_v21  ;;  %v10596_v21 = vld [vmem:[%s14583_s3 + $0x4b0] ss:$12 sps:$4 sm:$0xff]  }
 0x2f7   : > { %3788 = vmatpush1.bf16.msra.mxu1 %v10522_v12  ;;  %v10600_v12 = vld [vmem:[%s14583_s3 + $0x5a8] ss:$12 sps:$4 sm:$0xff]  }
 0x2f8   : > { %3789 = vmatprep.subr.bf16.mxu1 %v10527_v45  ;;  %v10603_v45 = vld [vmem:[%s14583_s3 + $0x4cc] ss:$12 sps:$4 sm:$0xff]  }
 0x2fb   : > { %3790 = vmatpush1.bf16.msra.mxu1 %v10525_v46  ;;  %v10604_v46 = vld [vmem:[%s14583_s3 + $0x4e8] ss:$12 sps:$4 sm:$0xff]  }
 0x2fc   : > { %3791 = vmatprep.subr.bf16.mxu1 %v10530_v13  ;;  %v10601_v13 = vld [vmem:[%s14583_s3 + $0x4c8] ss:$12 sps:$4 sm:$0xff]  }
 0x2ff   : > { %3792 = vmatpush1.bf16.msra.mxu1 %v10528_v7  ;;  %v10605_v7 = vld [vmem:[%s14583_s3 + $0x5c0] ss:$12 sps:$4 sm:$0xff]  }
 0x300   : > { %3793 = vmatprep.subr.bf16.mxu1 %v10533_v51  ;;  %v10608_v51 = vld [vmem:[%s14583_s3 + $0x4e4] ss:$12 sps:$4 sm:$0xff]  }
 0x303   : > { %3794 = vmatpush1.bf16.msra.mxu1 %v10531_v52  ;;  %v10609_v52 = vld [vmem:[%s14583_s3 + $0x500] ss:$12 sps:$4 sm:$0xff]  }
 0x304   : > { %3795 = vmatprep.subr.bf16.mxu1 %v10536_v24  ;;  %v10606_v24 = vld [vmem:[%s14583_s3 + $0x4e0] ss:$12 sps:$4 sm:$0xff]  }
 0x307   : > { %3796 = vmatpush1.bf16.msra.mxu1 %v10534_v53  ;;  %v10610_v53 = vld [vmem:[%s14583_s3 + $0x5d8] ss:$12 sps:$4 sm:$0xff]  }
 0x308   : > { %3797 = vmatprep.subr.bf16.mxu1 %v10539_v55  ;;  %v10613_v55 = vld [vmem:[%s14583_s3 + $0x4fc] ss:$12 sps:$4 sm:$0xff]  }
 0x30b   : > { %3798 = vmatpush1.bf16.msra.mxu1 %v10537_v43 }
 0x30c   : > { %3799 = vmatprep.subr.bf16.mxu1 %v10543_v56  ;;  %v10614_v56 = vld [vmem:[%s14583_s3 + $0x518] ss:$12 sps:$4 sm:$0xff]  }
 0x30f   : > { %3800 = vmatpush1.bf16.msra.mxu1 %v10541_v8 }
 0x310   : > { %3801 = vmatprep.subr.bf16.mxu1 %v10548_v57  ;;  %v10611_v57 = vld [vmem:[%s14583_s3 + $0x4f8] ss:$12 sps:$4 sm:$0xff]  }
 0x313   : > { %3802 = vmatpush1.bf16.msra.mxu1 %v10546_v3 }
 0x314   : > { %3803 = vmatprep.subr.bf16.mxu1 %v10553_v40  ;;  %v10615_v40 = vld [vmem:[%s14583_s3 + $0x5f0] ss:$12 sps:$4 sm:$0xff]  }
 0x317   : > { %3804 = vmatpush1.bf16.msra.mxu1 %v10551_v15 }
 0x318   : > { %3805 = vmatprep.subr.bf16.mxu1 %v10558_v19  ;;  %v10618_v19 = vld [vmem:[%s14583_s3 + $0x514] ss:$12 sps:$4 sm:$0xff]  }
 0x31b   : > { %3806 = vmatpush1.bf16.msra.mxu1 %v10556_v29 }
 0x31c   : > { %3807 = vmatprep.subr.bf16.mxu1 %v10563_v18  ;;  %v10619_v18 = vld [vmem:[%s14583_s3 + $0x530] ss:$12 sps:$4 sm:$0xff]  }
 0x31f   : > { %3808 = vmatpush1.bf16.msra.mxu1 %v10561_v62 }
 0x320   : > { %3809 = vmatprep.subr.bf16.mxu1 %v10568_v48 }
 0x323   : > { %3810 = vmatpush1.bf16.msra.mxu1 %v10566_v63 }
 0x324   : > { %3811 = vmatprep.subr.bf16.mxu1 %v10573_v1 }
 0x326   : > { %v2331_v4 = vpop.permute.xlu1 %2330 }
 0x327   : > { %3812 = vmatpush1.bf16.msra.mxu1 %v10571_v47  ;;  %v2343_v35 = vsel %vm572_vm3, %v12429_v34, %v2331_v4  ;;  %v10581_v34 = vld [vmem:[%s14583_s3 + $0x468] ss:$12 sps:$4 sm:$0xff]  }
 0x328   : > { %v12654_v49 = vpop.permute.xlu0 %2332  ;;  %3813 = vmatprep.subr.bf16.mxu1 %v10578_v44  ;;  %v2360_v14 = vmax.bf16 %v2343_v35, %v12278_v27  ;;  %v10622_v44 = vld [vmem:[%s14583_s3 + $0x52c] ss:$12 sps:$4 sm:$0xff]  }
 0x329   : > { %v2344_v32 = vsel %vm572_vm3, %v2331_v4, %v12654_v49  ;;  %v10657_v4 = vld [vmem:[%s14583_s3 + $0x4] ss:$12 sps:$4 sm:$0xff]  }
 0x32a   : > { %v2361_v9 = vmax.bf16 %v2344_v32, %v12333_v60  ;;  %v12672_v0 = vpop.permute.xlu1 %4146  ;;  %v10660_v32 = vld [vmem:[%s14583_s3 + $0x1c] ss:$12 sps:$4 sm:$0xff]  }
 0x32b   : > { %3814 = vmatpush1.bf16.msra.mxu1 %v10576_v36 }
 0x32c   : > { %3817 = vmatprep.mubr.bf16.mxu1 %v2361_v9  ;;  %4028 = vmatprep.mubr.bf16.mxu0 %v2361_v9  ;;  %v12674_v60 = vpop.permute.xlu0 %4148  ;;  %v10663_v9 = vld [vmem:[%s14583_s3 + $0x34] ss:$12 sps:$4 sm:$0xff]  }
 0x32d   : > { %v4163_v27 = vsel %vm446_vm0, %v12672_v0, %v12674_v60  ;;  %3815 = vmatprep.subr.bf16.mxu1 %v10583_v39  ;;  %4029 = vmatmul.mubr.bf16.vlgmr.msra.gmra.mrb[28].mxu0 %v2360_v14  ;;  %v10623_v39 = vld [vmem:[%s14583_s3 + $0x540] ss:$12 sps:$4 sm:$0xff]  }
 0x32e   : > { %v12683_v41 = vmax.bf16 %v4163_v27, %v12292_v6  ;;  %9905 = vmatpush3.bf16.msra.mxu0 %v10584_v54  ;;  %v10593_v6 = vld [vmem:[%s14583_s3 + $0x49c] ss:$12 sps:$4 sm:$0xff]   ;;  %v10669_v27 = vld [vmem:[%s14583_s3 + $0x64] ss:$12 sps:$4 sm:$0xff]  }
 0x32f   : > { %3816 = vmatpush1.bf16.msra.mxu1 %v10581_v34  ;;  %9906 = vmatprep.subr.bf16.mxu0 %v10585_v17  ;;  %v10628_v54 = vld [vmem:[%s14583_s3 + $0x55c] ss:$12 sps:$4 sm:$0xff]   ;;  %v10626_v34 = vld [vmem:[%s14583_s3 + $0x558] ss:$12 sps:$4 sm:$0xff]  }
 0x330   : > { %4199 = vrot.lane.b32.xlu1 %v12683_v41, %s14625_s30  ;;  %3828 = vmatprep.subr.bf16.mxu1 %v10588_v61  ;;  %v10666_v17 = vld [vmem:[%s14583_s3 + $0x4c] ss:$12 sps:$4 sm:$0xff]   ;;  %v10629_v61 = vld [vmem:[%s14583_s3 + $0x570] ss:$12 sps:$4 sm:$0xff]  }
 0x332   : > { %3818 = vmatmul.mubr.bf16.vlgmr.msra.gmra.mrb[16].mxu1 %v2360_v14  ;;  %9907 = vmatpush3.bf16.msra.mxu0 %v10589_v22  ;;  %v10661_v14 = vld [vmem:[%s14583_s3 + $0x30] ss:$12 sps:$4 sm:$0xff]   ;;  %v10634_v22 = vld [vmem:[%s14583_s3 + $0x58c] ss:$12 sps:$4 sm:$0xff]  }
 0x333   : > { %3829 = vmatpush1.bf16.msra.mxu1 %v10586_v23  ;;  %9908 = vmatprep.subr.bf16.mxu0 %v10590_v25  ;;  %v10667_v23 = vld [vmem:[%s14583_s3 + $0x60] ss:$12 sps:$4 sm:$0xff]   ;;  %v10632_v25 = vld [vmem:[%s14583_s3 + $0x588] ss:$12 sps:$4 sm:$0xff]  }
 0x334   : > { %3830 = vmatprep.subr.bf16.mxu1 %v10593_v6  ;;  %v10672_v6 = vld [vmem:[%s14583_s3 + $0x7c] ss:$12 sps:$4 sm:$0xff]  }
 0x336   : > { %9909 = vmatpush3.bf16.msra.mxu0 %v10594_v20  ;;  %v10637_v20 = vld [vmem:[%s14583_s3 + $0x5a4] ss:$12 sps:$4 sm:$0xff]  }
 0x337   : > { %3831 = vmatpush1.bf16.msra.mxu1 %v10591_v42  ;;  %9910 = vmatprep.subr.bf16.mxu0 %v10595_v28  ;;  %v10670_v42 = vld [vmem:[%s14583_s3 + $0x78] ss:$12 sps:$4 sm:$0xff]   ;;  %v10635_v28 = vld [vmem:[%s14583_s3 + $0x5a0] ss:$12 sps:$4 sm:$0xff]  }
 0x338   : > { %3832 = vmatprep.subr.bf16.mxu1 %v10598_v30  ;;  %v10675_v30 = vld [vmem:[%s14583_s3 + $0x94] ss:$12 sps:$4 sm:$0xff]  }
 0x33a   : > { %9911 = vmatpush3.bf16.msra.mxu0 %v10599_v2  ;;  %v10640_v2 = vld [vmem:[%s14583_s3 + $0x5bc] ss:$12 sps:$4 sm:$0xff]  }
 0x33b   : > { %3833 = vmatpush1.bf16.msra.mxu1 %v10596_v21  ;;  %9912 = vmatprep.subr.bf16.mxu0 %v10600_v12  ;;  %v10673_v21 = vld [vmem:[%s14583_s3 + $0x90] ss:$12 sps:$4 sm:$0xff]   ;;  %v10638_v12 = vld [vmem:[%s14583_s3 + $0x5b8] ss:$12 sps:$4 sm:$0xff]  }
 0x33c   : > { %3834 = vmatprep.subr.bf16.mxu1 %v10603_v45  ;;  %v10678_v45 = vld [vmem:[%s14583_s3 + $0xac] ss:$12 sps:$4 sm:$0xff]  }
 0x33e   : > { %9913 = vmatpush3.bf16.msra.mxu0 %v10604_v46  ;;  %v10643_v46 = vld [vmem:[%s14583_s3 + $0x5d4] ss:$12 sps:$4 sm:$0xff]  }
 0x33f   : > { %3835 = vmatpush1.bf16.msra.mxu1 %v10601_v13  ;;  %9914 = vmatprep.subr.bf16.mxu0 %v10605_v7  ;;  %v10676_v13 = vld [vmem:[%s14583_s3 + $0xa8] ss:$12 sps:$4 sm:$0xff]   ;;  %v10641_v7 = vld [vmem:[%s14583_s3 + $0x5d0] ss:$12 sps:$4 sm:$0xff]  }
 0x340   : > { %3836 = vmatprep.subr.bf16.mxu1 %v10608_v51  ;;  %v10681_v51 = vld [vmem:[%s14583_s3 + $0xc4] ss:$12 sps:$4 sm:$0xff]  }
 0x342   : > { %9915 = vmatpush3.bf16.msra.mxu0 %v10609_v52  ;;  %v12747_v43 = vpop.permute.xlu0 %2336  ;;  %v10646_v52 = vld [vmem:[%s14583_s3 + $0x5ec] ss:$12 sps:$4 sm:$0xff]  }
 0x343   : > { %3837 = vmatpush1.bf16.msra.mxu1 %v10606_v24  ;;  %v2335_v8 = vpop.permute.xlu1 %2334  ;;  %9916 = vmatprep.subr.bf16.mxu0 %v10610_v53  ;;  %v11181_v24 = vmov 65535  }
 0x344   : > { %v2346_v3 = vsel %vm572_vm3, %v2335_v8, %v12747_v43  ;;  %3838 = vmatprep.subr.bf16.mxu1 %v10613_v55  ;;  %v2345_v63 = vsel %vm572_vm3, %v12654_v49, %v2335_v8  ;;  %v10625_v49 = vld [vmem:[%s14583_s3 + $0x544] ss:$12 sps:$4 sm:$0xff]   ;;  %v3688_v53 = vsel %vm3686_vm11, 4294967295, %v11181_v24  ;;  %v10679_v55 = vld [vmem:[%s14583_s3 + $0xc0] ss:$12 sps:$4 sm:$0xff]  }
 0x345   : > { %v2363_v15 = vmax.bf16 %v2346_v3, %v12454_v50  ;;  %v10616_v50 = vld [vmem:[%s14583_s3 + $0x510] ss:$12 sps:$4 sm:$0xff]   ;;  %v12797_v35 = vmax.bf16 %v2345_v63, %v12351_v38  ;;  %v10658_v38 = vld [vmem:[%s14583_s3 + $0x18] ss:$12 sps:$4 sm:$0xff]   ;;  %v10746_v24 = vld [vmem:[%s14583_s3 + $0x248] ss:$12 sps:$4 sm:$0xff]  }
 0x346   : > { %9917 = vmatpush3.bf16.msra.mxu0 %v10614_v56  ;;  %v4145_v29 = vpop.permute.xlu0 %4144  ;;  %v10644_v56 = vld [vmem:[%s14583_s3 + $0x5e8] ss:$12 sps:$4 sm:$0xff]  }
 0x347   : > { %3839 = vmatpush1.bf16.msra.mxu1 %v10611_v57  ;;  %v4162_v62 = vsel %vm446_vm0, %v4145_v29, %v12672_v0  ;;  %v12769_v48 = vpop.permute.xlu1 %4150  ;;  %3860 = vmatprep.mubr.bf16.mxu1 %v2363_v15  ;;  %v10631_v0 = vld [vmem:[%s14583_s3 + $0x574] ss:$12 sps:$4 sm:$0xff]   ;;  %v10686_v8 = vld [vmem:[%s14583_s3 + $0xdc] ss:$12 sps:$4 sm:$0xff]   ;;  %v10649_v57 = vld [vmem:[%s14583_s3 + $0x604] ss:$12 sps:$4 sm:$0xff]  }
 0x348   : > { %v12777_v1 = vmax.bf16 %v4162_v62, %v12233_v26  ;;  %v4164_v47 = vsel %vm446_vm0, %v12674_v60, %v12769_v48  ;;  %9918 = vmatprep.subr.bf16.mxu0 %v10615_v40  ;;  %4069 = vmatprep.mubr.bf16.mxu0 %v2363_v15  ;;  %v10655_v26 = vld [vmem:[%s14583_s3] ss:$12 sps:$4 sm:$0xff]   ;;  %v10664_v60 = vld [vmem:[%s14583_s3 + $0x48] ss:$12 sps:$4 sm:$0xff]   ;;  %v12914_v40 = vsel %vm3687_vm12, %v3688_v53, 0 }
 0x349   : > { %v12789_v36 = vmax.bf16 %v4164_v47, %v12295_v11  ;;  %3840 = vmatprep.subr.bf16.mxu1 %v10618_v19  ;;  %v10620_v11 = vld [vmem:[%s14583_s3 + $0x528] ss:$12 sps:$4 sm:$0xff]   ;;  %v10684_v15 = vld [vmem:[%s14583_s3 + $0xd8] ss:$12 sps:$4 sm:$0xff]   ;;  %v10647_v19 = vld [vmem:[%s14583_s3 + $0x600] ss:$12 sps:$4 sm:$0xff]  }
 0x34a   : > { %9919 = vmatpush3.bf16.msra.mxu0 %v10619_v18  ;;  %4197 = vrot.lane.b32.xlu1 %v12777_v1, %s14625_s30  ;;  %v10652_v3 = vld [vmem:[%s14583_s3 + $0x61c] ss:$12 sps:$4 sm:$0x3f]   ;;  %v10650_v29 = vld [vmem:[%s14583_s3 + $0x618] ss:$12 sps:$4 sm:$0x3f]  }
 0x34b   : > { %3841 = vmatpush1.bf16.msra.mxu1 %v10616_v50  ;;  %4201 = vrot.lane.b32.xlu0 %v12789_v36, %s14625_s30  ;;  %v3694_v18 = vand.u32 %v10652_v3, %v12914_v40  ;;  %v10691_v62 = vld [vmem:[%s14583_s3 + $0xf4] ss:$12 sps:$4 sm:$0xff]   ;;  %v10689_v50 = vld [vmem:[%s14583_s3 + $0xf0] ss:$12 sps:$4 sm:$0xff]   ;;  %v3691_v63 = vand.u32 %v10650_v29, %v12914_v40  ;;  %v10696_v47 = vld [vmem:[%s14583_s3 + $0x10c] ss:$12 sps:$4 sm:$0xff]  }
 0x34c   : > { %3842 = vmatprep.subr.bf16.mxu1 %v10622_v44  ;;  %5570 = vmatprep.subr.bf16.mxu0 %v10657_v4  ;;  %v10694_v44 = vld [vmem:[%s14583_s3 + $0x108] ss:$12 sps:$4 sm:$0xff]   ;;  %v10701_v4 = vld [vmem:[%s14583_s3 + $0x124] ss:$12 sps:$4 sm:$0xff]  }
 0x34d   : > { %4070 = vmatmul.mubr.bf16.vlgmr.msra.gmra.mrb[32].mxu0 %v12797_v35 }
 0x34e   : > { %4154 = vrot.lane.b32.xlu1 %v12306_v31, %s14626_s12  ;;  %5571 = vmatpush1.bf16.msra.mxu0 %v10655_v26  ;;  %v11182_v26 = vmov 0.0  }
 0x34f   : > { %3843 = vmatpush1.bf16.msra.mxu1 %v10620_v11  ;;  %4152 = vrot.lane.b32.xlu0 %v12300_v16, %s14626_s12  ;;  %v10653_v11 = vld [vmem:[%s14583_s3 + $0x608] ss:$12 sps:$4 sm:$0xff]  }
 0x350   : > { %3844 = vmatprep.subr.bf16.mxu1 %v10625_v49  ;;  %5572 = vmatprep.subr.bf16.mxu0 %v10660_v32  ;;  %v10654_v49 = vld [vmem:[%s14583_s3 + $0x620] ss:$12 sps:$4 sm:$0x3f]   ;;  %v2364_v32 = vmax.bf16 %v12747_v43, %v12451_v58  ;;  %v10682_v43 = vld [vmem:[%s14583_s3 + $0xc8] ss:$12 sps:$4 sm:$0xff]  }
 0x351   : > { %v10711_v58 = vld [vmem:[%s14583_s3 + $0x154] ss:$12 sps:$4 sm:$0xff]  }
 0x352   : > { %5573 = vmatpush1.bf16.msra.mxu0 %v10658_v38  ;;  %v10706_v38 = vld [vmem:[%s14583_s3 + $0x13c] ss:$12 sps:$4 sm:$0xff]  }
 0x353   : > { %3845 = vmatpush1.bf16.msra.mxu1 %v10623_v39  ;;  %5574 = vmatprep.subr.bf16.mxu0 %v10663_v9  ;;  %v10704_v39 = vld [vmem:[%s14583_s3 + $0x138] ss:$12 sps:$4 sm:$0xff]   ;;  %v3697_v9 = vand.u32 %v10654_v49, %v12914_v40  ;;  %v10724_v49 = vld [vmem:[%s14583_s3 + $0x19c] ss:$12 sps:$4 sm:$0xff]  }
 0x354   : > { %3846 = vmatprep.subr.bf16.mxu1 %v10628_v54  ;;  %v10709_v54 = vld [vmem:[%s14583_s3 + $0x150] ss:$12 sps:$4 sm:$0xff]  }
 0x356   : > { %5575 = vmatpush1.bf16.msra.mxu0 %v10661_v14  ;;  %v10683_v14 = vld [vmem:[%s14583_s3 + $0x8] ss:$12 sps:$4 sm:$0xff]  }
 0x357   : > { %3847 = vmatpush1.bf16.msra.mxu1 %v10626_v34  ;;  %5576 = vmatprep.subr.bf16.mxu0 %v10666_v17  ;;  %v10716_v34 = vld [vmem:[%s14583_s3 + $0x16c] ss:$12 sps:$4 sm:$0xff]  }
 0x358   : > { %3848 = vmatprep.subr.bf16.mxu1 %v10631_v0  ;;  %v10687_v17 = vld [vmem:[%s14583_s3 + $0xe0] ss:$12 sps:$4 sm:$0xff]  }
 0x35a   : > { %5577 = vmatpush1.bf16.msra.mxu0 %v10664_v60 }
 0x35b   : > { %3849 = vmatpush1.bf16.msra.mxu1 %v10629_v61  ;;  %5578 = vmatprep.subr.bf16.mxu0 %v10669_v27  ;;  %v10714_v61 = vld [vmem:[%s14583_s3 + $0x168] ss:$12 sps:$4 sm:$0xff]  }
 0x35c   : > { %3850 = vmatprep.subr.bf16.mxu1 %v10634_v22 }
 0x35e   : > { %5579 = vmatpush1.bf16.msra.mxu0 %v10667_v23  ;;  %v10688_v23 = vld [vmem:[%s14583_s3 + $0x20] ss:$12 sps:$4 sm:$0xff]  }
 0x35f   : > { %3851 = vmatpush1.bf16.msra.mxu1 %v10632_v25  ;;  %5580 = vmatprep.subr.bf16.mxu0 %v10672_v6  ;;  %v10721_v25 = vld [vmem:[%s14583_s3 + $0x184] ss:$12 sps:$4 sm:$0xff]  }
 0x360   : > { %3852 = vmatprep.subr.bf16.mxu1 %v10637_v20  ;;  %v10692_v20 = vld [vmem:[%s14583_s3 + $0xf8] ss:$12 sps:$4 sm:$0xff]  }
 0x362   : > { %5581 = vmatpush1.bf16.msra.mxu0 %v10670_v42 }
 0x363   : > { %3853 = vmatpush1.bf16.msra.mxu1 %v10635_v28  ;;  %5582 = vmatprep.subr.bf16.mxu0 %v10675_v30  ;;  %v10693_v28 = vld [vmem:[%s14583_s3 + $0x38] ss:$12 sps:$4 sm:$0xff]   ;;  %v10697_v30 = vld [vmem:[%s14583_s3 + $0x110] ss:$12 sps:$4 sm:$0xff]  }
 0x364   : > { %3854 = vmatprep.subr.bf16.mxu1 %v10640_v2  ;;  %v10698_v2 = vld [vmem:[%s14583_s3 + $0x50] ss:$12 sps:$4 sm:$0xff]  }
 0x366   : > { %5583 = vmatpush1.bf16.msra.mxu0 %v10673_v21  ;;  %v10702_v21 = vld [vmem:[%s14583_s3 + $0x128] ss:$12 sps:$4 sm:$0xff]  }
 0x367   : > { %3855 = vmatpush1.bf16.msra.mxu1 %v10638_v12  ;;  %5584 = vmatprep.subr.bf16.mxu0 %v10678_v45  ;;  %v10703_v12 = vld [vmem:[%s14583_s3 + $0x68] ss:$12 sps:$4 sm:$0xff]   ;;  %v10707_v45 = vld [vmem:[%s14583_s3 + $0x140] ss:$12 sps:$4 sm:$0xff]  }
 0x368   : > { %3856 = vmatprep.subr.bf16.mxu1 %v10643_v46  ;;  %v10708_v46 = vld [vmem:[%s14583_s3 + $0x80] ss:$12 sps:$4 sm:$0xff]  }
 0x36a   : > { %5585 = vmatpush1.bf16.msra.mxu0 %v10676_v13  ;;  %v10712_v13 = vld [vmem:[%s14583_s3 + $0x158] ss:$12 sps:$4 sm:$0xff]  }
 0x36b   : > { %3857 = vmatpush1.bf16.msra.mxu1 %v10641_v7  ;;  %5586 = vmatprep.subr.bf16.mxu0 %v10681_v51  ;;  %v10713_v7 = vld [vmem:[%s14583_s3 + $0x98] ss:$12 sps:$4 sm:$0xff]   ;;  %v10717_v51 = vld [vmem:[%s14583_s3 + $0x170] ss:$12 sps:$4 sm:$0xff]  }
 0x36c   : > { %3858 = vmatprep.subr.bf16.mxu1 %v10646_v52  ;;  %v10718_v52 = vld [vmem:[%s14583_s3 + $0xb0] ss:$12 sps:$4 sm:$0xff]  }
 0x36e   : > { %5587 = vmatpush1.bf16.msra.mxu0 %v10679_v55 }
 0x36f   : > { %3859 = vmatpush1.bf16.msra.mxu1 %v10644_v56  ;;  %5588 = vmatprep.subr.bf16.mxu0 %v10686_v8 }
 0x370   : > { %3871 = vmatprep.subr.bf16.mxu1 %v10649_v57 }
 0x372   : > { %3861 = vmatmul.mubr.bf16.vlgmr.msra.gmra.mrb[16].mxu1 %v12797_v35  ;;  %5589 = vmatpush1.bf16.msra.mxu0 %v10684_v15  ;;  %v10699_v35 = vld [vmem:[%s14583_s3 + $0x120] ss:$12 sps:$4 sm:$0xff]  }
 0x373   : > { %3872 = vmatpush1.bf16.msra.mxu1 %v10647_v19  ;;  %3903 = vmatprep.mubr.bf16.mxu1 %v11179_v10 }
 0x374   : > { %3873 = vmatprep.subr.bf16.mxu1 %v3694_v18  ;;  %5590 = vmatprep.subr.bf16.mxu0 %v10691_v62 }
 0x376   : > { %5591 = vmatpush1.bf16.msra.mxu0 %v10689_v50 }
 0x377   : > { %3874 = vmatpush1.bf16.msra.mxu1 %v3691_v63  ;;  %5592 = vmatprep.subr.bf16.mxu0 %v10696_v47 }
 0x378   : > { %10261 = vmatprep.subr.bf16.mxu1 %v11182_v26 }
 0x37a   : > { %5593 = vmatpush1.bf16.msra.mxu0 %v10694_v44  ;;  %v10719_v44 = vld [vmem:[%s14583_s3 + $0x180] ss:$12 sps:$4 sm:$0xff]  }
 0x37b   : > { %5594 = vmatprep.subr.bf16.mxu0 %v10701_v4  ;;  %v10747_v4 = vld [vmem:[%s14583_s3 + $0x188] ss:$12 sps:$4 sm:$0xff]  }
 0x37e   : > { %9443 = vmatmul.mubr.msk.bf16.vlgmr.msra.gmra.mrb[16].mxu1 %vm3682_vm13, %v2364_v32  ;;  %5595 = vmatpush1.bf16.msra.mxu0 %v10699_v35 }
 0x37f   : > { %10262 = vmatpush3.bf16.msra.mxu1 %v10653_v11  ;;  %10265 = vmatprep.mubr.msk.bf16.mxu1 %vm11183_vm14, %v11182_v26 }
 0x380   : > { %10263 = vmatprep.subr.bf16.mxu1 %v11182_v26  ;;  %5596 = vmatprep.subr.bf16.mxu0 %v10706_v38 }
 0x382   : > { %5597 = vmatpush1.bf16.msra.mxu0 %v10704_v39 }
 0x383   : > { %10264 = vmatpush3.bf16.msra.mxu1 %v3697_v9  ;;  %5598 = vmatprep.subr.bf16.mxu0 %v10711_v58  ;;  %v10722_v58 = vld [vmem:[%s14583_s3 + $0x198] ss:$12 sps:$4 sm:$0xff]  }
 0x384   : > { %9929 = vmatprep.subr.bf16.mxu1 %v10682_v43  ;;  %v10727_v43 = vld [vmem:[%s14583_s3 + $0x1b4] ss:$12 sps:$4 sm:$0xff]  }
 0x385   : > { %v9854_v0 = vpop.f32.mrb[20].mxu0 }
 0x386   : > { %10266 = vmatmul.mubr.msk.bf16.vlgmr.msra.gmra.mrb[20].mxu1 %vm3682_vm13, %v2364_v32  ;;  %v9855_v60 = vpop.f32.mrb[21].mxu0  ;;  %5599 = vmatpush1.bf16.msra.mxu0 %v10709_v54  ;;  %v10757_v54 = vld [vmem:[%s14583_s3 + $0x1b8] ss:$12 sps:$4 sm:$0xff]  }
 0x387   : > { %v9856_v27 = vadd.f32 %v9855_v60, %v9854_v0  ;;  %v9857_v22 = vpop.f32.mrb[22].mxu0  ;;  %9930 = vmatpush3.bf16.msra.mxu1 %v10683_v14  ;;  %5600 = vmatprep.subr.bf16.mxu0 %v10716_v34  ;;  %v10730_v14 = vld [vmem:[%s14583_s3 + $0x1cc] ss:$12 sps:$4 sm:$0xff]   ;;  %v10761_v34 = vld [vmem:[%s14583_s3 + $0x290] ss:$12 sps:$4 sm:$0xff]  }
 0x388   : > { %v9858_v6 = vpop.f32.mrb[23].mxu0  ;;  %9931 = vmatprep.subr.bf16.mxu1 %v10687_v17  ;;  %v10728_v17 = vld [vmem:[%s14583_s3 + $0x1c8] ss:$12 sps:$4 sm:$0xff]   ;;  %v10762_v0 = vld [vmem:[%s14583_s3 + $0x1d0] ss:$12 sps:$4 sm:$0xff]  }
 0x389   : > { %v9859_v42 = vadd.f32 %v9858_v6, %v9857_v22  ;;  %v10733_v60 = vld [vmem:[%s14583_s3 + $0x1e4] ss:$12 sps:$4 sm:$0xff]   ;;  %v10767_v22 = vld [vmem:[%s14583_s3 + $0x1e8] ss:$12 sps:$4 sm:$0xff]  }
 0x38a   : > { %5601 = vmatpush1.bf16.msra.mxu0 %v10714_v61  ;;  %v10766_v61 = vld [vmem:[%s14583_s3 + $0x2a8] ss:$12 sps:$4 sm:$0xff]   ;;  %v10734_v6 = vld [vmem:[%s14583_s3 + $0x1f8] ss:$12 sps:$4 sm:$0xff]  }
 0x38b   : > { %9932 = vmatpush3.bf16.msra.mxu1 %v10688_v23  ;;  %5613 = vmatprep.subr.bf16.mxu0 %v10721_v25  ;;  %v10736_v23 = vld [vmem:[%s14583_s3 + $0x1fc] ss:$12 sps:$4 sm:$0xff]   ;;  %v10771_v25 = vld [vmem:[%s14583_s3 + $0x2c0] ss:$12 sps:$4 sm:$0xff]  }
 0x38c   : > { %9933 = vmatprep.subr.bf16.mxu1 %v10692_v20  ;;  %v10772_v20 = vld [vmem:[%s14583_s3 + $0x200] ss:$12 sps:$4 sm:$0xff]  }
 0x38f   : > { %9934 = vmatpush3.bf16.msra.mxu1 %v10693_v28  ;;  %v10776_v28 = vld [vmem:[%s14583_s3 + $0x2d8] ss:$12 sps:$4 sm:$0xff]  }
 0x390   : > { %9935 = vmatprep.subr.bf16.mxu1 %v10697_v30  ;;  %v10737_v30 = vld [vmem:[%s14583_s3 + $0x210] ss:$12 sps:$4 sm:$0xff]  }
 0x393   : > { %9936 = vmatpush3.bf16.msra.mxu1 %v10698_v2  ;;  %v10777_v2 = vld [vmem:[%s14583_s3 + $0x218] ss:$12 sps:$4 sm:$0xff]  }
 0x394   : > { %9937 = vmatprep.subr.bf16.mxu1 %v10702_v21  ;;  %v10742_v21 = vld [vmem:[%s14583_s3 + $0x22c] ss:$12 sps:$4 sm:$0xff]  }
 0x397   : > { %9938 = vmatpush3.bf16.msra.mxu1 %v10703_v12  ;;  %v10781_v12 = vld [vmem:[%s14583_s3 + $0x2f0] ss:$12 sps:$4 sm:$0xff]  }
 0x398   : > { %9939 = vmatprep.subr.bf16.mxu1 %v10707_v45  ;;  %v10740_v45 = vld [vmem:[%s14583_s3 + $0x228] ss:$12 sps:$4 sm:$0xff]  }
 0x39b   : > { %9940 = vmatpush3.bf16.msra.mxu1 %v10708_v46  ;;  %v10782_v46 = vld [vmem:[%s14583_s3 + $0x230] ss:$12 sps:$4 sm:$0xff]  }
 0x39c   : > { %9941 = vmatprep.subr.bf16.mxu1 %v10712_v13  ;;  %v10745_v13 = vld [vmem:[%s14583_s3 + $0x244] ss:$12 sps:$4 sm:$0xff]  }
 0x39f   : > { %9942 = vmatpush3.bf16.msra.mxu1 %v10713_v7  ;;  %v10743_v7 = vld [vmem:[%s14583_s3 + $0x240] ss:$12 sps:$4 sm:$0xff]  }
 0x3a0   : > { %9943 = vmatprep.subr.bf16.mxu1 %v10717_v51  ;;  %v10750_v51 = vld [vmem:[%s14583_s3 + $0x25c] ss:$12 sps:$4 sm:$0xff]  }
 0x3a2   : > { %v4200_v29 = vpop.permute.xlu1 %4199 }
 0x3a3   : > { %9944 = vmatpush3.bf16.msra.mxu1 %v10718_v52  ;;  %v10748_v52 = vld [vmem:[%s14583_s3 + $0x258] ss:$12 sps:$4 sm:$0xff]  }
 0x3a4   : > { %9951 = vmatprep.subr.bf16.mxu1 %v10746_v24  ;;  %v10755_v24 = vld [vmem:[%s14583_s3 + $0x274] ss:$12 sps:$4 sm:$0xff]  }
 0x3a5   : > { %v9876_v53 = vpop.f32.mrb[24].mxu0 }
 0x3a6   : > { %v9877_v55 = vpop.f32.mrb[25].mxu0 }
 0x3a7   : > { %v9878_v56 = vadd.f32 %v9877_v55, %v9876_v53  ;;  %v9879_v8 = vpop.f32.mrb[26].mxu0  ;;  %v10753_v53 = vld [vmem:[%s14583_s3 + $0x270] ss:$12 sps:$4 sm:$0xff]   ;;  %v10760_v55 = vld [vmem:[%s14583_s3 + $0x28c] ss:$12 sps:$4 sm:$0xff]  }
 0x3a8   : > { %v9880_v57 = vpop.f32.mrb[27].mxu0 }
 0x3a9   : > { %v13034_v3 = vadd.f32 %v9878_v56, %v9856_v27  ;;  %v9881_v15 = vadd.f32 %v9880_v57, %v9879_v8  ;;  %v10731_v27 = vld [vmem:[%s14583_s3 + $0x1e0] ss:$12 sps:$4 sm:$0xff]   ;;  %v10758_v56 = vld [vmem:[%s14583_s3 + $0x288] ss:$12 sps:$4 sm:$0xff]   ;;  %v10765_v8 = vld [vmem:[%s14583_s3 + $0x2a4] ss:$12 sps:$4 sm:$0xff]  }
 0x3aa   : > { %v10763_v57 = vld [vmem:[%s14583_s3 + $0x2a0] ss:$12 sps:$4 sm:$0xff]  }
 0x3ab   : > { %v13036_v19 = vadd.f32 %v9881_v15, %v9859_v42  ;;  %v10739_v42 = vld [vmem:[%s14583_s3 + $0x214] ss:$12 sps:$4 sm:$0xff]   ;;  %v10770_v15 = vld [vmem:[%s14583_s3 + $0x2bc] ss:$12 sps:$4 sm:$0xff]  }
 0x3bc   : > { %v4198_v18 = vpop.permute.xlu1 %4197 }
 0x3bd   : > { %v4215_v62 = vsel %vm572_vm3, %v4198_v18, %v4200_v29  ;;  %v13039_v50 = vpop.permute.xlu0 %4201  ;;  %v10775_v18 = vld [vmem:[%s14583_s3 + $0x2d4] ss:$12 sps:$4 sm:$0xff]  }
 0x3be   : > { %v4216_v63 = vsel %vm572_vm3, %v4200_v29, %v13039_v50  ;;  %v4232_v35 = vmax.bf16 %v4215_v62, %v12777_v1  ;;  %v10768_v29 = vld [vmem:[%s14583_s3 + $0x2b8] ss:$12 sps:$4 sm:$0xff]   ;;  %v10773_v62 = vld [vmem:[%s14583_s3 + $0x2d0] ss:$12 sps:$4 sm:$0xff]  }
 0x3bf   : > { %v4233_v47 = vmax.bf16 %v4216_v63, %v12683_v41  ;;  %v10751_v41 = vld [vmem:[%s14583_s3 + $0x260] ss:$12 sps:$4 sm:$0xff]  }
 0x3c0   : > { %v13051_v11 = vpop.permute.xlu1 %4154  ;;  %v10780_v63 = vld [vmem:[%s14583_s3 + $0x2ec] ss:$12 sps:$4 sm:$0xff]  }
 0x3c1   : > { %5602 = vmatprep.mubr.bf16.mxu0 %v4233_v47  ;;  %5817 = vmatprep.mubr.bf16.mxu1 %v4233_v47  ;;  %v4153_v32 = vpop.permute.xlu0 %4152  ;;  %v10778_v47 = vld [vmem:[%s14583_s3 + $0x2e8] ss:$12 sps:$4 sm:$0xff]  }
 0x3c2   : > { %v4165_v38 = vsel %vm446_vm0, %v12769_v48, %v4153_v32  ;;  %v4166_v39 = vsel %vm446_vm0, %v4153_v32, %v13051_v11  ;;  %5603 = vmatmul.mubr.bf16.vlgmr.msra.gmra.mrb[36].mxu0 %v4232_v35  ;;  %5818 = vmatmul.mubr.bf16.vlgmr.msra.gmra.mrb[24].mxu1 %v4232_v35  ;;  %v10752_v48 = vld [vmem:[%s14583_s3 + $0x1a0] ss:$12 sps:$4 sm:$0xff]  }
 0x3c3   : > { %v13064_v1 = vmax.bf16 %v4165_v38, %v12298_v33  ;;  %v13067_v9 = vmax.bf16 %v4166_v39, %v12300_v16  ;;  %5614 = vmatpush1.bf16.msra.mxu0 %v10719_v44  ;;  %9952 = vmatpush3.bf16.msra.mxu1 %v10747_v4  ;;  %v10756_v33 = vld [vmem:[%s14583_s3 + $0x278] ss:$12 sps:$4 sm:$0xff]   ;;  %v10725_v16 = vld [vmem:[%s14583_s3 + $0x1b0] ss:$12 sps:$4 sm:$0xff]  }
 0x3c4   : > { %5615 = vmatprep.subr.bf16.mxu0 %v10724_v49  ;;  %9953 = vmatprep.subr.bf16.mxu1 %v10751_v41  ;;  %v10785_v44 = vld [vmem:[%s14583_s3 + $0x304] ss:$12 sps:$4 sm:$0xff]  }
 0x3c5   : > { %4205 = vrot.lane.b32.xlu1 %v13067_v9, %s14625_s30  ;;  %4203 = vrot.lane.b32.xlu0 %v13064_v1, %s14625_s30 }
 0x3c7   : > { %5616 = vmatpush1.bf16.msra.mxu0 %v10722_v58  ;;  %9954 = vmatpush3.bf16.msra.mxu1 %v10752_v48  ;;  %v10810_v48 = vld [vmem:[%s14583_s3 + $0x3c8] ss:$12 sps:$4 sm:$0xff]  }
 0x3c8   : > { %5617 = vmatprep.subr.bf16.mxu0 %v10727_v43  ;;  %9955 = vmatprep.subr.bf16.mxu1 %v10756_v33 }
 0x3c9   : > { %4158 = vrot.lane.b32.xlu1 %v12348_v5, %s14626_s12  ;;  %4156 = vrot.lane.b32.xlu0 %v12308_v37, %s14626_s12 }
 0x3cb   : > { %5618 = vmatpush1.bf16.msra.mxu0 %v10725_v16  ;;  %9956 = vmatpush3.bf16.msra.mxu1 %v10757_v54 }
 0x3cc   : > { %5619 = vmatprep.subr.bf16.mxu0 %v10730_v14  ;;  %9957 = vmatprep.subr.bf16.mxu1 %v10761_v34 }
 0x3cf   : > { %5620 = vmatpush1.bf16.msra.mxu0 %v10728_v17  ;;  %9958 = vmatpush3.bf16.msra.mxu1 %v10762_v0 }
 0x3d0   : > { %5621 = vmatprep.subr.bf16.mxu0 %v10733_v60  ;;  %9959 = vmatprep.subr.bf16.mxu1 %v10766_v61 }
 0x3d3   : > { %5622 = vmatpush1.bf16.msra.mxu0 %v10731_v27  ;;  %9960 = vmatpush3.bf16.msra.mxu1 %v10767_v22 }
 0x3d4   : > { %5623 = vmatprep.subr.bf16.mxu0 %v10736_v23  ;;  %9961 = vmatprep.subr.bf16.mxu1 %v10771_v25  ;;  %v10783_v23 = vld [vmem:[%s14583_s3 + $0x300] ss:$12 sps:$4 sm:$0xff]   ;;  %v10811_v25 = vld [vmem:[%s14583_s3 + $0x308] ss:$12 sps:$4 sm:$0xff]  }
 0x3d7   : > { %5624 = vmatpush1.bf16.msra.mxu0 %v10734_v6  ;;  %9962 = vmatpush3.bf16.msra.mxu1 %v10772_v20  ;;  %v10788_v6 = vld [vmem:[%s14583_s3 + $0x31c] ss:$12 sps:$4 sm:$0xff]  }
 0x3d8   : > { %5625 = vmatprep.subr.bf16.mxu0 %v10739_v42  ;;  %9963 = vmatprep.subr.bf16.mxu1 %v10776_v28 }
 0x3db   : > { %5626 = vmatpush1.bf16.msra.mxu0 %v10737_v30  ;;  %9964 = vmatpush3.bf16.msra.mxu1 %v10777_v2  ;;  %v10786_v2 = vld [vmem:[%s14583_s3 + $0x318] ss:$12 sps:$4 sm:$0xff]  }
 0x3dc   : > { %5627 = vmatprep.subr.bf16.mxu0 %v10742_v21  ;;  %9965 = vmatprep.subr.bf16.mxu1 %v10781_v12  ;;  %v10791_v21 = vld [vmem:[%s14583_s3 + $0x334] ss:$12 sps:$4 sm:$0xff]   ;;  %v10821_v12 = vld [vmem:[%s14583_s3 + $0x338] ss:$12 sps:$4 sm:$0xff]  }
 0x3df   : > { %5628 = vmatpush1.bf16.msra.mxu0 %v10740_v45  ;;  %9966 = vmatpush3.bf16.msra.mxu1 %v10782_v46  ;;  %v10794_v45 = vld [vmem:[%s14583_s3 + $0x34c] ss:$12 sps:$4 sm:$0xff]   ;;  %v10825_v46 = vld [vmem:[%s14583_s3 + $0x410] ss:$12 sps:$4 sm:$0xff]  }
 0x3e0   : > { %5629 = vmatprep.subr.bf16.mxu0 %v10745_v13  ;;  %9973 = vmatprep.subr.bf16.mxu1 %v10810_v48  ;;  %v10792_v13 = vld [vmem:[%s14583_s3 + $0x348] ss:$12 sps:$4 sm:$0xff]  }
 0x3e3   : > { %5630 = vmatpush1.bf16.msra.mxu0 %v10743_v7  ;;  %v10826_v7 = vld [vmem:[%s14583_s3 + $0x350] ss:$12 sps:$4 sm:$0xff]  }
 0x3e4   : > { %5631 = vmatprep.subr.bf16.mxu0 %v10750_v51  ;;  %v10797_v51 = vld [vmem:[%s14583_s3 + $0x364] ss:$12 sps:$4 sm:$0xff]  }
 0x3e7   : > { %5632 = vmatpush1.bf16.msra.mxu0 %v10748_v52  ;;  %v10830_v52 = vld [vmem:[%s14583_s3 + $0x428] ss:$12 sps:$4 sm:$0xff]  }
 0x3e8   : > { %5633 = vmatprep.subr.bf16.mxu0 %v10755_v24  ;;  %v10795_v24 = vld [vmem:[%s14583_s3 + $0x360] ss:$12 sps:$4 sm:$0xff]  }
 0x3eb   : > { %5634 = vmatpush1.bf16.msra.mxu0 %v10753_v53  ;;  %v10831_v53 = vld [vmem:[%s14583_s3 + $0x368] ss:$12 sps:$4 sm:$0xff]  }
 0x3ec   : > { %5635 = vmatprep.subr.bf16.mxu0 %v10760_v55  ;;  %v10800_v55 = vld [vmem:[%s14583_s3 + $0x37c] ss:$12 sps:$4 sm:$0xff]  }
 0x3ef   : > { %5636 = vmatpush1.bf16.msra.mxu0 %v10758_v56  ;;  %v10835_v56 = vld [vmem:[%s14583_s3 + $0x440] ss:$12 sps:$4 sm:$0xff]  }
 0x3f0   : > { %5637 = vmatprep.subr.bf16.mxu0 %v10765_v8  ;;  %v10798_v8 = vld [vmem:[%s14583_s3 + $0x378] ss:$12 sps:$4 sm:$0xff]  }
 0x3f3   : > { %5638 = vmatpush1.bf16.msra.mxu0 %v10763_v57  ;;  %v10836_v57 = vld [vmem:[%s14583_s3 + $0x380] ss:$12 sps:$4 sm:$0xff]  }
 0x3f4   : > { %5639 = vmatprep.subr.bf16.mxu0 %v10770_v15  ;;  %v10803_v15 = vld [vmem:[%s14583_s3 + $0x394] ss:$12 sps:$4 sm:$0xff]  }
 0x3f7   : > { %5640 = vmatpush1.bf16.msra.mxu0 %v10768_v29  ;;  %v10840_v29 = vld [vmem:[%s14583_s3 + $0x458] ss:$12 sps:$4 sm:$0xff]  }
 0x3f8   : > { %5641 = vmatprep.subr.bf16.mxu0 %v10775_v18 }
 0x3fb   : > { %5642 = vmatpush1.bf16.msra.mxu0 %v10773_v62  ;;  %v10801_v62 = vld [vmem:[%s14583_s3 + $0x390] ss:$12 sps:$4 sm:$0xff]  }
 0x3fc   : > { %5643 = vmatprep.subr.bf16.mxu0 %v10780_v63  ;;  %v10841_v63 = vld [vmem:[%s14583_s3 + $0x398] ss:$12 sps:$4 sm:$0xff]  }
 0x3ff   : > { %5644 = vmatpush1.bf16.msra.mxu0 %v10778_v47 }
 0x400   : > { %v9898_v4 = vpop.f32.mrb[28].mxu0  ;;  %5656 = vmatprep.subr.bf16.mxu0 %v10785_v44  ;;  %v10806_v44 = vld [vmem:[%s14583_s3 + $0x3ac] ss:$12 sps:$4 sm:$0xff]  }
 0x401   : > { %v9899_v35 = vpop.f32.mrb[29].mxu0 }
 0x402   : > { %v9900_v49 = vadd.f32 %v9899_v35, %v9898_v4  ;;  %v9901_v41 = vpop.f32.mrb[30].mxu0  ;;  %v10845_v4 = vld [vmem:[%s14583_s3 + $0x470] ss:$12 sps:$4 sm:$0xff]  }
 0x403   : > { %v9902_v32 = vpop.f32.mrb[31].mxu0 }
 0x404   : > { %v4031_v38 = vadd.f32 %v9900_v49, %v13034_v3  ;;  %v9903_v39 = vadd.f32 %v9902_v32, %v9901_v41 }
 0x406   : > { %v4034_v58 = vadd.f32 %v9903_v39, %v13036_v19  ;;  %v10846_v39 = vld [vmem:[%s14583_s3 + $0x3b0] ss:$12 sps:$4 sm:$0xff]  }
 0x420   : > { %v9920_v43 = vpop.f32.mrb[32].mxu0 }
 0x421   : > { %v9921_v33 = vpop.f32.mrb[33].mxu0 }
 0x422   : > { %v9922_v16 = vadd.f32 %v9921_v33, %v9920_v43  ;;  %v9923_v54 = vpop.f32.mrb[34].mxu0  ;;  %v10807_v43 = vld [vmem:[%s14583_s3 + $0x3c0] ss:$12 sps:$4 sm:$0xff]  }
 0x423   : > { %v9924_v14 = vpop.f32.mrb[35].mxu0 }
 0x424   : > { %v9925_v34 = vadd.f32 %v9924_v14, %v9923_v54  ;;  %v13211_v17 = vadd.f32 %v9922_v16, %v4031_v38  ;;  %v10804_v38 = vld [vmem:[%s14583_s3 + $0x3a8] ss:$12 sps:$4 sm:$0xff]  }
 0x425   : > { %v10814_v54 = vld [vmem:[%s14583_s3 + $0x3dc] ss:$12 sps:$4 sm:$0xff]  }
 0x426   : > { %v13213_v0 = vadd.f32 %v9925_v34, %v4034_v58  ;;  %v10809_v58 = vld [vmem:[%s14583_s3 + $0x3c4] ss:$12 sps:$4 sm:$0xff]  }
 0x437   : > { %v13215_v60 = vpop.permute.xlu1 %4205  ;;  %v4204_v3 = vpop.permute.xlu0 %4203 }
 0x438   : > { %v4217_v19 = vsel %vm572_vm3, %v13039_v50, %v4204_v3  ;;  %v4218_v61 = vsel %vm572_vm3, %v4204_v3, %v13215_v60  ;;  %v10815_v50 = vld [vmem:[%s14583_s3 + $0x3e0] ss:$12 sps:$4 sm:$0xff]  }
 0x439   : > { %v4234_v27 = vmax.bf16 %v4217_v19, %v12789_v36  ;;  %v4235_v22 = vmax.bf16 %v4218_v61, %v13064_v1  ;;  %v10812_v19 = vld [vmem:[%s14583_s3 + $0x3d8] ss:$12 sps:$4 sm:$0xff]  }
 0x43b   : > { %v13235_v20 = vpop.permute.xlu1 %4158  ;;  %5645 = vmatprep.mubr.bf16.mxu0 %v4235_v22  ;;  %5858 = vmatprep.mubr.bf16.mxu1 %v4235_v22  ;;  %v4157_v36 = vpop.permute.xlu0 %4156  ;;  %v10822_v22 = vld [vmem:[%s14583_s3 + $0x408] ss:$12 sps:$4 sm:$0xff]  }
 0x43c   : > { %v4167_v1 = vsel %vm446_vm0, %v13051_v11, %v4157_v36  ;;  %v4168_v42 = vsel %vm446_vm0, %v4157_v36, %v13235_v20  ;;  %5646 = vmatmul.mubr.bf16.vlgmr.msra.gmra.mrb[36].mxu0 %v4234_v27  ;;  %5859 = vmatmul.mubr.bf16.vlgmr.msra.gmra.mrb[28].mxu1 %v4234_v27  ;;  %v10816_v11 = vld [vmem:[%s14583_s3 + $0x320] ss:$12 sps:$4 sm:$0xff]   ;;  %v10832_v36 = vld [vmem:[%s14583_s3 + $0x438] ss:$12 sps:$4 sm:$0xff]  }
 0x43d   : > { %v13242_v28 = vmax.bf16 %v4167_v1, %v12306_v31  ;;  %v13245_v30 = vmax.bf16 %v4168_v42, %v12308_v37  ;;  %5657 = vmatpush1.bf16.msra.mxu0 %v10783_v23  ;;  %9974 = vmatpush3.bf16.msra.mxu1 %v10811_v25  ;;  %v10820_v31 = vld [vmem:[%s14583_s3 + $0x3f8] ss:$12 sps:$4 sm:$0xff]   ;;  %v10789_v37 = vld [vmem:[%s14583_s3 + $0x330] ss:$12 sps:$4 sm:$0xff]   ;;  %v10839_v1 = vld [vmem:[%s14583_s3 + $0x454] ss:$12 sps:$4 sm:$0xff]  }
 0x43e   : > { %5658 = vmatprep.subr.bf16.mxu0 %v10788_v6  ;;  %9975 = vmatprep.subr.bf16.mxu1 %v10815_v50  ;;  %v10824_v27 = vld [vmem:[%s14583_s3 + $0x40c] ss:$12 sps:$4 sm:$0xff]   ;;  %v10829_v23 = vld [vmem:[%s14583_s3 + $0x424] ss:$12 sps:$4 sm:$0xff]   ;;  %v10834_v50 = vld [vmem:[%s14583_s3 + $0x43c] ss:$12 sps:$4 sm:$0xff]  }
 0x43f   : > { %4209 = vrot.lane.b32.xlu1 %v13245_v30, %s14625_s30  ;;  %4207 = vrot.lane.b32.xlu0 %v13242_v28, %s14625_s30  ;;  %v10827_v6 = vld [vmem:[%s14583_s3 + $0x420] ss:$12 sps:$4 sm:$0xff]   ;;  %v10837_v42 = vld [vmem:[%s14583_s3 + $0x450] ss:$12 sps:$4 sm:$0xff]  }
 0x441   : > { %5659 = vmatpush1.bf16.msra.mxu0 %v10786_v2  ;;  %9976 = vmatpush3.bf16.msra.mxu1 %v10816_v11  ;;  %v10844_v2 = vld [vmem:[%s14583_s3 + $0x46c] ss:$12 sps:$4 sm:$0xff]   ;;  %v10842_v11 = vld [vmem:[%s14583_s3 + $0x468] ss:$12 sps:$4 sm:$0xff]  }
 0x442   : > { %5660 = vmatprep.subr.bf16.mxu0 %v10791_v21  ;;  %9977 = vmatprep.subr.bf16.mxu1 %v10820_v31  ;;  %v10849_v21 = vld [vmem:[%s14583_s3 + $0x484] ss:$12 sps:$4 sm:$0xff]   ;;  %v10874_v31 = vld [vmem:[%s14583_s3 + $0x548] ss:$12 sps:$4 sm:$0xff]  }
 0x443   : > { %4160 = vrot.lane.b32.xlu0 %v12358_v59, %s14626_s12 }
 0x445   : > { %5661 = vmatpush1.bf16.msra.mxu0 %v10789_v37  ;;  %9978 = vmatpush3.bf16.msra.mxu1 %v10821_v12 }
 0x446   : > { %5662 = vmatprep.subr.bf16.mxu0 %v10794_v45  ;;  %9979 = vmatprep.subr.bf16.mxu1 %v10825_v46 }
 0x449   : > { %5663 = vmatpush1.bf16.msra.mxu0 %v10792_v13  ;;  %9980 = vmatpush3.bf16.msra.mxu1 %v10826_v7 }
 0x44a   : > { %5664 = vmatprep.subr.bf16.mxu0 %v10797_v51  ;;  %9981 = vmatprep.subr.bf16.mxu1 %v10830_v52 }
 0x44d   : > { %5665 = vmatpush1.bf16.msra.mxu0 %v10795_v24  ;;  %9982 = vmatpush3.bf16.msra.mxu1 %v10831_v53 }
 0x44e   : > { %5666 = vmatprep.subr.bf16.mxu0 %v10800_v55  ;;  %9983 = vmatprep.subr.bf16.mxu1 %v10835_v56 }
 0x451   : > { %v3905_v18 = vpop.f32.mrb[16].mxu1  ;;  %5667 = vmatpush1.bf16.msra.mxu0 %v10798_v8  ;;  %9984 = vmatpush3.bf16.msra.mxu1 %v10836_v57  ;;  %v10847_v8 = vld [vmem:[%s14583_s3 + $0x480] ss:$12 sps:$4 sm:$0xff]   ;;  %v10875_v57 = vld [vmem:[%s14583_s3 + $0x488] ss:$12 sps:$4 sm:$0xff]  }
 0x452   : > { %v3907_v47 = vpop.f32.mrb[17].mxu1  ;;  %5668 = vmatprep.subr.bf16.mxu0 %v10803_v15  ;;  %9985 = vmatprep.subr.bf16.mxu1 %v10840_v29  ;;  %v10852_v15 = vld [vmem:[%s14583_s3 + $0x49c] ss:$12 sps:$4 sm:$0xff]  }
 0x453   : > { %v3909_v35 = vpop.f32.mrb[18].mxu1 }
 0x454   : > { %v13325_v49 = vpack.c.bf16 %v3909_v35, %v3905_v18  ;;  %v3911_v41 = vpop.f32.mrb[19].mxu1  ;;  %v10856_v35 = vld [vmem:[%s14583_s3 + $0x4c8] ss:$12 sps:$4 sm:$0xff]  }
 0x455   : > { %v13327_v32 = vpack.c.bf16 %v3911_v41, %v3907_v47  ;;  %5669 = vmatpush1.bf16.msra.mxu0 %v10801_v62  ;;  %9986 = vmatpush3.bf16.msra.mxu1 %v10841_v63  ;;  %v10850_v62 = vld [vmem:[%s14583_s3 + $0x498] ss:$12 sps:$4 sm:$0xff]   ;;  %v10880_v63 = vld [vmem:[%s14583_s3 + $0x4a0] ss:$12 sps:$4 sm:$0xff]   ;;  %v10890_v41 = vld [vmem:[%s14583_s3 + $0x4d0] ss:$12 sps:$4 sm:$0xff]  }
 0x456   : > { %4122 = vst [vmem:[#allocation4] sm:$0xff] %v13325_v49  ;;  %5670 = vmatprep.subr.bf16.mxu0 %v10806_v44  ;;  %9987 = vmatprep.subr.bf16.mxu1 %v10845_v4  ;;  %v10885_v47 = vld [vmem:[%s14583_s3 + $0x4b8] ss:$12 sps:$4 sm:$0xff]   ;;  %v10889_v4 = vld [vmem:[%s14583_s3 + $0x590] ss:$12 sps:$4 sm:$0xff]  }
 0x457   : > { %4123 = vst [vmem:[#allocation4 + $0x8] sm:$0xff] %v13327_v32  ;;  %v10858_v44 = vld [vmem:[%s14583_s3 + $0x4cc] ss:$12 sps:$4 sm:$0xff]  }
 0x459   : > { %v4112_v48 = vpop.f32.mrb[20].mxu1  ;;  %5671 = vmatpush1.bf16.msra.mxu0 %v10804_v38  ;;  %9988 = vmatpush3.bf16.msra.mxu1 %v10846_v39  ;;  %v10861_v38 = vld [vmem:[%s14583_s3 + $0x4e4] ss:$12 sps:$4 sm:$0xff]   ;;  %v10894_v39 = vld [vmem:[%s14583_s3 + $0x5a8] ss:$12 sps:$4 sm:$0xff]  }
 0x45a   : > { %v4113_v33 = vadd.f32 %v4112_v48, %v13211_v17  ;;  %v10267_v16 = vpop.f32.mrb[21].mxu1  ;;  %5672 = vmatprep.subr.bf16.mxu0 %v10809_v58  ;;  %v10819_v17 = vld [vmem:[%s14583_s3 + $0x3f4] ss:$12 sps:$4 sm:$0xff]   ;;  %9995 = vmatprep.subr.bf16.mxu1 %v10874_v31  ;;  %v10898_v31 = vld [vmem:[%s14583_s3 + $0x5bc] ss:$12 sps:$4 sm:$0xff]  }
 0x45b   : > { %v4115_v14 = vpop.f32.mrb[22].mxu1  ;;  %v10859_v58 = vld [vmem:[%s14583_s3 + $0x4e0] ss:$12 sps:$4 sm:$0xff]   ;;  %v10895_v48 = vld [vmem:[%s14583_s3 + $0x4e8] ss:$12 sps:$4 sm:$0xff]  }
 0x45c   : > { %v4116_v34 = vadd.f32 %v4115_v14, %v13213_v0  ;;  %v10268_v3 = vpop.f32.mrb[23].mxu1  ;;  %v10817_v0 = vld [vmem:[%s14583_s3 + $0x3f0] ss:$12 sps:$4 sm:$0xff]   ;;  %v10862_v16 = vld [vmem:[%s14583_s3 + $0x4f8] ss:$12 sps:$4 sm:$0xff]  }
 0x45d   : > { %5673 = vmatpush1.bf16.msra.mxu0 %v10807_v43  ;;  %v10864_v43 = vld [vmem:[%s14583_s3 + $0x4fc] ss:$12 sps:$4 sm:$0xff]   ;;  %v10867_v14 = vld [vmem:[%s14583_s3 + $0x514] ss:$12 sps:$4 sm:$0xff]  }
 0x45e   : > { %v4121_v61 = vpack.c.bf16 %v4116_v34, %v4113_v33  ;;  %5674 = vmatprep.subr.bf16.mxu0 %v10814_v54  ;;  %v10899_v33 = vld [vmem:[%s14583_s3 + $0x5c0] ss:$12 sps:$4 sm:$0xff]   ;;  %v10904_v34 = vld [vmem:[%s14583_s3 + $0x5d8] ss:$12 sps:$4 sm:$0xff]   ;;  %v10865_v3 = vld [vmem:[%s14583_s3 + $0x510] ss:$12 sps:$4 sm:$0xff]  }
 0x45f   : > { %v10900_v54 = vld [vmem:[%s14583_s3 + $0x500] ss:$12 sps:$4 sm:$0xff]  }
 0x460   : > { %4125 = vst.msk [vmem:[#allocation4 + $0x10] sm:$0xff] %vm4124_vm15, %v4121_v61  ;;  %v10870_v61 = vld [vmem:[%s14583_s3 + $0x52c] ss:$12 sps:$4 sm:$0xff]  }
 0x461   : > { %5675 = vmatpush1.bf16.msra.mxu0 %v10812_v19  ;;  %v10905_v19 = vld [vmem:[%s14583_s3 + $0x518] ss:$12 sps:$4 sm:$0xff]  }
 0x462   : > { %5676 = vmatprep.subr.bf16.mxu0 %v10819_v17  ;;  %v10909_v17 = vld [vmem:[%s14583_s3 + $0x5f0] ss:$12 sps:$4 sm:$0xff]  }
 0x465   : > { %5677 = vmatpush1.bf16.msra.mxu0 %v10817_v0  ;;  %v10868_v0 = vld [vmem:[%s14583_s3 + $0x528] ss:$12 sps:$4 sm:$0xff]  }
 0x466   : > { %5678 = vmatprep.subr.bf16.mxu0 %v10824_v27  ;;  %v10910_v27 = vld [vmem:[%s14583_s3 + $0x530] ss:$12 sps:$4 sm:$0xff]  }
 0x467   : > { %v13367_v25 = vld [vmem:[#allocation4 + $0x10] sm:$0xff] }
 0x468   : > { %6002 = vst.msk [vmem:[#allocation5 + $0x10] sm:$0xff] %vm6001_vm2, %v13367_v25 }
 0x469   : > { %5679 = vmatpush1.bf16.msra.mxu0 %v10822_v22  ;;  %v10873_v22 = vld [vmem:[%s14583_s3 + $0x544] ss:$12 sps:$4 sm:$0xff]  }
 0x46a   : > { %5680 = vmatprep.subr.bf16.mxu0 %v10829_v23  ;;  %v10871_v23 = vld [vmem:[%s14583_s3 + $0x540] ss:$12 sps:$4 sm:$0xff]  }
 0x46d   : > { %5681 = vmatpush1.bf16.msra.mxu0 %v10827_v6  ;;  %v10878_v6 = vld [vmem:[%s14583_s3 + $0x55c] ss:$12 sps:$4 sm:$0xff]  }
 0x46e   : > { %5682 = vmatprep.subr.bf16.mxu0 %v10834_v50  ;;  %v10876_v50 = vld [vmem:[%s14583_s3 + $0x558] ss:$12 sps:$4 sm:$0xff]  }
 0x471   : > { %5683 = vmatpush1.bf16.msra.mxu0 %v10832_v36  ;;  %v10883_v36 = vld [vmem:[%s14583_s3 + $0x574] ss:$12 sps:$4 sm:$0xff]  }
 0x472   : > { %5684 = vmatprep.subr.bf16.mxu0 %v10839_v1  ;;  %v10881_v1 = vld [vmem:[%s14583_s3 + $0x570] ss:$12 sps:$4 sm:$0xff]  }
 0x475   : > { %5685 = vmatpush1.bf16.msra.mxu0 %v10837_v42  ;;  %v10888_v42 = vld [vmem:[%s14583_s3 + $0x58c] ss:$12 sps:$4 sm:$0xff]  }
 0x476   : > { %5686 = vmatprep.subr.bf16.mxu0 %v10844_v2  ;;  %v10886_v2 = vld [vmem:[%s14583_s3 + $0x588] ss:$12 sps:$4 sm:$0xff]  }
 0x479   : > { %5687 = vmatpush1.bf16.msra.mxu0 %v10842_v11  ;;  %v10893_v11 = vld [vmem:[%s14583_s3 + $0x5a4] ss:$12 sps:$4 sm:$0xff]  }
 0x47a   : > { %5699 = vmatprep.subr.bf16.mxu0 %v10849_v21  ;;  %v10891_v21 = vld [vmem:[%s14583_s3 + $0x5a0] ss:$12 sps:$4 sm:$0xff]  }
 0x495   : > { %v9945_v37 = vpop.f32.mrb[24].mxu1 }
 0x496   : > { %v9946_v12 = vpop.f32.mrb[25].mxu1 }
 0x497   : > { %v13398_v45 = vadd.f32 %v9946_v12, %v9945_v37  ;;  %v9948_v46 = vpop.f32.mrb[26].mxu1  ;;  %v10896_v37 = vld [vmem:[%s14583_s3 + $0x5b8] ss:$12 sps:$4 sm:$0xff]   ;;  %v10903_v12 = vld [vmem:[%s14583_s3 + $0x5d4] ss:$12 sps:$4 sm:$0xff]  }
 0x498   : > { %v9949_v13 = vpop.f32.mrb[27].mxu1 }
 0x499   : > { %v13400_v7 = vadd.f32 %v9949_v13, %v9948_v46  ;;  %v10901_v46 = vld [vmem:[%s14583_s3 + $0x5d0] ss:$12 sps:$4 sm:$0xff]   ;;  %v10908_v13 = vld [vmem:[%s14583_s3 + $0x5ec] ss:$12 sps:$4 sm:$0xff]  }
 0x4b1   : > { %v13402_v51 = vpop.permute.xlu1 %4209  ;;  %v4208_v52 = vpop.permute.xlu0 %4207 }
 0x4b2   : > { %v4219_v24 = vsel %vm572_vm3, %v13215_v60, %v4208_v52  ;;  %v4220_v53 = vsel %vm572_vm3, %v4208_v52, %v13402_v51  ;;  %v10906_v52 = vld [vmem:[%s14583_s3 + $0x5e8] ss:$12 sps:$4 sm:$0xff]  }
 0x4b3   : > { %v4236_v55 = vmax.bf16 %v4219_v24, %v13067_v9  ;;  %v4237_v56 = vmax.bf16 %v4220_v53, %v13242_v28  ;;  %v10879_v9 = vld [vmem:[%s14583_s3 + $0x560] ss:$12 sps:$4 sm:$0xff]   ;;  %v10913_v24 = vld [vmem:[%s14583_s3 + $0x604] ss:$12 sps:$4 sm:$0xff]  }
 0x4b5   : > { %5688 = vmatprep.mubr.bf16.mxu0 %v4237_v56  ;;  %5899 = vmatprep.mubr.bf16.mxu1 %v4237_v56  ;;  %v4161_v60 = vpop.permute.xlu0 %4160 }
 0x4b6   : > { %v4169_v28 = vsel %vm446_vm0, %v13235_v20, %v4161_v60  ;;  %v13425_v29 = vmax.bf16 %v4161_v60, %v12358_v59  ;;  %5689 = vmatmul.mubr.bf16.vlgmr.msra.gmra.mrb[36].mxu0 %v4236_v55  ;;  %5900 = vmatmul.mubr.bf16.vlgmr.msra.gmra.mrb[32].mxu1 %v4236_v55  ;;  %v10855_v59 = vld [vmem:[%s14583_s3 + $0x4b4] ss:$12 sps:$4 sm:$0xff]   ;;  %v10853_v20 = vld [vmem:[%s14583_s3 + $0x4b0] ss:$12 sps:$4 sm:$0xff]  }
 0x4b7   : > { %v13428_v18 = vmax.bf16 %v4169_v28, %v12348_v5  ;;  %5700 = vmatpush1.bf16.msra.mxu0 %v10847_v8  ;;  %9996 = vmatpush3.bf16.msra.mxu1 %v10875_v57  ;;  %v10884_v5 = vld [vmem:[%s14583_s3 + $0x578] ss:$12 sps:$4 sm:$0xff]  }
 0x4b8   : > { %4213 = vrot.lane.b32.xlu0 %v13425_v29, %s14625_s30  ;;  %5701 = vmatprep.subr.bf16.mxu0 %v10852_v15 }
 0x4b9   : > { %4211 = vrot.lane.b32.xlu1 %v13428_v18, %s14625_s30  ;;  %9997 = vmatprep.subr.bf16.mxu1 %v10879_v9 }
 0x4bb   : > { %5702 = vmatpush1.bf16.msra.mxu0 %v10850_v62  ;;  %9998 = vmatpush3.bf16.msra.mxu1 %v10880_v63  ;;  %v10918_v62 = vld [vmem:[%s14583_s3 + $0x61c] ss:$12 sps:$4 sm:$0x3f]  }
 0x4bc   : > { %6029 = vrot.lane.b32.xlu0 %v13325_v49, %s14627_s16  ;;  %5703 = vmatprep.subr.bf16.mxu0 %v10855_v59 }
 0x4bd   : > { %6009 = vrot.lane.b32.xlu1 %v13325_v49, %s14626_s12  ;;  %9999 = vmatprep.subr.bf16.mxu1 %v10884_v5 }
 0x4bf   : > { %5704 = vmatpush1.bf16.msra.mxu0 %v10853_v20  ;;  %10000 = vmatpush3.bf16.msra.mxu1 %v10885_v47 }
 0x4c0   : > { %6071 = vrot.lane.b32.xlu0 %v13325_v49, %s14609_s14  ;;  %5705 = vmatprep.subr.bf16.mxu0 %v10858_v44  ;;  %v10915_v44 = vld [vmem:[%s14583_s3 + $0x620] ss:$12 sps:$4 sm:$0x3f]  }
 0x4c1   : > { %6050 = vrot.lane.b32.xlu1 %v13325_v49, %s14603_s22  ;;  %10001 = vmatprep.subr.bf16.mxu1 %v10889_v4 }
 0x4c3   : > { %5706 = vmatpush1.bf16.msra.mxu0 %v10856_v35  ;;  %10002 = vmatpush3.bf16.msra.mxu1 %v10890_v41  ;;  %v5565_v35 = vand.u32 %v10918_v62, %v12914_v40 }
 0x4c4   : > { %6113 = vrot.lane.b32.xlu0 %v13325_v49, %s14624_s13  ;;  %5707 = vmatprep.subr.bf16.mxu0 %v10861_v38 }
 0x4c5   : > { %6092 = vrot.lane.b32.xlu1 %v13325_v49, %s14605_s0  ;;  %10003 = vmatprep.subr.bf16.mxu1 %v10894_v39 }
 0x4c7   : > { %5708 = vmatpush1.bf16.msra.mxu0 %v10859_v58  ;;  %10004 = vmatpush3.bf16.msra.mxu1 %v10895_v48 }
 0x4c8   : > { %6031 = vrot.lane.b32.xlu0 %v13327_v32, %s14627_s16  ;;  %5709 = vmatprep.subr.bf16.mxu0 %v10864_v43 }
 0x4c9   : > { %6134 = vrot.lane.b32.xlu1 %v13325_v49, %s14607_s15  ;;  %10005 = vmatprep.subr.bf16.mxu1 %v10899_v33 }
 0x4cb   : > { %5710 = vmatpush1.bf16.msra.mxu0 %v10862_v16  ;;  %10006 = vmatpush3.bf16.msra.mxu1 %v10900_v54 }
 0x4cc   : > { %6073 = vrot.lane.b32.xlu0 %v13327_v32, %s14609_s14  ;;  %5711 = vmatprep.subr.bf16.mxu0 %v10867_v14 }
 0x4cd   : > { %6011 = vrot.lane.b32.xlu1 %v13327_v32, %s14626_s12  ;;  %10007 = vmatprep.subr.bf16.mxu1 %v10904_v34 }
 0x4cf   : > { %5712 = vmatpush1.bf16.msra.mxu0 %v10865_v3  ;;  %10008 = vmatpush3.bf16.msra.mxu1 %v10905_v19 }
 0x4d0   : > { %6115 = vrot.lane.b32.xlu0 %v13327_v32, %s14624_s13  ;;  %5713 = vmatprep.subr.bf16.mxu0 %v10870_v61 }
 0x4d1   : > { %6052 = vrot.lane.b32.xlu1 %v13327_v32, %s14628_s1  ;;  %10009 = vmatprep.subr.bf16.mxu1 %v10909_v17 }
 0x4d3   : > { %5714 = vmatpush1.bf16.msra.mxu0 %v10868_v0  ;;  %10010 = vmatpush3.bf16.msra.mxu1 %v10910_v27 }
 0x4d4   : > { %6013 = vrot.lane.b32.xlu0 %v13367_v25, %s14626_s12  ;;  %5715 = vmatprep.subr.bf16.mxu0 %v10873_v22 }
 0x4d5   : > { %6094 = vrot.lane.b32.xlu1 %v13327_v32, %s14629_s25  ;;  %10269 = vmatprep.subr.bf16.mxu1 %v11182_v26 }
 0x4d7   : > { %5716 = vmatpush1.bf16.msra.mxu0 %v10871_v23 }
 0x4d8   : > { %6054 = vrot.lane.b32.xlu0 %v13367_v25, %s14628_s1  ;;  %5717 = vmatprep.subr.bf16.mxu0 %v10878_v6 }
 0x4d9   : > { %6136 = vrot.lane.b32.xlu1 %v13327_v32, %s14607_s15 }
 0x4db   : > { %5718 = vmatpush1.bf16.msra.mxu0 %v10876_v50 }
 0x4dc   : > { %6096 = vrot.lane.b32.xlu0 %v13367_v25, %s14629_s25  ;;  %5719 = vmatprep.subr.bf16.mxu0 %v10883_v36 }
 0x4dd   : > { %6033 = vrot.lane.b32.xlu1 %v13367_v25, %s14627_s16 }
 0x4df   : > { %5720 = vmatpush1.bf16.msra.mxu0 %v10881_v1 }
 0x4e0   : > { %6138 = vrot.lane.b32.xlu0 %v13367_v25, %s14607_s15  ;;  %5721 = vmatprep.subr.bf16.mxu0 %v10888_v42  ;;  %s11191_s15 = smov [#allocation8]  }
 0x4e1   : > { %6075 = vrot.lane.b32.xlu1 %v13367_v25, %s14609_s14  ;;  %s11188_s14 = smov 90   ;;  %s11112_s24 = sshll.u32 %s11191_s15, 4  ;;  %s11113_s24 = int_to_ptr.vmem [resolvable:$false] %s11112_s24 }
 0x4e3   : > { %5722 = vmatpush1.bf16.msra.mxu0 %v10886_v2 }
 0x4e4   : > { %5723 = vmatprep.subr.bf16.mxu0 %v10893_v11 }
 0x4e5   : > { %6117 = vrot.lane.b32.xlu1 %v13367_v25, %s14624_s13 }
 0x4e7   : > { %5724 = vmatpush1.bf16.msra.mxu0 %v10891_v21 }
 0x4e8   : > { %5725 = vmatprep.subr.bf16.mxu0 %v10898_v31 }
 0x4eb   : > { %5726 = vmatpush1.bf16.msra.mxu0 %v10896_v37 }
 0x4ec   : > { %5727 = vmatprep.subr.bf16.mxu0 %v10903_v12 }
 0x4ef   : > { %5728 = vmatpush1.bf16.msra.mxu0 %v10901_v46 }
 0x4f0   : > { %5729 = vmatprep.subr.bf16.mxu0 %v10908_v13 }
 0x4f3   : > { %5730 = vmatpush1.bf16.msra.mxu0 %v10906_v52 }
 0x4f4   : > { %5742 = vmatprep.subr.bf16.mxu0 %v10913_v24 }
 0x50f   : > { %v9967_v53 = vpop.f32.mrb[28].mxu1 }
 0x510   : > { %v9968_v55 = vpop.f32.mrb[29].mxu1 }
 0x511   : > { %v9969_v56 = vadd.f32 %v9968_v55, %v9967_v53  ;;  %v9970_v8 = vpop.f32.mrb[30].mxu1 }
 0x512   : > { %v9971_v57 = vpop.f32.mrb[31].mxu1 }
 0x513   : > { %v13607_v15 = vadd.f32 %v9969_v56, %v13398_v45  ;;  %v9972_v60 = vadd.f32 %v9971_v57, %v9970_v8  ;;  %v10911_v45 = vld [vmem:[%s14583_s3 + $0x600] ss:$12 sps:$4 sm:$0xff]  }
 0x515   : > { %v13610_v9 = vadd.f32 %v9972_v60, %v13400_v7  ;;  %v10914_v7 = vld [vmem:[%s14583_s3 + $0x608] ss:$12 sps:$4 sm:$0xff]  }
 0x52a   : > { %v4214_v28 = vpop.permute.xlu0 %4213 }
 0x52b   : > { %v4212_v63 = vpop.permute.xlu1 %4211  ;;  %v4240_v58 = vmax.bf16 %v4214_v28, %v13425_v29 }
 0x52c   : > { %v4221_v59 = vsel %vm572_vm3, %v13402_v51, %v4212_v63  ;;  %v4222_v5 = vsel %vm572_vm3, %v4212_v63, %v4214_v28  ;;  %v10916_v51 = vld [vmem:[%s14583_s3 + $0x618] ss:$12 sps:$4 sm:$0x3f]   ;;  %vm6077_vm3 = vcmask 891904  }
 0x52d   : > { %v4238_v20 = vmax.bf16 %v4221_v59, %v13245_v30  ;;  %v4239_v47 = vmax.bf16 %v4222_v5, %v13428_v18  ;;  %v5568_v30 = vand.u32 %v10915_v44, %v12914_v40  ;;  %v5562_v18 = vand.u32 %v10916_v51, %v12914_v40 }
 0x52e   : > { %v6030_v4 = vpop.permute.xlu0 %6029 }
 0x52f   : > { %5731 = vmatprep.mubr.bf16.mxu0 %v4239_v47  ;;  %5940 = vmatprep.mubr.bf16.mxu1 %v4239_v47  ;;  %v6010_v41 = vpop.permute.xlu1 %6009 }
 0x530   : > { %5732 = vmatmul.mubr.bf16.vlgmr.msra.gmra.mrb[36].mxu0 %v4238_v20  ;;  %5941 = vmatmul.mubr.bf16.vlgmr.msra.gmra.mrb[36].mxu1 %v4238_v20 }
 0x531   : > { %5743 = vmatpush1.bf16.msra.mxu0 %v10911_v45  ;;  %10270 = vmatpush3.bf16.msra.mxu1 %v10914_v7 }
 0x532   : > { %v6072_v38 = vpop.permute.xlu0 %6071  ;;  %10271 = vmatprep.subr.bf16.mxu1 %v11182_v26  ;;  %5744 = vmatprep.subr.bf16.mxu0 %v5565_v35 }
 0x533   : > { %v6051_v39 = vpop.permute.xlu1 %6050  ;;  %10273 = vmatprep.mubr.msk.bf16.mxu1 %vm11183_vm14, %v11182_v26  ;;  %5774 = vmatprep.mubr.bf16.mxu0 %v11179_v10 }
 0x535   : > { %10272 = vmatpush3.bf16.msra.mxu1 %v5568_v30  ;;  %5745 = vmatpush1.bf16.msra.mxu0 %v5562_v18 }
 0x536   : > { %6443 = vmatprep.subr.bf16.mxu1 %v13327_v32  ;;  %v6114_v48 = vpop.permute.xlu0 %6113 }
 0x537   : > { %v6093_v43 = vpop.permute.xlu1 %6092 }
 0x538   : > { %10274 = vmatmul.mubr.msk.bf16.vlgmr.msra.gmra.mrb[40].mxu1 %vm3682_vm13, %v4240_v58 }
 0x539   : > { %6444 = vmatpush1.bf16.msra.mxu1 %v13325_v49 }
 0x53a   : > { %v6032_v33 = vpop.permute.xlu0 %6031 }
 0x53b   : > { %v6036_v16 = vsel %vm509_vm1, %v6030_v4, %v6032_v33  ;;  %v6135_v54 = vpop.permute.xlu1 %6134 }
 0x53c   : > { %9643 = vmatmul.mubr.msk.bf16.vlgmr.msra.gmra.mrb[36].mxu0 %vm3682_vm13, %v4240_v58  ;;  %v6342_v58 = vld [vmem:[#allocation5 + $0x10] sm:$0xff] }
 0x53e   : > { %v6074_v10 = vpop.permute.xlu0 %6073 }
 0x53f   : > { %v6078_v14 = vsel %vm6077_vm3, %v6072_v38, %v6074_v10  ;;  %v6012_v34 = vpop.permute.xlu1 %6011 }
 0x540   : > { %v6015_v29 = vsel %vm446_vm0, %v6010_v41, %v6012_v34 }
 0x542   : > { %v6116_v32 = vpop.permute.xlu0 %6115 }
 0x543   : > { %v6120_v3 = vsel %vm698_vm5, %v6114_v48, %v6116_v32  ;;  %v6053_v19 = vpop.permute.xlu1 %6052 }
 0x544   : > { %v6057_v49 = vsel %vm6056_vm4, %v6051_v39, %v6053_v19 }
 0x546   : > { %v6014_v61 = vpop.permute.xlu0 %6013 }
 0x547   : > { %v6016_v17 = vsel %vm446_vm0, %v6012_v34, %v6014_v61  ;;  %6022 = vst.msk [vmem:[#allocation5 + $0x40] sm:$0xff] %vm6001_vm2, %v6014_v61  ;;  %v6095_v0 = vpop.permute.xlu1 %6094 }
 0x548   : > { %v6099_v27 = vsel %vm6098_vm6, %v6093_v43, %v6095_v0  ;;  %6445 = vmatprep.subr.bf16.mxu1 %v6016_v17  ;;  %v13684_v43 = vld [vmem:[%s14584_s4 + $0x4] ss:$8 sps:$4 sm:$0xff]  }
 0x549   : > { %6446 = vmatpush1.bf16.msra.mxu1 %v6015_v29  ;;  %9649 = vmatprep.mubr.msk.bf16.mxu1 %vm6436_vm8, %v13684_v43 }
 0x54a   : > { %v6055_v22 = vpop.permute.xlu0 %6054  ;;  %9651 = vmatprep.mubr.msk.bf16.mxu0 %vm6436_vm8, %v13684_v43 }
 0x54b   : > { %v6058_v23 = vsel %vm6056_vm4, %v6053_v19, %v6055_v22  ;;  %6064 = vst.msk [vmem:[#allocation5 + $0xa0] sm:$0xff] %vm6001_vm2, %v6055_v22  ;;  %v6137_v6 = vpop.permute.xlu1 %6136 }
 0x54c   : > { %v6141_v50 = vsel %vm6140_vm7, %v6135_v54, %v6137_v6  ;;  %v6395_v54 = vld [vmem:[%s14585_s5 + $0x8] sm:$0xff] }
 0x54e   : > { %v6097_v36 = vpop.permute.xlu0 %6096  ;;  %v6348_v17 = vld [vmem:[#allocation5 + $0x40] sm:$0xff] }
 0x54f   : > { %v6100_v1 = vsel %vm6098_vm6, %v6095_v0, %v6097_v36  ;;  %6106 = vst.msk [vmem:[#allocation5 + $0x100] sm:$0xff] %vm6001_vm2, %v6097_v36  ;;  %v6034_v42 = vpop.permute.xlu1 %6033 }
 0x550   : > { %v6037_v2 = vsel %vm509_vm1, %v6032_v33, %v6034_v42  ;;  %6043 = vst.msk [vmem:[#allocation5 + $0x70] sm:$0xff] %vm6001_vm2, %v6034_v42  ;;  %v6150_v33 = vld [vmem:[#allocation4 + $0x8] sm:$0xff] }
 0x551   : > { %6447 = vmatprep.subr.bf16.mxu1 %v6037_v2 }
 0x552   : > { %v6139_v11 = vpop.permute.xlu0 %6138  ;;  %6448 = vmatpush1.bf16.msra.mxu1 %v6036_v16  ;;  %v6394_v16 = vld [vmem:[%s14585_s5] sm:$0xff] }
 0x553   : > { %v6142_v21 = vsel %vm6140_vm7, %v6137_v6, %v6139_v11  ;;  %6148 = vst.msk [vmem:[#allocation5 + $0x160] sm:$0xff] %vm6001_vm2, %v6139_v11  ;;  %v6076_v31 = vpop.permute.xlu1 %6075  ;;  %6449 = vmatprep.subr.bf16.mxu1 %v6058_v23  ;;  %v6360_v42 = vld [vmem:[#allocation5 + $0xa0] sm:$0xff] }
 0x554   : > { %v6079_v37 = vsel %vm6077_vm3, %v6074_v10, %v6076_v31  ;;  %6085 = vst.msk [vmem:[#allocation5 + $0xd0] sm:$0xff] %vm6001_vm2, %v6076_v31  ;;  %v6396_v10 = vld [vmem:[%s14585_s5 + $0x10] sm:$0xff] }
 0x556   : > { %6450 = vmatpush1.bf16.msra.mxu1 %v6057_v49 }
 0x557   : > { %v6118_v12 = vpop.permute.xlu1 %6117  ;;  %6451 = vmatprep.subr.bf16.mxu1 %v6079_v37  ;;  %v6354_v23 = vld [vmem:[#allocation5 + $0x70] sm:$0xff] }
 0x558   : > { %v6121_v46 = vsel %vm698_vm5, %v6116_v32, %v6118_v12  ;;  %6127 = vst.msk [vmem:[#allocation5 + $0x130] sm:$0xff] %vm6001_vm2, %v6118_v12 }
 0x55a   : > { %6452 = vmatpush1.bf16.msra.mxu1 %v6078_v14  ;;  %v6397_v14 = vld [vmem:[%s14585_s5 + $0x18] sm:$0xff] }
 0x55b   : > { %6453 = vmatprep.subr.bf16.mxu1 %v6100_v1  ;;  %v6366_v31 = vld [vmem:[#allocation5 + $0xd0] sm:$0xff] }
 0x55e   : > { %6454 = vmatpush1.bf16.msra.mxu1 %v6099_v27 }
 0x55f   : > { %6455 = vmatprep.subr.bf16.mxu1 %v6121_v46 }
 0x562   : > { %6456 = vmatpush1.bf16.msra.mxu1 %v6120_v3 }
 0x563   : > { %6457 = vmatprep.subr.bf16.mxu1 %v6142_v21 }
 0x566   : > { %6458 = vmatpush1.bf16.msra.mxu1 %v6141_v50 }
 0x589   : > { %v9989_v13 = vpop.f32.mrb[32].mxu1 }
 0x58a   : > { %v9990_v52 = vpop.f32.mrb[33].mxu1 }
 0x58b   : > { %v9991_v24 = vadd.f32 %v9990_v52, %v9989_v13  ;;  %v9992_v53 = vpop.f32.mrb[34].mxu1  ;;  %v13736_v52 = vld [vmem:[%s14584_s4] ss:$8 sps:$4 sm:$0xff]  }
 0x58c   : > { %v9993_v55 = vpop.f32.mrb[35].mxu1 }
 0x58d   : > { %v5902_v56 = vadd.f32 %v9991_v24, %v13607_v15  ;;  %v9994_v8 = vadd.f32 %v9993_v55, %v9992_v53  ;;  %v6372_v24 = vld [vmem:[#allocation5 + $0x100] sm:$0xff]  ;;  %v13741_v55 = vld [vmem:[%s14584_s4 + $0x14] ss:$8 sps:$4 sm:$0xff]  }
 0x58f   : > { %v5905_v57 = vadd.f32 %v9994_v8, %v13610_v9 }
 0x603   : > { %v10011_v60 = vpop.f32.mrb[36].mxu1 }
 0x604   : > { %v10012_v28 = vpop.f32.mrb[37].mxu1 }
 0x605   : > { %v10013_v62 = vadd.f32 %v10012_v28, %v10011_v60  ;;  %v10014_v63 = vpop.f32.mrb[38].mxu1  ;;  %v6378_v60 = vld [vmem:[#allocation5 + $0x130] sm:$0xff] }
 0x606   : > { %v10015_v59 = vpop.f32.mrb[39].mxu1  ;;  %v6338_v28 = vld [vmem:[%s14584_s4 + $0x10] sm:$0xff] }
 0x607   : > { %v10016_v5 = vadd.f32 %v10015_v59, %v10014_v63  ;;  %v5943_v45 = vadd.f32 %v10013_v62, %v5902_v56  ;;  %v6339_v62 = vld [vmem:[%s14584_s4 + $0x18] sm:$0xff] }
 0x609   : > { %v5946_v7 = vadd.f32 %v10016_v5, %v5905_v57 }
 0x60b   : > { %v5983_v20 = vpop.f32.mrb[40].mxu1 }
 0x60c   : > { %v5984_v47 = vadd.f32 %v5983_v20, %v5943_v45  ;;  %v10275_v44 = vpop.f32.mrb[41].mxu1  ;;  %v6384_v20 = vld [vmem:[#allocation5 + $0x160] sm:$0xff] }
 0x60d   : > { %v5986_v51 = vpop.f32.mrb[42].mxu1 }
 0x60e   : > { %v5987_v4 = vadd.f32 %v5986_v51, %v5946_v7  ;;  %v10276_v35 = vpop.f32.mrb[43].mxu1  ;;  %v9647_v7 = vcombine.low %v6338_v28, %v6339_v62 }
 0x60f   : > { %v5776_v41 = vpop.f32.mrb[36].mxu0 }
 0x610   : > { %v5992_v30 = vpack.c.bf16 %v5987_v4, %v5984_v47  ;;  %v5778_v15 = vpop.f32.mrb[37].mxu0 }
 0x611   : > { %v5780_v18 = vpop.f32.mrb[38].mxu0 }
 0x612   : > { %5995 = vst.msk [vmem:[#allocation4 + $0x28] sm:$0xff] %vm4124_vm15, %v5992_v30  ;;  %v5990_v9 = vpack.c.bf16 %v5780_v18, %v5776_v41  ;;  %v5782_v38 = vpop.f32.mrb[39].mxu0 }
 0x613   : > { %v13668_v39 = vpack.c.bf16 %v5782_v38, %v5778_v15 }
 0x614   : > { %6202 = vrot.lane.b32.xlu1 %v5990_v9, %s14627_s16  ;;  %6182 = vrot.lane.b32.xlu0 %v5990_v9, %s14626_s12 }
 0x615   : > { %6496 = vmatprep.subr.bf16.mxu0 %v5990_v9 }
 0x616   : > { %6497 = vmatpush1.bf16.msra.mxu0 %v6342_v58 }
 0x618   : > { %6242 = vrot.lane.b32.xlu1 %v5990_v9, %s14630_s19  ;;  %6222 = vrot.lane.b32.xlu0 %v5990_v9, %s14628_s1 }
 0x619   : > { %v6178_v48 = vld [vmem:[#allocation4 + $0x28] sm:$0xff] }
 0x61a   : > { %6175 = vst.msk [vmem:[#allocation5 + $0x28] sm:$0xff] %vm6001_vm2, %v6178_v48 }
 0x61c   : > { %6262 = vrot.lane.b32.xlu0 %v5990_v9, %s14629_s25  ;;  %6184 = vrot.lane.b32.xlu1 %v13668_v39, %s14626_s12 }
 0x620   : > { %6204 = vrot.lane.b32.xlu0 %v13668_v39, %s14627_s16  ;;  %6159 = vrot.lane.b32.xlu1 %v13367_v25, %s11188_s14  ;;  %v6149_v25 = vld [vmem:[#allocation4] sm:$0xff] }
 0x621   : > { %v6345_v53 = vld [vmem:[#allocation5 + $0x28] sm:$0xff] }
 0x624   : > { %6157 = vrot.lane.b32.xlu0 %v6150_v33, %s11188_s14  ;;  %6224 = vrot.lane.b32.xlu1 %v13668_v39, %s14628_s1 }
 0x628   : > { %6244 = vrot.lane.b32.xlu0 %v13668_v39, %s14630_s19  ;;  %6282 = vrot.lane.b32.xlu1 %v5990_v9, %s14624_s13 }
 0x62c   : > { %6155 = vrot.lane.b32.xlu0 %v6149_v25, %s11188_s14  ;;  %6264 = vrot.lane.b32.xlu1 %v13668_v39, %s14629_s25 }
 0x630   : > { %6284 = vrot.lane.b32.xlu0 %v13668_v39, %s14624_s13  ;;  %6302 = vrot.lane.b32.xlu1 %v5990_v9, %s14631_s29 }
 0x634   : > { %6304 = vrot.lane.b32.xlu0 %v13668_v39, %s14631_s29  ;;  %6186 = vrot.lane.b32.xlu1 %v6178_v48, %s14626_s12 }
 0x638   : > { %6322 = vrot.lane.b32.xlu0 %v5990_v9, %s11188_s14  ;;  %6324 = vrot.lane.b32.xlu1 %v13668_v39, %s11188_s14 }
 0x63c   : > { %6206 = vrot.lane.b32.xlu0 %v6178_v48, %s14627_s16  ;;  %6226 = vrot.lane.b32.xlu1 %v6178_v48, %s14628_s1 }
 0x640   : > { %6246 = vrot.lane.b32.xlu0 %v6178_v48, %s14630_s19  ;;  %6266 = vrot.lane.b32.xlu1 %v6178_v48, %s14629_s25 }
 0x644   : > { %6286 = vrot.lane.b32.xlu0 %v6178_v48, %s14624_s13  ;;  %6306 = vrot.lane.b32.xlu1 %v6178_v48, %s14631_s29  ;;  %s11114_s29 = scalar_lea.vmem %s11113_s24, 64 }
 0x648   : > { %6326 = vrot.lane.b32.xlu0 %v6178_v48, %s11188_s14  ;;  %6400 = vperm.xlu1 %10388, %v6394_v16  }
 0x64c   : > { %6405 = vperm.xlu0 %10389, %v6395_v54   ;;  %6410 = vperm.xlu1 %10388, %v6396_v10  }
 0x650   : > { %6415 = vperm.xlu0 %10389, %v6397_v14  }
 0x686   : > { %v6183_v34 = vpop.permute.xlu0 %6182  ;;  %v6203_v29 = vpop.permute.xlu1 %6202 }
 0x68a   : > { %v6223_v32 = vpop.permute.xlu0 %6222  ;;  %v6243_v3 = vpop.permute.xlu1 %6242 }
 0x68e   : > { %v6263_v19 = vpop.permute.xlu0 %6262  ;;  %v6185_v49 = vpop.permute.xlu1 %6184 }
 0x68f   : > { %v6188_v61 = vsel %vm446_vm0, %v6183_v34, %v6185_v49 }
 0x690   : > { %6498 = vmatprep.subr.bf16.mxu0 %v6188_v61 }
 0x691   : > { %6499 = vmatpush1.bf16.msra.mxu0 %v6348_v17 }
 0x692   : > { %v13723_v0 = vpop.permute.xlu0 %6204  ;;  %v6160_v27 = vpop.permute.xlu1 %6159 }
 0x693   : > { %v6208_v22 = vsel %vm509_vm1, %v6203_v29, %v13723_v0  ;;  %6169 = vst.msk [vmem:[#allocation5 + $0x190] sm:$0xff] %vm6001_vm2, %v6160_v27 }
 0x694   : > { %6500 = vmatprep.subr.bf16.mxu0 %v6208_v22 }
 0x695   : > { %6501 = vmatpush1.bf16.msra.mxu0 %v6354_v23 }
 0x696   : > { %v6158_v6 = vpop.permute.xlu0 %6157  ;;  %v6225_v50 = vpop.permute.xlu1 %6224 }
 0x697   : > { %v6163_v36 = vsel %vm6161_vm9, %v6158_v6, %v6160_v27  ;;  %v6228_v1 = vsel %vm6056_vm4, %v6223_v32, %v6225_v50 }
 0x698   : > { %6459 = vmatprep.subr.bf16.mxu1 %v6163_v36  ;;  %6502 = vmatprep.subr.bf16.mxu0 %v6228_v1 }
 0x699   : > { %6503 = vmatpush1.bf16.msra.mxu0 %v6360_v42 }
 0x69a   : > { %v6245_v2 = vpop.permute.xlu0 %6244  ;;  %v6283_v11 = vpop.permute.xlu1 %6282  ;;  %v6390_v4 = vld [vmem:[#allocation5 + $0x190] sm:$0xff] }
 0x69b   : > { %v6248_v21 = vsel %vm6077_vm3, %v6243_v3, %v6245_v2 }
 0x69c   : > { %6504 = vmatprep.subr.bf16.mxu0 %v6248_v21 }
 0x69d   : > { %6505 = vmatpush1.bf16.msra.mxu0 %v6366_v31 }
 0x69e   : > { %v6156_v37 = vpop.permute.xlu0 %6155  ;;  %v6265_v12 = vpop.permute.xlu1 %6264 }
 0x69f   : > { %v6162_v46 = vsel %vm6161_vm9, %v6156_v37, %v6158_v6  ;;  %v6268_v13 = vsel %vm6098_vm6, %v6263_v19, %v6265_v12 }
 0x6a0   : > { %6460 = vmatpush1.bf16.msra.mxu1 %v6162_v46  ;;  %6506 = vmatprep.subr.bf16.mxu0 %v6268_v13 }
 0x6a1   : > { %6507 = vmatpush1.bf16.msra.mxu0 %v6372_v24  ;;  %6549 = vmatprep.subr.bf16.mxu1 %v6345_v53 }
 0x6a2   : > { %v6285_v56 = vpop.permute.xlu0 %6284  ;;  %v6303_v8 = vpop.permute.xlu1 %6302 }
 0x6a3   : > { %v6288_v57 = vsel %vm698_vm5, %v6283_v11, %v6285_v56  ;;  %6476 = vmatmul.mubr.bf16.vlgmr.msra.gmra.mrb[44].mxu1 %v13736_v52 }
 0x6a4   : > { %6508 = vmatprep.subr.bf16.mxu0 %v6288_v57  ;;  %6550 = vmatpush1.bf16.msra.mxu1 %v13668_v39 }
 0x6a5   : > { %6509 = vmatpush1.bf16.msra.mxu0 %v6378_v60  ;;  %9650 = vmatprep.mubr.msk.bf16.mxu1 %vm6436_vm8, %v13741_v55 }
 0x6a6   : > { %v6305_v63 = vpop.permute.xlu0 %6304  ;;  %v6187_v59 = vpop.permute.xlu1 %6186 }
 0x6a7   : > { %v6308_v5 = vsel %vm6140_vm7, %v6303_v8, %v6305_v63  ;;  %v6189_v45 = vsel %vm446_vm0, %v6185_v49, %v6187_v59  ;;  %6195 = vst.msk [vmem:[#allocation5 + $0x58] sm:$0xff] %vm6001_vm2, %v6187_v59 }
 0x6a8   : > { %6510 = vmatprep.subr.bf16.mxu0 %v6308_v5 }
 0x6a9   : > { %6511 = vmatpush1.bf16.msra.mxu0 %v6384_v20 }
 0x6aa   : > { %v6323_v47 = vpop.permute.xlu0 %6322  ;;  %v6325_v44 = vpop.permute.xlu1 %6324 }
 0x6ab   : > { %v6328_v51 = vsel %vm6161_vm9, %v6323_v47, %v6325_v44  ;;  %6486 = vmatmul.mubr.bf16.gmra.mrb[48].mxu1 %v9647_v7 }
 0x6ac   : > { %6512 = vmatprep.subr.bf16.mxu0 %v6328_v51  ;;  %9653 = vmatprep.mubr.msk.bf16.mxu1 %vm6436_vm8, %v13684_v43 }
 0x6ad   : > { %6513 = vmatpush1.bf16.msra.mxu0 %v6390_v4 }
 0x6ae   : > { %v6207_v35 = vpop.permute.xlu0 %6206  ;;  %v6227_v41 = vpop.permute.xlu1 %6226  ;;  %v6351_v30 = vld [vmem:[#allocation5 + $0x58] sm:$0xff] }
 0x6af   : > { %v6209_v15 = vsel %vm509_vm1, %v13723_v0, %v6207_v35  ;;  %6215 = vst.msk [vmem:[#allocation5 + $0x88] sm:$0xff] %vm6001_vm2, %v6207_v35  ;;  %v6229_v18 = vsel %vm6056_vm4, %v6225_v50, %v6227_v41  ;;  %6235 = vst.msk [vmem:[#allocation5 + $0xb8] sm:$0xff] %vm6001_vm2, %v6227_v41  ;;  %6551 = vmatprep.subr.bf16.mxu1 %v6351_v30  ;;  %vm6859_vm1 = vcmask 89088  }
 0x6b0   : > { %6552 = vmatpush1.bf16.msra.mxu1 %v6189_v45  ;;  %6529 = vmatmul.mubr.bf16.vlgmr.msra.gmra.mrb[40].mxu0 %v13736_v52 }
 0x6b1   : > { %9652 = vmatprep.mubr.msk.bf16.mxu0 %vm6436_vm8, %v13741_v55 }
 0x6b2   : > { %v6247_v9 = vpop.permute.xlu0 %6246  ;;  %v6267_v38 = vpop.permute.xlu1 %6266 }
 0x6b3   : > { %v6249_v39 = vsel %vm6077_vm3, %v6245_v2, %v6247_v9  ;;  %6255 = vst.msk [vmem:[#allocation5 + $0xe8] sm:$0xff] %vm6001_vm2, %v6247_v9  ;;  %v6269_v58 = vsel %vm6098_vm6, %v6265_v12, %v6267_v38  ;;  %6275 = vst.msk [vmem:[#allocation5 + $0x118] sm:$0xff] %vm6001_vm2, %v6267_v38 }
 0x6b6   : > { %v6287_v48 = vpop.permute.xlu0 %6286  ;;  %v6307_v43 = vpop.permute.xlu1 %6306  ;;  %v6357_v33 = vld [vmem:[#allocation5 + $0x88] sm:$0xff]  ;;  %v6363_v54 = vld [vmem:[#allocation5 + $0xb8] sm:$0xff] }
 0x6b7   : > { %v6289_v25 = vsel %vm698_vm5, %v6285_v56, %v6287_v48  ;;  %6295 = vst.msk [vmem:[#allocation5 + $0x148] sm:$0xff] %vm6001_vm2, %v6287_v48  ;;  %v6309_v16 = vsel %vm6140_vm7, %v6305_v63, %v6307_v43  ;;  %6315 = vst.msk [vmem:[#allocation5 + $0x178] sm:$0xff] %vm6001_vm2, %v6307_v43  ;;  %6553 = vmatprep.subr.bf16.mxu1 %v6357_v33  ;;  %vm9016_vm5 = vcmask 261120  }
 0x6b8   : > { %6554 = vmatpush1.bf16.msra.mxu1 %v6209_v15  ;;  %6539 = vmatmul.mubr.bf16.gmra.mrb[44].mxu0 %v9647_v7 }
 0x6b9   : > { %6555 = vmatprep.subr.bf16.mxu1 %v6363_v54 }
 0x6ba   : > { %v6327_v10 = vpop.permute.xlu0 %6326  ;;  %v6369_v34 = vld [vmem:[#allocation5 + $0xe8] sm:$0xff]  ;;  %v6375_v29 = vld [vmem:[#allocation5 + $0x118] sm:$0xff] }
 0x6bb   : > { %v6329_v14 = vsel %vm6161_vm9, %v6325_v44, %v6327_v10  ;;  %6335 = vst.msk [vmem:[#allocation5 + $0x1a8] sm:$0xff] %vm6001_vm2, %v6327_v10 }
 0x6bc   : > { %6556 = vmatpush1.bf16.msra.mxu1 %v6229_v18 }
 0x6bd   : > { %6557 = vmatprep.subr.bf16.mxu1 %v6369_v34 }
 0x6be   : > { %v6381_v32 = vld [vmem:[#allocation5 + $0x148] sm:$0xff]  ;;  %v6387_v3 = vld [vmem:[#allocation5 + $0x178] sm:$0xff] }
 0x6c0   : > { %6558 = vmatpush1.bf16.msra.mxu1 %v6249_v39 }
 0x6c1   : > { %6559 = vmatprep.subr.bf16.mxu1 %v6375_v29 }
 0x6c2   : > { %v6393_v19 = vld [vmem:[#allocation5 + $0x1a8] sm:$0xff] }
 0x6c4   : > { %6560 = vmatpush1.bf16.msra.mxu1 %v6269_v58 }
 0x6c5   : > { %6561 = vmatprep.subr.bf16.mxu1 %v6381_v32 }
 0x6c7   : > { %v13781_v49 = vpop.permute.xlu1 %6400 }
 0x6c8   : > { %6562 = vmatpush1.bf16.msra.mxu1 %v6289_v25 }
 0x6c9   : > { %6563 = vmatprep.subr.bf16.mxu1 %v6387_v3 }
 0x6cb   : > { %v13784_v27 = vpop.permute.xlu0 %6405  ;;  %v13791_v31 = vpop.permute.xlu1 %6410 }
 0x6cc   : > { %6564 = vmatpush1.bf16.msra.mxu1 %v6309_v16 }
 0x6cd   : > { %6565 = vmatprep.subr.bf16.mxu1 %v6393_v19 }
 0x6d0   : > { %6566 = vmatpush1.bf16.msra.mxu1 %v6329_v14 }
 0x6d3   : > { %6582 = vmatmul.mubr.bf16.vlgmr.msra.gmra.mrb[52].mxu1 %v13736_v52  ;;  %v13796_v52 = vpop.permute.xlu0 %6415 }
 0x6d4   : > { %9654 = vmatprep.mubr.msk.bf16.mxu1 %vm6436_vm8, %v13741_v55 }
 0x6db   : > { %6592 = vmatmul.mubr.bf16.gmra.mrb[56].mxu1 %v9647_v7 }
 0x776   : > { %v6477_v61 = vpop.f32.mrb[44].mxu1 }
 0x777   : > { %v6478_v17 = vadd.f32 %v6477_v61, %v13781_v49  ;;  %v6479_v0 = vpop.f32.mrb[45].mxu1 }
 0x778   : > { %v6480_v22 = vadd.f32 %v6479_v0, %v13781_v49  ;;  %v6481_v23 = vpop.f32.mrb[46].mxu1 }
 0x779   : > { %v6482_v6 = vadd.f32 %v6481_v23, %v13784_v27  ;;  %v6483_v50 = vpop.f32.mrb[47].mxu1  ;;  %v6602_v1 = vmax.f32 %v6478_v17, 0.0 }
 0x77a   : > { %v6484_v36 = vadd.f32 %v6483_v50, %v13784_v27  ;;  %v6603_v2 = vmax.f32 %v6480_v22, 0.0 }
 0x77b   : > { %v6608_v42 = vmax.f32 %v6482_v6, 0.0 }
 0x77c   : > { %v6609_v11 = vmax.f32 %v6484_v36, 0.0 }
 0x77d   : > { %v13789_v21 = vpack.c.bf16 %v6608_v42, %v6602_v1 }
 0x77e   : > { %v13793_v37 = vpack.c.bf16 %v6609_v11, %v6603_v2  ;;  %v6487_v12 = vpop.f32.mrb[48].mxu1 }
 0x77f   : > { %v6488_v46 = vadd.f32 %v6487_v12, %v13791_v31  ;;  %v6489_v13 = vpop.f32.mrb[49].mxu1 }
 0x780   : > { %v6490_v24 = vadd.f32 %v6489_v13, %v13791_v31  ;;  %v6491_v53 = vpop.f32.mrb[50].mxu1  ;;  %6664 = vrot.lane.b32.xlu1 %v13793_v37, %s14626_s12 }
 0x781   : > { %v6492_v55 = vadd.f32 %v6491_v53, %v13796_v52  ;;  %v6493_v56 = vpop.f32.mrb[51].mxu1  ;;  %v6614_v57 = vmax.f32 %v6488_v46, 0.0  ;;  %v10924_v46 = vld [vmem:[%s14586_s6 + $0x40] sm:$0xff]  }
 0x782   : > { %v6494_v8 = vadd.f32 %v6493_v56, %v13796_v52  ;;  %v6615_v62 = vmax.f32 %v6490_v24, 0.0  ;;  %10020 = vmatprep.subr.bf16.mxu0 %v10924_v46 }
 0x783   : > { %v6620_v60 = vmax.f32 %v6492_v55, 0.0  ;;  %v6530_v28 = vpop.f32.mrb[40].mxu0 }
 0x784   : > { %v6621_v63 = vmax.f32 %v6494_v8, 0.0  ;;  %v6531_v59 = vadd.f32 %v6530_v28, %v13781_v49  ;;  %v6532_v5 = vpop.f32.mrb[41].mxu0  ;;  %6662 = vrot.lane.b32.xlu1 %v13789_v21, %s14626_s12 }
 0x785   : > { %v13806_v45 = vpack.c.bf16 %v6620_v60, %v6614_v57  ;;  %v6533_v7 = vadd.f32 %v6532_v5, %v13781_v49  ;;  %v6534_v20 = vpop.f32.mrb[42].mxu0  ;;  %v10927_v57 = vld [vmem:[%s14586_s6 + $0x8] sm:$0xff]  }
 0x786   : > { %v13809_v47 = vpack.c.bf16 %v6621_v63, %v6615_v62  ;;  %v6535_v44 = vadd.f32 %v6534_v20, %v13784_v27  ;;  %v6536_v51 = vpop.f32.mrb[43].mxu0  ;;  %v6604_v35 = vmax.f32 %v6531_v59, 0.0  ;;  %v10930_v20 = vld [vmem:[%s14586_s6 + $0x58] sm:$0xff]  }
 0x787   : > { %v6537_v4 = vadd.f32 %v6536_v51, %v13784_v27  ;;  %v6605_v30 = vmax.f32 %v6533_v7, 0.0  ;;  %v10929_v7 = vld [vmem:[%s14586_s6 + $0x10] sm:$0xff]   ;;  %v10932_v51 = vld [vmem:[%s14586_s6 + $0x60] sm:$0xff]  }
 0x788   : > { %v6610_v41 = vmax.f32 %v6535_v44, 0.0  ;;  %v10931_v44 = vld [vmem:[%s14586_s6 + $0x18] sm:$0xff]  }
 0x789   : > { %v6611_v15 = vmax.f32 %v6537_v4, 0.0  ;;  %v10933_v4 = vld [vmem:[%s14586_s6 + $0x20] sm:$0xff]  }
 0x78a   : > { %v13813_v18 = vpack.c.bf16 %v6610_v41, %v6604_v35  ;;  %v10934_v35 = vld [vmem:[%s14586_s6 + $0x68] sm:$0xff]  }
 0x78b   : > { %v13815_v9 = vpack.c.bf16 %v6611_v15, %v6605_v30  ;;  %v6540_v38 = vpop.f32.mrb[44].mxu0  ;;  %v10935_v41 = vld [vmem:[%s14586_s6 + $0x28] sm:$0xff]   ;;  %v10936_v30 = vld [vmem:[%s14586_s6 + $0x70] sm:$0xff]  }
 0x78c   : > { %v6541_v39 = vadd.f32 %v6540_v38, %v13791_v31  ;;  %v6542_v58 = vpop.f32.mrb[45].mxu0  ;;  %6666 = vrot.lane.b32.xlu0 %v13813_v18, %s14626_s12  ;;  %v10937_v15 = vld [vmem:[%s14586_s6 + $0x30] sm:$0xff]   ;;  %v10938_v38 = vld [vmem:[%s14586_s6 + $0x78] sm:$0xff]  }
 0x78d   : > { %v6543_v48 = vadd.f32 %v6542_v58, %v13791_v31  ;;  %v6544_v43 = vpop.f32.mrb[46].mxu0 }
 0x78e   : > { %v6545_v33 = vadd.f32 %v6544_v43, %v13796_v52  ;;  %v6546_v25 = vpop.f32.mrb[47].mxu0  ;;  %v6616_v54 = vmax.f32 %v6541_v39, 0.0  ;;  %v10939_v39 = vld [vmem:[%s14586_s6 + $0x38] sm:$0xff]   ;;  %v10941_v43 = vld [vmem:[%s14586_s6 + $0x40] sm:$0xff]  }
 0x78f   : > { %v6547_v16 = vadd.f32 %v6546_v25, %v13796_v52  ;;  %v6617_v14 = vmax.f32 %v6543_v48, 0.0  ;;  %v10940_v48 = vld [vmem:[%s14586_s6 + $0x80] sm:$0x3f]  }
 0x790   : > { %v6622_v10 = vmax.f32 %v6545_v33, 0.0  ;;  %6670 = vrot.lane.b32.xlu0 %v13809_v47, %s14626_s12  ;;  %v6867_v33 = vand.u32 %v10940_v48, %v12914_v40 }
 0x791   : > { %v6623_v34 = vmax.f32 %v6547_v16, 0.0 }
 0x792   : > { %v13825_v29 = vpack.c.bf16 %v6622_v10, %v6616_v54  ;;  %10277 = vmatprep.subr.bf16.mxu1 %v6867_v33 }
 0x793   : > { %v13827_v32 = vpack.c.bf16 %v6623_v34, %v6617_v14  ;;  %10278 = vmatpush3.bf16.msra.mxu1 %v6867_v33 }
 0x794   : > { %6672 = vrot.lane.b32.xlu1 %v13825_v29, %s14626_s12  ;;  %6668 = vrot.lane.b32.xlu0 %v13806_v45, %s14626_s12 }
 0x7a6   : > { %v6583_v3 = vpop.f32.mrb[52].mxu1 }
 0x7a7   : > { %v6584_v19 = vadd.f32 %v6583_v3, %v13781_v49  ;;  %v6585_v61 = vpop.f32.mrb[53].mxu1 }
 0x7a8   : > { %v6586_v17 = vadd.f32 %v6585_v61, %v13781_v49  ;;  %v6587_v0 = vpop.f32.mrb[54].mxu1  ;;  %v10925_v49 = vld [vmem:[%s14586_s6] sm:$0xff]  }
 0x7a9   : > { %v6588_v22 = vadd.f32 %v6587_v0, %v13784_v27  ;;  %v6589_v23 = vpop.f32.mrb[55].mxu1  ;;  %v6606_v50 = vmax.f32 %v6584_v19, 0.0  ;;  %10021 = vmatpush3.bf16.msra.mxu0 %v10925_v49 }
 0x7aa   : > { %v6590_v6 = vadd.f32 %v6589_v23, %v13784_v27  ;;  %v6607_v1 = vmax.f32 %v6586_v17, 0.0  ;;  %v10926_v27 = vld [vmem:[%s14586_s6 + $0x48] sm:$0xff]  }
 0x7ab   : > { %v6612_v36 = vmax.f32 %v6588_v22, 0.0  ;;  %10022 = vmatprep.subr.bf16.mxu0 %v10926_v27 }
 0x7ac   : > { %v6613_v42 = vmax.f32 %v6590_v6, 0.0 }
 0x7ad   : > { %v13837_v2 = vpack.c.bf16 %v6612_v36, %v6606_v50  ;;  %10023 = vmatpush3.bf16.msra.mxu0 %v10927_v57 }
 0x7ae   : > { %v13839_v11 = vpack.c.bf16 %v6613_v42, %v6607_v1  ;;  %v6593_v12 = vpop.f32.mrb[56].mxu1 }
 0x7af   : > { %v6594_v13 = vadd.f32 %v6593_v12, %v13791_v31  ;;  %v6595_v24 = vpop.f32.mrb[57].mxu1  ;;  %7106 = vrot.lane.b32.xlu1 %v13837_v2, %s14626_s12 }
 0x7b0   : > { %v6596_v53 = vadd.f32 %v6595_v24, %v13791_v31  ;;  %v6597_v55 = vpop.f32.mrb[58].mxu1  ;;  %7108 = vrot.lane.b32.xlu0 %v13839_v11, %s14626_s12  ;;  %v10928_v31 = vld [vmem:[%s14586_s6 + $0x50] sm:$0xff]  }
 0x7b1   : > { %v6598_v56 = vadd.f32 %v6597_v55, %v13796_v52  ;;  %v6599_v8 = vpop.f32.mrb[59].mxu1  ;;  %v6618_v28 = vmax.f32 %v6594_v13, 0.0  ;;  %10024 = vmatprep.subr.bf16.mxu0 %v10928_v31  ;;  %v10944_v31 = vld [vmem:[%s14586_s6 + $0x8] sm:$0xff]  }
 0x7b2   : > { %v6600_v60 = vadd.f32 %v6599_v8, %v13796_v52  ;;  %v6619_v63 = vmax.f32 %v6596_v53, 0.0  ;;  %10025 = vmatpush3.bf16.msra.mxu0 %v10929_v7  ;;  %v10942_v53 = vld [vmem:[%s14586_s6] sm:$0xff]   ;;  %v10946_v7 = vld [vmem:[%s14586_s6 + $0x10] sm:$0xff]  }
 0x7b3   : > { %v6624_v62 = vmax.f32 %v6598_v56, 0.0  ;;  %7104 = vrot.lane.b32.xlu1 %v13815_v9, %s14626_s12  ;;  %10026 = vmatprep.subr.bf16.mxu0 %v10930_v20  ;;  %v10943_v56 = vld [vmem:[%s14586_s6 + $0x48] sm:$0xff]  }
 0x7b4   : > { %v6625_v59 = vmax.f32 %v6600_v60, 0.0 }
 0x7b5   : > { %v13866_v5 = vpack.c.bf16 %v6624_v62, %v6618_v28  ;;  %v10945_v28 = vld [vmem:[%s14586_s6 + $0x50] sm:$0xff]  }
 0x7b6   : > { %v13871_v52 = vpack.c.bf16 %v6625_v59, %v6619_v63  ;;  %10027 = vmatpush3.bf16.msra.mxu0 %v10931_v44  ;;  %v10947_v44 = vld [vmem:[%s14586_s6 + $0x58] sm:$0xff]  }
 0x7b7   : > { %10028 = vmatprep.subr.bf16.mxu0 %v10932_v51  ;;  %v10948_v51 = vld [vmem:[%s14586_s6 + $0x18] sm:$0xff]  }
 0x7b8   : > { %7114 = vrot.lane.b32.xlu0 %v13871_v52, %s14626_s12 }
 0x7ba   : > { %10029 = vmatpush3.bf16.msra.mxu0 %v10933_v4  ;;  %v10949_v4 = vld [vmem:[%s14586_s6 + $0x60] sm:$0xff]  }
 0x7bb   : > { %10030 = vmatprep.subr.bf16.mxu0 %v10934_v35  ;;  %v10950_v35 = vld [vmem:[%s14586_s6 + $0x20] sm:$0xff]  }
 0x7be   : > { %10031 = vmatpush3.bf16.msra.mxu0 %v10935_v41  ;;  %v10951_v41 = vld [vmem:[%s14586_s6 + $0x68] sm:$0xff]  }
 0x7bf   : > { %10032 = vmatprep.subr.bf16.mxu0 %v10936_v30  ;;  %v10952_v30 = vld [vmem:[%s14586_s6 + $0x28] sm:$0xff]  }
 0x7c2   : > { %10033 = vmatpush3.bf16.msra.mxu0 %v10937_v15  ;;  %v10953_v15 = vld [vmem:[%s14586_s6 + $0x70] sm:$0xff]  }
 0x7c3   : > { %10034 = vmatprep.subr.bf16.mxu0 %v10938_v38  ;;  %v10954_v38 = vld [vmem:[%s14586_s6 + $0x30] sm:$0xff]  }
 0x7c6   : > { %10035 = vmatpush3.bf16.msra.mxu0 %v10939_v39  ;;  %v10956_v39 = vld [vmem:[%s14586_s6 + $0x78] sm:$0xff]  }
 0x7c7   : > { %10051 = vmatprep.subr.bf16.mxu0 %v10941_v43 }
 0x7f2   : > { %v6665_v58 = vpop.permute.xlu1 %6664 }
 0x7f6   : > { %v6663_v25 = vpop.permute.xlu1 %6662 }
 0x7f7   : > { %v6674_v34 = vsel %vm446_vm0, %v6663_v25, %v6665_v58 }
 0x7f8   : > { %v6684_v19 = vmax.bf16 %v6674_v34, %v13789_v21  ;;  %v10955_v21 = vld [vmem:[%s14586_s6 + $0x80] sm:$0x3f]  }
 0x7f9   : > { %v7308_v6 = vand.u32 %v10955_v21, %v12914_v40 }
 0x7fb   : > { %10283 = vmatprep.subr.bf16.mxu1 %v7308_v6 }
 0x7fe   : > { %v6667_v16 = vpop.permute.xlu0 %6666 }
 0x7ff   : > { %v6675_v54 = vsel %vm446_vm0, %v6665_v58, %v6667_v16  ;;  %v6686_v10 = vmax.bf16 %v6667_v16, %v13813_v18  ;;  %v10957_v58 = vld [vmem:[%s14586_s6 + $0x38] sm:$0xff]  }
 0x800   : > { %v6685_v14 = vmax.bf16 %v6675_v54, %v13793_v37 }
 0x801   : > { %6700 = vrot.lane.b32.xlu0 %v6686_v10, %s14628_s1 }
 0x802   : > { %v6671_v3 = vpop.permute.xlu0 %6670  ;;  %6698 = vrot.lane.b32.xlu1 %v6685_v14, %s14628_s1 }
 0x806   : > { %v6669_v61 = vpop.permute.xlu0 %6668  ;;  %6696 = vrot.lane.b32.xlu1 %v6684_v19, %s14628_s1  ;;  %v6673_v17 = vpop.permute.xlu1 %6672 }
 0x807   : > { %v6676_v0 = vsel %vm446_vm0, %v6669_v61, %v6671_v3  ;;  %v6689_v22 = vmax.bf16 %v6673_v17, %v13825_v29  ;;  %v6677_v37 = vsel %vm446_vm0, %v6671_v3, %v6673_v17 }
 0x808   : > { %v6687_v18 = vmax.bf16 %v6676_v0, %v13806_v45  ;;  %v6688_v23 = vmax.bf16 %v6677_v37, %v13809_v47 }
 0x80a   : > { %6702 = vrot.lane.b32.xlu0 %v6687_v18, %s14628_s1  ;;  %6706 = vrot.lane.b32.xlu1 %v6689_v22, %s14628_s1 }
 0x80e   : > { %6704 = vrot.lane.b32.xlu0 %v6688_v23, %s14628_s1 }
 0x821   : > { %v7107_v29 = vpop.permute.xlu1 %7106 }
 0x822   : > { %v7109_v50 = vpop.permute.xlu0 %7108 }
 0x823   : > { %v7117_v45 = vsel %vm446_vm0, %v7107_v29, %v7109_v50  ;;  %v13934_v36 = vmax.bf16 %v7109_v50, %v13839_v11 }
 0x824   : > { %v13937_v1 = vmax.bf16 %v7117_v45, %v13837_v2 }
 0x825   : > { %7142 = vrot.lane.b32.xlu0 %v13934_v36, %s14628_s1  ;;  %v7105_v47 = vpop.permute.xlu1 %7104 }
 0x826   : > { %v7116_v42 = vsel %vm446_vm0, %v7105_v47, %v7107_v29  ;;  %7140 = vrot.lane.b32.xlu1 %v13937_v1, %s14628_s1 }
 0x827   : > { %v13945_v40 = vmax.bf16 %v7116_v42, %v13815_v9 }
 0x829   : > { %7112 = vrot.lane.b32.xlu0 %v13866_v5, %s14626_s12 }
 0x82a   : > { %v13949_v11 = vpop.permute.xlu0 %7114  ;;  %7138 = vrot.lane.b32.xlu1 %v13945_v40, %s14628_s1 }
 0x82b   : > { %v13955_v2 = vmax.bf16 %v13949_v11, %v13871_v52 }
 0x82d   : > { %7148 = vrot.lane.b32.xlu0 %v13955_v2, %s14628_s1 }
 0x82e   : > { %7110 = vrot.lane.b32.xlu1 %v13827_v32, %s14626_s12  ;;  %s9835_s12 = sshll.u32 %s11273_s21, 5  ;;  %s9063_s21 = scalar_lea.sflag [#allocation9], %s380_s26 }
 0x82f   : > { %s14538_s19 = scalar_lea.hbm %s14591_s11, %s9835_s12 }
 0x873   : > { %v6701_v9 = vpop.permute.xlu0 %6700 }
 0x874   : > { %v6720_v12 = vmax.bf16 %v6701_v9, %v6686_v10  ;;  %v6699_v46 = vpop.permute.xlu1 %6698 }
 0x875   : > { %v6709_v49 = vsel %vm6056_vm4, %v6699_v46, %v6701_v9 }
 0x876   : > { %v6719_v27 = vmax.bf16 %v6709_v49, %v6685_v14  ;;  %10279 = vmatprep.mubr.msk.bf16.mxu1 %vm6859_vm1, %v6720_v12 }
 0x878   : > { %6901 = vmatprep.mubr.bf16.mxu0 %v6719_v27  ;;  %v6697_v13 = vpop.permute.xlu1 %6696 }
 0x879   : > { %v6708_v24 = vsel %vm6056_vm4, %v6697_v13, %v6699_v46 }
 0x87a   : > { %v6718_v55 = vmax.bf16 %v6708_v24, %v6684_v19 }
 0x87c   : > { %v6703_v8 = vpop.permute.xlu0 %6702  ;;  %6902 = vmatmul.mubr.bf16.vlgmr.msra.gmra.mrb[48].mxu0 %v6718_v55  ;;  %v6707_v57 = vpop.permute.xlu1 %6706 }
 0x87d   : > { %10052 = vmatpush3.bf16.msra.mxu0 %v10942_v53  ;;  %v6723_v60 = vmax.bf16 %v6707_v57, %v6689_v22 }
 0x87e   : > { %10053 = vmatprep.subr.bf16.mxu0 %v10943_v56 }
 0x87f   : > { %10280 = vmatmul.mubr.msk.bf16.vlgmr.msra.gmra.mrb[60].mxu1 %vm6859_vm1, %v6723_v60 }
 0x880   : > { %v6705_v62 = vpop.permute.xlu0 %6704  ;;  %10284 = vmatpush3.bf16.msra.mxu1 %v7308_v6 }
 0x881   : > { %v6710_v63 = vsel %vm6056_vm4, %v6703_v8, %v6705_v62  ;;  %v6711_v59 = vsel %vm6056_vm4, %v6705_v62, %v6707_v57  ;;  %10054 = vmatpush3.bf16.msra.mxu0 %v10944_v31  ;;  %v10958_v31 = vld [vmem:[%s14587_s7 + $0x40] sm:$0xff]  }
 0x882   : > { %v6721_v52 = vmax.bf16 %v6710_v63, %v6687_v18  ;;  %v6722_v20 = vmax.bf16 %v6711_v59, %v6688_v23  ;;  %10055 = vmatprep.subr.bf16.mxu0 %v10945_v28  ;;  %v10959_v28 = vld [vmem:[%s14587_s7] sm:$0xff]   ;;  %v10962_v59 = vld [vmem:[%s14587_s7 + $0x48] sm:$0xff]   ;;  %10082 = vmatprep.subr.bf16.mxu1 %v10958_v31 }
 0x883   : > { %v10960_v62 = vld [vmem:[%s14587_s7 + $0xc0] sm:$0xff]  }
 0x884   : > { %6909 = vmatprep.mubr.bf16.mxu0 %v6722_v20  ;;  %v10961_v63 = vld [vmem:[%s14587_s7 + $0x80] sm:$0xff]  }
 0x885   : > { %10056 = vmatpush3.bf16.msra.mxu0 %v10946_v7  ;;  %v10964_v7 = vld [vmem:[%s14587_s7 + $0xc8] sm:$0xff]  }
 0x886   : > { %6910 = vmatmul.mubr.bf16.gmra.mrb[52].mxu0 %v6721_v52  ;;  %10057 = vmatprep.subr.bf16.mxu0 %v10947_v44  ;;  %v10963_v52 = vld [vmem:[%s14587_s7 + $0x8] sm:$0xff]  }
 0x887   : > { %v10965_v44 = vld [vmem:[%s14587_s7 + $0x88] sm:$0xff]  }
 0x889   : > { %10058 = vmatpush3.bf16.msra.mxu0 %v10948_v51  ;;  %v10966_v51 = vld [vmem:[%s14587_s7 + $0x50] sm:$0xff]  }
 0x88a   : > { %10059 = vmatprep.subr.bf16.mxu0 %v10949_v4  ;;  %v10967_v4 = vld [vmem:[%s14587_s7 + $0x10] sm:$0xff]  }
 0x88d   : > { %10060 = vmatpush3.bf16.msra.mxu0 %v10950_v35  ;;  %v10968_v35 = vld [vmem:[%s14587_s7 + $0xd0] sm:$0xff]  }
 0x88e   : > { %10061 = vmatprep.subr.bf16.mxu0 %v10951_v41  ;;  %v10969_v41 = vld [vmem:[%s14587_s7 + $0x90] sm:$0xff]  }
 0x891   : > { %10062 = vmatpush3.bf16.msra.mxu0 %v10952_v30  ;;  %v10970_v30 = vld [vmem:[%s14587_s7 + $0x58] sm:$0xff]  }
 0x892   : > { %10063 = vmatprep.subr.bf16.mxu0 %v10953_v15  ;;  %v10971_v15 = vld [vmem:[%s14587_s7 + $0x18] sm:$0xff]  }
 0x895   : > { %10064 = vmatpush3.bf16.msra.mxu0 %v10954_v38  ;;  %v10972_v38 = vld [vmem:[%s14587_s7 + $0xd8] sm:$0xff]  }
 0x896   : > { %10065 = vmatprep.subr.bf16.mxu0 %v10956_v39  ;;  %v10973_v39 = vld [vmem:[%s14587_s7 + $0x98] sm:$0xff]  }
 0x897   : > { %v7143_v48 = vpop.permute.xlu0 %7142 }
 0x898   : > { %v7162_v43 = vmax.bf16 %v7143_v48, %v13934_v36  ;;  %v7141_v33 = vpop.permute.xlu1 %7140 }
 0x899   : > { %v7151_v25 = vsel %vm6056_vm4, %v7141_v33, %v7143_v48  ;;  %10066 = vmatpush3.bf16.msra.mxu0 %v10957_v58  ;;  %v10974_v48 = vld [vmem:[%s14587_s7 + $0x60] sm:$0xff]  }
 0x89a   : > { %v7161_v16 = vmax.bf16 %v7151_v25, %v13937_v1  ;;  %10285 = vmatprep.mubr.msk.bf16.mxu1 %vm6859_vm1, %v7162_v43  ;;  %10104 = vmatprep.subr.bf16.mxu0 %v10960_v62 }
 0x89b   : > { %v7113_v54 = vpop.permute.xlu0 %7112 }
 0x89c   : > { %v7119_v10 = vsel %vm446_vm0, %v7113_v54, %v13949_v11  ;;  %7342 = vmatprep.mubr.bf16.mxu0 %v7161_v16  ;;  %v7139_v14 = vpop.permute.xlu1 %7138 }
 0x89d   : > { %v7130_v34 = vmax.bf16 %v7119_v10, %v13866_v5  ;;  %v7150_v3 = vsel %vm6056_vm4, %v7139_v14, %v7141_v33  ;;  %v10975_v33 = vld [vmem:[%s14587_s7 + $0x20] sm:$0xff]  }
 0x89e   : > { %v7160_v19 = vmax.bf16 %v7150_v3, %v13945_v40  ;;  %v10976_v10 = vld [vmem:[%s14587_s7 + $0xe0] sm:$0xff]  }
 0x89f   : > { %v7149_v61 = vpop.permute.xlu0 %7148  ;;  %7146 = vrot.lane.b32.xlu1 %v7130_v34, %s14628_s1  ;;  %v10977_v3 = vld [vmem:[%s14587_s7 + $0xa0] sm:$0xff]  }
 0x8a0   : > { %v7165_v17 = vmax.bf16 %v7149_v61, %v13955_v2  ;;  %v7111_v0 = vpop.permute.xlu1 %7110  ;;  %7343 = vmatmul.mubr.bf16.vlgmr.msra.gmra.mrb[56].mxu0 %v7160_v19 }
 0x8a1   : > { %v7118_v22 = vsel %vm446_vm0, %v7111_v0, %v7113_v54  ;;  %10105 = vmatpush3.bf16.msra.mxu0 %v10961_v63  ;;  %v10978_v0 = vld [vmem:[%s14587_s7 + $0x68] sm:$0xff]   ;;  %vm6972_vm0 = vcmask 523264  }
 0x8a2   : > { %v7129_v18 = vmax.bf16 %v7118_v22, %v13827_v32  ;;  %10286 = vmatmul.mubr.msk.bf16.vlgmr.msra.gmra.mrb[64].mxu1 %vm6859_vm1, %v7165_v17  ;;  %10106 = vmatprep.subr.bf16.mxu0 %v10964_v7 }
 0x8a3   : > { %10083 = vmatpush3.bf16.msra.mxu1 %v10959_v28 }
 0x8a4   : > { %7144 = vrot.lane.b32.xlu0 %v7129_v18, %s14628_s1  ;;  %s11189_s1 = smov 64   ;;  %10084 = vmatprep.subr.bf16.mxu1 %v10962_v59 }
 0x8a5   : > { %10107 = vmatpush3.bf16.msra.mxu0 %v10965_v44 }
 0x8a6   : > { %10108 = vmatprep.subr.bf16.mxu0 %v10968_v35 }
 0x8a7   : > { %10085 = vmatpush3.bf16.msra.mxu1 %v10963_v52 }
 0x8a8   : > { %10086 = vmatprep.subr.bf16.mxu1 %v10966_v51 }
 0x8a9   : > { %10109 = vmatpush3.bf16.msra.mxu0 %v10969_v41 }
 0x8aa   : > { %10110 = vmatprep.subr.bf16.mxu0 %v10972_v38 }
 0x8ab   : > { %10087 = vmatpush3.bf16.msra.mxu1 %v10967_v4 }
 0x8ac   : > { %10088 = vmatprep.subr.bf16.mxu1 %v10970_v30 }
 0x8ad   : > { %10111 = vmatpush3.bf16.msra.mxu0 %v10973_v39 }
 0x8ae   : > { %10112 = vmatprep.subr.bf16.mxu0 %v10976_v10 }
 0x8af   : > { %10089 = vmatpush3.bf16.msra.mxu1 %v10971_v15 }
 0x8b0   : > { %10090 = vmatprep.subr.bf16.mxu1 %v10974_v48 }
 0x8b1   : > { %10113 = vmatpush3.bf16.msra.mxu0 %v10977_v3 }
 0x8b3   : > { %10091 = vmatpush3.bf16.msra.mxu1 %v10975_v33 }
 0x8b4   : > { %10092 = vmatprep.subr.bf16.mxu1 %v10978_v0 }
 0x911   : > { %v7147_v5 = vpop.permute.xlu1 %7146 }
 0x912   : > { %v7153_v37 = vsel %vm6056_vm4, %v7147_v5, %v7149_v61 }
 0x913   : > { %v7164_v23 = vmax.bf16 %v7153_v37, %v7130_v34 }
 0x915   : > { %7350 = vmatprep.mubr.bf16.mxu0 %v7164_v23  ;;  %v10980_v23 = vld [vmem:[%s14587_s7 + $0xe8] sm:$0xff]  }
 0x916   : > { %v7145_v21 = vpop.permute.xlu0 %7144  ;;  %10114 = vmatprep.subr.bf16.mxu0 %v10980_v23 }
 0x917   : > { %v7152_v6 = vsel %vm6056_vm4, %v7145_v21, %v7147_v5  ;;  %v10981_v21 = vld [vmem:[%s14587_s7 + $0xa8] sm:$0xff]  }
 0x918   : > { %v7163_v29 = vmax.bf16 %v7152_v6, %v7129_v18  ;;  %v10979_v18 = vld [vmem:[%s14587_s7 + $0x28] sm:$0xff]   ;;  %v10982_v6 = vld [vmem:[%s14587_s7 + $0x70] sm:$0xff]   ;;  %10115 = vmatpush3.bf16.msra.mxu0 %v10981_v21 }
 0x919   : > { %10093 = vmatpush3.bf16.msra.mxu1 %v10979_v18 }
 0x91a   : > { %7351 = vmatmul.mubr.bf16.gmra.mrb[60].mxu0 %v7163_v29  ;;  %v10983_v29 = vld [vmem:[%s14587_s7 + $0x30] sm:$0xff]   ;;  %10094 = vmatprep.subr.bf16.mxu1 %v10982_v6 }
 0x91d   : > { %10095 = vmatpush3.bf16.msra.mxu1 %v10983_v29 }
 0x94f   : > { %v10036_v50 = vpop.f32.mrb[48].mxu0 }
 0x950   : > { %v10037_v45 = vpop.f32.mrb[49].mxu0 }
 0x951   : > { %v10038_v36 = vadd.f32 %v10037_v45, %v10036_v50  ;;  %v10039_v1 = vpop.f32.mrb[50].mxu0  ;;  %v10984_v50 = vld [vmem:[%s14587_s7 + $0xf0] sm:$0xff]   ;;  %v10986_v45 = vld [vmem:[%s14587_s7 + $0x78] sm:$0xff]  }
 0x952   : > { %v10040_v47 = vpop.f32.mrb[51].mxu0  ;;  %v10281_v32 = vpop.f32.mrb[60].mxu1  ;;  %10116 = vmatprep.subr.bf16.mxu0 %v10984_v50  ;;  %10096 = vmatprep.subr.bf16.mxu1 %v10986_v45 }
 0x953   : > { %v10041_v42 = vadd.f32 %v10040_v47, %v10039_v1  ;;  %v6952_v40 = vpop.f32.mrb[61].mxu1  ;;  %v10988_v47 = vld [vmem:[%s14587_s7 + $0xf8] sm:$0xff]  }
 0x954   : > { %v14029_v11 = vadd.f32 %v10038_v36, %v6952_v40  ;;  %v10282_v2 = vpop.f32.mrb[62].mxu1  ;;  %v10985_v36 = vld [vmem:[%s14587_s7 + $0xb0] sm:$0xff]   ;;  %v10990_v40 = vld [vmem:[%s14587_s7 + $0x140] sm:$0xff]  }
 0x955   : > { %v6955_v9 = vpop.f32.mrb[63].mxu1  ;;  %10117 = vmatpush3.bf16.msra.mxu0 %v10985_v36 }
 0x956   : > { %v6968_v12 = vrot.slane %v14029_v11, 1  ;;  %v14032_v46 = vadd.f32 %v10041_v42, %v6955_v9  ;;  %v10989_v42 = vld [vmem:[%s14587_s7 + $0xb8] sm:$0xff]   ;;  %10118 = vmatprep.subr.bf16.mxu0 %v10988_v47  ;;  %v11190_v9 = vmov 1983009808  }
 0x958   : > { %6969 = vrot.lane.b32.xlu1 %v6968_v12, %s11189_s1  ;;  %v7000_v27 = vrot.slane %v14032_v46, 1  ;;  %v6977_v12 = vunpack.c.l.s4 %v11190_v9 }
 0x959   : > { %v10042_v49 = vpop.f32.mrb[52].mxu0  ;;  %10119 = vmatpush3.bf16.msra.mxu0 %v10989_v42 }
 0x95a   : > { %v10043_v13 = vpop.f32.mrb[53].mxu0 }
 0x95b   : > { %v10044_v24 = vadd.f32 %v10043_v13, %v10042_v49  ;;  %v10045_v53 = vpop.f32.mrb[54].mxu0  ;;  %v6979_v49 = vlaneseq }
 0x95c   : > { %v10046_v55 = vpop.f32.mrb[55].mxu0  ;;  %7001 = vrot.lane.b32.xlu1 %v7000_v27, %s11189_s1  ;;  %v6978_v27 = vunpack.c.0.s8 %v6977_v12  ;;  %v10991_v12 = vld [vmem:[%s14587_s7 + $0x100] sm:$0xff]  }
 0x95d   : > { %v14037_v56 = vadd.f32 %v10281_v32, %v10044_v24  ;;  %v10047_v8 = vadd.f32 %v10046_v55, %v10045_v53  ;;  %v10987_v32 = vld [vmem:[%s14587_s7 + $0x38] sm:$0xff]   ;;  %v6980_v13 = vshrl.u32 %v6979_v49, 7 }
 0x95e   : > { %10097 = vmatpush3.bf16.msra.mxu1 %v10987_v32 }
 0x95f   : > { %v7031_v57 = vrot.slane %v14037_v56, 1  ;;  %v14040_v60 = vadd.f32 %v10282_v2, %v10047_v8  ;;  %10126 = vmatprep.subr.bf16.mxu1 %v10990_v40  ;;  %v10993_v2 = vld [vmem:[%s14587_s7 + $0x1c0] sm:$0xff]   ;;  %v14159_v24 = vsub.s32 %v6978_v27, %v6980_v13 }
 0x960   : > { %10148 = vmatprep.subr.bf16.mxu0 %v10993_v2 }
 0x961   : > { %7032 = vrot.lane.b32.xlu1 %v7031_v57, %s11189_s1  ;;  %v7062_v20 = vrot.slane %v14040_v60, 1 }
 0x965   : > { %7063 = vrot.lane.b32.xlu1 %v7062_v20, %s11189_s1 }
 0x973   : > { %v10067_v58 = vpop.f32.mrb[56].mxu0 }
 0x974   : > { %v10068_v43 = vpop.f32.mrb[57].mxu0 }
 0x975   : > { %v14099_v25 = vpop.f32.mrb[64].mxu1  ;;  %v10069_v16 = vadd.f32 %v10068_v43, %v10067_v58  ;;  %v10070_v54 = vpop.f32.mrb[58].mxu0 }
 0x976   : > { %v7393_v14 = vpop.f32.mrb[65].mxu1  ;;  %v10071_v34 = vpop.f32.mrb[59].mxu0 }
 0x977   : > { %v14107_v19 = vadd.f32 %v10069_v16, %v7393_v14  ;;  %v14109_v61 = vpop.f32.mrb[66].mxu1  ;;  %v10072_v17 = vadd.f32 %v10071_v34, %v10070_v54 }
 0x978   : > { %v7396_v22 = vpop.f32.mrb[67].mxu1 }
 0x979   : > { %v7409_v5 = vrot.slane %v14107_v19, 1  ;;  %v14118_v37 = vadd.f32 %v10072_v17, %v7396_v22 }
 0x97b   : > { %7410 = vrot.lane.b32.xlu0 %v7409_v5, %s11189_s1  ;;  %v7440_v1 = vrot.slane %v14118_v37, 1 }
 0x97f   : > { %7441 = vrot.lane.b32.xlu0 %v7440_v1, %s11189_s1 }
 0x9ca   : > { %v6970_v53 = vpop.permute.xlu1 %6969 }
 0x9cb   : > { %v6973_v55 = vsel %vm6972_vm0, %v14029_v11, %v6970_v53  ;;  %v10995_v53 = vld [vmem:[%s14587_s7 + $0x148] sm:$0xff]  }
 0x9cc   : > { %6974 = vst [vmem:[#allocation7] sm:$0x1] %v6973_v55  ;;  %v6982_v8 = vrot.slane %v6973_v55, %v14159_v24  ;;  %v6986_v57 = vcombine.high %v6973_v55, %v6973_v55 }
 0x9ce   : > { %v6983_v31 = vcombine.high %v6982_v8, %v6982_v8  ;;  %v6993_v28 = vrot.slane %v6986_v57, %v14159_v24  ;;  %9674 = vst.sshfl [vmem:[#allocation7 + $0x4] sm:$0x1 pattern:$0x76325410] %v6986_v57  ;;  %v7002_v62 = vpop.permute.xlu1 %7001 }
 0x9cf   : > { %v7004_v63 = vsel %vm6972_vm0, %v14032_v46, %v7002_v62 }
 0x9d0   : > { %6985 = vst [vmem:[#allocation7 + $0x2] sm:$0x1] %v6983_v31  ;;  %v6996_v59 = vcombine.high %v6993_v28, %v6993_v28  ;;  %7005 = vst [vmem:[#allocation7 + $0x8] sm:$0x1] %v7004_v63  ;;  %v7013_v7 = vrot.slane %v7004_v63, %v14159_v24  ;;  %v7017_v52 = vcombine.high %v7004_v63, %v7004_v63  ;;  %v10994_v31 = vld [vmem:[%s14587_s7 + $0x180] sm:$0xff]   ;;  %v10997_v63 = vld [vmem:[%s14587_s7 + $0x1c8] sm:$0xff]  }
 0x9d2   : > { %6998 = vst [vmem:[#allocation7 + $0x6] sm:$0x1] %v6996_v59  ;;  %v7014_v11 = vcombine.high %v7013_v7, %v7013_v7  ;;  %v7024_v20 = vrot.slane %v7017_v52, %v14159_v24  ;;  %9675 = vst.sshfl [vmem:[#allocation7 + $0xc] sm:$0x1 pattern:$0x76325410] %v7017_v52 }
 0x9d3   : > { %v7033_v44 = vpop.permute.xlu1 %7032  ;;  %v10996_v7 = vld [vmem:[%s14587_s7 + $0x108] sm:$0xff]  }
 0x9d4   : > { %7016 = vst [vmem:[#allocation7 + $0xa] sm:$0x1] %v7014_v11  ;;  %v7027_v51 = vcombine.high %v7024_v20, %v7024_v20  ;;  %v7035_v4 = vsel %vm6972_vm0, %v14037_v56, %v7033_v44  ;;  %v11000_v20 = vld [vmem:[%s14587_s7 + $0x150] sm:$0xff]   ;;  %v10999_v44 = vld [vmem:[%s14587_s7 + $0x188] sm:$0xff]  }
 0x9d5   : > { %7036 = vst [vmem:[#allocation7 + $0x10] sm:$0x1] %v7035_v4  ;;  %v7044_v46 = vrot.slane %v7035_v4, %v14159_v24  ;;  %v7048_v35 = vcombine.high %v7035_v4, %v7035_v4  ;;  %v11002_v4 = vld [vmem:[%s14587_s7 + $0x1d0] sm:$0xff]  }
 0x9d6   : > { %7029 = vst [vmem:[#allocation7 + $0xe] sm:$0x1] %v7027_v51 }
 0x9d7   : > { %v7045_v41 = vcombine.high %v7044_v46, %v7044_v46  ;;  %v7055_v30 = vrot.slane %v7048_v35, %v14159_v24  ;;  %9676 = vst.sshfl [vmem:[#allocation7 + $0x14] sm:$0x1 pattern:$0x76325410] %v7048_v35  ;;  %v7064_v15 = vpop.permute.xlu1 %7063  ;;  %v11001_v46 = vld [vmem:[%s14587_s7 + $0x110] sm:$0xff]   ;;  %v11004_v35 = vld [vmem:[%s14587_s7 + $0x158] sm:$0xff]  }
 0x9d8   : > { %v7066_v38 = vsel %vm6972_vm0, %v14040_v60, %v7064_v15  ;;  %v11005_v15 = vld [vmem:[%s14587_s7 + $0x118] sm:$0xff]  }
 0x9d9   : > { %7047 = vst [vmem:[#allocation7 + $0x12] sm:$0x1] %v7045_v41  ;;  %v7058_v39 = vcombine.high %v7055_v30, %v7055_v30  ;;  %7067 = vst [vmem:[#allocation7 + $0x18] sm:$0x1] %v7066_v38  ;;  %v7075_v58 = vrot.slane %v7066_v38, %v14159_v24  ;;  %v7079_v48 = vcombine.high %v7066_v38, %v7066_v38  ;;  %v11003_v41 = vld [vmem:[%s14587_s7 + $0x190] sm:$0xff]   ;;  %v11006_v30 = vld [vmem:[%s14587_s7 + $0x1d8] sm:$0xff]  }
 0x9da   : > { %v11008_v38 = vld [vmem:[%s14587_s7 + $0x160] sm:$0xff]  }
 0x9db   : > { %7060 = vst [vmem:[#allocation7 + $0x16] sm:$0x1] %v7058_v39  ;;  %v7076_v56 = vcombine.high %v7075_v58, %v7075_v58  ;;  %v7086_v43 = vrot.slane %v7079_v48, %v14159_v24  ;;  %9677 = vst.sshfl [vmem:[#allocation7 + $0x1c] sm:$0x1 pattern:$0x76325410] %v7079_v48 }
 0x9dc   : > { %v11007_v39 = vld [vmem:[%s14587_s7 + $0x198] sm:$0xff]   ;;  %v11010_v58 = vld [vmem:[%s14587_s7 + $0x1e0] sm:$0xff]  }
 0x9dd   : > { %7078 = vst [vmem:[#allocation7 + $0x1a] sm:$0x1] %v7076_v56  ;;  %v7089_v33 = vcombine.high %v7086_v43, %v7086_v43  ;;  %v11009_v48 = vld [vmem:[%s14587_s7 + $0x120] sm:$0xff]   ;;  %v11012_v56 = vld [vmem:[%s14587_s7 + $0x168] sm:$0xff]  }
 0x9de   : > { %v11011_v43 = vld [vmem:[%s14587_s7 + $0x1a0] sm:$0xff]  }
 0x9df   : > { %7091 = vst [vmem:[#allocation7 + $0x1e] sm:$0x1] %v7089_v33  ;;  %v11014_v33 = vld [vmem:[%s14587_s7 + $0x1e8] sm:$0xff]  }
 0x9ed   : > { %v10073_v16 = vpop.f32.mrb[60].mxu0  ;;  %v7411_v54 = vpop.permute.xlu0 %7410 }
 0x9ee   : > { %v10074_v10 = vpop.f32.mrb[61].mxu0  ;;  %v7413_v60 = vsel %vm6972_vm0, %v14107_v19, %v7411_v54  ;;  %v11016_v54 = vld [vmem:[%s14587_s7 + $0x170] sm:$0xff]  }
 0x9ef   : > { %v10075_v14 = vadd.f32 %v10074_v10, %v10073_v16  ;;  %v10076_v34 = vpop.f32.mrb[62].mxu0  ;;  %7414 = vst [vmem:[#allocation7 + $0x1] sm:$0x1] %v7413_v60  ;;  %v7422_v3 = vrot.slane %v7413_v60, %v14159_v24  ;;  %v7426_v17 = vcombine.high %v7413_v60, %v7413_v60  ;;  %v11013_v16 = vld [vmem:[%s14587_s7 + $0x128] sm:$0xff]   ;;  %v11018_v60 = vld [vmem:[%s14587_s7 + $0x1f0] sm:$0xff]  }
 0x9f0   : > { %v10077_v0 = vpop.f32.mrb[63].mxu0  ;;  %v11015_v10 = vld [vmem:[%s14587_s7 + $0x1a8] sm:$0xff]  }
 0x9f1   : > { %v14181_v22 = vadd.f32 %v14099_v25, %v10075_v14  ;;  %v7423_v18 = vcombine.high %v7422_v3, %v7422_v3  ;;  %v7433_v5 = vrot.slane %v7426_v17, %v14159_v24  ;;  %9697 = vst.sshfl [vmem:[#allocation7 + $0x5] sm:$0x1 pattern:$0x76325410] %v7426_v17  ;;  %v10078_v23 = vadd.f32 %v10077_v0, %v10076_v34  ;;  %v7442_v21 = vpop.permute.xlu0 %7441  ;;  %v11017_v14 = vld [vmem:[%s14587_s7 + $0x130] sm:$0xff]   ;;  %v11020_v34 = vld [vmem:[%s14587_s7 + $0x178] sm:$0xff]  }
 0x9f2   : > { %v7444_v6 = vsel %vm6972_vm0, %v14118_v37, %v7442_v21  ;;  %v11019_v3 = vld [vmem:[%s14587_s7 + $0x1b0] sm:$0xff]   ;;  %v11022_v17 = vld [vmem:[%s14587_s7 + $0x1f8] sm:$0xff]   ;;  %v11025_v21 = vld [vmem:[%s14587_s7 + $0x200] sm:$0xff]  }
 0x9f3   : > { %v7471_v19 = vrot.slane %v14181_v22, 1  ;;  %7425 = vst [vmem:[#allocation7 + $0x3] sm:$0x1] %v7423_v18  ;;  %v7436_v29 = vcombine.high %v7433_v5, %v7433_v5  ;;  %v14188_v50 = vadd.f32 %v14109_v61, %v10078_v23  ;;  %7445 = vst [vmem:[#allocation7 + $0x9] sm:$0x1] %v7444_v6  ;;  %v7453_v25 = vrot.slane %v7444_v6, %v14159_v24  ;;  %v11021_v0 = vld [vmem:[%s14587_s7 + $0x138] sm:$0xff]  }
 0x9f4   : > { %v7457_v45 = vcombine.high %v7444_v6, %v7444_v6  ;;  %v11024_v18 = vld [vmem:[%s14587_s7 + $0x240] sm:$0xff]   ;;  %v11023_v5 = vld [vmem:[%s14587_s7 + $0x1b8] sm:$0xff]  }
 0x9f5   : > { %7438 = vst [vmem:[#allocation7 + $0x7] sm:$0x1] %v7436_v29  ;;  %v7454_v36 = vcombine.high %v7453_v25, %v7453_v25  ;;  %7472 = vrot.lane.b32.xlu0 %v7471_v19, %s11189_s1  ;;  %v7502_v37 = vrot.slane %v14188_v50, 1  ;;  %v11026_v23 = vld [vmem:[%s14587_s7 + $0x2c0] sm:$0xff]   ;;  %v11028_v19 = vld [vmem:[%s14587_s7 + $0x248] sm:$0xff]  }
 0x9f6   : > { %v7464_v1 = vrot.slane %v7457_v45, %v14159_v24  ;;  %9698 = vst.sshfl [vmem:[#allocation7 + $0xd] sm:$0x1 pattern:$0x76325410] %v7457_v45  ;;  %v11027_v29 = vld [vmem:[%s14587_s7 + $0x280] sm:$0xff]   ;;  %v11030_v45 = vld [vmem:[%s14587_s7 + $0x2c8] sm:$0xff]  }
 0x9f7   : > { %7456 = vst [vmem:[#allocation7 + $0xb] sm:$0x1] %v7454_v36  ;;  %v11029_v36 = vld [vmem:[%s14587_s7 + $0x208] sm:$0xff]  }
 0x9f8   : > { %v7467_v47 = vcombine.high %v7464_v1, %v7464_v1  ;;  %v11032_v1 = vld [vmem:[%s14587_s7 + $0x250] sm:$0xff]  }
 0x9f9   : > { %7503 = vrot.lane.b32.xlu0 %v7502_v37, %s11189_s1  ;;  %v11031_v37 = vld [vmem:[%s14587_s7 + $0x288] sm:$0xff]   ;;  %s382_s1 = scalar_lea.vmem [#allocation8], %s9139_s2 }
 0x9fa   : > { %7469 = vst [vmem:[#allocation7 + $0xf] sm:$0x1] %v7467_v47  ;;  %v11034_v47 = vld [vmem:[%s14587_s7 + $0x2d0] sm:$0xff]   ;;  %s9076_s0 = sshll.u32 %s382_s1, 4  ;;  %s14540_s0 = int_to_ptr.vmem [resolvable:$true] %s9076_s0 }
 0x9fb   : > { %s11108_s14 = scalar_lea.vmem %s14540_s0, 32  ;;  %p11115_p0 = scmp.lt.s32.totalorder %s14540_s0, %s11113_s24 }
 0x9fc   : > { %v7532_v61 = vld [vmem:[#allocation7] sm:$0xff]  ;;  %p11109_p11 = scmp.ne.s32.totalorder %s14540_s0, %s11108_s14  ;;  %p11116_p1 = scmp.lt.s32.totalorder %s11114_s29, %s11108_s14 }
 0x9fd   : > { %v7547_v32 = vrot.slane %v7532_v61, %v14159_v24  ;;  %v7540_v42 = vcombine.high %v7532_v61, %v7532_v61  ;;  %v11033_v61 = vld [vmem:[%s14587_s7 + $0x210] sm:$0xff]  }
 0x9fe   : > { %p11110_p12 = pnand %p11109_p11, %p11290_p5  ;;  %p11117_p2 = por %p11116_p1, %p11115_p0 }
 0x9ff   : > { %v7555_v40 = vcombine.high %v7547_v32, %v7547_v32  ;;  %v7554_v2 = vrot.slane %v7540_v42, %v14159_v24  ;;  %v7624_v13 = vpack.c.bf16 %v7547_v32, %v7547_v32  ;;  %v11036_v32 = vld [vmem:[%s14587_s7 + $0x258] sm:$0xff]   ;;  %v11035_v42 = vld [vmem:[%s14587_s7 + $0x290] sm:$0xff]  }
 0xa00   : > { %p11111_p13 = pneg %p11110_p12 }
 0xa01   : > { %v7625_v9 = vpack.c.bf16 %v7555_v40, %v7555_v40  ;;  %v7556_v49 = vcombine.high %v7554_v2, %v7554_v2  ;;  %v7533_v27 = vld [vmem:[#allocation7 + $0x8] sm:$0xff]  ;;  %v7626_v28 = vpack.c.bf16 %v7554_v2, %v7554_v2 }
 0xa02   : > { %v14204_v55 = vrot.slane %v7533_v27, %v14159_v24  ;;  %v7557_v8 = vcombine.high %v7533_v27, %v7533_v27  ;;  %v11038_v40 = vld [vmem:[%s14587_s7 + $0x2d8] sm:$0xff]   ;;  %v11041_v27 = vld [vmem:[%s14587_s7 + $0x220] sm:$0xff]   ;;  %p11118_p3 = pnand %p11117_p2, %p11111_p13 }
 0xa03   : > { %8703 = vmatprep.mubr.bf16.mxu1 %v7625_v9  ;;  %v7627_v57 = vpack.c.bf16 %v7556_v49, %v7556_v49  ;;  %v11037_v2 = vld [vmem:[%s14587_s7 + $0x218] sm:$0xff]   ;;  %v11040_v9 = vld [vmem:[%s14587_s7 + $0x260] sm:$0xff]  }
 0xa04   : > { %8704 = vmatmul.mubr.bf16.vlgmr.msra.gmra.mrb[68].mxu1 %v7624_v13  ;;  %v7572_v62 = vcombine.high %v14204_v55, %v14204_v55  ;;  %v14215_v59 = vrot.slane %v7557_v8, %v14159_v24  ;;  %v7628_v6 = vpack.c.bf16 %v14204_v55, %v14204_v55  ;;  %v11042_v49 = vld [vmem:[%s14587_s7 + $0x2e0] sm:$0xff]   ;;  %v11044_v13 = vld [vmem:[%s14587_s7 + $0x268] sm:$0xff]  }
 0xa05   : > { %10127 = vmatpush3.bf16.msra.mxu1 %v10991_v12  ;;  %8743 = vmatprep.mubr.bf16.mxu0 %v7627_v57  ;;  %v11039_v12 = vld [vmem:[%s14587_s7 + $0x298] sm:$0xff]   ;;  %v11046_v55 = vld [vmem:[%s14587_s7 + $0x2e8] sm:$0xff]   ;;  %v11048_v57 = vld [vmem:[%s14587_s7 + $0x270] sm:$0xff]  }
 0xa06   : > { %8744 = vmatmul.mubr.bf16.vlgmr.msra.gmra.mrb[64].mxu0 %v7626_v28  ;;  %10128 = vmatprep.subr.bf16.mxu1 %v10995_v53  ;;  %v7629_v52 = vpack.c.bf16 %v7572_v62, %v7572_v62  ;;  %v7573_v11 = vcombine.high %v14215_v59, %v14215_v59  ;;  %v7630_v25 = vpack.c.bf16 %v14215_v59, %v14215_v59  ;;  %v11043_v53 = vld [vmem:[%s14587_s7 + $0x2a0] sm:$0xff]   ;;  %v11045_v8 = vld [vmem:[%s14587_s7 + $0x228] sm:$0xff]   ;;  %v11050_v28 = vld [vmem:[%s14587_s7 + $0x2f0] sm:$0xff]  }
 0xa07   : > { %10149 = vmatpush3.bf16.msra.mxu0 %v10994_v31  ;;  %v11047_v31 = vld [vmem:[%s14587_s7 + $0x2a8] sm:$0xff]   ;;  %v11049_v62 = vld [vmem:[%s14587_s7 + $0x230] sm:$0xff]  }
 0xa08   : > { %8783 = vmatprep.mubr.bf16.mxu1 %v7629_v52  ;;  %10150 = vmatprep.subr.bf16.mxu0 %v10997_v63  ;;  %v7631_v51 = vpack.c.bf16 %v7573_v11, %v7573_v11  ;;  %v11052_v63 = vld [vmem:[%s14587_s7 + $0x278] sm:$0xff]   ;;  %v11051_v59 = vld [vmem:[%s14587_s7 + $0x2b0] sm:$0xff]   ;;  %v11056_v11 = vld [vmem:[%s14587_s7 + $0x340] sm:$0xff]  }
 0xa09   : > { %10129 = vmatpush3.bf16.msra.mxu1 %v10996_v7  ;;  %v11054_v7 = vld [vmem:[%s14587_s7 + $0x2f8] sm:$0xff]  }
 0xa0a   : > { %8823 = vmatprep.mubr.bf16.mxu0 %v7631_v51  ;;  %10130 = vmatprep.subr.bf16.mxu1 %v11000_v20  ;;  %v11053_v52 = vld [vmem:[%s14587_s7 + $0x238] sm:$0xff]  }
 0xa0b   : > { %10151 = vmatpush3.bf16.msra.mxu0 %v10999_v44  ;;  %v11055_v20 = vld [vmem:[%s14587_s7 + $0x2b8] sm:$0xff]   ;;  %v11059_v44 = vld [vmem:[%s14587_s7 + $0x3c0] sm:$0xff]  }
 0xa0c   : > { %10152 = vmatprep.subr.bf16.mxu0 %v11002_v4 }
 0xa0d   : > { %10131 = vmatpush3.bf16.msra.mxu1 %v11001_v46 }
 0xa0e   : > { %10132 = vmatprep.subr.bf16.mxu1 %v11004_v35 }
 0xa0f   : > { %10153 = vmatpush3.bf16.msra.mxu0 %v11003_v41 }
 0xa10   : > { %10154 = vmatprep.subr.bf16.mxu0 %v11006_v30 }
 0xa11   : > { %10133 = vmatpush3.bf16.msra.mxu1 %v11005_v15 }
 0xa12   : > { %10134 = vmatprep.subr.bf16.mxu1 %v11008_v38 }
 0xa13   : > { %10155 = vmatpush3.bf16.msra.mxu0 %v11007_v39 }
 0xa14   : > { %10156 = vmatprep.subr.bf16.mxu0 %v11010_v58 }
 0xa15   : > { %10135 = vmatpush3.bf16.msra.mxu1 %v11009_v48 }
 0xa16   : > { %10136 = vmatprep.subr.bf16.mxu1 %v11012_v56 }
 0xa17   : > { %10157 = vmatpush3.bf16.msra.mxu0 %v11011_v43 }
 0xa18   : > { %10158 = vmatprep.subr.bf16.mxu0 %v11014_v33 }
 0xa19   : > { %10137 = vmatpush3.bf16.msra.mxu1 %v11013_v16 }
 0xa1a   : > { %10138 = vmatprep.subr.bf16.mxu1 %v11016_v54 }
 0xa1b   : > { %10159 = vmatpush3.bf16.msra.mxu0 %v11015_v10 }
 0xa1c   : > { %10160 = vmatprep.subr.bf16.mxu0 %v11018_v60 }
 0xa1d   : > { %10139 = vmatpush3.bf16.msra.mxu1 %v11017_v14 }
 0xa1e   : > { %10140 = vmatprep.subr.bf16.mxu1 %v11020_v34  ;;  %v11057_v34 = vld [vmem:[%s14587_s7 + $0x300] sm:$0xff]  }
 0xa1f   : > { %10161 = vmatpush3.bf16.msra.mxu0 %v11019_v3 }
 0xa20   : > { %10162 = vmatprep.subr.bf16.mxu0 %v11022_v17 }
 0xa21   : > { %10141 = vmatpush3.bf16.msra.mxu1 %v11021_v0 }
 0xa22   : > { %10170 = vmatprep.subr.bf16.mxu1 %v11024_v18  ;;  %v11061_v18 = vld [vmem:[%s14587_s7 + $0x348] sm:$0xff]  }
 0xa23   : > { %10163 = vmatpush3.bf16.msra.mxu0 %v11023_v5 }
 0xa24   : > { %8784 = vmatmul.mubr.bf16.vlgmr.msra.gmra.mrb[72].mxu1 %v7628_v6  ;;  %10192 = vmatprep.subr.bf16.mxu0 %v11026_v23 }
 0xa25   : > { %10171 = vmatpush3.bf16.msra.mxu1 %v11025_v21  ;;  %v11060_v21 = vld [vmem:[%s14587_s7 + $0x380] sm:$0xff]  }
 0xa26   : > { %8824 = vmatmul.mubr.bf16.vlgmr.msra.gmra.mrb[68].mxu0 %v7630_v25  ;;  %10172 = vmatprep.subr.bf16.mxu1 %v11028_v19 }
 0xa27   : > { %10193 = vmatpush3.bf16.msra.mxu0 %v11027_v29  ;;  %v11063_v29 = vld [vmem:[%s14587_s7 + $0x3c8] sm:$0xff]  }
 0xa28   : > { %10194 = vmatprep.subr.bf16.mxu0 %v11030_v45 }
 0xa29   : > { %10173 = vmatpush3.bf16.msra.mxu1 %v11029_v36  ;;  %v11062_v36 = vld [vmem:[%s14587_s7 + $0x308] sm:$0xff]  }
 0xa2a   : > { %10174 = vmatprep.subr.bf16.mxu1 %v11032_v1 }
 0xa2b   : > { %10195 = vmatpush3.bf16.msra.mxu0 %v11031_v37  ;;  %v11066_v37 = vld [vmem:[%s14587_s7 + $0x350] sm:$0xff]  }
 0xa2c   : > { %10196 = vmatprep.subr.bf16.mxu0 %v11034_v47 }
 0xa2d   : > { %10175 = vmatpush3.bf16.msra.mxu1 %v11033_v61  ;;  %v11068_v61 = vld [vmem:[%s14587_s7 + $0x3d0] sm:$0xff]  }
 0xa2e   : > { %10176 = vmatprep.subr.bf16.mxu1 %v11036_v32  ;;  %v11067_v32 = vld [vmem:[%s14587_s7 + $0x310] sm:$0xff]  }
 0xa2f   : > { %10197 = vmatpush3.bf16.msra.mxu0 %v11035_v42  ;;  %v11070_v42 = vld [vmem:[%s14587_s7 + $0x358] sm:$0xff]  }
 0xa30   : > { %10198 = vmatprep.subr.bf16.mxu0 %v11038_v40  ;;  %v11069_v40 = vld [vmem:[%s14587_s7 + $0x390] sm:$0xff]  }
 0xa31   : > { %10177 = vmatpush3.bf16.msra.mxu1 %v11037_v2  ;;  %v11072_v2 = vld [vmem:[%s14587_s7 + $0x3d8] sm:$0xff]  }
 0xa32   : > { %10178 = vmatprep.subr.bf16.mxu1 %v11040_v9  ;;  %v11071_v9 = vld [vmem:[%s14587_s7 + $0x318] sm:$0xff]  }
 0xa33   : > { %10199 = vmatpush3.bf16.msra.mxu0 %v11039_v12  ;;  %v11074_v12 = vld [vmem:[%s14587_s7 + $0x360] sm:$0xff]  }
 0xa34   : > { %10200 = vmatprep.subr.bf16.mxu0 %v11042_v49  ;;  %v11073_v49 = vld [vmem:[%s14587_s7 + $0x398] sm:$0xff]  }
 0xa35   : > { %10179 = vmatpush3.bf16.msra.mxu1 %v11041_v27  ;;  %v11076_v27 = vld [vmem:[%s14587_s7 + $0x3e0] sm:$0xff]  }
 0xa36   : > { %10180 = vmatprep.subr.bf16.mxu1 %v11044_v13  ;;  %v11075_v13 = vld [vmem:[%s14587_s7 + $0x320] sm:$0xff]  }
 0xa37   : > { %10201 = vmatpush3.bf16.msra.mxu0 %v11043_v53  ;;  %v11078_v53 = vld [vmem:[%s14587_s7 + $0x368] sm:$0xff]  }
 0xa38   : > { %10202 = vmatprep.subr.bf16.mxu0 %v11046_v55  ;;  %v11077_v55 = vld [vmem:[%s14587_s7 + $0x3a0] sm:$0xff]  }
 0xa39   : > { %10181 = vmatpush3.bf16.msra.mxu1 %v11045_v8  ;;  %v11080_v8 = vld [vmem:[%s14587_s7 + $0x3e8] sm:$0xff]  }
 0xa3a   : > { %10182 = vmatprep.subr.bf16.mxu1 %v11048_v57  ;;  %v11079_v57 = vld [vmem:[%s14587_s7 + $0x328] sm:$0xff]  }
 0xa3b   : > { %10203 = vmatpush3.bf16.msra.mxu0 %v11047_v31  ;;  %v11082_v31 = vld [vmem:[%s14587_s7 + $0x370] sm:$0xff]  }
 0xa3c   : > { %10204 = vmatprep.subr.bf16.mxu0 %v11050_v28  ;;  %v11081_v28 = vld [vmem:[%s14587_s7 + $0x3a8] sm:$0xff]  }
 0xa3d   : > { %10183 = vmatpush3.bf16.msra.mxu1 %v11049_v62  ;;  %v11084_v62 = vld [vmem:[%s14587_s7 + $0x3f0] sm:$0xff]  }
 0xa3e   : > { %10184 = vmatprep.subr.bf16.mxu1 %v11052_v63  ;;  %v11083_v63 = vld [vmem:[%s14587_s7 + $0x330] sm:$0xff]  }
 0xa3f   : > { %10205 = vmatpush3.bf16.msra.mxu0 %v11051_v59  ;;  %v11086_v59 = vld [vmem:[%s14587_s7 + $0x378] sm:$0xff]  }
 0xa40   : > { %10206 = vmatprep.subr.bf16.mxu0 %v11054_v7  ;;  %v11085_v7 = vld [vmem:[%s14587_s7 + $0x3b0] sm:$0xff]  }
 0xa41   : > { %10185 = vmatpush3.bf16.msra.mxu1 %v11053_v52  ;;  %v11088_v52 = vld [vmem:[%s14587_s7 + $0x3f8] sm:$0xff]  }
 0xa42   : > { %10214 = vmatprep.subr.bf16.mxu1 %v11056_v11  ;;  %v11087_v11 = vld [vmem:[%s14587_s7 + $0x338] sm:$0xff]  }
 0xa43   : > { %10207 = vmatpush3.bf16.msra.mxu0 %v11055_v20  ;;  %v11089_v20 = vld [vmem:[%s14587_s7 + $0x3b8] sm:$0xff]  }
 0xa44   : > { %10236 = vmatprep.subr.bf16.mxu0 %v11059_v44 }
 0xa67   : > { %v7473_v51 = vpop.permute.xlu0 %7472 }
 0xa68   : > { %v7475_v4 = vsel %vm6972_vm0, %v14181_v22, %v7473_v51 }
 0xa69   : > { %7476 = vst [vmem:[#allocation7 + $0x11] sm:$0x1] %v7475_v4  ;;  %v7484_v46 = vrot.slane %v7475_v4, %v14159_v24  ;;  %v7488_v35 = vcombine.high %v7475_v4, %v7475_v4 }
 0xa6b   : > { %v7485_v41 = vcombine.high %v7484_v46, %v7484_v46  ;;  %v7495_v30 = vrot.slane %v7488_v35, %v14159_v24  ;;  %9699 = vst.sshfl [vmem:[#allocation7 + $0x15] sm:$0x1 pattern:$0x76325410] %v7488_v35  ;;  %v7504_v15 = vpop.permute.xlu0 %7503  ;;  %v9701_v46 = vld [vmem:[%s14588_s8] ss:$0 sm:$0xff] }
 0xa6c   : > { %v7506_v38 = vsel %vm6972_vm0, %v14188_v50, %v7504_v15 }
 0xa6d   : > { %7487 = vst [vmem:[#allocation7 + $0x13] sm:$0x1] %v7485_v41  ;;  %v7498_v39 = vcombine.high %v7495_v30, %v7495_v30  ;;  %7507 = vst [vmem:[#allocation7 + $0x19] sm:$0x1] %v7506_v38  ;;  %v7515_v58 = vrot.slane %v7506_v38, %v14159_v24  ;;  %v7519_v48 = vcombine.high %v7506_v38, %v7506_v38 }
 0xa6f   : > { %7500 = vst [vmem:[#allocation7 + $0x17] sm:$0x1] %v7498_v39  ;;  %v7516_v22 = vcombine.high %v7515_v58, %v7515_v58  ;;  %v7526_v56 = vrot.slane %v7519_v48, %v14159_v24  ;;  %9700 = vst.sshfl [vmem:[#allocation7 + $0x1d] sm:$0x1 pattern:$0x76325410] %v7519_v48 }
 0xa71   : > { %7518 = vst [vmem:[#allocation7 + $0x1b] sm:$0x1] %v7516_v22  ;;  %v7529_v43 = vcombine.high %v7526_v56, %v7526_v56 }
 0xa73   : > { %7531 = vst [vmem:[#allocation7 + $0x1f] sm:$0x1] %v7529_v43 }
 0xa76   : > { %v7534_v33 = vld [vmem:[#allocation7 + $0x10] sm:$0xff] }
 0xa77   : > { %v7581_v16 = vrot.slane %v7534_v33, %v14159_v24  ;;  %v7574_v54 = vcombine.high %v7534_v33, %v7534_v33  ;;  %v11090_v33 = vld [vmem:[%s14589_s9] sm:$0xff]  }
 0xa79   : > { %v7589_v10 = vcombine.high %v7581_v16, %v7581_v16  ;;  %v7588_v50 = vrot.slane %v7574_v54, %v14159_v24  ;;  %v7632_v0 = vpack.c.bf16 %v7581_v16, %v7581_v16 }
 0xa7a   : > { %v7535_v60 = vld [vmem:[#allocation7 + $0x18] sm:$0xff] }
 0xa7b   : > { %v7633_v14 = vpack.c.bf16 %v7589_v10, %v7589_v10  ;;  %v7590_v3 = vcombine.high %v7588_v50, %v7588_v50  ;;  %v14417_v17 = vrot.slane %v7535_v60, %v14159_v24  ;;  %v7591_v5 = vcombine.high %v7535_v60, %v7535_v60 }
 0xa7c   : > { %v7634_v19 = vpack.c.bf16 %v7588_v50, %v7588_v50 }
 0xa7d   : > { %8863 = vmatprep.mubr.bf16.mxu1 %v7633_v14  ;;  %v7635_v23 = vpack.c.bf16 %v7590_v3, %v7590_v3  ;;  %v7606_v6 = vcombine.high %v14417_v17, %v14417_v17  ;;  %v14431_v25 = vrot.slane %v7591_v5, %v14159_v24  ;;  %v11065_v24 = vld [vmem:[%s14587_s7 + $0x388] sm:$0xff]   ;;  %v7636_v44 = vpack.c.bf16 %v14417_v17, %v14417_v17 }
 0xa7e   : > { %8864 = vmatmul.mubr.bf16.vlgmr.msra.gmra.mrb[76].mxu1 %v7632_v0  ;;  %v11091_v14 = vld [vmem:[%s14589_s9 + $0x8] sm:$0xff]  }
 0xa7f   : > { %10215 = vmatpush3.bf16.msra.mxu1 %v11057_v34  ;;  %8903 = vmatprep.mubr.bf16.mxu0 %v7635_v23  ;;  %v7637_v45 = vpack.c.bf16 %v7606_v6, %v7606_v6  ;;  %v7607_v1 = vcombine.high %v14431_v25, %v14431_v25  ;;  %v7638_v51 = vpack.c.bf16 %v14431_v25, %v14431_v25 }
 0xa80   : > { %8904 = vmatmul.mubr.bf16.vlgmr.msra.gmra.mrb[72].mxu0 %v7634_v19  ;;  %10216 = vmatprep.subr.bf16.mxu1 %v11061_v18 }
 0xa81   : > { %10237 = vmatpush3.bf16.msra.mxu0 %v11060_v21  ;;  %8943 = vmatprep.mubr.bf16.mxu1 %v7637_v45  ;;  %v7639_v47 = vpack.c.bf16 %v7607_v1, %v7607_v1 }
 0xa82   : > { %10238 = vmatprep.subr.bf16.mxu0 %v11063_v29 }
 0xa83   : > { %10217 = vmatpush3.bf16.msra.mxu1 %v11062_v36  ;;  %8983 = vmatprep.mubr.bf16.mxu0 %v7639_v47 }
 0xa84   : > { %10218 = vmatprep.subr.bf16.mxu1 %v11066_v37 }
 0xa85   : > { %10239 = vmatpush3.bf16.msra.mxu0 %v11065_v24 }
 0xa86   : > { %10240 = vmatprep.subr.bf16.mxu0 %v11068_v61 }
 0xa87   : > { %10219 = vmatpush3.bf16.msra.mxu1 %v11067_v32 }
 0xa88   : > { %10220 = vmatprep.subr.bf16.mxu1 %v11070_v42 }
 0xa89   : > { %10241 = vmatpush3.bf16.msra.mxu0 %v11069_v40 }
 0xa8a   : > { %10242 = vmatprep.subr.bf16.mxu0 %v11072_v2 }
 0xa8b   : > { %10221 = vmatpush3.bf16.msra.mxu1 %v11071_v9 }
 0xa8c   : > { %10222 = vmatprep.subr.bf16.mxu1 %v11074_v12 }
 0xa8d   : > { %10243 = vmatpush3.bf16.msra.mxu0 %v11073_v49 }
 0xa8e   : > { %10244 = vmatprep.subr.bf16.mxu0 %v11076_v27 }
 0xa8f   : > { %10223 = vmatpush3.bf16.msra.mxu1 %v11075_v13 }
 0xa90   : > { %10224 = vmatprep.subr.bf16.mxu1 %v11078_v53 }
 0xa91   : > { %10245 = vmatpush3.bf16.msra.mxu0 %v11077_v55 }
 0xa92   : > { %10246 = vmatprep.subr.bf16.mxu0 %v11080_v8 }
 0xa93   : > { %10225 = vmatpush3.bf16.msra.mxu1 %v11079_v57 }
 0xa94   : > { %10226 = vmatprep.subr.bf16.mxu1 %v11082_v31  ;;  %v9830_v31 = vld [vmem:[%s14590_s10] ss:$0 sm:$0xff] }
 0xa95   : > { %10247 = vmatpush3.bf16.msra.mxu0 %v11081_v28 }
 0xa96   : > { %10248 = vmatprep.subr.bf16.mxu0 %v11084_v62 }
 0xa97   : > { %10227 = vmatpush3.bf16.msra.mxu1 %v11083_v63 }
 0xa98   : > { %10228 = vmatprep.subr.bf16.mxu1 %v11086_v59 }
 0xa99   : > { %10249 = vmatpush3.bf16.msra.mxu0 %v11085_v7 }
 0xa9a   : > { %10250 = vmatprep.subr.bf16.mxu0 %v11088_v52 }
 0xa9b   : > { %10229 = vmatpush3.bf16.msra.mxu1 %v11087_v11 }
 0xa9c   : > { %10289 = vmatprep.subr.bf16.mxu1 %v11182_v26 }
 0xa9d   : > { %10251 = vmatpush3.bf16.msra.mxu0 %v11089_v20 }
 0xa9e   : > { %8944 = vmatmul.mubr.bf16.vlgmr.msra.gmra.mrb[80].mxu1 %v7636_v44 }
 0xa9f   : > { %10293 = vmatprep.mubr.msk.bf16.mxu1 %vm11183_vm14, %v11182_v26  ;;  %10290 = vmatpush3.bf16.msra.mxu1 %v11090_v33 }
 0xaa0   : > { %8984 = vmatmul.mubr.bf16.vlgmr.msra.gmra.mrb[76].mxu0 %v7638_v51  ;;  %10291 = vmatprep.subr.bf16.mxu1 %v11182_v26 }
 0xaa3   : > { %10292 = vmatpush3.bf16.msra.mxu1 %v11091_v14 }
 0xad7   : > { %v10098_v4 = vpop.f32.mrb[68].mxu1 }
 0xad8   : > { %v10099_v35 = vpop.f32.mrb[69].mxu1 }
 0xad9   : > { %v10100_v41 = vadd.f32 %v10099_v35, %v10098_v4  ;;  %v10101_v30 = vpop.f32.mrb[70].mxu1  ;;  %v10120_v15 = vpop.f32.mrb[64].mxu0 }
 0xada   : > { %v10102_v38 = vpop.f32.mrb[71].mxu1  ;;  %v10121_v39 = vpop.f32.mrb[65].mxu0 }
 0xadb   : > { %v8706_v58 = vadd.f32 %v10100_v41, %v9701_v46  ;;  %v10122_v48 = vadd.f32 %v10121_v39, %v10120_v15  ;;  %v10123_v22 = vpop.f32.mrb[66].mxu0 }
 0xadc   : > { %v10124_v56 = vpop.f32.mrb[67].mxu0 }
 0xadd   : > { %v8746_v43 = vadd.f32 %v10122_v48, %v8706_v58 }
 0xaf7   : > { %v10142_v16 = vpop.f32.mrb[72].mxu1 }
 0xaf8   : > { %v10143_v54 = vpop.f32.mrb[73].mxu1 }
 0xaf9   : > { %v10144_v10 = vadd.f32 %v10143_v54, %v10142_v16  ;;  %v10145_v50 = vpop.f32.mrb[74].mxu1  ;;  %v10164_v60 = vpop.f32.mrb[68].mxu0 }
 0xafa   : > { %v10146_v34 = vpop.f32.mrb[75].mxu1  ;;  %v10165_v3 = vpop.f32.mrb[69].mxu0 }
 0xafb   : > { %v8786_v17 = vadd.f32 %v10144_v10, %v8746_v43  ;;  %v10166_v0 = vadd.f32 %v10165_v3, %v10164_v60  ;;  %v10167_v18 = vpop.f32.mrb[70].mxu0 }
 0xafc   : > { %v10168_v5 = vpop.f32.mrb[71].mxu0 }
 0xafd   : > { %v8826_v23 = vadd.f32 %v10166_v0, %v8786_v17 }
 0xb51   : > { %v10186_v21 = vpop.f32.mrb[76].mxu1 }
 0xb52   : > { %v10187_v6 = vpop.f32.mrb[77].mxu1 }
 0xb53   : > { %v10188_v19 = vadd.f32 %v10187_v6, %v10186_v21  ;;  %v10189_v29 = vpop.f32.mrb[78].mxu1  ;;  %v10208_v26 = vpop.f32.mrb[72].mxu0 }
 0xb54   : > { %v10190_v25 = vpop.f32.mrb[79].mxu1  ;;  %v10209_v45 = vpop.f32.mrb[73].mxu0 }
 0xb55   : > { %v8866_v36 = vadd.f32 %v10188_v19, %v8826_v23  ;;  %v10210_v1 = vadd.f32 %v10209_v45, %v10208_v26  ;;  %v10211_v37 = vpop.f32.mrb[74].mxu0 }
 0xb56   : > { %v10212_v24 = vpop.f32.mrb[75].mxu0 }
 0xb57   : > { %v8906_v47 = vadd.f32 %v10210_v1, %v8866_v36 }
 0xb71   : > { %v10230_v61 = vpop.f32.mrb[80].mxu1 }
 0xb72   : > { %v10231_v32 = vpop.f32.mrb[81].mxu1 }
 0xb73   : > { %v10232_v42 = vadd.f32 %v10231_v32, %v10230_v61  ;;  %v10233_v40 = vpop.f32.mrb[82].mxu1  ;;  %v10252_v2 = vpop.f32.mrb[76].mxu0 }
 0xb74   : > { %v10234_v9 = vpop.f32.mrb[83].mxu1  ;;  %v10253_v12 = vpop.f32.mrb[77].mxu0 }
 0xb75   : > { %v8946_v49 = vadd.f32 %v10232_v42, %v8906_v47  ;;  %v10254_v27 = vadd.f32 %v10253_v12, %v10252_v2  ;;  %v10255_v13 = vpop.f32.mrb[78].mxu0 }
 0xb76   : > { %v10256_v53 = vpop.f32.mrb[79].mxu0 }
 0xb77   : > { %v8986_v55 = vadd.f32 %v10254_v27, %v8946_v49 }
 0xb79   : > { %v8991_v8 = vmax.f32 %v8986_v55, 0.0 }
 0xb7b   : > { %v8992_v57 = vpack.c.bf16 %v8991_v8, %v8991_v8 }
 0xb7d   : > { %10294 = vmatmul.mubr.msk.bf16.vlgmr.msra.gmra.mrb[84].mxu1 %vm9016_vm5, %v8992_v57 }
 0xc50   : > { %v9054_v28 = vpop.f32.mrb[84].mxu1 }
 0xc51   : > { %v9055_v62 = vadd.f32 %v9830_v31, %v9054_v28  ;;  %v10295_v63 = vpop.f32.mrb[85].mxu1 }
 0xc52   : > { %v9057_v59 = vpop.f32.mrb[86].mxu1 }
 0xc53   : > { %v10296_v7 = vpop.f32.mrb[87].mxu1  ;;  %9061 = vst.msk [vmem:[%s382_s1] sm:$0x3] %vm9060_vm10, %v9055_v62 }
 0xc54   : > { %11121 = shalt.err (!%p11118_p3)
}
 0xc55   : > { %s11122_s30 = scalar_lea.hbm %s14538_s19, 32  ;;  %s11126_s22 = scalar_lea.hbm %s14591_s11, 64 }
 0xc56   : > { %p11123_p4 = scmp.ne.s32.totalorder %s14538_s19, %s11122_s30  ;;  %p11127_p9 = scmp.lt.u32.totalorder %s14538_s19, %s14591_s11 }
 0xc57   : > { %p11128_p10 = scmp.lt.u32.totalorder %s11126_s22, %s11122_s30  ;;  %p11130_p12 = scmp.lt.u32.totalorder %s11122_s30, %s14538_s19 }
 0xc58   : > { %p11124_p7 = pnand %p11123_p4, %p11290_p5 }
 0xc59   : > { %p11129_p11 = por %p11128_p10, %p11127_p9 }
 0xc5a   : > { %p11125_p8 = pneg %p11124_p7 }
 0xc5b   : > { %p11131_p13 = por %p11130_p12, %p11129_p11 }
 0xc5d   : > { %p11132_p0 = pnand %p11131_p13, %p11125_p8 }
 0xc5f   : > { %11135 = shalt.err (!%p11132_p0)
}
 0xc60   : > { %10330 = dma.vmem_to_hbm [thread:$0]  (%p11290_p5), %s14540_s0, 32, %s14538_s19, %s9063_s21  }
 0xc61 PF: > { %p10336_p1 = scmp.ge.s32.totalorder %s11170_s20, 2  ;;  %s9088_s1 = sand.u32 1, %s11158_s17  }
 0xc62   : > { %s9089_s25 = scalar_lea.sflag [#allocation9], %s9088_s1 }
 0xc63   : > { %p10333_p2 = pnand %p10336_p1, %p11294_p6 }
 0xc65   : > { %11153 = dma.done.wait (!%p10333_p2), %s9089_s25, 32  }
 0xc66   : > { %11155 = vsyncadd (!%p10333_p2), %s9089_s25, 4294967264  ;;  %s14632_s13 = sld [smem:[#allocation11_spill]]  ;;  %s14633_s19 = sld [smem:[#allocation12_spill]] }
 0xc67   : > { %p21_p3 = scmp.ge.s32.totalorder %s11277_s23, 4   ;;  %s14634_s17 = smov %s11162_s18 }
 0xc68   : > { %s14636_s20 = smov %s11277_s23 }
 0xc69   :  { %23 = sbr.rel (!%p21_p3) target bundleno = 7 (0x7), region = 100 }
 0xc6c   : > { %s14635_s18 = smov %s14632_s13 }
 0xc70   :  { %9094 = vsyncpa [#allocation9], 1 }
 0xc71   :  { %9096 = vsyncpa [#allocation9 + $0x1], 1 }

</bundles_post_ra>
